<compile_context>
chip_gen: v6e
topology: v6e:2x2x1
jax: 0.10.0
libtpu: 0.0.40
codegen_flags: <defaults>
</compile_context>

<pallas_src>
import functools

import jax
import jax.numpy as jnp
from jax import lax
from jax.experimental import pallas as pl
from jax.experimental.pallas import tpu as pltpu

BN_EPS = 1e-5
LANE = 128


# --------------------------------------------------------------------------- #
# small helpers
# --------------------------------------------------------------------------- #
def _vmem_limit_bytes():
    """Generation-aware scoped-VMEM cap (v5e/v6e: 128 MiB parts, v7x: 64 MiB)."""
    phys = None
    try:
        info = pltpu.get_tpu_info()
        for name in ("vmem_capacity_bytes", "vmem_bytes", "vmem_size_bytes"):
            v = getattr(info, name, None)
            if v:
                phys = int(v)
                break
    except Exception:
        phys = None
    if not phys:
        phys = 64 * 1024 * 1024          # conservative fallback (v7x-sized)
    return int(min(phys * 3 // 4, 100 * 1024 * 1024))


def _pick_block_n(n, h, w, cip, cop, cdt_bytes, use_im2col, vmem_limit):
    """Largest batch tile that keeps >=2 grid steps and fits the VMEM budget."""
    budget = max(vmem_limit // 2, 4 * 1024 * 1024)
    best = 1
    for bn in range(1, n + 1):
        if n % bn:
            continue
        nt = n // bn
        if n >= 2 and nt < 2:            # keep both v7x TensorCores busy
            continue
        m = bn * h * w
        patch_c = 9 * cop if use_im2col else cop
        foot = (2 * m * cip * cdt_bytes          # double-buffered input tile
                + 2 * m * cop * cdt_bytes        # double-buffered output tile
                + bn * (h + 2) * (w + 2) * cop * cdt_bytes   # halo scratch
                + m * patch_c * cdt_bytes        # patch / tap temporaries
                + 3 * m * cop * 4                # f32 matmul result + stats
                + 2 * 9 * cop * cop * cdt_bytes)  # resident weights
        if foot <= budget:
            best = bn
    return best


def _zero_halo_border(pad_ref):
    """Zero only the 1-pixel halo border of a (bn, H+2, W+2, C) scratch."""
    bn, hp, wp, c = pad_ref.shape
    dt = pad_ref.dtype
    pad_ref[:, 0:1, :, :] = jnp.zeros((bn, 1, wp, c), dt)
    pad_ref[:, hp - 1:hp, :, :] = jnp.zeros((bn, 1, wp, c), dt)
    pad_ref[:, :, 0:1, :] = jnp.zeros((bn, hp, 1, c), dt)
    pad_ref[:, :, wp - 1:wp, :] = jnp.zeros((bn, hp, 1, c), dt)


def _conv3x3(pad_ref, w_ref, h, w, use_im2col):
    """3x3 SAME conv on a (bn, H+2, W+2, C) padded scratch -> (bn*H*W, Cout) f32."""
    bn = pad_ref.shape[0]
    c = pad_ref.shape[-1]
    m = bn * h * w
    if use_im2col:
        taps = [pad_ref[:, dy:dy + h, dx:dx + w, :]
                for dy in range(3) for dx in range(3)]
        patches = jnp.concatenate(taps, axis=-1).reshape(m, 9 * c)
        return jnp.dot(patches, w_ref[...], preferred_element_type=jnp.float32)
    # direct-tap accumulation: 9 K=C matmuls, no 9x-wide patch materialisation
    acc = jnp.zeros((m, w_ref.shape[-1]), jnp.float32)
    t = 0
    for dy in range(3):
        for dx in range(3):
            tap = pad_ref[:, dy:dy + h, dx:dx + w, :].reshape(m, c)
            acc = acc + jnp.dot(tap, w_ref[t * c:(t + 1) * c, :],
                                preferred_element_type=jnp.float32)
            t += 1
    return acc


# --------------------------------------------------------------------------- #
# stage A: conv1 (3x3) + BN1 partials (+ BN_s partials if projection shortcut)
# --------------------------------------------------------------------------- #
def _conv1_stats_kernel(x_ref, w1_ref, *rest, has_projection, use_im2col):
    if has_projection:
        ws_ref, y1_ref, st_ref, xpad_ref = rest
    else:
        ws_ref = None
        y1_ref, st_ref, xpad_ref = rest

    bn, h, w, ci = x_ref.shape
    m = bn * h * w
    x = x_ref[...]

    _zero_halo_border(xpad_ref)
    xpad_ref[:, 1:h + 1, 1:w + 1, :] = x

    # conv1; conv bias omitted (cancels exactly under training-mode BN).
    y1 = _conv3x3(xpad_ref, w1_ref, h, w, use_im2col)          # (m, cop) f32
    y1_ref[...] = y1.reshape(y1_ref.shape).astype(y1_ref.dtype)

    stats = [jnp.sum(y1, axis=0, keepdims=True),
             jnp.sum(y1 * y1, axis=0, keepdims=True)]
    if has_projection:
        # 1x1 projection: only its BN_s sums are needed here; the activation
        # itself is recomputed in stage C (no HBM round trip).
        ys = jnp.dot(x.reshape(m, ci), ws_ref[...],
                     preferred_element_type=jnp.float32)
        stats += [jnp.sum(ys, axis=0, keepdims=True),
                  jnp.sum(ys * ys, axis=0, keepdims=True)]
    st_ref[...] = jnp.concatenate(stats, axis=0).reshape(st_ref.shape)


# --------------------------------------------------------------------------- #
# stage B: BN1-apply + ReLU + conv2 (3x3) + BN2 partials
# --------------------------------------------------------------------------- #
def _bn1_relu_conv2_stats_kernel(y1_ref, sc1_ref, sh1_ref, w2_ref,
                                 y2_ref, st_ref, hpad_ref, *, use_im2col):
    bn, h, w, co = y1_ref.shape
    m = bn * h * w

    h1 = jnp.maximum(
        y1_ref[...].reshape(m, co).astype(jnp.float32) * sc1_ref[...]
        + sh1_ref[...], 0.0)

    _zero_halo_border(hpad_ref)
    hpad_ref[:, 1:h + 1, 1:w + 1, :] = (
        h1.astype(hpad_ref.dtype).reshape(bn, h, w, co))

    y2 = _conv3x3(hpad_ref, w2_ref, h, w, use_im2col)          # (m, cop) f32
    y2_ref[...] = y2.reshape(y2_ref.shape).astype(y2_ref.dtype)
    st_ref[...] = jnp.concatenate(
        [jnp.sum(y2, axis=0, keepdims=True),
         jnp.sum(y2 * y2, axis=0, keepdims=True)], axis=0).reshape(st_ref.shape)


# --------------------------------------------------------------------------- #
# stage C: BN2-apply + shortcut (identity or recomputed 1x1 + BN_s) + add + ReLU
# --------------------------------------------------------------------------- #
def _bn2_shortcut_add_relu_kernel(y2_ref, x_ref, *rest, has_projection):
    if has_projection:
        ws_ref, sc2_ref, sh2_ref, scs_ref, shs_ref, out_ref = rest
    else:
        sc2_ref, sh2_ref, out_ref = rest

    bn, h, w, co = out_ref.shape
    m = bn * h * w

    main = (y2_ref[...].reshape(m, co).astype(jnp.float32) * sc2_ref[...]
            + sh2_ref[...])
    if has_projection:
        ci = x_ref.shape[-1]
        ys = jnp.dot(x_ref[...].reshape(m, ci), ws_ref[...],
                     preferred_element_type=jnp.float32)
        res = ys * scs_ref[...] + shs_ref[...]
    else:
        res = x_ref[...].reshape(m, co).astype(jnp.float32)

    out = jnp.maximum(main + res, 0.0)
    out_ref[...] = out.reshape(out_ref.shape).astype(out_ref.dtype)


# --------------------------------------------------------------------------- #
# wrapper
# --------------------------------------------------------------------------- #
def _round_up(n, m):
    return (n + m - 1) // m * m


def _pad_last(a, c):
    if a.shape[-1] == c:
        return a
    pad = [(0, 0)] * (a.ndim - 1) + [(0, c - a.shape[-1])]
    return jnp.pad(a, pad)          # zero-padded gamma => padded lanes stay 0


def _finalize_bn(sum_, sumsq, gamma, beta, count):
    """Training-mode BN: batch mean / biased var -> per-channel scale/shift.
    Note: one-pass E[x^2]-E[x]^2 in f32; adequate here, switch to a shifted /
    Welford combine if used at very large N*H*W with large means."""
    mean = sum_ / count
    var = jnp.maximum(sumsq / count - mean * mean, 0.0)
    scale = gamma * lax.rsqrt(var + BN_EPS)
    shift = beta - mean * scale
    return scale.astype(jnp.float32), shift.astype(jnp.float32)


@functools.partial(jax.jit, static_argnames=("block_n", "mxu_dtype",
                                              "use_im2col"))
def residual_block_nhwc(x, params, *, block_n=None, mxu_dtype=jnp.bfloat16,
                        use_im2col=True):
    """ResidualBlock forward (training-mode BN), NHWC-native entry point."""
    n, h, w, ci = x.shape
    co = params["w1"].shape[-1]
    has_projection = ci != co
    f32 = jnp.float32
    cdt = mxu_dtype
    cdt_bytes = jnp.dtype(cdt).itemsize

    # lane-pad channels (no-op for real ResNet widths >= 128)
    cip = _round_up(ci, LANE)
    cop = _round_up(co, LANE)
    if not has_projection:
        assert cip == cop, "identity shortcut requires Cin == Cout"

    vmem_limit = _vmem_limit_bytes()
    if block_n is None:
        block_n = _pick_block_n(n, h, w, cip, cop, cdt_bytes, use_im2col,
                                vmem_limit)
    assert n % block_n == 0, "batch size must divide the batch tile"
    bn = block_n
    nt = n // bn
    m_total = n * h * w

    xb = _pad_last(x, cip).astype(cdt)
    w1 = jnp.pad(params["w1"],
                 ((0, 0), (0, 0), (0, cip - ci), (0, cop - co))
                 ).reshape(9 * cip, cop).astype(cdt)
    w2 = jnp.pad(params["w2"],
                 ((0, 0), (0, 0), (0, cop - co), (0, cop - co))
                 ).reshape(9 * cop, cop).astype(cdt)
    g1, be1 = _pad_last(params["g1"], cop), _pad_last(params["be1"], cop)
    g2, be2 = _pad_last(params["g2"], cop), _pad_last(params["be2"], cop)
    if has_projection:
        ws = jnp.pad(params["ws"], ((0, cip - ci), (0, cop - co))).astype(cdt)
        gs, bes = _pad_last(params["gs"], cop), _pad_last(params["bes"], cop)

    cparams = pltpu.CompilerParams(dimension_semantics=("parallel",),
                                   vmem_limit_bytes=vmem_limit)

    def tile4(c):
        return pl.BlockSpec((bn, h, w, c), lambda i: (i, 0, 0, 0))

    def full2(r, c):
        return pl.BlockSpec((r, c), lambda i: (0, 0))

    def stat_spec(r):
        return pl.BlockSpec((1, r, cop), lambda i: (i, 0, 0))

    # ---- stage A: conv1 + BN1 (and BN_s) partials ---------------------------
    a_in_specs = [tile4(cip), full2(9 * cip, cop)]
    a_args = [xb, w1]
    if has_projection:
        a_in_specs.append(full2(cip, cop))
        a_args.append(ws)
    nstat = 4 if has_projection else 2

    y1, st1 = pl.pallas_call(
        functools.partial(_conv1_stats_kernel,
                          has_projection=has_projection, use_im2col=use_im2col),
        out_shape=(jax.ShapeDtypeStruct((n, h, w, cop), cdt),     # bf16 y1
                   jax.ShapeDtypeStruct((nt, nstat, cop), f32)),
        grid_spec=pltpu.PrefetchScalarGridSpec(
            num_scalar_prefetch=0, grid=(nt,),
            in_specs=a_in_specs,
            out_specs=(tile4(cop), stat_spec(nstat)),
            scratch_shapes=[pltpu.VMEM((bn, h + 2, w + 2, cip), cdt)]),
        compiler_params=cparams,
    )(*a_args)

    s1 = jnp.sum(st1, axis=0)                                     # (nstat, cop)
    scale1, shift1 = _finalize_bn(s1[0], s1[1], g1, be1, m_total)
    if has_projection:
        scale_s, shift_s = _finalize_bn(s1[2], s1[3], gs, bes, m_total)

    # ---- stage B: BN1-apply + ReLU + conv2 + BN2 partials --------------------
    y2, st2 = pl.pallas_call(
        functools.partial(_bn1_relu_conv2_stats_kernel, use_im2col=use_im2col),
        out_shape=(jax.ShapeDtypeStruct((n, h, w, cop), cdt),     # bf16 y2
                   jax.ShapeDtypeStruct((nt, 2, cop), f32)),
        grid_spec=pltpu.PrefetchScalarGridSpec(
            num_scalar_prefetch=0, grid=(nt,),
            in_specs=[tile4(cop), full2(1, cop), full2(1, cop),
                      full2(9 * cop, cop)],
            out_specs=(tile4(cop), stat_spec(2)),
            scratch_shapes=[pltpu.VMEM((bn, h + 2, w + 2, cop), cdt)]),
        compiler_params=cparams,
    )(y1, scale1, shift1, w2)

    s2 = jnp.sum(st2, axis=0)
    scale2, shift2 = _finalize_bn(s2[0], s2[1], g2, be2, m_total)

    # ---- stage C: BN2-apply + shortcut + add + ReLU --------------------------
    c_in_specs = [tile4(cop), tile4(cip)]
    c_args = [y2, xb]
    if has_projection:
        c_in_specs += [full2(cip, cop), full2(1, cop), full2(1, cop),
                       full2(1, cop), full2(1, cop)]
        c_args += [ws, scale2, shift2, scale_s, shift_s]
    else:
        c_in_specs += [full2(1, cop), full2(1, cop)]
        c_args += [scale2, shift2]

    out = pl.pallas_call(
        functools.partial(_bn2_shortcut_add_relu_kernel,
                          has_projection=has_projection),
        out_shape=jax.ShapeDtypeStruct((n, h, w, cop), f32),
        grid_spec=pltpu.PrefetchScalarGridSpec(
            num_scalar_prefetch=0, grid=(nt,),
            in_specs=c_in_specs,
            out_specs=tile4(cop)),
        compiler_params=cparams,
    )(*c_args)

    return out[..., :co]


@functools.partial(jax.jit, static_argnames=("block_n", "mxu_dtype",
                                              "use_im2col"))
def residual_block(x_nchw, params, *, block_n=None, mxu_dtype=jnp.bfloat16,
                   use_im2col=True):
    """PyTorch-layout entry point: NCHW in, NCHW out (channels-last callers
    should use residual_block_nhwc directly and skip both transposes)."""
    x = jnp.transpose(x_nchw, (0, 2, 3, 1))
    out = residual_block_nhwc(x, params, block_n=block_n, mxu_dtype=mxu_dtype,
                              use_im2col=use_im2col)
    return jnp.transpose(out, (0, 3, 1, 2))


# --------------------------------------------------------------------------- #
# parameters + pure-JAX reference (mirrors the PyTorch forward, training BN)
# --------------------------------------------------------------------------- #
def make_params(key, cin, cout):
    ks = jax.random.split(key, 10)
    f32 = jnp.float32
    p = {
        "w1": 0.1 * jax.random.normal(ks[0], (3, 3, cin, cout), f32),
        "b1": 0.1 * jax.random.normal(ks[1], (1, cout), f32),
        "g1": 1.0 + 0.1 * jax.random.normal(ks[2], (1, cout), f32),
        "be1": 0.05 * jax.random.normal(ks[3], (1, cout), f32),
        "w2": 0.1 * jax.random.normal(ks[4], (3, 3, cout, cout), f32),
        "b2": 0.1 * jax.random.normal(ks[5], (1, cout), f32),
        "g2": 1.0 + 0.1 * jax.random.normal(ks[6], (1, cout), f32),
        "be2": 0.05 * jax.random.normal(ks[7], (1, cout), f32),
    }
    if cin != cout:   # 1x1 projection shortcut + its BN, like the PyTorch module
        p.update({
            "ws": 0.1 * jax.random.normal(ks[8], (cin, cout), f32),
            "bs": 0.1 * jax.random.normal(ks[9], (1, cout), f32),
            "gs": 1.0 + 0.1 * jax.random.normal(ks[8], (1, cout), f32),
            "bes": 0.05 * jax.random.normal(ks[9], (1, cout), f32),
        })
    return p


def residual_block_ref(x_nchw, p):
    """Pure-JAX reference (keeps the conv biases: BN cancels them exactly)."""
    x = jnp.transpose(x_nchw, (0, 2, 3, 1)).astype(jnp.float32)

    def conv(hh, w_hwio, b):
        y = lax.conv_general_dilated(hh, w_hwio, (1, 1), "SAME",
                                     dimension_numbers=("NHWC", "HWIO", "NHWC"))
        return y + b.reshape(1, 1, 1, -1)

    def bn(y, g, be):
        mean = jnp.mean(y, axis=(0, 1, 2), keepdims=True)
        var = jnp.mean((y - mean) ** 2, axis=(0, 1, 2), keepdims=True)
        return ((y - mean) * lax.rsqrt(var + BN_EPS)
                * g.reshape(1, 1, 1, -1) + be.reshape(1, 1, 1, -1))

    if "ws" in p:
        residual = bn(conv(x, p["ws"][None, None], p["bs"]), p["gs"], p["bes"])
    else:
        residual = x
    hh = jax.nn.relu(bn(conv(x, p["w1"], p["b1"]), p["g1"], p["be1"]))
    hh = bn(conv(hh, p["w2"], p["b2"]), p["g2"], p["be2"])
    return jnp.transpose(jax.nn.relu(hh + residual), (0, 3, 1, 2))


if __name__ == "__main__":
    key = jax.random.PRNGKey(0)
    kx, kp = jax.random.split(key)

    # Projection-shortcut case (Cin != Cout), PyTorch-style NCHW input.
    N, Cin, Cout, H, W = 2, 4, 8, 16, 16
    x = jax.random.normal(kx, (N, Cin, H, W), jnp.float32)
    params = make_params(kp, Cin, Cout)
    ref = jax.block_until_ready(residual_block_ref(x, params))

    # 1) exact-math check: f32 MXU path + f32 intermediates match the reference.
    out_f32 = jax.block_until_ready(
        residual_block(x, params, mxu_dtype=jnp.float32))
    assert out_f32.shape == (N, Cout, H, W)
    err_f32 = float(jnp.max(jnp.abs(out_f32 - ref)))
    assert err_f32 < 1e-3, f"f32 mismatch vs reference: {err_f32}"

    # 2) performance path: bf16 MXU inputs AND bf16 HBM intermediates; BN stats
    #    stay f32 in-kernel.  bf16 rounding through two stacked convs + BN
    #    rescaling gives a few 1e-2 worst-case abs error at these magnitudes.
    out_bf16 = jax.block_until_ready(residual_block(x, params))
    assert out_bf16.shape == (N, Cout, H, W)
    err_bf16 = float(jnp.max(jnp.abs(out_bf16 - ref)))
    assert err_bf16 < 8e-2, f"bf16 mismatch vs reference: {err_bf16}"

    # 3) identity-shortcut case (Cin == Cout): exercises the no-projection path
    #    (no ys write, 2-row stats, direct residual add).
    ki1, ki2 = jax.random.split(jax.random.PRNGKey(1))
    x_id = jax.random.normal(ki1, (2, 8, 16, 16), jnp.float32)
    p_id = make_params(ki2, 8, 8)
    ref_id = jax.block_until_ready(residual_block_ref(x_id, p_id))
    out_id = jax.block_until_ready(residual_block(x_id, p_id))
    err_id = float(jnp.max(jnp.abs(out_id - ref_id)))
    assert err_id < 8e-2, f"identity-path mismatch: {err_id}"

    print("KERNEL_OK")
</pallas_src>

<mosaic_0001>
module attributes {stable_mosaic.version = 11 : i64} {
  func.func @_conv1_stats_kernel(%arg0: i32, %arg1: memref<1x16x16x128xf32, #tpu.memory_space<vmem>>, %arg2: memref<1152x128xf32, #tpu.memory_space<vmem>>, %arg3: memref<128x128xf32, #tpu.memory_space<vmem>>, %arg4: memref<1x16x16x128xf32, #tpu.memory_space<vmem>>, %arg5: memref<1x4x128xf32, #tpu.memory_space<vmem>>, %arg6: memref<1x18x18x128xf32, #tpu.memory_space<vmem>>) attributes {dimension_semantics = [#tpu.dimension_semantics<parallel>], iteration_bounds = array<i64: 2>, scalar_prefetch = 0 : i64, scratch_operands = 1 : i64, tpu.core_type = #tpu.core_type<tc>, window_params = [{transform_indices = @transform_0, window_bounds = array<i64: 1, 16, 16, 128>}, {pipeline_mode = #tpu.pipeline_mode<synchronous>, transform_indices = @transform_1, window_bounds = array<i64: 1152, 128>}, {pipeline_mode = #tpu.pipeline_mode<synchronous>, transform_indices = @transform_2, window_bounds = array<i64: 128, 128>}, {transform_indices = @transform_3, window_bounds = array<i64: 1, 16, 16, 128>}, {transform_indices = @transform_4, window_bounds = array<i64: 1, 4, 128>}]} {
    %c0 = arith.constant 0 : index
    %c0_0 = arith.constant 0 : index
    %c0_1 = arith.constant 0 : index
    %c0_2 = arith.constant 0 : index
    %0 = vector.load %arg1[%c0, %c0_0, %c0_1, %c0_2] : memref<1x16x16x128xf32, #tpu.memory_space<vmem>>, vector<1x16x16x128xf32>
    %cst = arith.constant 0.000000e+00 : f32
    %1 = vector.broadcast %cst : f32 to vector<1x1x18x128xf32>
    %c0_3 = arith.constant 0 : index
    %c0_4 = arith.constant 0 : index
    %c0_5 = arith.constant 0 : index
    %c0_6 = arith.constant 0 : index
    %2 = vector.load %arg6[%c0_3, %c0_4, %c0_5, %c0_6] : memref<1x18x18x128xf32, #tpu.memory_space<vmem>>, vector<1x1x18x128xf32>
    tpu.vector_store %arg6[%c0_3, %c0_4, %c0_5, %c0_6], %1 {strides = array<i32>} : memref<1x18x18x128xf32, #tpu.memory_space<vmem>>, vector<1x1x18x128xf32>,
    %cst_7 = arith.constant 0.000000e+00 : f32
    %3 = vector.broadcast %cst_7 : f32 to vector<1x1x18x128xf32>
    %c0_8 = arith.constant 0 : index
    %c17 = arith.constant 17 : index
    %c0_9 = arith.constant 0 : index
    %c0_10 = arith.constant 0 : index
    %4 = vector.load %arg6[%c0_8, %c17, %c0_9, %c0_10] : memref<1x18x18x128xf32, #tpu.memory_space<vmem>>, vector<1x1x18x128xf32>
    tpu.vector_store %arg6[%c0_8, %c17, %c0_9, %c0_10], %3 {strides = array<i32>} : memref<1x18x18x128xf32, #tpu.memory_space<vmem>>, vector<1x1x18x128xf32>,
    %cst_11 = arith.constant 0.000000e+00 : f32
    %5 = vector.broadcast %cst_11 : f32 to vector<1x18x1x128xf32>
    %c0_12 = arith.constant 0 : index
    %c0_13 = arith.constant 0 : index
    %c0_14 = arith.constant 0 : index
    %c0_15 = arith.constant 0 : index
    %6 = vector.load %arg6[%c0_12, %c0_13, %c0_14, %c0_15] : memref<1x18x18x128xf32, #tpu.memory_space<vmem>>, vector<1x18x1x128xf32>
    tpu.vector_store %arg6[%c0_12, %c0_13, %c0_14, %c0_15], %5 {strides = array<i32>} : memref<1x18x18x128xf32, #tpu.memory_space<vmem>>, vector<1x18x1x128xf32>,
    %cst_16 = arith.constant 0.000000e+00 : f32
    %7 = vector.broadcast %cst_16 : f32 to vector<1x18x1x128xf32>
    %c0_17 = arith.constant 0 : index
    %c0_18 = arith.constant 0 : index
    %c17_19 = arith.constant 17 : index
    %c0_20 = arith.constant 0 : index
    %8 = vector.load %arg6[%c0_17, %c0_18, %c17_19, %c0_20] : memref<1x18x18x128xf32, #tpu.memory_space<vmem>>, vector<1x18x1x128xf32>
    tpu.vector_store %arg6[%c0_17, %c0_18, %c17_19, %c0_20], %7 {strides = array<i32>} : memref<1x18x18x128xf32, #tpu.memory_space<vmem>>, vector<1x18x1x128xf32>,
    %c0_21 = arith.constant 0 : index
    %c1 = arith.constant 1 : index
    %c1_22 = arith.constant 1 : index
    %c0_23 = arith.constant 0 : index
    %9 = vector.load %arg6[%c0_21, %c1, %c1_22, %c0_23] : memref<1x18x18x128xf32, #tpu.memory_space<vmem>>, vector<1x16x16x128xf32>
    tpu.vector_store %arg6[%c0_21, %c1, %c1_22, %c0_23], %0 {strides = array<i32>} : memref<1x18x18x128xf32, #tpu.memory_space<vmem>>, vector<1x16x16x128xf32>,
    %c0_24 = arith.constant 0 : index
    %c0_25 = arith.constant 0 : index
    %c0_26 = arith.constant 0 : index
    %c0_27 = arith.constant 0 : index
    %10 = vector.load %arg6[%c0_24, %c0_25, %c0_26, %c0_27] : memref<1x18x18x128xf32, #tpu.memory_space<vmem>>, vector<1x16x16x128xf32>
    %c0_28 = arith.constant 0 : index
    %c0_29 = arith.constant 0 : index
    %c1_30 = arith.constant 1 : index
    %c0_31 = arith.constant 0 : index
    %11 = vector.load %arg6[%c0_28, %c0_29, %c1_30, %c0_31] : memref<1x18x18x128xf32, #tpu.memory_space<vmem>>, vector<1x16x16x128xf32>
    %c0_32 = arith.constant 0 : index
    %c0_33 = arith.constant 0 : index
    %c2 = arith.constant 2 : index
    %c0_34 = arith.constant 0 : index
    %12 = vector.load %arg6[%c0_32, %c0_33, %c2, %c0_34] : memref<1x18x18x128xf32, #tpu.memory_space<vmem>>, vector<1x16x16x128xf32>
    %c0_35 = arith.constant 0 : index
    %c1_36 = arith.constant 1 : index
    %c0_37 = arith.constant 0 : index
    %c0_38 = arith.constant 0 : index
    %13 = vector.load %arg6[%c0_35, %c1_36, %c0_37, %c0_38] : memref<1x18x18x128xf32, #tpu.memory_space<vmem>>, vector<1x16x16x128xf32>
    %c0_39 = arith.constant 0 : index
    %c1_40 = arith.constant 1 : index
    %c1_41 = arith.constant 1 : index
    %c0_42 = arith.constant 0 : index
    %14 = vector.load %arg6[%c0_39, %c1_40, %c1_41, %c0_42] : memref<1x18x18x128xf32, #tpu.memory_space<vmem>>, vector<1x16x16x128xf32>
    %c0_43 = arith.constant 0 : index
    %c1_44 = arith.constant 1 : index
    %c2_45 = arith.constant 2 : index
    %c0_46 = arith.constant 0 : index
    %15 = vector.load %arg6[%c0_43, %c1_44, %c2_45, %c0_46] : memref<1x18x18x128xf32, #tpu.memory_space<vmem>>, vector<1x16x16x128xf32>
    %c0_47 = arith.constant 0 : index
    %c2_48 = arith.constant 2 : index
    %c0_49 = arith.constant 0 : index
    %c0_50 = arith.constant 0 : index
    %16 = vector.load %arg6[%c0_47, %c2_48, %c0_49, %c0_50] : memref<1x18x18x128xf32, #tpu.memory_space<vmem>>, vector<1x16x16x128xf32>
    %c0_51 = arith.constant 0 : index
    %c2_52 = arith.constant 2 : index
    %c1_53 = arith.constant 1 : index
    %c0_54 = arith.constant 0 : index
    %17 = vector.load %arg6[%c0_51, %c2_52, %c1_53, %c0_54] : memref<1x18x18x128xf32, #tpu.memory_space<vmem>>, vector<1x16x16x128xf32>
    %c0_55 = arith.constant 0 : index
    %c2_56 = arith.constant 2 : index
    %c2_57 = arith.constant 2 : index
    %c0_58 = arith.constant 0 : index
    %18 = vector.load %arg6[%c0_55, %c2_56, %c2_57, %c0_58] : memref<1x18x18x128xf32, #tpu.memory_space<vmem>>, vector<1x16x16x128xf32>
    %19 = tpu.concatenate %10, %11, %12, %13, %14, %15, %16, %17, %18 in 3 : vector<1x16x16x128xf32>, vector<1x16x16x128xf32>, vector<1x16x16x128xf32>, vector<1x16x16x128xf32>, vector<1x16x16x128xf32>, vector<1x16x16x128xf32>, vector<1x16x16x128xf32>, vector<1x16x16x128xf32>, vector<1x16x16x128xf32> -> vector<1x16x16x1152xf32>
    %20 = vector.shape_cast %19 : vector<1x16x16x1152xf32> to vector<256x1152xf32>
    %c0_59 = arith.constant 0 : index
    %c0_60 = arith.constant 0 : index
    %21 = vector.load %arg2[%c0_59, %c0_60] : memref<1152x128xf32, #tpu.memory_space<vmem>>, vector<1152x128xf32>
    %cst_61 = arith.constant dense<0.000000e+00> : vector<256x128xf32>
    %22 = tpu.matmul %20, %21, %cst_61 {dimension_numbers = #tpu.dot_dimension_numbers<[1], [0], [0], [1], [0, 0, 1, 1], [], []>} : vector<256x1152xf32>, vector<1152x128xf32>, vector<256x128xf32> -> vector<256x128xf32>
    %23 = vector.shape_cast %22 : vector<256x128xf32> to vector<1x16x16x128xf32>
    %c0_62 = arith.constant 0 : index
    %c0_63 = arith.constant 0 : index
    %c0_64 = arith.constant 0 : index
    %c0_65 = arith.constant 0 : index
    %24 = vector.load %arg4[%c0_62, %c0_63, %c0_64, %c0_65] : memref<1x16x16x128xf32, #tpu.memory_space<vmem>>, vector<1x16x16x128xf32>
    tpu.vector_store %arg4[%c0_62, %c0_63, %c0_64, %c0_65], %23 {strides = array<i32>} : memref<1x16x16x128xf32, #tpu.memory_space<vmem>>, vector<1x16x16x128xf32>,
    %cst_66 = arith.constant dense<0.000000e+00> : vector<128xf32>
    %25 = vector.multi_reduction <add>, %22, %cst_66 [0] : vector<256x128xf32> to vector<128xf32>
    %26 = vector.shape_cast %25 : vector<128xf32> to vector<1x128xf32>
    %27 = arith.mulf %22, %22 : vector<256x128xf32>
    %cst_67 = arith.constant dense<0.000000e+00> : vector<128xf32>
    %28 = vector.multi_reduction <add>, %27, %cst_67 [0] : vector<256x128xf32> to vector<128xf32>
    %29 = vector.shape_cast %28 : vector<128xf32> to vector<1x128xf32>
    %30 = vector.shape_cast %0 : vector<1x16x16x128xf32> to vector<256x128xf32>
    %c0_68 = arith.constant 0 : index
    %c0_69 = arith.constant 0 : index
    %31 = vector.load %arg3[%c0_68, %c0_69] : memref<128x128xf32, #tpu.memory_space<vmem>>, vector<128x128xf32>
    %cst_70 = arith.constant dense<0.000000e+00> : vector<256x128xf32>
    %32 = tpu.matmul %30, %31, %cst_70 {dimension_numbers = #tpu.dot_dimension_numbers<[1], [0], [0], [1], [0, 0, 1, 1], [], []>} : vector<256x128xf32>, vector<128x128xf32>, vector<256x128xf32> -> vector<256x128xf32>
    %cst_71 = arith.constant dense<0.000000e+00> : vector<128xf32>
    %33 = vector.multi_reduction <add>, %32, %cst_71 [0] : vector<256x128xf32> to vector<128xf32>
    %34 = vector.shape_cast %33 : vector<128xf32> to vector<1x128xf32>
    %35 = arith.mulf %32, %32 : vector<256x128xf32>
    %cst_72 = arith.constant dense<0.000000e+00> : vector<128xf32>
    %36 = vector.multi_reduction <add>, %35, %cst_72 [0] : vector<256x128xf32> to vector<128xf32>
    %37 = vector.shape_cast %36 : vector<128xf32> to vector<1x128xf32>
    %38 = tpu.concatenate %26, %29, %34, %37 in 0 : vector<1x128xf32>, vector<1x128xf32>, vector<1x128xf32>, vector<1x128xf32> -> vector<4x128xf32>
    %39 = vector.shape_cast %38 : vector<4x128xf32> to vector<1x4x128xf32>
    %c0_73 = arith.constant 0 : index
    %c0_74 = arith.constant 0 : index
    %c0_75 = arith.constant 0 : index
    %40 = vector.load %arg5[%c0_73, %c0_74, %c0_75] : memref<1x4x128xf32, #tpu.memory_space<vmem>>, vector<1x4x128xf32>
    tpu.vector_store %arg5[%c0_73, %c0_74, %c0_75], %39 {strides = array<i32>} : memref<1x4x128xf32, #tpu.memory_space<vmem>>, vector<1x4x128xf32>,
    return
  }
  func.func @transform_0(%arg0: i32) -> (i32, i32, i32, i32) {
    %c0_i32 = arith.constant 0 : i32
    %c0_i32_0 = arith.constant 0 : i32
    %c0_i32_1 = arith.constant 0 : i32
    %c0_i32_2 = arith.constant 0 : i32
    return %arg0, %c0_i32, %c0_i32_0, %c0_i32_1 : i32, i32, i32, i32
  }
  func.func @transform_1(%arg0: i32) -> (i32, i32) {
    %c0_i32 = arith.constant 0 : i32
    %c0_i32_0 = arith.constant 0 : i32
    %c0_i32_1 = arith.constant 0 : i32
    return %c0_i32, %c0_i32_0 : i32, i32
  }
  func.func @transform_2(%arg0: i32) -> (i32, i32) {
    %c0_i32 = arith.constant 0 : i32
    %c0_i32_0 = arith.constant 0 : i32
    %c0_i32_1 = arith.constant 0 : i32
    return %c0_i32, %c0_i32_0 : i32, i32
  }
  func.func @transform_3(%arg0: i32) -> (i32, i32, i32, i32) {
    %c0_i32 = arith.constant 0 : i32
    %c0_i32_0 = arith.constant 0 : i32
    %c0_i32_1 = arith.constant 0 : i32
    %c0_i32_2 = arith.constant 0 : i32
    return %arg0, %c0_i32, %c0_i32_0, %c0_i32_1 : i32, i32, i32, i32
  }
  func.func @transform_4(%arg0: i32) -> (i32, i32, i32) {
    %c0_i32 = arith.constant 0 : i32
    %c0_i32_0 = arith.constant 0 : i32
    %c0_i32_1 = arith.constant 0 : i32
    return %arg0, %c0_i32, %c0_i32_0 : i32, i32, i32
  }
}

module attributes {stable_mosaic.version = 11 : i64} {
  func.func @_bn1_relu_conv2_stats_kernel(%arg0: i32, %arg1: memref<1x16x16x128xf32, #tpu.memory_space<vmem>>, %arg2: memref<1x128xf32, #tpu.memory_space<vmem>>, %arg3: memref<1x128xf32, #tpu.memory_space<vmem>>, %arg4: memref<1152x128xf32, #tpu.memory_space<vmem>>, %arg5: memref<1x16x16x128xf32, #tpu.memory_space<vmem>>, %arg6: memref<1x2x128xf32, #tpu.memory_space<vmem>>, %arg7: memref<1x18x18x128xf32, #tpu.memory_space<vmem>>) attributes {dimension_semantics = [#tpu.dimension_semantics<parallel>], iteration_bounds = array<i64: 2>, scalar_prefetch = 0 : i64, scratch_operands = 1 : i64, tpu.core_type = #tpu.core_type<tc>, window_params = [{transform_indices = @transform_0, window_bounds = array<i64: 1, 16, 16, 128>}, {pipeline_mode = #tpu.pipeline_mode<synchronous>, transform_indices = @transform_1, window_bounds = array<i64: 1, 128>}, {pipeline_mode = #tpu.pipeline_mode<synchronous>, transform_indices = @transform_2, window_bounds = array<i64: 1, 128>}, {pipeline_mode = #tpu.pipeline_mode<synchronous>, transform_indices = @transform_3, window_bounds = array<i64: 1152, 128>}, {transform_indices = @transform_4, window_bounds = array<i64: 1, 16, 16, 128>}, {transform_indices = @transform_5, window_bounds = array<i64: 1, 2, 128>}]} {
    %c0 = arith.constant 0 : index
    %c0_0 = arith.constant 0 : index
    %c0_1 = arith.constant 0 : index
    %c0_2 = arith.constant 0 : index
    %0 = vector.load %arg1[%c0, %c0_0, %c0_1, %c0_2] : memref<1x16x16x128xf32, #tpu.memory_space<vmem>>, vector<1x16x16x128xf32>
    %1 = vector.shape_cast %0 : vector<1x16x16x128xf32> to vector<256x128xf32>
    %c0_3 = arith.constant 0 : index
    %c0_4 = arith.constant 0 : index
    %2 = vector.load %arg2[%c0_3, %c0_4] : memref<1x128xf32, #tpu.memory_space<vmem>>, vector<1x128xf32>
    %3 = vector.broadcast %2 : vector<1x128xf32> to vector<256x128xf32>
    %4 = arith.mulf %1, %3 : vector<256x128xf32>
    %c0_5 = arith.constant 0 : index
    %c0_6 = arith.constant 0 : index
    %5 = vector.load %arg3[%c0_5, %c0_6] : memref<1x128xf32, #tpu.memory_space<vmem>>, vector<1x128xf32>
    %6 = vector.broadcast %5 : vector<1x128xf32> to vector<256x128xf32>
    %7 = arith.addf %4, %6 : vector<256x128xf32>
    %cst = arith.constant 0.000000e+00 : f32
    %8 = vector.broadcast %cst : f32 to vector<256x128xf32>
    %9 = arith.maximumf %7, %8 : vector<256x128xf32>
    %cst_7 = arith.constant 0.000000e+00 : f32
    %10 = vector.broadcast %cst_7 : f32 to vector<1x1x18x128xf32>
    %c0_8 = arith.constant 0 : index
    %c0_9 = arith.constant 0 : index
    %c0_10 = arith.constant 0 : index
    %c0_11 = arith.constant 0 : index
    %11 = vector.load %arg7[%c0_8, %c0_9, %c0_10, %c0_11] : memref<1x18x18x128xf32, #tpu.memory_space<vmem>>, vector<1x1x18x128xf32>
    tpu.vector_store %arg7[%c0_8, %c0_9, %c0_10, %c0_11], %10 {strides = array<i32>} : memref<1x18x18x128xf32, #tpu.memory_space<vmem>>, vector<1x1x18x128xf32>,
    %cst_12 = arith.constant 0.000000e+00 : f32
    %12 = vector.broadcast %cst_12 : f32 to vector<1x1x18x128xf32>
    %c0_13 = arith.constant 0 : index
    %c17 = arith.constant 17 : index
    %c0_14 = arith.constant 0 : index
    %c0_15 = arith.constant 0 : index
    %13 = vector.load %arg7[%c0_13, %c17, %c0_14, %c0_15] : memref<1x18x18x128xf32, #tpu.memory_space<vmem>>, vector<1x1x18x128xf32>
    tpu.vector_store %arg7[%c0_13, %c17, %c0_14, %c0_15], %12 {strides = array<i32>} : memref<1x18x18x128xf32, #tpu.memory_space<vmem>>, vector<1x1x18x128xf32>,
    %cst_16 = arith.constant 0.000000e+00 : f32
    %14 = vector.broadcast %cst_16 : f32 to vector<1x18x1x128xf32>
    %c0_17 = arith.constant 0 : index
    %c0_18 = arith.constant 0 : index
    %c0_19 = arith.constant 0 : index
    %c0_20 = arith.constant 0 : index
    %15 = vector.load %arg7[%c0_17, %c0_18, %c0_19, %c0_20] : memref<1x18x18x128xf32, #tpu.memory_space<vmem>>, vector<1x18x1x128xf32>
    tpu.vector_store %arg7[%c0_17, %c0_18, %c0_19, %c0_20], %14 {strides = array<i32>} : memref<1x18x18x128xf32, #tpu.memory_space<vmem>>, vector<1x18x1x128xf32>,
    %cst_21 = arith.constant 0.000000e+00 : f32
    %16 = vector.broadcast %cst_21 : f32 to vector<1x18x1x128xf32>
    %c0_22 = arith.constant 0 : index
    %c0_23 = arith.constant 0 : index
    %c17_24 = arith.constant 17 : index
    %c0_25 = arith.constant 0 : index
    %17 = vector.load %arg7[%c0_22, %c0_23, %c17_24, %c0_25] : memref<1x18x18x128xf32, #tpu.memory_space<vmem>>, vector<1x18x1x128xf32>
    tpu.vector_store %arg7[%c0_22, %c0_23, %c17_24, %c0_25], %16 {strides = array<i32>} : memref<1x18x18x128xf32, #tpu.memory_space<vmem>>, vector<1x18x1x128xf32>,
    %18 = vector.shape_cast %9 : vector<256x128xf32> to vector<1x16x16x128xf32>
    %c0_26 = arith.constant 0 : index
    %c1 = arith.constant 1 : index
    %c1_27 = arith.constant 1 : index
    %c0_28 = arith.constant 0 : index
    %19 = vector.load %arg7[%c0_26, %c1, %c1_27, %c0_28] : memref<1x18x18x128xf32, #tpu.memory_space<vmem>>, vector<1x16x16x128xf32>
    tpu.vector_store %arg7[%c0_26, %c1, %c1_27, %c0_28], %18 {strides = array<i32>} : memref<1x18x18x128xf32, #tpu.memory_space<vmem>>, vector<1x16x16x128xf32>,
    %c0_29 = arith.constant 0 : index
    %c0_30 = arith.constant 0 : index
    %c0_31 = arith.constant 0 : index
    %c0_32 = arith.constant 0 : index
    %20 = vector.load %arg7[%c0_29, %c0_30, %c0_31, %c0_32] : memref<1x18x18x128xf32, #tpu.memory_space<vmem>>, vector<1x16x16x128xf32>
    %c0_33 = arith.constant 0 : index
    %c0_34 = arith.constant 0 : index
    %c1_35 = arith.constant 1 : index
    %c0_36 = arith.constant 0 : index
    %21 = vector.load %arg7[%c0_33, %c0_34, %c1_35, %c0_36] : memref<1x18x18x128xf32, #tpu.memory_space<vmem>>, vector<1x16x16x128xf32>
    %c0_37 = arith.constant 0 : index
    %c0_38 = arith.constant 0 : index
    %c2 = arith.constant 2 : index
    %c0_39 = arith.constant 0 : index
    %22 = vector.load %arg7[%c0_37, %c0_38, %c2, %c0_39] : memref<1x18x18x128xf32, #tpu.memory_space<vmem>>, vector<1x16x16x128xf32>
    %c0_40 = arith.constant 0 : index
    %c1_41 = arith.constant 1 : index
    %c0_42 = arith.constant 0 : index
    %c0_43 = arith.constant 0 : index
    %23 = vector.load %arg7[%c0_40, %c1_41, %c0_42, %c0_43] : memref<1x18x18x128xf32, #tpu.memory_space<vmem>>, vector<1x16x16x128xf32>
    %c0_44 = arith.constant 0 : index
    %c1_45 = arith.constant 1 : index
    %c1_46 = arith.constant 1 : index
    %c0_47 = arith.constant 0 : index
    %24 = vector.load %arg7[%c0_44, %c1_45, %c1_46, %c0_47] : memref<1x18x18x128xf32, #tpu.memory_space<vmem>>, vector<1x16x16x128xf32>
    %c0_48 = arith.constant 0 : index
    %c1_49 = arith.constant 1 : index
    %c2_50 = arith.constant 2 : index
    %c0_51 = arith.constant 0 : index
    %25 = vector.load %arg7[%c0_48, %c1_49, %c2_50, %c0_51] : memref<1x18x18x128xf32, #tpu.memory_space<vmem>>, vector<1x16x16x128xf32>
    %c0_52 = arith.constant 0 : index
    %c2_53 = arith.constant 2 : index
    %c0_54 = arith.constant 0 : index
    %c0_55 = arith.constant 0 : index
    %26 = vector.load %arg7[%c0_52, %c2_53, %c0_54, %c0_55] : memref<1x18x18x128xf32, #tpu.memory_space<vmem>>, vector<1x16x16x128xf32>
    %c0_56 = arith.constant 0 : index
    %c2_57 = arith.constant 2 : index
    %c1_58 = arith.constant 1 : index
    %c0_59 = arith.constant 0 : index
    %27 = vector.load %arg7[%c0_56, %c2_57, %c1_58, %c0_59] : memref<1x18x18x128xf32, #tpu.memory_space<vmem>>, vector<1x16x16x128xf32>
    %c0_60 = arith.constant 0 : index
    %c2_61 = arith.constant 2 : index
    %c2_62 = arith.constant 2 : index
    %c0_63 = arith.constant 0 : index
    %28 = vector.load %arg7[%c0_60, %c2_61, %c2_62, %c0_63] : memref<1x18x18x128xf32, #tpu.memory_space<vmem>>, vector<1x16x16x128xf32>
    %29 = tpu.concatenate %20, %21, %22, %23, %24, %25, %26, %27, %28 in 3 : vector<1x16x16x128xf32>, vector<1x16x16x128xf32>, vector<1x16x16x128xf32>, vector<1x16x16x128xf32>, vector<1x16x16x128xf32>, vector<1x16x16x128xf32>, vector<1x16x16x128xf32>, vector<1x16x16x128xf32>, vector<1x16x16x128xf32> -> vector<1x16x16x1152xf32>
    %30 = vector.shape_cast %29 : vector<1x16x16x1152xf32> to vector<256x1152xf32>
    %c0_64 = arith.constant 0 : index
    %c0_65 = arith.constant 0 : index
    %31 = vector.load %arg4[%c0_64, %c0_65] : memref<1152x128xf32, #tpu.memory_space<vmem>>, vector<1152x128xf32>
    %cst_66 = arith.constant dense<0.000000e+00> : vector<256x128xf32>
    %32 = tpu.matmul %30, %31, %cst_66 {dimension_numbers = #tpu.dot_dimension_numbers<[1], [0], [0], [1], [0, 0, 1, 1], [], []>} : vector<256x1152xf32>, vector<1152x128xf32>, vector<256x128xf32> -> vector<256x128xf32>
    %33 = vector.shape_cast %32 : vector<256x128xf32> to vector<1x16x16x128xf32>
    %c0_67 = arith.constant 0 : index
    %c0_68 = arith.constant 0 : index
    %c0_69 = arith.constant 0 : index
    %c0_70 = arith.constant 0 : index
    %34 = vector.load %arg5[%c0_67, %c0_68, %c0_69, %c0_70] : memref<1x16x16x128xf32, #tpu.memory_space<vmem>>, vector<1x16x16x128xf32>
    tpu.vector_store %arg5[%c0_67, %c0_68, %c0_69, %c0_70], %33 {strides = array<i32>} : memref<1x16x16x128xf32, #tpu.memory_space<vmem>>, vector<1x16x16x128xf32>,
    %cst_71 = arith.constant dense<0.000000e+00> : vector<128xf32>
    %35 = vector.multi_reduction <add>, %32, %cst_71 [0] : vector<256x128xf32> to vector<128xf32>
    %36 = vector.shape_cast %35 : vector<128xf32> to vector<1x128xf32>
    %37 = arith.mulf %32, %32 : vector<256x128xf32>
    %cst_72 = arith.constant dense<0.000000e+00> : vector<128xf32>
    %38 = vector.multi_reduction <add>, %37, %cst_72 [0] : vector<256x128xf32> to vector<128xf32>
    %39 = vector.shape_cast %38 : vector<128xf32> to vector<1x128xf32>
    %40 = tpu.concatenate %36, %39 in 0 : vector<1x128xf32>, vector<1x128xf32> -> vector<2x128xf32>
    %41 = vector.shape_cast %40 : vector<2x128xf32> to vector<1x2x128xf32>
    %c0_73 = arith.constant 0 : index
    %c0_74 = arith.constant 0 : index
    %c0_75 = arith.constant 0 : index
    %42 = vector.load %arg6[%c0_73, %c0_74, %c0_75] : memref<1x2x128xf32, #tpu.memory_space<vmem>>, vector<1x2x128xf32>
    tpu.vector_store %arg6[%c0_73, %c0_74, %c0_75], %41 {strides = array<i32>} : memref<1x2x128xf32, #tpu.memory_space<vmem>>, vector<1x2x128xf32>,
    return
  }
  func.func @transform_0(%arg0: i32) -> (i32, i32, i32, i32) {
    %c0_i32 = arith.constant 0 : i32
    %c0_i32_0 = arith.constant 0 : i32
    %c0_i32_1 = arith.constant 0 : i32
    %c0_i32_2 = arith.constant 0 : i32
    return %arg0, %c0_i32, %c0_i32_0, %c0_i32_1 : i32, i32, i32, i32
  }
  func.func @transform_1(%arg0: i32) -> (i32, i32) {
    %c0_i32 = arith.constant 0 : i32
    %c0_i32_0 = arith.constant 0 : i32
    %c0_i32_1 = arith.constant 0 : i32
    return %c0_i32, %c0_i32_0 : i32, i32
  }
  func.func @transform_2(%arg0: i32) -> (i32, i32) {
    %c0_i32 = arith.constant 0 : i32
    %c0_i32_0 = arith.constant 0 : i32
    %c0_i32_1 = arith.constant 0 : i32
    return %c0_i32, %c0_i32_0 : i32, i32
  }
  func.func @transform_3(%arg0: i32) -> (i32, i32) {
    %c0_i32 = arith.constant 0 : i32
    %c0_i32_0 = arith.constant 0 : i32
    %c0_i32_1 = arith.constant 0 : i32
    return %c0_i32, %c0_i32_0 : i32, i32
  }
  func.func @transform_4(%arg0: i32) -> (i32, i32, i32, i32) {
    %c0_i32 = arith.constant 0 : i32
    %c0_i32_0 = arith.constant 0 : i32
    %c0_i32_1 = arith.constant 0 : i32
    %c0_i32_2 = arith.constant 0 : i32
    return %arg0, %c0_i32, %c0_i32_0, %c0_i32_1 : i32, i32, i32, i32
  }
  func.func @transform_5(%arg0: i32) -> (i32, i32, i32) {
    %c0_i32 = arith.constant 0 : i32
    %c0_i32_0 = arith.constant 0 : i32
    %c0_i32_1 = arith.constant 0 : i32
    return %arg0, %c0_i32, %c0_i32_0 : i32, i32, i32
  }
}

module attributes {stable_mosaic.version = 11 : i64} {
  func.func @_bn2_shortcut_add_relu_kernel(%arg0: i32, %arg1: memref<1x16x16x128xf32, #tpu.memory_space<vmem>>, %arg2: memref<1x16x16x128xf32, #tpu.memory_space<vmem>>, %arg3: memref<128x128xf32, #tpu.memory_space<vmem>>, %arg4: memref<1x128xf32, #tpu.memory_space<vmem>>, %arg5: memref<1x128xf32, #tpu.memory_space<vmem>>, %arg6: memref<1x128xf32, #tpu.memory_space<vmem>>, %arg7: memref<1x128xf32, #tpu.memory_space<vmem>>, %arg8: memref<1x16x16x128xf32, #tpu.memory_space<vmem>>) attributes {dimension_semantics = [#tpu.dimension_semantics<parallel>], iteration_bounds = array<i64: 2>, scalar_prefetch = 0 : i64, scratch_operands = 0 : i64, tpu.core_type = #tpu.core_type<tc>, window_params = [{transform_indices = @transform_0, window_bounds = array<i64: 1, 16, 16, 128>}, {transform_indices = @transform_1, window_bounds = array<i64: 1, 16, 16, 128>}, {pipeline_mode = #tpu.pipeline_mode<synchronous>, transform_indices = @transform_2, window_bounds = array<i64: 128, 128>}, {pipeline_mode = #tpu.pipeline_mode<synchronous>, transform_indices = @transform_3, window_bounds = array<i64: 1, 128>}, {pipeline_mode = #tpu.pipeline_mode<synchronous>, transform_indices = @transform_4, window_bounds = array<i64: 1, 128>}, {pipeline_mode = #tpu.pipeline_mode<synchronous>, transform_indices = @transform_5, window_bounds = array<i64: 1, 128>}, {pipeline_mode = #tpu.pipeline_mode<synchronous>, transform_indices = @transform_6, window_bounds = array<i64: 1, 128>}, {transform_indices = @transform_7, window_bounds = array<i64: 1, 16, 16, 128>}]} {
    %c0 = arith.constant 0 : index
    %c0_0 = arith.constant 0 : index
    %c0_1 = arith.constant 0 : index
    %c0_2 = arith.constant 0 : index
    %0 = vector.load %arg1[%c0, %c0_0, %c0_1, %c0_2] : memref<1x16x16x128xf32, #tpu.memory_space<vmem>>, vector<1x16x16x128xf32>
    %1 = vector.shape_cast %0 : vector<1x16x16x128xf32> to vector<256x128xf32>
    %c0_3 = arith.constant 0 : index
    %c0_4 = arith.constant 0 : index
    %2 = vector.load %arg4[%c0_3, %c0_4] : memref<1x128xf32, #tpu.memory_space<vmem>>, vector<1x128xf32>
    %3 = vector.broadcast %2 : vector<1x128xf32> to vector<256x128xf32>
    %4 = arith.mulf %1, %3 : vector<256x128xf32>
    %c0_5 = arith.constant 0 : index
    %c0_6 = arith.constant 0 : index
    %5 = vector.load %arg5[%c0_5, %c0_6] : memref<1x128xf32, #tpu.memory_space<vmem>>, vector<1x128xf32>
    %6 = vector.broadcast %5 : vector<1x128xf32> to vector<256x128xf32>
    %7 = arith.addf %4, %6 : vector<256x128xf32>
    %c0_7 = arith.constant 0 : index
    %c0_8 = arith.constant 0 : index
    %c0_9 = arith.constant 0 : index
    %c0_10 = arith.constant 0 : index
    %8 = vector.load %arg2[%c0_7, %c0_8, %c0_9, %c0_10] : memref<1x16x16x128xf32, #tpu.memory_space<vmem>>, vector<1x16x16x128xf32>
    %9 = vector.shape_cast %8 : vector<1x16x16x128xf32> to vector<256x128xf32>
    %c0_11 = arith.constant 0 : index
    %c0_12 = arith.constant 0 : index
    %10 = vector.load %arg3[%c0_11, %c0_12] : memref<128x128xf32, #tpu.memory_space<vmem>>, vector<128x128xf32>
    %cst = arith.constant dense<0.000000e+00> : vector<256x128xf32>
    %11 = tpu.matmul %9, %10, %cst {dimension_numbers = #tpu.dot_dimension_numbers<[1], [0], [0], [1], [0, 0, 1, 1], [], []>} : vector<256x128xf32>, vector<128x128xf32>, vector<256x128xf32> -> vector<256x128xf32>
    %c0_13 = arith.constant 0 : index
    %c0_14 = arith.constant 0 : index
    %12 = vector.load %arg6[%c0_13, %c0_14] : memref<1x128xf32, #tpu.memory_space<vmem>>, vector<1x128xf32>
    %13 = vector.broadcast %12 : vector<1x128xf32> to vector<256x128xf32>
    %14 = arith.mulf %11, %13 : vector<256x128xf32>
    %c0_15 = arith.constant 0 : index
    %c0_16 = arith.constant 0 : index
    %15 = vector.load %arg7[%c0_15, %c0_16] : memref<1x128xf32, #tpu.memory_space<vmem>>, vector<1x128xf32>
    %16 = vector.broadcast %15 : vector<1x128xf32> to vector<256x128xf32>
    %17 = arith.addf %14, %16 : vector<256x128xf32>
    %18 = arith.addf %7, %17 : vector<256x128xf32>
    %cst_17 = arith.constant 0.000000e+00 : f32
    %19 = vector.broadcast %cst_17 : f32 to vector<256x128xf32>
    %20 = arith.maximumf %18, %19 : vector<256x128xf32>
    %21 = vector.shape_cast %20 : vector<256x128xf32> to vector<1x16x16x128xf32>
    %c0_18 = arith.constant 0 : index
    %c0_19 = arith.constant 0 : index
    %c0_20 = arith.constant 0 : index
    %c0_21 = arith.constant 0 : index
    %22 = vector.load %arg8[%c0_18, %c0_19, %c0_20, %c0_21] : memref<1x16x16x128xf32, #tpu.memory_space<vmem>>, vector<1x16x16x128xf32>
    tpu.vector_store %arg8[%c0_18, %c0_19, %c0_20, %c0_21], %21 {strides = array<i32>} : memref<1x16x16x128xf32, #tpu.memory_space<vmem>>, vector<1x16x16x128xf32>,
    return
  }
  func.func @transform_0(%arg0: i32) -> (i32, i32, i32, i32) {
    %c0_i32 = arith.constant 0 : i32
    %c0_i32_0 = arith.constant 0 : i32
    %c0_i32_1 = arith.constant 0 : i32
    %c0_i32_2 = arith.constant 0 : i32
    return %arg0, %c0_i32, %c0_i32_0, %c0_i32_1 : i32, i32, i32, i32
  }
  func.func @transform_1(%arg0: i32) -> (i32, i32, i32, i32) {
    %c0_i32 = arith.constant 0 : i32
    %c0_i32_0 = arith.constant 0 : i32
    %c0_i32_1 = arith.constant 0 : i32
    %c0_i32_2 = arith.constant 0 : i32
    return %arg0, %c0_i32, %c0_i32_0, %c0_i32_1 : i32, i32, i32, i32
  }
  func.func @transform_2(%arg0: i32) -> (i32, i32) {
    %c0_i32 = arith.constant 0 : i32
    %c0_i32_0 = arith.constant 0 : i32
    %c0_i32_1 = arith.constant 0 : i32
    return %c0_i32, %c0_i32_0 : i32, i32
  }
  func.func @transform_3(%arg0: i32) -> (i32, i32) {
    %c0_i32 = arith.constant 0 : i32
    %c0_i32_0 = arith.constant 0 : i32
    %c0_i32_1 = arith.constant 0 : i32
    return %c0_i32, %c0_i32_0 : i32, i32
  }
  func.func @transform_4(%arg0: i32) -> (i32, i32) {
    %c0_i32 = arith.constant 0 : i32
    %c0_i32_0 = arith.constant 0 : i32
    %c0_i32_1 = arith.constant 0 : i32
    return %c0_i32, %c0_i32_0 : i32, i32
  }
  func.func @transform_5(%arg0: i32) -> (i32, i32) {
    %c0_i32 = arith.constant 0 : i32
    %c0_i32_0 = arith.constant 0 : i32
    %c0_i32_1 = arith.constant 0 : i32
    return %c0_i32, %c0_i32_0 : i32, i32
  }
  func.func @transform_6(%arg0: i32) -> (i32, i32) {
    %c0_i32 = arith.constant 0 : i32
    %c0_i32_0 = arith.constant 0 : i32
    %c0_i32_1 = arith.constant 0 : i32
    return %c0_i32, %c0_i32_0 : i32, i32
  }
  func.func @transform_7(%arg0: i32) -> (i32, i32, i32, i32) {
    %c0_i32 = arith.constant 0 : i32
    %c0_i32_0 = arith.constant 0 : i32
    %c0_i32_1 = arith.constant 0 : i32
    %c0_i32_2 = arith.constant 0 : i32
    return %arg0, %c0_i32, %c0_i32_0, %c0_i32_1 : i32, i32, i32, i32
  }
}

</mosaic_0001>

<bundles_post_ra>
// kernel: residual_block_nhwc.5
= control target key start
LH: loop header
LB: loop body
LE: loop exit
PB: predicated region body
PF: predicated region fallthrough
CT: control target
= control target key end

     0   :  { %s1159_s24 = smov 0   ;;  %s1582_s0 = inlined_call_operand.vmem [shape: f32[2,16,16,128], index: 0, kind: input, shape index: {}]   ;;  %s1583_s1 = inlined_call_operand.vmem [shape: f32[2,16,16,128], index: 1, kind: input, shape index: {}]   ;;  %s1584_s2 = inlined_call_operand.vmem [shape: f32[128,128], index: 2, kind: input, shape index: {}]   ;;  %s1585_s3 = inlined_call_operand.vmem [shape: f32[1,128], index: 3, kind: input, shape index: {}]   ;;  %s1586_s4 = inlined_call_operand.vmem [shape: f32[1,128], index: 4, kind: input, shape index: {}]   ;;  %s1587_s5 = inlined_call_operand.vmem [shape: f32[1,128], index: 5, kind: input, shape index: {}]   ;;  %s1588_s6 = inlined_call_operand.vmem [shape: f32[1,128], index: 6, kind: input, shape index: {}]   ;;  %s1589_s7 = inlined_call_operand.vmem [shape: f32[2,16,16,128], index: 7, kind: output, shape index: {}]  }
   0x1 LB: > { %s923_s25 = sadd.s32 4294967295, %s1117_s24   ;;  %p927_p0 = scmp.ge.s32.totalorder %s1117_s24, 1  ;;  %s1117_s24 = sphi %s1159_s24, %s17_s24  }
   0x2   : > { %p247_p1 = scmp.lt.s32.totalorder %s1117_s24, 3 }
   0x4   : > { %p248_p2 = pnand %p927_p0, %p247_p1 }
   0x5   : > { %p284_p3 = scmp.lt.s32.totalorder (!%p248_p2), %s923_s25, 1 }
   0x6   : > { %251 = sbr.rel (%p248_p2) target bundleno = 279 (0x117), region = 48 }
   0xb   : > { %v456_v0 = vld [vmem:[%s1584_s2 + $0x78] sm:$0xff]  ;;  %v455_v1 = vld [vmem:[%s1584_s2 + $0x70] sm:$0xff]  ;;  %v454_v2 = vld [vmem:[%s1584_s2 + $0x68] sm:$0xff]  ;;  %s1591_s25 = smov (!%p284_p3, %s923_s25), 1 }
   0xc   : > { %991 = vmatprep.subr.mxu0 %v456_v0  ;;  %1071 = vmatprep.subr.mxu1 %v456_v0  ;;  %v453_v3 = vld [vmem:[%s1584_s2 + $0x60] sm:$0xff]  ;;  %v452_v4 = vld [vmem:[%s1584_s2 + $0x58] sm:$0xff]  ;;  %v451_v5 = vld [vmem:[%s1584_s2 + $0x50] sm:$0xff]  ;;  %s1213_s10 = sshll.u32 %s1591_s25, 8 }
   0xd   : > { %992 = vmatpush3.msra.mxu0 %v456_v0  ;;  %1087 = vmatpush3.msra.mxu1 %v456_v0  ;;  %v450_v6 = vld [vmem:[%s1584_s2 + $0x48] sm:$0xff]  ;;  %v449_v7 = vld [vmem:[%s1584_s2 + $0x40] sm:$0xff]  ;;  %v448_v8 = vld [vmem:[%s1584_s2 + $0x38] sm:$0xff]  ;;  %s1222_s15 = scalar_lea.vmem %s1583_s1, %s1213_s10  ;;  %s1263_s19 = scalar_lea.vmem %s1582_s0, %s1213_s10 }
   0xe   : > { %993 = vmatprep.subr.mxu0 %v455_v1  ;;  %1072 = vmatprep.subr.mxu1 %v455_v1  ;;  %v447_v9 = vld [vmem:[%s1584_s2 + $0x30] sm:$0xff]  ;;  %v446_v10 = vld [vmem:[%s1584_s2 + $0x28] sm:$0xff]  ;;  %v445_v11 = vld [vmem:[%s1584_s2 + $0x20] sm:$0xff]  ;;  %s1453_s9 = scalar_lea.vmem %s1589_s7, %s1213_s10 }
   0xf   : > { %994 = vmatpush3.msra.mxu0 %v455_v1  ;;  %1088 = vmatpush3.msra.mxu1 %v455_v1  ;;  %v444_v12 = vld [vmem:[%s1584_s2 + $0x18] sm:$0xff]  ;;  %v443_v13 = vld [vmem:[%s1584_s2 + $0x10] sm:$0xff]  ;;  %v442_v14 = vld [vmem:[%s1584_s2 + $0x8] sm:$0xff] }
  0x10   : > { %995 = vmatprep.subr.mxu0 %v454_v2  ;;  %1073 = vmatprep.subr.mxu1 %v454_v2  ;;  %v441_v15 = vld [vmem:[%s1584_s2] sm:$0xff]  ;;  %v410_v18 = vld [vmem:[%s1222_s15 + $0x8] sm:$0xff]  ;;  %v411_v20 = vld [vmem:[%s1222_s15 + $0x10] sm:$0xff] }
  0x11   : > { %996 = vmatpush3.msra.mxu0 %v454_v2  ;;  %1089 = vmatpush3.msra.mxu1 %v454_v2  ;;  %v409_v16 = vld [vmem:[%s1222_s15] sm:$0xff]  ;;  %v426_v19 = vld [vmem:[%s1222_s15 + $0x88] sm:$0xff]  ;;  %v427_v21 = vld [vmem:[%s1222_s15 + $0x90] sm:$0xff] }
  0x12   : > { %997 = vmatprep.subr.mxu0 %v453_v3  ;;  %1074 = vmatprep.subr.mxu1 %v453_v3  ;;  %v425_v17 = vld [vmem:[%s1222_s15 + $0x80] sm:$0xff]  ;;  %v412_v22 = vld [vmem:[%s1222_s15 + $0x18] sm:$0xff]  ;;  %v414_v26 = vld [vmem:[%s1222_s15 + $0x28] sm:$0xff] }
  0x13   : > { %998 = vmatpush3.msra.mxu0 %v453_v3  ;;  %1090 = vmatpush3.msra.mxu1 %v453_v3  ;;  %v428_v23 = vld [vmem:[%s1222_s15 + $0x98] sm:$0xff]  ;;  %v413_v24 = vld [vmem:[%s1222_s15 + $0x20] sm:$0xff]  ;;  %v430_v27 = vld [vmem:[%s1222_s15 + $0xa8] sm:$0xff] }
  0x14   : > { %999 = vmatprep.subr.mxu0 %v452_v4  ;;  %1075 = vmatprep.subr.mxu1 %v452_v4  ;;  %v429_v25 = vld [vmem:[%s1222_s15 + $0xa0] sm:$0xff]  ;;  %v415_v28 = vld [vmem:[%s1222_s15 + $0x30] sm:$0xff]  ;;  %v416_v30 = vld [vmem:[%s1222_s15 + $0x38] sm:$0xff] }
  0x15   : > { %1000 = vmatpush3.msra.mxu0 %v452_v4  ;;  %1091 = vmatpush3.msra.mxu1 %v452_v4  ;;  %v431_v29 = vld [vmem:[%s1222_s15 + $0xb0] sm:$0xff]  ;;  %v432_v31 = vld [vmem:[%s1222_s15 + $0xb8] sm:$0xff]  ;;  %v417_v32 = vld [vmem:[%s1222_s15 + $0x40] sm:$0xff] }
  0x16   : > { %1001 = vmatprep.subr.mxu0 %v451_v5  ;;  %1076 = vmatprep.subr.mxu1 %v451_v5  ;;  %v433_v33 = vld [vmem:[%s1222_s15 + $0xc0] sm:$0xff]  ;;  %v418_v34 = vld [vmem:[%s1222_s15 + $0x48] sm:$0xff]  ;;  %v419_v36 = vld [vmem:[%s1222_s15 + $0x50] sm:$0xff] }
  0x17   : > { %1002 = vmatpush3.msra.mxu0 %v451_v5  ;;  %1092 = vmatpush3.msra.mxu1 %v451_v5  ;;  %v434_v35 = vld [vmem:[%s1222_s15 + $0xc8] sm:$0xff]  ;;  %v435_v37 = vld [vmem:[%s1222_s15 + $0xd0] sm:$0xff]  ;;  %v420_v38 = vld [vmem:[%s1222_s15 + $0x58] sm:$0xff] }
  0x18   : > { %1003 = vmatprep.subr.mxu0 %v450_v6  ;;  %1077 = vmatprep.subr.mxu1 %v450_v6  ;;  %v436_v39 = vld [vmem:[%s1222_s15 + $0xd8] sm:$0xff]  ;;  %v421_v40 = vld [vmem:[%s1222_s15 + $0x60] sm:$0xff]  ;;  %v422_v42 = vld [vmem:[%s1222_s15 + $0x68] sm:$0xff] }
  0x19   : > { %1004 = vmatpush3.msra.mxu0 %v450_v6  ;;  %1093 = vmatpush3.msra.mxu1 %v450_v6  ;;  %v437_v41 = vld [vmem:[%s1222_s15 + $0xe0] sm:$0xff]  ;;  %v438_v43 = vld [vmem:[%s1222_s15 + $0xe8] sm:$0xff]  ;;  %v423_v44 = vld [vmem:[%s1222_s15 + $0x70] sm:$0xff] }
  0x1a   : > { %1005 = vmatprep.subr.mxu0 %v449_v7  ;;  %1078 = vmatprep.subr.mxu1 %v449_v7  ;;  %v439_v45 = vld [vmem:[%s1222_s15 + $0xf0] sm:$0xff]  ;;  %v424_v46 = vld [vmem:[%s1222_s15 + $0x78] sm:$0xff]  ;;  %v1268_v48 = vld [vmem:[%s1585_s3] ss:$0 sm:$0xff] }
  0x1b   : > { %1006 = vmatpush3.msra.mxu0 %v449_v7  ;;  %1094 = vmatpush3.msra.mxu1 %v449_v7  ;;  %v440_v47 = vld [vmem:[%s1222_s15 + $0xf8] sm:$0xff]  ;;  %v300_v49 = vld [vmem:[%s1263_s19 + $0x8] sm:$0xff]  ;;  %v299_v51 = vld [vmem:[%s1263_s19] sm:$0xff] }
  0x1c   : > { %1007 = vmatprep.subr.mxu0 %v448_v8  ;;  %1079 = vmatprep.subr.mxu1 %v448_v8  ;;  %v316_v50 = vld [vmem:[%s1263_s19 + $0x88] sm:$0xff]  ;;  %v315_v52 = vld [vmem:[%s1263_s19 + $0x80] sm:$0xff]  ;;  %v302_v53 = vld [vmem:[%s1263_s19 + $0x18] sm:$0xff]  ;;  %v339_v55 = vmul.f32 %v1268_v48, %v300_v49  ;;  %v338_v60 = vmul.f32 %v1268_v48, %v299_v51 }
  0x1d   : > { %1008 = vmatpush3.msra.mxu0 %v448_v8  ;;  %1095 = vmatpush3.msra.mxu1 %v448_v8  ;;  %v318_v54 = vld [vmem:[%s1263_s19 + $0x98] sm:$0xff]  ;;  %v355_v56 = vmul.f32 %v1268_v48, %v316_v50  ;;  %v301_v57 = vld [vmem:[%s1263_s19 + $0x10] sm:$0xff]  ;;  %v1283_v59 = vld [vmem:[%s1586_s4] ss:$0 sm:$0xff]  ;;  %v354_v61 = vmul.f32 %v1268_v48, %v315_v52  ;;  %v341_v62 = vmul.f32 %v1268_v48, %v302_v53 }
  0x1e   : > { %1009 = vmatprep.subr.mxu0 %v447_v9  ;;  %1080 = vmatprep.subr.mxu1 %v447_v9  ;;  %v317_v58 = vld [vmem:[%s1263_s19 + $0x90] sm:$0xff]  ;;  %v357_v63 = vmul.f32 %v1268_v48, %v318_v54  ;;  %v304_v0 = vld [vmem:[%s1263_s19 + $0x28] sm:$0xff]  ;;  %v303_v2 = vld [vmem:[%s1263_s19 + $0x20] sm:$0xff]  ;;  %v340_v3 = vmul.f32 %v1268_v48, %v301_v57  ;;  %v1298_v8 = vadd.f32 %v1283_v59, %v339_v55 }
  0x1f   : > { %1010 = vmatpush3.msra.mxu0 %v447_v9  ;;  %1096 = vmatpush3.msra.mxu1 %v447_v9  ;;  %v320_v1 = vld [vmem:[%s1263_s19 + $0xa8] sm:$0xff]  ;;  %v356_v4 = vmul.f32 %v1268_v48, %v317_v58  ;;  %v319_v5 = vld [vmem:[%s1263_s19 + $0xa0] sm:$0xff]  ;;  %v306_v6 = vld [vmem:[%s1263_s19 + $0x38] sm:$0xff]  ;;  %v1301_v9 = vadd.f32 %v1283_v59, %v355_v56 }
  0x20   : > { %1011 = vmatprep.subr.mxu0 %v446_v10  ;;  %1081 = vmatprep.subr.mxu1 %v446_v10  ;;  %v322_v7 = vld [vmem:[%s1263_s19 + $0xb8] sm:$0xff]  ;;  %v311_v49 = vld [vmem:[%s1263_s19 + $0x60] sm:$0xff] }
  0x21   : > { %1012 = vmatpush3.msra.mxu0 %v446_v10  ;;  %1097 = vmatpush3.msra.mxu1 %v446_v10  ;;  %v343_v10 = vmul.f32 %v1268_v48, %v304_v0  ;;  %v327_v54 = vld [vmem:[%s1263_s19 + $0xe0] sm:$0xff]  ;;  %v314_v55 = vld [vmem:[%s1263_s19 + $0x78] sm:$0xff] }
  0x22   : > { %1013 = vmatprep.subr.mxu0 %v445_v11  ;;  %1082 = vmatprep.subr.mxu1 %v445_v11  ;;  %v330_v56 = vld [vmem:[%s1263_s19 + $0xf8] sm:$0xff]  ;;  %v1380_v57 = vld [vmem:[%s1587_s5] ss:$0 sm:$0xff] }
  0x23   : > { %1014 = vmatpush3.msra.mxu0 %v445_v11  ;;  %1098 = vmatpush3.msra.mxu1 %v445_v11  ;;  %v359_v11 = vmul.f32 %v1268_v48, %v320_v1 }
  0x24   : > { %1015 = vmatprep.subr.mxu0 %v444_v12  ;;  %1083 = vmatprep.subr.mxu1 %v444_v12 }
  0x25   : > { %1016 = vmatpush3.msra.mxu0 %v444_v12  ;;  %1099 = vmatpush3.msra.mxu1 %v444_v12  ;;  %v305_v12 = vld [vmem:[%s1263_s19 + $0x30] sm:$0xff] }
  0x26   : > { %1017 = vmatprep.subr.mxu0 %v443_v13  ;;  %1084 = vmatprep.subr.mxu1 %v443_v13 }
  0x27   : > { %1018 = vmatpush3.msra.mxu0 %v443_v13  ;;  %1100 = vmatpush3.msra.mxu1 %v443_v13  ;;  %v321_v13 = vld [vmem:[%s1263_s19 + $0xb0] sm:$0xff] }
  0x28   : > { %1019 = vmatprep.subr.mxu0 %v442_v14  ;;  %1085 = vmatprep.subr.mxu1 %v442_v14 }
  0x29   : > { %1020 = vmatpush3.msra.mxu0 %v442_v14  ;;  %1101 = vmatpush3.msra.mxu1 %v442_v14  ;;  %v1308_v14 = vadd.f32 %v1283_v59, %v338_v60 }
  0x2a   : > { %1021 = vmatprep.subr.mxu0 %v441_v15  ;;  %1086 = vmatprep.subr.mxu1 %v441_v15 }
  0x2b   : > { %1022 = vmatpush3.msra.mxu0 %v441_v15  ;;  %1102 = vmatpush3.msra.mxu1 %v441_v15  ;;  %v1311_v15 = vadd.f32 %v1283_v59, %v354_v61 }
  0x2c   : > { %1023 = vmatprep.mubr.f32.mxu0 %v409_v16  ;;  %1047 = vmatprep.mubr.f32.mxu1 %v425_v17  ;;  %v1314_v16 = vadd.f32 %v1283_v59, %v341_v62  ;;  %v1317_v17 = vadd.f32 %v1283_v59, %v357_v63 }
  0x2d   : > { %1024 = vmatmul.mubr.f32.vlgmr.msra.gmra.mxu0 %v410_v18  ;;  %1048 = vmatmul.mubr.f32.vlgmr.msra.gmra.mxu1 %v426_v19  ;;  %v308_v18 = vld [vmem:[%s1263_s19 + $0x48] sm:$0xff] }
  0x2e   : > { %1026 = vmatprep.mubr.f32.mxu0 %v411_v20  ;;  %1050 = vmatprep.mubr.f32.mxu1 %v427_v21  ;;  %v324_v19 = vld [vmem:[%s1263_s19 + $0xc8] sm:$0xff]  ;;  %v307_v20 = vld [vmem:[%s1263_s19 + $0x40] sm:$0xff]  ;;  %v342_v21 = vmul.f32 %v1268_v48, %v303_v2 }
  0x31   : > { %1027 = vmatmul.mubr.f32.gmra.mxu0 %v412_v22  ;;  %1051 = vmatmul.mubr.f32.gmra.mxu1 %v428_v23  ;;  %v358_v22 = vmul.f32 %v1268_v48, %v319_v5  ;;  %v345_v23 = vmul.f32 %v1268_v48, %v306_v6  ;;  %v1407_v6 = vld [vmem:[%s1588_s6] ss:$0 sm:$0xff] }
  0x32   : > { %1029 = vmatprep.mubr.f32.mxu0 %v413_v24  ;;  %1053 = vmatprep.mubr.f32.mxu1 %v429_v25  ;;  %v361_v24 = vmul.f32 %v1268_v48, %v322_v7  ;;  %v323_v25 = vld [vmem:[%s1263_s19 + $0xc0] sm:$0xff] }
  0x35   : > { %1030 = vmatmul.mubr.f32.gmra.mxu0 %v414_v26  ;;  %1054 = vmatmul.mubr.f32.gmra.mxu1 %v430_v27  ;;  %v310_v26 = vld [vmem:[%s1263_s19 + $0x58] sm:$0xff] }
  0x36   : > { %1032 = vmatprep.mubr.f32.mxu0 %v415_v28  ;;  %1056 = vmatprep.mubr.f32.mxu1 %v431_v29  ;;  %v326_v27 = vld [vmem:[%s1263_s19 + $0xd8] sm:$0xff]  ;;  %v1330_v28 = vadd.f32 %v1283_v59, %v340_v3  ;;  %v1333_v29 = vadd.f32 %v1283_v59, %v356_v4  ;;  %v313_v3 = vld [vmem:[%s1263_s19 + $0x70] sm:$0xff] }
  0x37   : > { %v329_v4 = vld [vmem:[%s1263_s19 + $0xf0] sm:$0xff] }
  0x39   : > { %1033 = vmatmul.mubr.f32.gmra.mxu0 %v416_v30  ;;  %1057 = vmatmul.mubr.f32.gmra.mxu1 %v432_v31  ;;  %v344_v30 = vmul.f32 %v1268_v48, %v305_v12  ;;  %v360_v31 = vmul.f32 %v1268_v48, %v321_v13  ;;  %v353_v12 = vmul.f32 %v1268_v48, %v314_v55 }
  0x3a   : > { %1035 = vmatprep.mubr.f32.mxu0 %v417_v32  ;;  %1059 = vmatprep.mubr.f32.mxu1 %v433_v33  ;;  %v1338_v32 = vadd.f32 %v1283_v59, %v343_v10  ;;  %v1341_v33 = vadd.f32 %v1283_v59, %v359_v11  ;;  %v350_v10 = vmul.f32 %v1268_v48, %v311_v49 }
  0x3b   : > { %v1367_v50 = vadd.f32 %v1283_v59, %v344_v30  ;;  %v1370_v51 = vadd.f32 %v1283_v59, %v360_v31  ;;  %v366_v11 = vmul.f32 %v1268_v48, %v327_v54  ;;  %v369_v13 = vmul.f32 %v1268_v48, %v330_v56 }
  0x3d   : > { %1036 = vmatmul.mubr.f32.gmra.mxu0 %v418_v34  ;;  %1060 = vmatmul.mubr.f32.gmra.mxu1 %v434_v35  ;;  %v347_v34 = vmul.f32 %v1268_v48, %v308_v18  ;;  %v363_v35 = vmul.f32 %v1268_v48, %v324_v19 }
  0x3e   : > { %1038 = vmatprep.mubr.f32.mxu0 %v419_v36  ;;  %1062 = vmatprep.mubr.f32.mxu1 %v435_v37  ;;  %v309_v36 = vld [vmem:[%s1263_s19 + $0x50] sm:$0xff] }
  0x3f   : > { %v325_v37 = vld [vmem:[%s1263_s19 + $0xd0] sm:$0xff]  ;;  %v348_v52 = vmul.f32 %v1268_v48, %v309_v36  ;;  %v1383_v58 = vadd.f32 %v1283_v59, %v347_v34  ;;  %v1386_v60 = vadd.f32 %v1283_v59, %v363_v35 }
  0x40   : > { %v364_v53 = vmul.f32 %v1268_v48, %v325_v37 }
  0x41   : > { %1039 = vmatmul.mubr.f32.gmra.mxu0 %v420_v38  ;;  %1063 = vmatmul.mubr.f32.gmra.mxu1 %v436_v39  ;;  %v346_v38 = vmul.f32 %v1268_v48, %v307_v20  ;;  %v362_v39 = vmul.f32 %v1268_v48, %v323_v25  ;;  %v1416_v20 = vadd.f32 %v1283_v59, %v348_v52 }
  0x42   : > { %1041 = vmatprep.mubr.f32.mxu0 %v421_v40  ;;  %1065 = vmatprep.mubr.f32.mxu1 %v437_v41  ;;  %v349_v40 = vmul.f32 %v1268_v48, %v310_v26  ;;  %v365_v41 = vmul.f32 %v1268_v48, %v326_v27  ;;  %v352_v26 = vmul.f32 %v1268_v48, %v313_v3 }
  0x43   : > { %v1391_v63 = vadd.f32 %v1283_v59, %v346_v38  ;;  %v1394_v0 = vadd.f32 %v1283_v59, %v362_v39  ;;  %v368_v27 = vmul.f32 %v1268_v48, %v329_v4  ;;  %v1434_v38 = vadd.f32 %v1283_v59, %v350_v10 }
  0x44   : > { %v1397_v1 = vadd.f32 %v1283_v59, %v349_v40  ;;  %v1400_v2 = vadd.f32 %v1283_v59, %v365_v41  ;;  %v1437_v39 = vadd.f32 %v1283_v59, %v366_v11  ;;  %v1440_v40 = vadd.f32 %v1283_v59, %v353_v12 }
  0x45   : > { %1042 = vmatmul.mubr.f32.gmra.mxu0 %v422_v42  ;;  %1066 = vmatmul.mubr.f32.gmra.mxu1 %v438_v43  ;;  %v312_v42 = vld [vmem:[%s1263_s19 + $0x68] sm:$0xff] }
  0x46   : > { %1044 = vmatprep.mubr.f32.mxu0 %v423_v44  ;;  %1068 = vmatprep.mubr.f32.mxu1 %v439_v45  ;;  %v328_v43 = vld [vmem:[%s1263_s19 + $0xe8] sm:$0xff]  ;;  %v1354_v44 = vadd.f32 %v1283_v59, %v342_v21  ;;  %v1357_v45 = vadd.f32 %v1283_v59, %v358_v22  ;;  %v351_v61 = vmul.f32 %v1268_v48, %v312_v42 }
  0x47   : > { %v367_v62 = vmul.f32 %v1268_v48, %v328_v43  ;;  %v1419_v21 = vadd.f32 %v1283_v59, %v364_v53  ;;  %v1443_v48 = vadd.f32 %v1283_v59, %v369_v13 }
  0x49   : > { %1045 = vmatmul.mubr.f32.gmra.mxu0 %v424_v46  ;;  %1069 = vmatmul.mubr.f32.gmra.mxu1 %v440_v47  ;;  %v1360_v46 = vadd.f32 %v1283_v59, %v345_v23  ;;  %v1363_v47 = vadd.f32 %v1283_v59, %v361_v24  ;;  %v1422_v24 = vadd.f32 %v1283_v59, %v351_v61 }
  0x4a   : > { %v1425_v25 = vadd.f32 %v1283_v59, %v367_v62 }
  0xed   : > { %v1025_v5 = vpop.f32.mrf.mxu0  ;;  %v1049_v7 = vpop.f32.mrf.mxu1 }
  0xee   : > { %v690_v18 = vmul.f32 %v1025_v5, %v1380_v57  ;;  %v706_v19 = vmul.f32 %v1049_v7, %v1380_v57 }
  0xef   : > { %v523_v22 = vpop.f32.mrf.mxu0  ;;  %v603_v23 = vpop.f32.mrf.mxu1 }
  0xf0   : > { %v729_v30 = vadd.f32 %v1407_v6, %v690_v18  ;;  %v745_v31 = vadd.f32 %v1407_v6, %v706_v19  ;;  %v689_v34 = vmul.f32 %v1380_v57, %v523_v22  ;;  %v705_v35 = vmul.f32 %v1380_v57, %v603_v23 }
  0xf1   : > { %v1028_v36 = vpop.f32.mrf.mxu0  ;;  %v1052_v37 = vpop.f32.mrf.mxu1 }
  0xf2   : > { %v761_v41 = vadd.f32 %v729_v30, %v1298_v8  ;;  %v777_v42 = vadd.f32 %v745_v31, %v1301_v9  ;;  %v728_v43 = vadd.f32 %v1407_v6, %v689_v34  ;;  %v744_v49 = vadd.f32 %v1407_v6, %v705_v35 }
  0xf3   : > { %v692_v52 = vmul.f32 %v1028_v36, %v1380_v57  ;;  %v708_v53 = vmul.f32 %v1052_v37, %v1380_v57  ;;  %v533_v54 = vpop.f32.mrf.mxu0  ;;  %v613_v55 = vpop.f32.mrf.mxu1  ;;  %v1458_v8 = vadd.f32 %v1283_v59, %v352_v26  ;;  %v1461_v9 = vadd.f32 %v1283_v59, %v368_v27 }
  0xf4   : > { %v793_v56 = vmax.f32 %v761_v41, 0.0  ;;  %v809_v61 = vmax.f32 %v777_v42, 0.0  ;;  %v760_v62 = vadd.f32 %v728_v43, %v1308_v14  ;;  %v776_v3 = vadd.f32 %v744_v49, %v1311_v15 }
  0xf5   : > { %v731_v4 = vadd.f32 %v1407_v6, %v692_v52  ;;  %v747_v5 = vadd.f32 %v1407_v6, %v708_v53  ;;  %v691_v7 = vmul.f32 %v1380_v57, %v533_v54  ;;  %v707_v10 = vmul.f32 %v1380_v57, %v613_v55  ;;  %v1031_v11 = vpop.f32.mrf.mxu0  ;;  %v1055_v12 = vpop.f32.mrf.mxu1 }
  0xf6   : > { %825 = vst [vmem:[%s1453_s9 + $0x8] sm:$0xff] %v793_v56  ;;  %841 = vst [vmem:[%s1453_s9 + $0x88] sm:$0xff] %v809_v61  ;;  %v792_v59 = vmax.f32 %v760_v62, 0.0  ;;  %v808_v13 = vmax.f32 %v776_v3, 0.0  ;;  %v694_v14 = vmul.f32 %v1031_v11, %v1380_v57  ;;  %v710_v15 = vmul.f32 %v1055_v12, %v1380_v57 }
  0xf7   : > { %v763_v18 = vadd.f32 %v731_v4, %v1314_v16  ;;  %v779_v19 = vadd.f32 %v747_v5, %v1317_v17  ;;  %v730_v22 = vadd.f32 %v1407_v6, %v691_v7  ;;  %v746_v23 = vadd.f32 %v1407_v6, %v707_v10  ;;  %v543_v26 = vpop.f32.mrf.mxu0  ;;  %v623_v27 = vpop.f32.mrf.mxu1 }
  0xf8   : > { %824 = vst [vmem:[%s1453_s9] sm:$0xff] %v792_v59  ;;  %840 = vst [vmem:[%s1453_s9 + $0x80] sm:$0xff] %v808_v13  ;;  %v733_v30 = vadd.f32 %v1407_v6, %v694_v14  ;;  %v749_v31 = vadd.f32 %v1407_v6, %v710_v15  ;;  %v693_v34 = vmul.f32 %v1380_v57, %v543_v26 }
  0xf9   : > { %v709_v16 = vmul.f32 %v1380_v57, %v623_v27  ;;  %v795_v35 = vmax.f32 %v763_v18, 0.0  ;;  %v811_v17 = vmax.f32 %v779_v19, 0.0  ;;  %v762_v36 = vadd.f32 %v730_v22, %v1330_v28  ;;  %v1034_v41 = vpop.f32.mrf.mxu0  ;;  %v1058_v42 = vpop.f32.mrf.mxu1 }
  0xfa   : > { %v778_v37 = vadd.f32 %v746_v23, %v1333_v29  ;;  %v765_v43 = vadd.f32 %v733_v30, %v1338_v32  ;;  %v781_v49 = vadd.f32 %v749_v31, %v1341_v33  ;;  %v732_v52 = vadd.f32 %v1407_v6, %v693_v34 }
  0xfb   : > { %v748_v53 = vadd.f32 %v1407_v6, %v709_v16  ;;  %827 = vst [vmem:[%s1453_s9 + $0x18] sm:$0xff] %v795_v35  ;;  %843 = vst [vmem:[%s1453_s9 + $0x98] sm:$0xff] %v811_v17  ;;  %v794_v54 = vmax.f32 %v762_v36, 0.0  ;;  %v696_v28 = vmul.f32 %v1034_v41, %v1380_v57  ;;  %v712_v29 = vmul.f32 %v1058_v42, %v1380_v57  ;;  %v553_v56 = vpop.f32.mrf.mxu0  ;;  %v633_v32 = vpop.f32.mrf.mxu1 }
  0xfc   : > { %v810_v55 = vmax.f32 %v778_v37, 0.0  ;;  %v797_v61 = vmax.f32 %v765_v43, 0.0  ;;  %v813_v62 = vmax.f32 %v781_v49, 0.0  ;;  %v764_v33 = vadd.f32 %v732_v52, %v1354_v44 }
  0xfd   : > { %v780_v3 = vadd.f32 %v748_v53, %v1357_v45  ;;  %826 = vst [vmem:[%s1453_s9 + $0x10] sm:$0xff] %v794_v54  ;;  %v735_v4 = vadd.f32 %v1407_v6, %v696_v28  ;;  %v751_v5 = vadd.f32 %v1407_v6, %v712_v29  ;;  %v695_v7 = vmul.f32 %v1380_v57, %v553_v56  ;;  %v1037_v11 = vpop.f32.mrf.mxu0  ;;  %v1061_v12 = vpop.f32.mrf.mxu1 }
  0xfe   : > { %842 = vst [vmem:[%s1453_s9 + $0x90] sm:$0xff] %v810_v55  ;;  %v711_v10 = vmul.f32 %v1380_v57, %v633_v32  ;;  %829 = vst [vmem:[%s1453_s9 + $0x28] sm:$0xff] %v797_v61  ;;  %v796_v59 = vmax.f32 %v764_v33, 0.0  ;;  %v698_v45 = vmul.f32 %v1037_v11, %v1380_v57  ;;  %v714_v13 = vmul.f32 %v1061_v12, %v1380_v57 }
  0xff   : > { %845 = vst [vmem:[%s1453_s9 + $0xa8] sm:$0xff] %v813_v62  ;;  %v812_v44 = vmax.f32 %v780_v3, 0.0  ;;  %v767_v14 = vadd.f32 %v735_v4, %v1360_v46  ;;  %v783_v15 = vadd.f32 %v751_v5, %v1363_v47  ;;  %v734_v18 = vadd.f32 %v1407_v6, %v695_v7  ;;  %v563_v22 = vpop.f32.mrf.mxu0  ;;  %v643_v23 = vpop.f32.mrf.mxu1 }
 0x100   : > { %v750_v19 = vadd.f32 %v1407_v6, %v711_v10  ;;  %828 = vst [vmem:[%s1453_s9 + $0x20] sm:$0xff] %v796_v59  ;;  %v737_v26 = vadd.f32 %v1407_v6, %v698_v45  ;;  %v753_v27 = vadd.f32 %v1407_v6, %v714_v13  ;;  %v697_v30 = vmul.f32 %v1380_v57, %v563_v22 }
 0x101   : > { %844 = vst [vmem:[%s1453_s9 + $0xa0] sm:$0xff] %v812_v44  ;;  %v713_v46 = vmul.f32 %v1380_v57, %v643_v23  ;;  %v799_v31 = vmax.f32 %v767_v14, 0.0  ;;  %v815_v47 = vmax.f32 %v783_v15, 0.0  ;;  %v766_v34 = vadd.f32 %v734_v18, %v1367_v50  ;;  %v1040_v35 = vpop.f32.mrf.mxu0  ;;  %v1064_v17 = vpop.f32.mrf.mxu1 }
 0x102   : > { %v782_v16 = vadd.f32 %v750_v19, %v1370_v51  ;;  %v769_v36 = vadd.f32 %v737_v26, %v1383_v58  ;;  %v785_v37 = vadd.f32 %v753_v27, %v1386_v60  ;;  %v736_v41 = vadd.f32 %v1407_v6, %v697_v30 }
 0x103   : > { %v752_v42 = vadd.f32 %v1407_v6, %v713_v46  ;;  %831 = vst [vmem:[%s1453_s9 + $0x38] sm:$0xff] %v799_v31  ;;  %847 = vst [vmem:[%s1453_s9 + $0xb8] sm:$0xff] %v815_v47  ;;  %v798_v43 = vmax.f32 %v766_v34, 0.0  ;;  %v700_v50 = vmul.f32 %v1040_v35, %v1380_v57  ;;  %v716_v51 = vmul.f32 %v1064_v17, %v1380_v57  ;;  %v573_v52 = vpop.f32.mrf.mxu0  ;;  %v653_v58 = vpop.f32.mrf.mxu1 }
 0x104   : > { %v814_v49 = vmax.f32 %v782_v16, 0.0  ;;  %v801_v53 = vmax.f32 %v769_v36, 0.0  ;;  %v817_v54 = vmax.f32 %v785_v37, 0.0  ;;  %v768_v60 = vadd.f32 %v736_v41, %v1391_v63 }
 0x105   : > { %v784_v55 = vadd.f32 %v752_v42, %v1394_v0  ;;  %830 = vst [vmem:[%s1453_s9 + $0x30] sm:$0xff] %v798_v43  ;;  %v739_v28 = vadd.f32 %v1407_v6, %v700_v50  ;;  %v755_v29 = vadd.f32 %v1407_v6, %v716_v51  ;;  %v699_v56 = vmul.f32 %v1380_v57, %v573_v52  ;;  %v1043_v61 = vpop.f32.mrf.mxu0  ;;  %v1067_v62 = vpop.f32.mrf.mxu1 }
 0x106   : > { %846 = vst [vmem:[%s1453_s9 + $0xb0] sm:$0xff] %v814_v49  ;;  %v715_v32 = vmul.f32 %v1380_v57, %v653_v58  ;;  %833 = vst [vmem:[%s1453_s9 + $0x48] sm:$0xff] %v801_v53  ;;  %v800_v33 = vmax.f32 %v768_v60, 0.0  ;;  %v702_v0 = vmul.f32 %v1043_v61, %v1380_v57  ;;  %v718_v3 = vmul.f32 %v1067_v62, %v1380_v57 }
 0x107   : > { %849 = vst [vmem:[%s1453_s9 + $0xc8] sm:$0xff] %v817_v54  ;;  %v816_v63 = vmax.f32 %v784_v55, 0.0  ;;  %v771_v4 = vadd.f32 %v739_v28, %v1397_v1  ;;  %v787_v5 = vadd.f32 %v755_v29, %v1400_v2  ;;  %v738_v7 = vadd.f32 %v1407_v6, %v699_v56  ;;  %v583_v11 = vpop.f32.mrf.mxu0  ;;  %v663_v12 = vpop.f32.mrf.mxu1 }
 0x108   : > { %v754_v10 = vadd.f32 %v1407_v6, %v715_v32  ;;  %832 = vst [vmem:[%s1453_s9 + $0x40] sm:$0xff] %v800_v33  ;;  %v741_v59 = vadd.f32 %v1407_v6, %v702_v0  ;;  %v757_v44 = vadd.f32 %v1407_v6, %v718_v3  ;;  %v701_v45 = vmul.f32 %v1380_v57, %v583_v11 }
 0x109   : > { %848 = vst [vmem:[%s1453_s9 + $0xc0] sm:$0xff] %v816_v63  ;;  %v717_v1 = vmul.f32 %v1380_v57, %v663_v12  ;;  %v803_v13 = vmax.f32 %v771_v4, 0.0  ;;  %v819_v2 = vmax.f32 %v787_v5, 0.0  ;;  %v770_v14 = vadd.f32 %v738_v7, %v1416_v20  ;;  %v1046_v18 = vpop.f32.mrf.mxu0  ;;  %v1070_v19 = vpop.f32.mrf.mxu1 }
 0x10a   : > { %v786_v15 = vadd.f32 %v754_v10, %v1419_v21  ;;  %v773_v22 = vadd.f32 %v741_v59, %v1422_v24  ;;  %v789_v23 = vadd.f32 %v757_v44, %v1425_v25  ;;  %v740_v26 = vadd.f32 %v1407_v6, %v701_v45 }
 0x10b   : > { %v756_v27 = vadd.f32 %v1407_v6, %v717_v1  ;;  %835 = vst [vmem:[%s1453_s9 + $0x58] sm:$0xff] %v803_v13  ;;  %851 = vst [vmem:[%s1453_s9 + $0xd8] sm:$0xff] %v819_v2  ;;  %v802_v30 = vmax.f32 %v770_v14, 0.0  ;;  %v704_v20 = vmul.f32 %v1046_v18, %v1380_v57  ;;  %v720_v21 = vmul.f32 %v1070_v19, %v1380_v57  ;;  %v593_v31 = vpop.f32.mrf.mxu0  ;;  %v673_v24 = vpop.f32.mrf.mxu1 }
 0x10c   : > { %v818_v46 = vmax.f32 %v786_v15, 0.0  ;;  %v805_v47 = vmax.f32 %v773_v22, 0.0  ;;  %v821_v34 = vmax.f32 %v789_v23, 0.0  ;;  %v772_v25 = vadd.f32 %v740_v26, %v1434_v38 }
 0x10d   : > { %v788_v16 = vadd.f32 %v756_v27, %v1437_v39  ;;  %834 = vst [vmem:[%s1453_s9 + $0x50] sm:$0xff] %v802_v30  ;;  %v743_v35 = vadd.f32 %v1407_v6, %v704_v20  ;;  %v759_v17 = vadd.f32 %v1407_v6, %v720_v21  ;;  %v703_v36 = vmul.f32 %v1380_v57, %v593_v31 }
 0x10e   : > { %850 = vst [vmem:[%s1453_s9 + $0xd0] sm:$0xff] %v818_v46  ;;  %v719_v37 = vmul.f32 %v1380_v57, %v673_v24  ;;  %837 = vst [vmem:[%s1453_s9 + $0x68] sm:$0xff] %v805_v47  ;;  %v804_v41 = vmax.f32 %v772_v25, 0.0 }
 0x10f   : > { %853 = vst [vmem:[%s1453_s9 + $0xe8] sm:$0xff] %v821_v34  ;;  %v820_v38 = vmax.f32 %v788_v16, 0.0  ;;  %v775_v39 = vadd.f32 %v743_v35, %v1440_v40  ;;  %v791_v42 = vadd.f32 %v759_v17, %v1443_v48  ;;  %v742_v43 = vadd.f32 %v1407_v6, %v703_v36 }
 0x110   : > { %v758_v49 = vadd.f32 %v1407_v6, %v719_v37  ;;  %836 = vst [vmem:[%s1453_s9 + $0x60] sm:$0xff] %v804_v41 }
 0x111   : > { %852 = vst [vmem:[%s1453_s9 + $0xe0] sm:$0xff] %v820_v38  ;;  %v807_v50 = vmax.f32 %v775_v39, 0.0  ;;  %v823_v51 = vmax.f32 %v791_v42, 0.0  ;;  %v774_v57 = vadd.f32 %v742_v43, %v1458_v8 }
 0x112   : > { %v790_v52 = vadd.f32 %v758_v49, %v1461_v9 }
 0x113   : > { %839 = vst [vmem:[%s1453_s9 + $0x78] sm:$0xff] %v807_v50  ;;  %855 = vst [vmem:[%s1453_s9 + $0xf8] sm:$0xff] %v823_v51  ;;  %v806_v58 = vmax.f32 %v774_v57, 0.0 }
 0x114   : > { %v822_v53 = vmax.f32 %v790_v52, 0.0 }
 0x115   : > { %838 = vst [vmem:[%s1453_s9 + $0x70] sm:$0xff] %v806_v58 }
 0x116   : > { %854 = vst [vmem:[%s1453_s9 + $0xf0] sm:$0xff] %v822_v53 }
 0x117 PF: > { %s17_s24 = sadd.s32 1, %s1117_s24  }
 0x118   : > { %p14_p4 = scmp.ge.s32.totalorder %s17_s24, 4  }
 0x11a   :  { %16 = sbr.rel (!%p14_p4) target bundleno = 1 (0x1), region = 81 }

// kernel: residual_block_nhwc.4
= control target key start
LH: loop header
LB: loop body
LE: loop exit
PB: predicated region body
PF: predicated region fallthrough
CT: control target
= control target key end

     0   :  { %s2486_s18 = smov 0   ;;  %s4015_s0 = inlined_call_operand.vmem [shape: f32[2,16,16,128], index: 0, kind: input, shape index: {}]   ;;  %s4016_s1 = inlined_call_operand.vmem [shape: f32[1,128], index: 1, kind: input, shape index: {}]   ;;  %s4017_s2 = inlined_call_operand.vmem [shape: f32[1,128], index: 2, kind: input, shape index: {}]   ;;  %s4018_s3 = inlined_call_operand.vmem [shape: f32[1152,128], index: 3, kind: input, shape index: {}]   ;;  %s4019_s4 = inlined_call_operand.vmem [shape: f32[2,16,16,128], index: 4, kind: output, shape index: {0}]   ;;  %s4020_s5 = inlined_call_operand.vmem [shape: f32[2,2,128], index: 5, kind: output, shape index: {1}]  }
   0x1 LB: > { %s2239_s19 = sadd.s32 4294967295, %s2453_s18   ;;  %p2243_p0 = scmp.ge.s32.totalorder %s2453_s18, 1  ;;  %s2453_s18 = sphi %s2486_s18, %s16_s18  }
   0x2   : > { %p190_p1 = scmp.lt.s32.totalorder %s2453_s18, 3 }
   0x4   : > { %p191_p2 = pnand %p2243_p0, %p190_p1 }
   0x6   : > { %194 = sbr.rel (%p191_p2) target bundleno = 610 (0x262), region = 36 }
   0xb   : > { %v758_v0 = vld [vmem:[%s4018_s3 + $0x78] sm:$0xff]  ;;  %v2455_v2 = vmov 0.0   ;;  %v757_v3 = vld [vmem:[%s4018_s3 + $0x70] sm:$0xff]  ;;  %v756_v5 = vld [vmem:[%s4018_s3 + $0x68] sm:$0xff]  ;;  %p222_p3 = scmp.lt.s32.totalorder %s2239_s19, 1  ;;  %vm2150_vm0 = vcmask 1040384  }
   0xc   : > { %v790_v1 = vld [vmem:[%s4018_s3 + $0x178] sm:$0xff]  ;;  %887 = vmatprep.subr.mxu0 %v2455_v2  ;;  %378 = vst [vmem:[#allocation2] sm:$0xff] %v2455_v2  ;;  %379 = vst [vmem:[#allocation2 + $0x8] sm:$0xff] %v2455_v2  ;;  %1112 = vmatprep.subr.mxu1 %v2455_v2  ;;  %v789_v4 = vld [vmem:[%s4018_s3 + $0x170] sm:$0xff] }
   0xd   : > { %380 = vst [vmem:[#allocation2 + $0x10] sm:$0x3] %v2455_v2  ;;  %382 = vst [vmem:[#allocation2 + $0x198] sm:$0xff] %v2455_v2  ;;  %888 = vmatpush1.msra.mxu0 %v758_v0  ;;  %1113 = vmatpush1.msra.mxu1 %v790_v1  ;;  %v788_v6 = vld [vmem:[%s4018_s3 + $0x168] sm:$0xff]  ;;  %v755_v7 = vld [vmem:[%s4018_s3 + $0x60] sm:$0xff]  ;;  %s4060_s19 = smov (!%p222_p3, %s2239_s19), 1 }
   0xe   : > { %383 = vst [vmem:[#allocation2 + $0x1a0] sm:$0xff] %v2455_v2  ;;  %384 = vst [vmem:[#allocation2 + $0x1a8] sm:$0x3] %v2455_v2  ;;  %889 = vmatprep.subr.mxu0 %v2455_v2  ;;  %1114 = vmatprep.subr.mxu1 %v2455_v2  ;;  %v787_v8 = vld [vmem:[%s4018_s3 + $0x160] sm:$0xff]  ;;  %v754_v9 = vld [vmem:[%s4018_s3 + $0x58] sm:$0xff]  ;;  %s2253_s8 = sshll.u32 %s4060_s19, 8 }
   0xf   : > { %386 = vst [vmem:[#allocation2 + $0x18] sm:$0x1] %v2455_v2  ;;  %387 = vst [vmem:[#allocation2 + $0x30] sm:$0x1] %v2455_v2  ;;  %890 = vmatpush1.msra.mxu0 %v757_v3  ;;  %1115 = vmatpush1.msra.mxu1 %v789_v4  ;;  %v786_v10 = vld [vmem:[%s4018_s3 + $0x158] sm:$0xff]  ;;  %v753_v11 = vld [vmem:[%s4018_s3 + $0x50] sm:$0xff]  ;;  %s2626_s15 = scalar_lea.vmem %s4015_s0, %s2253_s8 }
  0x10   : > { %388 = vst [vmem:[#allocation2 + $0x48] sm:$0x1] %v2455_v2  ;;  %389 = vst [vmem:[#allocation2 + $0x60] sm:$0x1] %v2455_v2  ;;  %891 = vmatprep.subr.mxu0 %v2455_v2  ;;  %1116 = vmatprep.subr.mxu1 %v2455_v2  ;;  %v785_v12 = vld [vmem:[%s4018_s3 + $0x150] sm:$0xff]  ;;  %v752_v13 = vld [vmem:[%s4018_s3 + $0x48] sm:$0xff] }
  0x11   : > { %390 = vst [vmem:[#allocation2 + $0x78] sm:$0x1] %v2455_v2  ;;  %391 = vst [vmem:[#allocation2 + $0x90] sm:$0x1] %v2455_v2  ;;  %892 = vmatpush1.msra.mxu0 %v756_v5  ;;  %1117 = vmatpush1.msra.mxu1 %v788_v6  ;;  %v784_v14 = vld [vmem:[%s4018_s3 + $0x148] sm:$0xff]  ;;  %v751_v15 = vld [vmem:[%s4018_s3 + $0x40] sm:$0xff] }
  0x12   : > { %392 = vst [vmem:[#allocation2 + $0xa8] sm:$0x1] %v2455_v2  ;;  %393 = vst [vmem:[#allocation2 + $0xc0] sm:$0x1] %v2455_v2  ;;  %893 = vmatprep.subr.mxu0 %v2455_v2  ;;  %1118 = vmatprep.subr.mxu1 %v2455_v2  ;;  %v783_v16 = vld [vmem:[%s4018_s3 + $0x140] sm:$0xff]  ;;  %v750_v17 = vld [vmem:[%s4018_s3 + $0x38] sm:$0xff] }
  0x13   : > { %394 = vst [vmem:[#allocation2 + $0xd8] sm:$0x1] %v2455_v2  ;;  %395 = vst [vmem:[#allocation2 + $0xf0] sm:$0x1] %v2455_v2  ;;  %894 = vmatpush1.msra.mxu0 %v755_v7  ;;  %1119 = vmatpush1.msra.mxu1 %v787_v8  ;;  %v782_v18 = vld [vmem:[%s4018_s3 + $0x138] sm:$0xff]  ;;  %v749_v19 = vld [vmem:[%s4018_s3 + $0x30] sm:$0xff] }
  0x14   : > { %396 = vst [vmem:[#allocation2 + $0x108] sm:$0x1] %v2455_v2  ;;  %397 = vst [vmem:[#allocation2 + $0x120] sm:$0x1] %v2455_v2  ;;  %895 = vmatprep.subr.mxu0 %v2455_v2  ;;  %1120 = vmatprep.subr.mxu1 %v2455_v2  ;;  %v781_v20 = vld [vmem:[%s4018_s3 + $0x130] sm:$0xff]  ;;  %v748_v21 = vld [vmem:[%s4018_s3 + $0x28] sm:$0xff] }
  0x15   : > { %398 = vst [vmem:[#allocation2 + $0x138] sm:$0x1] %v2455_v2  ;;  %399 = vst [vmem:[#allocation2 + $0x150] sm:$0x1] %v2455_v2  ;;  %896 = vmatpush1.msra.mxu0 %v754_v9  ;;  %1121 = vmatpush1.msra.mxu1 %v786_v10  ;;  %v780_v22 = vld [vmem:[%s4018_s3 + $0x128] sm:$0xff]  ;;  %v747_v23 = vld [vmem:[%s4018_s3 + $0x20] sm:$0xff] }
  0x16   : > { %400 = vst [vmem:[#allocation2 + $0x168] sm:$0x1] %v2455_v2  ;;  %401 = vst [vmem:[#allocation2 + $0x180] sm:$0x1] %v2455_v2  ;;  %897 = vmatprep.subr.mxu0 %v2455_v2  ;;  %1122 = vmatprep.subr.mxu1 %v2455_v2  ;;  %v779_v24 = vld [vmem:[%s4018_s3 + $0x120] sm:$0xff]  ;;  %v746_v28 = vld [vmem:[%s4018_s3 + $0x18] sm:$0xff] }
  0x17   : > { %404 = vst [vmem:[#allocation2 + $0x29] sm:$0x1] %v2455_v2  ;;  %405 = vst [vmem:[#allocation2 + $0x41] sm:$0x1] %v2455_v2  ;;  %898 = vmatpush1.msra.mxu0 %v753_v11  ;;  %1123 = vmatpush1.msra.mxu1 %v785_v12  ;;  %v236_v25 = vld [vmem:[%s2626_s15] sm:$0xff]  ;;  %v778_v29 = vld [vmem:[%s4018_s3 + $0x118] sm:$0xff] }
  0x18   : > { %406 = vst [vmem:[#allocation2 + $0x59] sm:$0x1] %v2455_v2  ;;  %407 = vst [vmem:[#allocation2 + $0x71] sm:$0x1] %v2455_v2  ;;  %899 = vmatprep.subr.mxu0 %v2455_v2  ;;  %1124 = vmatprep.subr.mxu1 %v2455_v2  ;;  %v2648_v26 = vld [vmem:[%s4016_s1] ss:$0 sm:$0xff] }
  0x19   : > { %408 = vst [vmem:[#allocation2 + $0x89] sm:$0x1] %v2455_v2  ;;  %409 = vst [vmem:[#allocation2 + $0xa1] sm:$0x1] %v2455_v2  ;;  %900 = vmatpush1.msra.mxu0 %v752_v13  ;;  %1125 = vmatpush1.msra.mxu1 %v784_v14  ;;  %v2653_v27 = vld [vmem:[%s4017_s2] ss:$0 sm:$0xff]  ;;  %v275_v30 = vmul.f32 %v2648_v26, %v236_v25 }
  0x1a   : > { %410 = vst [vmem:[#allocation2 + $0xb9] sm:$0x1] %v2455_v2  ;;  %411 = vst [vmem:[#allocation2 + $0xd1] sm:$0x1] %v2455_v2  ;;  %901 = vmatprep.subr.mxu0 %v2455_v2  ;;  %1126 = vmatprep.subr.mxu1 %v2455_v2  ;;  %v745_v31 = vld [vmem:[%s4018_s3 + $0x10] sm:$0xff]  ;;  %v237_v32 = vld [vmem:[%s2626_s15 + $0x8] sm:$0xff] }
  0x1b   : > { %412 = vst [vmem:[#allocation2 + $0xe9] sm:$0x1] %v2455_v2  ;;  %413 = vst [vmem:[#allocation2 + $0x101] sm:$0x1] %v2455_v2  ;;  %902 = vmatpush1.msra.mxu0 %v751_v15  ;;  %1127 = vmatpush1.msra.mxu1 %v783_v16  ;;  %v777_v33 = vld [vmem:[%s4018_s3 + $0x110] sm:$0xff]  ;;  %v2674_v34 = vadd.f32 %v2653_v27, %v275_v30  ;;  %v276_v35 = vmul.f32 %v2648_v26, %v237_v32  ;;  %v239_v37 = vld [vmem:[%s2626_s15 + $0x18] sm:$0xff] }
  0x1c   : > { %414 = vst [vmem:[#allocation2 + $0x119] sm:$0x1] %v2455_v2  ;;  %415 = vst [vmem:[#allocation2 + $0x131] sm:$0x1] %v2455_v2  ;;  %903 = vmatprep.subr.mxu0 %v2455_v2  ;;  %1128 = vmatprep.subr.mxu1 %v2455_v2  ;;  %v238_v36 = vld [vmem:[%s2626_s15 + $0x10] sm:$0xff]  ;;  %v744_v38 = vld [vmem:[%s4018_s3 + $0x8] sm:$0xff]  ;;  %v278_v40 = vmul.f32 %v2648_v26, %v239_v37 }
  0x1d   : > { %416 = vst [vmem:[#allocation2 + $0x149] sm:$0x1] %v2455_v2  ;;  %417 = vst [vmem:[#allocation2 + $0x161] sm:$0x1] %v2455_v2  ;;  %904 = vmatpush1.msra.mxu0 %v750_v17  ;;  %1129 = vmatpush1.msra.mxu1 %v782_v18  ;;  %v277_v39 = vmul.f32 %v2648_v26, %v238_v36  ;;  %v240_v41 = vld [vmem:[%s2626_s15 + $0x20] sm:$0xff]  ;;  %v776_v42 = vld [vmem:[%s4018_s3 + $0x108] sm:$0xff]  ;;  %v2692_v44 = vadd.f32 %v2653_v27, %v276_v35 }
  0x1e   : > { %418 = vst [vmem:[#allocation2 + $0x179] sm:$0x1] %v2455_v2  ;;  %419 = vst [vmem:[#allocation2 + $0x191] sm:$0x1] %v2455_v2  ;;  %905 = vmatprep.subr.mxu0 %v2455_v2  ;;  %1130 = vmatprep.subr.mxu1 %v2455_v2  ;;  %v346_v43 = vmax.f32 %v2674_v34, 0.0  ;;  %v279_v45 = vmul.f32 %v2648_v26, %v240_v41  ;;  %v241_v46 = vld [vmem:[%s2626_s15 + $0x28] sm:$0xff]  ;;  %v2701_v49 = vadd.f32 %v2653_v27, %v278_v40 }
  0x1f   : > { %385 = vst [vmem:[#allocation2] sm:$0x1] %v2455_v2  ;;  %402 = vst [vmem:[#allocation2 + $0x198] sm:$0x1] %v2455_v2  ;;  %906 = vmatpush1.msra.mxu0 %v749_v19  ;;  %1131 = vmatpush1.msra.mxu1 %v781_v20  ;;  %v242_v47 = vld [vmem:[%s2626_s15 + $0x30] sm:$0xff]  ;;  %v2698_v48 = vadd.f32 %v2653_v27, %v277_v39  ;;  %v280_v50 = vmul.f32 %v2648_v26, %v241_v46  ;;  %v243_v51 = vld [vmem:[%s2626_s15 + $0x38] sm:$0xff] }
  0x20   : > { %403 = vst [vmem:[#allocation2 + $0x11] sm:$0x1] %v2455_v2  ;;  %420 = vst [vmem:[#allocation2 + $0x1a9] sm:$0x1] %v2455_v2  ;;  %907 = vmatprep.subr.mxu0 %v2455_v2  ;;  %1132 = vmatprep.subr.mxu1 %v2455_v2  ;;  %v743_v52 = vld [vmem:[%s4018_s3] sm:$0xff]  ;;  %v347_v54 = vmax.f32 %v2692_v44, 0.0  ;;  %v2717_v55 = vadd.f32 %v2653_v27, %v279_v45  ;;  %v281_v56 = vmul.f32 %v2648_v26, %v242_v47 }
  0x21   : > { %908 = vmatpush1.msra.mxu0 %v748_v21  ;;  %1133 = vmatpush1.msra.mxu1 %v780_v22  ;;  %v775_v53 = vld [vmem:[%s4018_s3 + $0x100] sm:$0xff]  ;;  %422 = vst [vmem:[#allocation2 + $0x19] sm:$0xff] %v346_v43  ;;  %v282_v57 = vmul.f32 %v2648_v26, %v243_v51  ;;  %v348_v59 = vmax.f32 %v2698_v48, 0.0  ;;  %v349_v60 = vmax.f32 %v2701_v49, 0.0  ;;  %v2725_v61 = vadd.f32 %v2653_v27, %v280_v50  ;;  %v245_v63 = vld [vmem:[%s2626_s15 + $0x48] sm:$0xff]  ;;  %v774_v0 = vld [vmem:[%s4018_s3 + $0xf8] sm:$0xff] }
  0x22   : > { %909 = vmatprep.subr.mxu0 %v2455_v2  ;;  %1134 = vmatprep.subr.mxu1 %v2455_v2  ;;  %v244_v58 = vld [vmem:[%s2626_s15 + $0x40] sm:$0xff]  ;;  %v806_v1 = vld [vmem:[%s4018_s3 + $0x1f8] sm:$0xff]  ;;  %423 = vst [vmem:[#allocation2 + $0x21] sm:$0xff] %v347_v54  ;;  %v350_v3 = vmax.f32 %v2717_v55, 0.0  ;;  %v2741_v4 = vadd.f32 %v2653_v27, %v281_v56  ;;  %v284_v6 = vmul.f32 %v2648_v26, %v245_v63  ;;  %v246_v7 = vld [vmem:[%s2626_s15 + $0x50] sm:$0xff] }
  0x23   : > { %910 = vmatpush1.msra.mxu0 %v747_v23  ;;  %1135 = vmatpush1.msra.mxu1 %v779_v24  ;;  %v283_v62 = vmul.f32 %v2648_v26, %v244_v58  ;;  %v2744_v5 = vadd.f32 %v2653_v27, %v282_v57  ;;  %424 = vst [vmem:[#allocation2 + $0x31] sm:$0xff] %v348_v59  ;;  %425 = vst [vmem:[#allocation2 + $0x39] sm:$0xff] %v349_v60  ;;  %v351_v8 = vmax.f32 %v2725_v61, 0.0  ;;  %v247_v11 = vld [vmem:[%s2626_s15 + $0x58] sm:$0xff]  ;;  %v773_v12 = vld [vmem:[%s4018_s3 + $0xf0] sm:$0xff] }
  0x24   : > { %911 = vmatprep.subr.mxu0 %v2455_v2  ;;  %1136 = vmatprep.subr.mxu1 %v2455_v2  ;;  %v285_v10 = vmul.f32 %v2648_v26, %v246_v7  ;;  %v805_v13 = vld [vmem:[%s4018_s3 + $0x1f0] sm:$0xff]  ;;  %426 = vst [vmem:[#allocation2 + $0x49] sm:$0xff] %v350_v3  ;;  %v352_v14 = vmax.f32 %v2741_v4, 0.0  ;;  %v2771_v16 = vadd.f32 %v2653_v27, %v284_v6  ;;  %v248_v18 = vld [vmem:[%s2626_s15 + $0x60] sm:$0xff]  ;;  %v249_v22 = vld [vmem:[%s2626_s15 + $0x68] sm:$0xff] }
  0x25   : > { %912 = vmatpush1.msra.mxu0 %v746_v28  ;;  %1137 = vmatpush1.msra.mxu1 %v778_v29  ;;  %v2754_v9 = vadd.f32 %v2653_v27, %v283_v62  ;;  %v353_v15 = vmax.f32 %v2744_v5, 0.0  ;;  %v286_v17 = vmul.f32 %v2648_v26, %v247_v11  ;;  %427 = vst [vmem:[#allocation2 + $0x51] sm:$0xff] %v351_v8  ;;  %v772_v23 = vld [vmem:[%s4018_s3 + $0xe8] sm:$0xff]  ;;  %v250_v30 = vld [vmem:[%s2626_s15 + $0x70] sm:$0xff]  ;;  %v251_v35 = vld [vmem:[%s2626_s15 + $0x78] sm:$0xff] }
  0x26   : > { %913 = vmatprep.subr.mxu0 %v2455_v2  ;;  %1138 = vmatprep.subr.mxu1 %v2455_v2  ;;  %v2779_v20 = vadd.f32 %v2653_v27, %v285_v10  ;;  %v287_v21 = vmul.f32 %v2648_v26, %v248_v18  ;;  %v804_v24 = vld [vmem:[%s4018_s3 + $0x1e8] sm:$0xff]  ;;  %428 = vst [vmem:[#allocation2 + $0x61] sm:$0xff] %v352_v14  ;;  %v355_v25 = vmax.f32 %v2771_v16, 0.0  ;;  %v771_v36 = vld [vmem:[%s4018_s3 + $0xe0] sm:$0xff]  ;;  %v770_v47 = vld [vmem:[%s4018_s3 + $0xd8] sm:$0xff] }
  0x27   : > { %914 = vmatpush1.msra.mxu0 %v745_v31  ;;  %1139 = vmatpush1.msra.mxu1 %v777_v33  ;;  %v354_v19 = vmax.f32 %v2754_v9, 0.0  ;;  %429 = vst [vmem:[#allocation2 + $0x69] sm:$0xff] %v353_v15  ;;  %v2797_v28 = vadd.f32 %v2653_v27, %v286_v17  ;;  %v288_v29 = vmul.f32 %v2648_v26, %v249_v22  ;;  %v803_v37 = vld [vmem:[%s4018_s3 + $0x1e0] sm:$0xff]  ;;  %v802_v50 = vld [vmem:[%s4018_s3 + $0x1d8] sm:$0xff]  ;;  %v769_v57 = vld [vmem:[%s4018_s3 + $0xd0] sm:$0xff] }
  0x28   : > { %915 = vmatprep.subr.mxu0 %v2455_v2  ;;  %1140 = vmatprep.subr.mxu1 %v2455_v2  ;;  %v356_v31 = vmax.f32 %v2779_v20, 0.0  ;;  %v2805_v32 = vadd.f32 %v2653_v27, %v287_v21  ;;  %v289_v33 = vmul.f32 %v2648_v26, %v250_v30  ;;  %431 = vst [vmem:[#allocation2 + $0x81] sm:$0xff] %v355_v25  ;;  %v252_v41 = vld [vmem:[%s2626_s15 + $0x80] sm:$0xff]  ;;  %v801_v58 = vld [vmem:[%s4018_s3 + $0x1d0] sm:$0xff]  ;;  %v253_v6 = vld [vmem:[%s2626_s15 + $0x88] sm:$0xff] }
  0x29   : > { %916 = vmatpush1.msra.mxu0 %v744_v38  ;;  %1141 = vmatpush1.msra.mxu1 %v776_v42  ;;  %430 = vst [vmem:[#allocation2 + $0x79] sm:$0xff] %v354_v19  ;;  %v357_v38 = vmax.f32 %v2797_v28, 0.0  ;;  %v2821_v39 = vadd.f32 %v2653_v27, %v288_v29  ;;  %v290_v40 = vmul.f32 %v2648_v26, %v251_v35  ;;  %v767_v10 = vld [vmem:[%s4018_s3 + $0xc0] sm:$0xff]  ;;  %v798_v17 = vld [vmem:[%s4018_s3 + $0x1b8] sm:$0xff]  ;;  %v254_v18 = vld [vmem:[%s2626_s15 + $0x90] sm:$0xff] }
  0x2a   : > { %917 = vmatprep.subr.mxu0 %v2455_v2  ;;  %1142 = vmatprep.subr.mxu1 %v2455_v2  ;;  %432 = vst [vmem:[#allocation2 + $0x91] sm:$0xff] %v356_v31  ;;  %v358_v42 = vmax.f32 %v2805_v32, 0.0  ;;  %v2829_v45 = vadd.f32 %v2653_v27, %v289_v33  ;;  %v291_v46 = vmul.f32 %v2648_v26, %v252_v41  ;;  %v799_v11 = vld [vmem:[%s4018_s3 + $0x1c0] sm:$0xff]  ;;  %v255_v29 = vld [vmem:[%s2626_s15 + $0x98] sm:$0xff]  ;;  %v764_v35 = vld [vmem:[%s4018_s3 + $0xa8] sm:$0xff] }
  0x2b   : > { %918 = vmatpush1.msra.mxu0 %v743_v52  ;;  %1143 = vmatpush1.msra.mxu1 %v775_v53  ;;  %433 = vst [vmem:[#allocation2 + $0x99] sm:$0xff] %v357_v38  ;;  %v359_v51 = vmax.f32 %v2821_v39, 0.0  ;;  %v2844_v52 = vadd.f32 %v2653_v27, %v290_v40  ;;  %v292_v7 = vmul.f32 %v2648_v26, %v253_v6  ;;  %v256_v41 = vld [vmem:[%s2626_s15 + $0xa0] sm:$0xff]  ;;  %v762_v6 = vld [vmem:[%s4018_s3 + $0x98] sm:$0xff]  ;;  %v852_v44 = vld [vmem:[%s4018_s3 + $0x368] sm:$0xff] }
  0x2c   : > { %919 = vmatprep.subr.mxu0 %v2455_v2  ;;  %1144 = vmatprep.subr.mxu1 %v2455_v2  ;;  %434 = vst [vmem:[#allocation2 + $0xa9] sm:$0xff] %v358_v42  ;;  %v360_v53 = vmax.f32 %v2829_v45, 0.0  ;;  %v2850_v56 = vadd.f32 %v2653_v27, %v291_v46  ;;  %v293_v22 = vmul.f32 %v2648_v26, %v254_v18  ;;  %v763_v46 = vld [vmem:[%s4018_s3 + $0xa0] sm:$0xff]  ;;  %v850_v49 = vld [vmem:[%s4018_s3 + $0x358] sm:$0xff]  ;;  %v849_v55 = vld [vmem:[%s4018_s3 + $0x350] sm:$0xff] }
  0x2d   : > { %920 = vmatpush2.msra.mxu0 %v774_v0  ;;  %1145 = vmatpush2.msra.mxu1 %v806_v1  ;;  %435 = vst [vmem:[#allocation2 + $0xb1] sm:$0xff] %v359_v51  ;;  %v361_v62 = vmax.f32 %v2844_v52, 0.0  ;;  %v768_v0 = vld [vmem:[%s4018_s3 + $0xc8] sm:$0xff]  ;;  %v294_v33 = vmul.f32 %v2648_v26, %v255_v29  ;;  %v819_v34 = vld [vmem:[%s4018_s3 + $0x260] sm:$0xff]  ;;  %v846_v5 = vld [vmem:[%s4018_s3 + $0x338] sm:$0xff] }
  0x2e   : > { %921 = vmatprep.subr.mxu0 %v2455_v2  ;;  %1146 = vmatprep.subr.mxu1 %v2455_v2  ;;  %436 = vst [vmem:[#allocation2 + $0xc1] sm:$0xff] %v360_v53  ;;  %v362_v63 = vmax.f32 %v2850_v56, 0.0  ;;  %v800_v1 = vld [vmem:[%s4018_s3 + $0x1c8] sm:$0xff]  ;;  %v2914_v30 = vadd.f32 %v2653_v27, %v293_v22  ;;  %v260_v22 = vld [vmem:[%s2626_s15 + $0xc0] sm:$0xff]  ;;  %v810_v16 = vld [vmem:[%s4018_s3 + $0x218] sm:$0xff] }
  0x2f   : > { %922 = vmatpush2.msra.mxu0 %v773_v12  ;;  %1147 = vmatpush2.msra.mxu1 %v805_v13  ;;  %437 = vst [vmem:[#allocation2 + $0xc9] sm:$0xff] %v361_v62  ;;  %v2889_v12 = vadd.f32 %v2653_v27, %v292_v7  ;;  %v766_v13 = vld [vmem:[%s4018_s3 + $0xb8] sm:$0xff]  ;;  %v2927_v40 = vadd.f32 %v2653_v27, %v294_v33  ;;  %v851_v48 = vld [vmem:[%s4018_s3 + $0x360] sm:$0xff]  ;;  %v848_v61 = vld [vmem:[%s4018_s3 + $0x348] sm:$0xff] }
  0x30   : > { %923 = vmatprep.subr.mxu0 %v2455_v2  ;;  %1148 = vmatprep.subr.mxu1 %v2455_v2  ;;  %438 = vst [vmem:[#allocation2 + $0xd9] sm:$0xff] %v362_v63  ;;  %v794_v7 = vld [vmem:[%s4018_s3 + $0x198] sm:$0xff]  ;;  %v847_v4 = vld [vmem:[%s4018_s3 + $0x340] sm:$0xff]  ;;  %v809_v20 = vld [vmem:[%s4018_s3 + $0x210] sm:$0xff] }
  0x31   : > { %924 = vmatpush2.msra.mxu0 %v772_v23  ;;  %1149 = vmatpush2.msra.mxu1 %v804_v24  ;;  %v4032_v21 = vmax.f32 %v2889_v12, 0.0  ;;  %v765_v23 = vld [vmem:[%s4018_s3 + $0xb0] sm:$0xff]  ;;  %v811_v9 = vld [vmem:[%s4018_s3 + $0x220] sm:$0xff]  ;;  %v808_v28 = vld [vmem:[%s4018_s3 + $0x208] sm:$0xff] }
  0x32   : > { %925 = vmatprep.subr.mxu0 %v2455_v2  ;;  %1150 = vmatprep.subr.mxu1 %v2455_v2  ;;  %v797_v24 = vld [vmem:[%s4018_s3 + $0x1b0] sm:$0xff]  ;;  %v807_v32 = vld [vmem:[%s4018_s3 + $0x200] sm:$0xff]  ;;  %v838_v39 = vld [vmem:[%s4018_s3 + $0x2f8] sm:$0xff] }
  0x33   : > { %926 = vmatpush2.msra.mxu0 %v771_v36  ;;  %1151 = vmatpush2.msra.mxu1 %v803_v37  ;;  %439 = vst [vmem:[#allocation2 + $0xe1] sm:$0xff] %v4032_v21  ;;  %v796_v36 = vld [vmem:[%s4018_s3 + $0x1a8] sm:$0xff]  ;;  %v4027_v37 = vmax.f32 %v2914_v30, 0.0  ;;  %v837_v45 = vld [vmem:[%s4018_s3 + $0x2f0] sm:$0xff]  ;;  %v835_v56 = vld [vmem:[%s4018_s3 + $0x2e0] sm:$0xff] }
  0x34   : > { %927 = vmatprep.subr.mxu0 %v2455_v2  ;;  %1152 = vmatprep.subr.mxu1 %v2455_v2  ;;  %v836_v52 = vld [vmem:[%s4018_s3 + $0x2e8] sm:$0xff] }
  0x35   : > { %928 = vmatpush2.msra.mxu0 %v770_v47  ;;  %1153 = vmatpush2.msra.mxu1 %v802_v50  ;;  %v795_v47 = vld [vmem:[%s4018_s3 + $0x1a0] sm:$0xff]  ;;  %v295_v50 = vmul.f32 %v2648_v26, %v256_v41  ;;  %440 = vst [vmem:[#allocation2 + $0xf1] sm:$0xff] %v4027_v37 }
  0x36   : > { %929 = vmatprep.subr.mxu0 %v2455_v2  ;;  %1154 = vmatprep.subr.mxu1 %v2455_v2  ;;  %v551_v37 = vld [vmem:[#allocation2 + $0x20] sm:$0xff] }
  0x37   : > { %930 = vmatpush2.msra.mxu0 %v769_v57  ;;  %1155 = vmatpush2.msra.mxu1 %v801_v58  ;;  %v257_v57 = vld [vmem:[%s2626_s15 + $0xa8] sm:$0xff]  ;;  %v4025_v58 = vmax.f32 %v2927_v40, 0.0 }
  0x38   : > { %931 = vmatprep.subr.mxu0 %v2455_v2  ;;  %1156 = vmatprep.subr.mxu1 %v2455_v2 }
  0x39   : > { %932 = vmatpush2.msra.mxu0 %v768_v0  ;;  %1157 = vmatpush2.msra.mxu1 %v800_v1  ;;  %v296_v0 = vmul.f32 %v2648_v26, %v257_v57  ;;  %v258_v1 = vld [vmem:[%s2626_s15 + $0xb0] sm:$0xff]  ;;  %441 = vst [vmem:[#allocation2 + $0xf9] sm:$0xff] %v4025_v58  ;;  %v265_v58 = vld [vmem:[%s2626_s15 + $0xe8] sm:$0xff] }
  0x3a   : > { %933 = vmatprep.subr.mxu0 %v2455_v2  ;;  %1158 = vmatprep.subr.mxu1 %v2455_v2 }
  0x3b   : > { %934 = vmatpush2.msra.mxu0 %v767_v10  ;;  %1159 = vmatpush2.msra.mxu1 %v799_v11  ;;  %v2954_v10 = vadd.f32 %v2653_v27, %v295_v50  ;;  %v297_v11 = vmul.f32 %v2648_v26, %v258_v1  ;;  %v792_v50 = vld [vmem:[%s4018_s3 + $0x188] sm:$0xff] }
  0x3c   : > { %935 = vmatprep.subr.mxu0 %v2455_v2  ;;  %1160 = vmatprep.subr.mxu1 %v2455_v2 }
  0x3d   : > { %936 = vmatpush2.msra.mxu0 %v766_v13  ;;  %1161 = vmatpush2.msra.mxu1 %v798_v17  ;;  %v259_v13 = vld [vmem:[%s2626_s15 + $0xb8] sm:$0xff]  ;;  %v2961_v17 = vadd.f32 %v2653_v27, %v296_v0  ;;  %v4024_v29 = vmax.f32 %v2954_v10, 0.0  ;;  %v2975_v33 = vadd.f32 %v2653_v27, %v297_v11 }
  0x3e   : > { %937 = vmatprep.subr.mxu0 %v2455_v2  ;;  %1162 = vmatprep.subr.mxu1 %v2455_v2  ;;  %v298_v18 = vmul.f32 %v2648_v26, %v259_v13  ;;  %v263_v13 = vld [vmem:[%s2626_s15 + $0xd8] sm:$0xff] }
  0x3f   : > { %938 = vmatpush2.msra.mxu0 %v765_v23  ;;  %1163 = vmatpush2.msra.mxu1 %v797_v24  ;;  %v761_v23 = vld [vmem:[%s4018_s3 + $0x90] sm:$0xff]  ;;  %442 = vst [vmem:[#allocation2 + $0x109] sm:$0xff] %v4024_v29  ;;  %v4021_v57 = vmax.f32 %v2975_v33, 0.0 }
  0x40   : > { %939 = vmatprep.subr.mxu0 %v2455_v2  ;;  %1164 = vmatprep.subr.mxu1 %v2455_v2  ;;  %v793_v24 = vld [vmem:[%s4018_s3 + $0x190] sm:$0xff]  ;;  %v2980_v41 = vadd.f32 %v2653_v27, %v298_v18  ;;  %v759_v18 = vld [vmem:[%s4018_s3 + $0x80] sm:$0xff] }
  0x41   : > { %940 = vmatpush2.msra.mxu0 %v764_v35  ;;  %1165 = vmatpush2.msra.mxu1 %v796_v36  ;;  %v299_v35 = vmul.f32 %v2648_v26, %v260_v22  ;;  %v4022_v36 = vmax.f32 %v2961_v17, 0.0  ;;  %v486_v22 = vld [vmem:[#allocation2 + $0x1] sm:$0xff]  ;;  %444 = vst [vmem:[#allocation2 + $0x121] sm:$0xff] %v4021_v57 }
  0x42   : > { %941 = vmatprep.subr.mxu0 %v2455_v2  ;;  %1166 = vmatprep.subr.mxu1 %v2455_v2 }
  0x43   : > { %942 = vmatpush2.msra.mxu0 %v763_v46  ;;  %1167 = vmatpush2.msra.mxu1 %v795_v47  ;;  %v261_v46 = vld [vmem:[%s2626_s15 + $0xc8] sm:$0xff]  ;;  %v2995_v0 = vadd.f32 %v2653_v27, %v299_v35  ;;  %443 = vst [vmem:[#allocation2 + $0x111] sm:$0xff] %v4022_v36  ;;  %v302_v35 = vmul.f32 %v2648_v26, %v263_v13  ;;  %v264_v36 = vld [vmem:[%s2626_s15 + $0xe0] sm:$0xff] }
  0x44   : > { %943 = vmatprep.subr.mxu0 %v2455_v2  ;;  %1168 = vmatprep.subr.mxu1 %v2455_v2  ;;  %v760_v47 = vld [vmem:[%s4018_s3 + $0x88] sm:$0xff]  ;;  %v300_v1 = vmul.f32 %v2648_v26, %v261_v46  ;;  %v791_v46 = vld [vmem:[%s4018_s3 + $0x180] sm:$0xff] }
  0x45   : > { %944 = vmatpush2.msra.mxu0 %v762_v6  ;;  %1169 = vmatpush2.msra.mxu1 %v794_v7  ;;  %v262_v6 = vld [vmem:[%s2626_s15 + $0xd0] sm:$0xff]  ;;  %v4023_v7 = vmax.f32 %v2980_v41, 0.0  ;;  %v3033_v13 = vadd.f32 %v2653_v27, %v302_v35 }
  0x46   : > { %945 = vmatprep.subr.mxu0 %v2455_v2  ;;  %1170 = vmatprep.subr.mxu1 %v2455_v2  ;;  %v301_v11 = vmul.f32 %v2648_v26, %v262_v6  ;;  %v3019_v6 = vld [vmem:[#allocation2 + $0x18] sm:$0xff]  ;;  %v266_v35 = vld [vmem:[%s2626_s15 + $0xf0] sm:$0xff] }
  0x47   : > { %946 = vmatpush2.msra.mxu0 %v761_v23  ;;  %1171 = vmatpush2.msra.mxu1 %v793_v24  ;;  %v4026_v23 = vmax.f32 %v2995_v0, 0.0  ;;  %v3013_v24 = vadd.f32 %v2653_v27, %v300_v1  ;;  %445 = vst [vmem:[#allocation2 + $0x129] sm:$0xff] %v4023_v7  ;;  %v303_v7 = vmul.f32 %v2648_v26, %v264_v36  ;;  %v4029_v36 = vmax.f32 %v3033_v13, 0.0 }
  0x48   : > { %947 = vmatprep.subr.mxu0 %v2455_v2  ;;  %1172 = vmatprep.subr.mxu1 %v2455_v2  ;;  %v3024_v57 = vadd.f32 %v2653_v27, %v301_v11  ;;  %v487_v11 = vld [vmem:[#allocation2 + $0x9] sm:$0xff] }
  0x49   : > { %948 = vmatpush2.msra.mxu0 %v760_v47  ;;  %1173 = vmatpush2.msra.mxu1 %v792_v50  ;;  %v454_v47 = vld [vmem:[#allocation2] sm:$0xff]  ;;  %446 = vst [vmem:[#allocation2 + $0x139] sm:$0xff] %v4026_v23  ;;  %v4028_v1 = vmax.f32 %v3013_v24, 0.0  ;;  %v822_v23 = vld [vmem:[%s4018_s3 + $0x278] sm:$0xff]  ;;  %449 = vst [vmem:[#allocation2 + $0x159] sm:$0xff] %v4029_v36 }
  0x4a   : > { %949 = vmatprep.subr.mxu0 %v2455_v2  ;;  %1174 = vmatprep.subr.mxu1 %v2455_v2  ;;  %v518_v50 = vld [vmem:[#allocation2 + $0x2] sm:$0xff]  ;;  %v4031_v29 = vmax.f32 %v3024_v57, 0.0  ;;  %v267_v36 = vld [vmem:[%s2626_s15 + $0xf8] sm:$0xff]  ;;  %s3830_s15 = scalar_lea.vmem %s4019_s4, %s2253_s8  ;;  %s2248_s8 = sshll.u32 %s4060_s19, 1 }
  0x4b   : > { %950 = vmatpush2.msra.mxu0 %v759_v18  ;;  %951 = vmatprep.mubr.f32.mxu0 %v486_v22  ;;  %447 = vst [vmem:[#allocation2 + $0x141] sm:$0xff] %v4028_v1  ;;  %v3046_v18 = vadd.f32 %v2653_v27, %v303_v7  ;;  %v304_v22 = vmul.f32 %v2648_v26, %v265_v58  ;;  %s235_s12 = scalar_lea.vmem %s4020_s5, %s2248_s8 }
  0x4c   : > { %1175 = vmatpush2.msra.mxu1 %v791_v46  ;;  %1176 = vmatprep.mubr.f32.mxu1 %v3019_v6  ;;  %448 = vst [vmem:[#allocation2 + $0x151] sm:$0xff] %v4031_v29  ;;  %v519_v46 = vld [vmem:[#allocation2 + $0xa] sm:$0xff]  ;;  %v305_v58 = vmul.f32 %v2648_v26, %v266_v35  ;;  %v854_v35 = vld [vmem:[%s4018_s3 + $0x378] sm:$0xff] }
  0x4d   : > { %952 = vmatmul.mubr.f32.vlgmr.msra.gmra.mxu0 %v454_v47  ;;  %1177 = vmatmul.mubr.f32.vlgmr.msra.gmra.mxu1 %v518_v50  ;;  %v4030_v1 = vmax.f32 %v3046_v18, 0.0  ;;  %v3057_v7 = vadd.f32 %v2653_v27, %v304_v22  ;;  %v821_v47 = vld [vmem:[%s4018_s3 + $0x270] sm:$0xff]  ;;  %v553_v29 = vld [vmem:[#allocation2 + $0x38] sm:$0xff] }
  0x4e   : > { %1337 = vmatprep.subr.mxu0 %v2455_v2  ;;  %956 = vmatprep.mubr.f32.mxu0 %v487_v11  ;;  %v552_v50 = vld [vmem:[#allocation2 + $0x30] sm:$0xff]  ;;  %v344_v22 = vadd.f32 %v2653_v27, %v305_v58 }
  0x4f   : > { %1338 = vmatpush1.msra.mxu0 %v822_v23  ;;  %1181 = vmatprep.mubr.f32.mxu1 %v551_v37  ;;  %450 = vst [vmem:[#allocation2 + $0x169] sm:$0xff] %v4030_v1  ;;  %v375_v11 = vmax.f32 %v3057_v7, 0.0  ;;  %v820_v23 = vld [vmem:[%s4018_s3 + $0x268] sm:$0xff]  ;;  %v520_v1 = vld [vmem:[#allocation2 + $0x1a] sm:$0xff] }
  0x50   : > { %1339 = vmatprep.subr.mxu0 %v2455_v2  ;;  %1562 = vmatprep.subr.mxu1 %v2455_v2  ;;  %v376_v58 = vmax.f32 %v344_v22, 0.0  ;;  %v558_v22 = vld [vmem:[#allocation2 + $0x78] sm:$0xff]  ;;  %v855_v7 = vld [vmem:[%s4018_s3 + $0x380] sm:$0xff] }
  0x51   : > { %957 = vmatmul.mubr.f32.gmra.mxu0 %v2455_v2  ;;  %1182 = vmatmul.mubr.f32.gmra.mxu1 %v519_v46  ;;  %451 = vst [vmem:[#allocation2 + $0x171] sm:$0xff] %v375_v11  ;;  %v306_v46 = vmul.f32 %v2648_v26, %v267_v36  ;;  %v853_v26 = vld [vmem:[%s4018_s3 + $0x370] sm:$0xff] }
  0x52   : > { %1340 = vmatpush1.msra.mxu0 %v821_v47  ;;  %961 = vmatprep.mubr.f32.mxu0 %v346_v43  ;;  %452 = vst [vmem:[#allocation2 + $0x181] sm:$0xff] %v376_v58  ;;  %v521_v43 = vld [vmem:[#allocation2 + $0x22] sm:$0xff]  ;;  %v813_v58 = vld [vmem:[%s4018_s3 + $0x230] sm:$0xff] }
  0x53   : > { %1186 = vmatprep.mubr.f32.mxu1 %v552_v50  ;;  %1341 = vmatprep.subr.mxu0 %v2455_v2  ;;  %v345_v21 = vadd.f32 %v2653_v27, %v306_v46  ;;  %v554_v27 = vld [vmem:[#allocation2 + $0x48] sm:$0xff]  ;;  %v560_v46 = vld [vmem:[#allocation2 + $0x90] sm:$0xff] }
  0x54   : > { %1342 = vmatpush1.msra.mxu0 %v820_v23  ;;  %1563 = vmatpush1.msra.mxu1 %v854_v35  ;;  %v816_v47 = vld [vmem:[%s4018_s3 + $0x248] sm:$0xff]  ;;  %v814_v23 = vld [vmem:[%s4018_s3 + $0x238] sm:$0xff]  ;;  %v559_v35 = vld [vmem:[#allocation2 + $0x80] sm:$0xff] }
  0x55   : > { %962 = vmatmul.mubr.f32.gmra.mxu0 %v3019_v6  ;;  %1187 = vmatmul.mubr.f32.gmra.mxu1 %v520_v1  ;;  %v377_v36 = vmax.f32 %v345_v21, 0.0  ;;  %v818_v6 = vld [vmem:[%s4018_s3 + $0x258] sm:$0xff]  ;;  %v555_v21 = vld [vmem:[#allocation2 + $0x50] sm:$0xff]  ;;  %v556_v1 = vld [vmem:[#allocation2 + $0x60] sm:$0xff] }
  0x56   : > { %966 = vmatprep.mubr.f32.mxu0 %v347_v54  ;;  %1191 = vmatprep.mubr.f32.mxu1 %v553_v29  ;;  %v522_v54 = vld [vmem:[#allocation2 + $0x32] sm:$0xff] }
  0x57   : > { %1343 = vmatprep.subr.mxu0 %v2455_v2  ;;  %1564 = vmatprep.subr.mxu1 %v2455_v2  ;;  %453 = vst [vmem:[#allocation2 + $0x189] sm:$0xff] %v377_v36  ;;  %v3184_v36 = vld [vmem:[#allocation2 + $0xa8] sm:$0xff] }
  0x58   : > { %1344 = vmatpush1.msra.mxu0 %v819_v34  ;;  %1565 = vmatpush1.msra.mxu1 %v853_v26  ;;  %v812_v34 = vld [vmem:[%s4018_s3 + $0x228] sm:$0xff] }
  0x59   : > { %967 = vmatmul.mubr.f32.gmra.mxu0 %v551_v37  ;;  %1192 = vmatmul.mubr.f32.gmra.mxu1 %v521_v43  ;;  %v817_v37 = vld [vmem:[%s4018_s3 + $0x250] sm:$0xff]  ;;  %v3165_v26 = vld [vmem:[#allocation2 + $0x8] sm:$0xff] }
  0x5a   : > { %971 = vmatprep.mubr.f32.mxu0 %v348_v59  ;;  %1196 = vmatprep.mubr.f32.mxu1 %v554_v27  ;;  %v523_v59 = vld [vmem:[#allocation2 + $0x3a] sm:$0xff]  ;;  %v3181_v43 = vld [vmem:[#allocation2 + $0x82] sm:$0xff] }
  0x5b   : > { %1345 = vmatprep.subr.mxu0 %v2455_v2  ;;  %1566 = vmatprep.subr.mxu1 %v2455_v2 }
  0x5c   : > { %1346 = vmatpush1.msra.mxu0 %v818_v6  ;;  %1567 = vmatpush1.msra.mxu1 %v852_v44  ;;  %v3200_v6 = vld [vmem:[#allocation2 + $0xb0] sm:$0xff]  ;;  %v3213_v44 = vld [vmem:[#allocation2 + $0x9a] sm:$0xff] }
  0x5d   : > { %972 = vmatmul.mubr.f32.gmra.mxu0 %v552_v50  ;;  %1197 = vmatmul.mubr.f32.gmra.mxu1 %v522_v54  ;;  %v557_v50 = vld [vmem:[#allocation2 + $0x68] sm:$0xff]  ;;  %v3216_v54 = vld [vmem:[#allocation2 + $0xc0] sm:$0xff] }
  0x5e   : > { %976 = vmatprep.mubr.f32.mxu0 %v349_v60  ;;  %1201 = vmatprep.mubr.f32.mxu1 %v555_v21  ;;  %v524_v60 = vld [vmem:[#allocation2 + $0x4a] sm:$0xff] }
  0x5f   : > { %1347 = vmatprep.subr.mxu0 %v2455_v2  ;;  %1568 = vmatprep.subr.mxu1 %v2455_v2 }
  0x60   : > { %1348 = vmatpush1.msra.mxu0 %v817_v37  ;;  %1569 = vmatpush1.msra.mxu1 %v851_v48  ;;  %v3233_v37 = vld [vmem:[#allocation2 + $0xc8] sm:$0xff]  ;;  %v3247_v48 = vld [vmem:[#allocation2 + $0xb2] sm:$0xff] }
  0x61   : > { %977 = vmatmul.mubr.f32.gmra.mxu0 %v553_v29  ;;  %1202 = vmatmul.mubr.f32.gmra.mxu1 %v523_v59  ;;  %v815_v29 = vld [vmem:[%s4018_s3 + $0x240] sm:$0xff]  ;;  %v3250_v59 = vld [vmem:[#allocation2 + $0xd8] sm:$0xff] }
  0x62   : > { %981 = vmatprep.mubr.f32.mxu0 %v350_v3  ;;  %1206 = vmatprep.mubr.f32.mxu1 %v556_v1  ;;  %v525_v3 = vld [vmem:[#allocation2 + $0x52] sm:$0xff] }
  0x63   : > { %1349 = vmatprep.subr.mxu0 %v2455_v2  ;;  %1570 = vmatprep.subr.mxu1 %v2455_v2 }
  0x64   : > { %1350 = vmatpush1.msra.mxu0 %v816_v47  ;;  %1571 = vmatpush1.msra.mxu1 %v850_v49  ;;  %v3267_v47 = vld [vmem:[#allocation2 + $0xe0] sm:$0xff]  ;;  %v3281_v49 = vld [vmem:[#allocation2 + $0xca] sm:$0xff] }
  0x65   : > { %982 = vmatmul.mubr.f32.gmra.mxu0 %v554_v27  ;;  %1207 = vmatmul.mubr.f32.gmra.mxu1 %v524_v60  ;;  %v3197_v27 = vld [vmem:[#allocation2 + $0x92] sm:$0xff] }
  0x66   : > { %986 = vmatprep.mubr.f32.mxu0 %v351_v8  ;;  %1211 = vmatprep.mubr.f32.mxu1 %v557_v50  ;;  %v526_v8 = vld [vmem:[#allocation2 + $0x62] sm:$0xff]  ;;  %v3284_v60 = vld [vmem:[#allocation2 + $0xf0] sm:$0xff] }
  0x67   : > { %1351 = vmatprep.subr.mxu0 %v2455_v2  ;;  %1572 = vmatprep.subr.mxu1 %v2455_v2 }
  0x68   : > { %1352 = vmatpush1.msra.mxu0 %v815_v29  ;;  %1573 = vmatpush1.msra.mxu1 %v849_v55  ;;  %v3301_v29 = vld [vmem:[#allocation2 + $0xf8] sm:$0xff]  ;;  %v4033_v55 = vmax.f32 %v2889_v12, 0.0 }
  0x69   : > { %987 = vmatmul.mubr.f32.gmra.mxu0 %v555_v21  ;;  %1212 = vmatmul.mubr.f32.gmra.mxu1 %v525_v3  ;;  %v3230_v21 = vld [vmem:[#allocation2 + $0xaa] sm:$0xff]  ;;  %v3315_v3 = vld [vmem:[#allocation2 + $0xe2] sm:$0xff]  ;;  %v834_v12 = vld [vmem:[%s4018_s3 + $0x2d8] sm:$0xff] }
  0x6a   : > { %991 = vmatprep.mubr.f32.mxu0 %v352_v14  ;;  %1216 = vmatprep.mubr.f32.mxu1 %v558_v22  ;;  %v527_v14 = vld [vmem:[#allocation2 + $0x6a] sm:$0xff] }
  0x6b   : > { %1353 = vmatprep.subr.mxu0 %v2455_v2  ;;  %1574 = vmatprep.subr.mxu1 %v2455_v2 }
  0x6c   : > { %1354 = vmatpush1.msra.mxu0 %v814_v23  ;;  %1575 = vmatpush1.msra.mxu1 %v848_v61  ;;  %v868_v23 = vld [vmem:[%s4018_s3 + $0x3e8] sm:$0xff]  ;;  %v4034_v61 = vmax.f32 %v2914_v30, 0.0  ;;  %v833_v30 = vld [vmem:[%s4018_s3 + $0x2d0] sm:$0xff] }
  0x6d   : > { %992 = vmatmul.mubr.f32.gmra.mxu0 %v556_v1  ;;  %1217 = vmatmul.mubr.f32.gmra.mxu1 %v526_v8  ;;  %v3264_v1 = vld [vmem:[#allocation2 + $0xc2] sm:$0xff]  ;;  %v3332_v8 = vld [vmem:[#allocation2 + $0xf2] sm:$0xff] }
  0x6e   : > { %996 = vmatprep.mubr.f32.mxu0 %v353_v15  ;;  %1221 = vmatprep.mubr.f32.mxu1 %v559_v35  ;;  %v3163_v15 = vld [vmem:[#allocation2 + $0x7a] sm:$0xff] }
  0x6f   : > { %1355 = vmatprep.subr.mxu0 %v2455_v2  ;;  %1576 = vmatprep.subr.mxu1 %v2455_v2  ;;  %v3168_v2 = vld [vmem:[#allocation2 + $0x98] sm:$0xff] }
  0x70   : > { %1356 = vmatpush1.msra.mxu0 %v813_v58  ;;  %1577 = vmatpush1.msra.mxu1 %v847_v4  ;;  %v867_v58 = vld [vmem:[%s4018_s3 + $0x3e0] sm:$0xff]  ;;  %v4035_v4 = vmax.f32 %v2927_v40, 0.0  ;;  %v832_v40 = vld [vmem:[%s4018_s3 + $0x2c8] sm:$0xff] }
  0x71   : > { %997 = vmatmul.mubr.f32.gmra.mxu0 %v557_v50  ;;  %1222 = vmatmul.mubr.f32.gmra.mxu1 %v527_v14  ;;  %v3298_v50 = vld [vmem:[#allocation2 + $0xda] sm:$0xff] }
  0x72   : > { %1001 = vmatprep.mubr.f32.mxu0 %v354_v19  ;;  %1226 = vmatprep.mubr.f32.mxu1 %v560_v46  ;;  %v845_v19 = vld [vmem:[%s4018_s3 + $0x330] sm:$0xff]  ;;  %v3349_v14 = vld [vmem:[#allocation2 + $0xfa] sm:$0xff] }
  0x73   : > { %1357 = vmatprep.subr.mxu0 %v3165_v26  ;;  %1578 = vmatprep.subr.mxu1 %v3165_v26 }
  0x74   : > { %1358 = vmatpush1.msra.mxu0 %v812_v34  ;;  %1579 = vmatpush1.msra.mxu1 %v846_v5  ;;  %v866_v34 = vld [vmem:[%s4018_s3 + $0x3d8] sm:$0xff]  ;;  %v4036_v5 = vmax.f32 %v2954_v10, 0.0  ;;  %v831_v10 = vld [vmem:[%s4018_s3 + $0x2c0] sm:$0xff] }
  0x75   : > { %1002 = vmatmul.mubr.f32.gmra.mxu0 %v558_v22  ;;  %1227 = vmatmul.mubr.f32.gmra.mxu1 %v3163_v15  ;;  %v3318_v22 = vld [vmem:[#allocation2 + $0x108] sm:$0xff] }
  0x76   : > { %1006 = vmatprep.mubr.f32.mxu0 %v355_v25  ;;  %1231 = vmatprep.mubr.f32.mxu1 %v3168_v2  ;;  %v844_v25 = vld [vmem:[%s4018_s3 + $0x328] sm:$0xff] }
  0x77   : > { %1359 = vmatprep.subr.mxu0 %v3165_v26  ;;  %1580 = vmatprep.subr.mxu1 %v3165_v26 }
  0x78   : > { %1360 = vmatpush1.msra.mxu0 %v811_v9  ;;  %1581 = vmatpush1.msra.mxu1 %v845_v19  ;;  %v3366_v9 = vld [vmem:[#allocation2 + $0x10a] sm:$0xff] }
  0x79   : > { %1007 = vmatmul.mubr.f32.gmra.mxu0 %v559_v35  ;;  %1232 = vmatmul.mubr.f32.gmra.mxu1 %v3181_v43  ;;  %v3335_v35 = vld [vmem:[#allocation2 + $0x110] sm:$0xff]  ;;  %v3369_v19 = vld [vmem:[#allocation2 + $0x128] sm:$0xff] }
  0x7a   : > { %1011 = vmatprep.mubr.f32.mxu0 %v356_v31  ;;  %1236 = vmatprep.mubr.f32.mxu1 %v3184_v36  ;;  %v843_v31 = vld [vmem:[%s4018_s3 + $0x320] sm:$0xff] }
  0x7b   : > { %1361 = vmatprep.subr.mxu0 %v3165_v26  ;;  %1582 = vmatprep.subr.mxu1 %v3165_v26 }
  0x7c   : > { %1362 = vmatpush1.msra.mxu0 %v810_v16  ;;  %1583 = vmatpush1.msra.mxu1 %v844_v25  ;;  %v865_v16 = vld [vmem:[%s4018_s3 + $0x3d0] sm:$0xff]  ;;  %v4037_v25 = vmax.f32 %v2961_v17, 0.0  ;;  %v830_v17 = vld [vmem:[%s4018_s3 + $0x2b8] sm:$0xff] }
  0x7d   : > { %1012 = vmatmul.mubr.f32.gmra.mxu0 %v560_v46  ;;  %1237 = vmatmul.mubr.f32.gmra.mxu1 %v3197_v27  ;;  %v3352_v46 = vld [vmem:[#allocation2 + $0x120] sm:$0xff] }
  0x7e   : > { %1016 = vmatprep.mubr.f32.mxu0 %v357_v38  ;;  %1241 = vmatprep.mubr.f32.mxu1 %v3200_v6  ;;  %v842_v38 = vld [vmem:[%s4018_s3 + $0x318] sm:$0xff] }
  0x7f   : > { %1363 = vmatprep.subr.mxu0 %v3165_v26  ;;  %1584 = vmatprep.subr.mxu1 %v3165_v26 }
  0x80   : > { %1364 = vmatpush1.msra.mxu0 %v809_v20  ;;  %1585 = vmatpush1.msra.mxu1 %v843_v31  ;;  %v3383_v20 = vld [vmem:[#allocation2 + $0x112] sm:$0xff] }
  0x81   : > { %1017 = vmatmul.mubr.f32.gmra.mxu0 %v3168_v2  ;;  %1242 = vmatmul.mubr.f32.gmra.mxu1 %v3213_v44  ;;  %v3386_v31 = vld [vmem:[#allocation2 + $0x138] sm:$0xff] }
  0x82   : > { %1021 = vmatprep.mubr.f32.mxu0 %v358_v42  ;;  %1246 = vmatprep.mubr.f32.mxu1 %v3216_v54  ;;  %v841_v42 = vld [vmem:[%s4018_s3 + $0x310] sm:$0xff] }
  0x83   : > { %1365 = vmatprep.subr.mxu0 %v3165_v26  ;;  %1586 = vmatprep.subr.mxu1 %v3165_v26 }
  0x84   : > { %1366 = vmatpush1.msra.mxu0 %v808_v28  ;;  %1587 = vmatpush1.msra.mxu1 %v842_v38  ;;  %v864_v28 = vld [vmem:[%s4018_s3 + $0x3c8] sm:$0xff]  ;;  %v4038_v38 = vmax.f32 %v2975_v33, 0.0  ;;  %v829_v33 = vld [vmem:[%s4018_s3 + $0x2b0] sm:$0xff] }
  0x85   : > { %1022 = vmatmul.mubr.f32.gmra.mxu0 %v3184_v36  ;;  %1247 = vmatmul.mubr.f32.gmra.mxu1 %v3230_v21 }
  0x86   : > { %1026 = vmatprep.mubr.f32.mxu0 %v359_v51  ;;  %1251 = vmatprep.mubr.f32.mxu1 %v3233_v37  ;;  %v840_v51 = vld [vmem:[%s4018_s3 + $0x308] sm:$0xff] }
  0x87   : > { %1367 = vmatprep.subr.mxu0 %v3165_v26  ;;  %1588 = vmatprep.subr.mxu1 %v3165_v26 }
  0x88   : > { %1368 = vmatpush1.msra.mxu0 %v807_v32  ;;  %1589 = vmatpush1.msra.mxu1 %v841_v42  ;;  %v3400_v32 = vld [vmem:[#allocation2 + $0x122] sm:$0xff] }
  0x89   : > { %1027 = vmatmul.mubr.f32.gmra.mxu0 %v3200_v6  ;;  %1252 = vmatmul.mubr.f32.gmra.mxu1 %v3247_v48  ;;  %v3403_v42 = vld [vmem:[#allocation2 + $0x140] sm:$0xff] }
  0x8a   : > { %1031 = vmatprep.mubr.f32.mxu0 %v360_v53  ;;  %1256 = vmatprep.mubr.f32.mxu1 %v3250_v59  ;;  %v839_v53 = vld [vmem:[%s4018_s3 + $0x300] sm:$0xff] }
  0x8b   : > { %1369 = vmatprep.subr.mxu0 %v3165_v26  ;;  %1590 = vmatprep.subr.mxu1 %v3165_v26 }
  0x8c   : > { %1370 = vmatpush2.msra.mxu0 %v838_v39  ;;  %1591 = vmatpush1.msra.mxu1 %v840_v51  ;;  %v863_v39 = vld [vmem:[%s4018_s3 + $0x3c0] sm:$0xff]  ;;  %v4039_v51 = vmax.f32 %v2980_v41, 0.0  ;;  %v828_v41 = vld [vmem:[%s4018_s3 + $0x2a8] sm:$0xff] }
  0x8d   : > { %1032 = vmatmul.mubr.f32.gmra.mxu0 %v3216_v54  ;;  %1257 = vmatmul.mubr.f32.gmra.mxu1 %v3264_v1 }
  0x8e   : > { %1036 = vmatprep.mubr.f32.mxu0 %v361_v62  ;;  %1261 = vmatprep.mubr.f32.mxu1 %v3267_v47  ;;  %v870_v62 = vld [vmem:[%s4018_s3 + $0x3f8] sm:$0xff] }
  0x8f   : > { %1371 = vmatprep.subr.mxu0 %v3165_v26  ;;  %1592 = vmatprep.subr.mxu1 %v3165_v26 }
  0x90   : > { %1372 = vmatpush2.msra.mxu0 %v837_v45  ;;  %1593 = vmatpush1.msra.mxu1 %v839_v53  ;;  %v3417_v45 = vld [vmem:[#allocation2 + $0x12a] sm:$0xff] }
  0x91   : > { %1037 = vmatmul.mubr.f32.gmra.mxu0 %v3233_v37  ;;  %1262 = vmatmul.mubr.f32.gmra.mxu1 %v3281_v49  ;;  %v3420_v53 = vld [vmem:[#allocation2 + $0x150] sm:$0xff] }
  0x92   : > { %1041 = vmatprep.mubr.f32.mxu0 %v362_v63  ;;  %1266 = vmatprep.mubr.f32.mxu1 %v3284_v60  ;;  %v869_v63 = vld [vmem:[%s4018_s3 + $0x3f0] sm:$0xff] }
  0x93   : > { %1373 = vmatprep.subr.mxu0 %v3165_v26  ;;  %1594 = vmatprep.subr.mxu1 %v3165_v26 }
  0x94   : > { %1374 = vmatpush2.msra.mxu0 %v836_v52  ;;  %1595 = vmatpush2.msra.mxu1 %v870_v62  ;;  %v862_v52 = vld [vmem:[%s4018_s3 + $0x3b8] sm:$0xff]  ;;  %v4040_v62 = vmax.f32 %v2995_v0, 0.0  ;;  %v827_v0 = vld [vmem:[%s4018_s3 + $0x2a0] sm:$0xff] }
  0x95   : > { %1042 = vmatmul.mubr.f32.gmra.mxu0 %v3250_v59  ;;  %1267 = vmatmul.mubr.f32.gmra.mxu1 %v3298_v50 }
  0x96   : > { %1046 = vmatprep.mubr.f32.mxu0 %v4033_v55  ;;  %1271 = vmatprep.mubr.f32.mxu1 %v3301_v29  ;;  %v861_v55 = vld [vmem:[%s4018_s3 + $0x3b0] sm:$0xff] }
  0x97   : > { %1375 = vmatprep.subr.mxu0 %v3165_v26  ;;  %1596 = vmatprep.subr.mxu1 %v3165_v26 }
  0x98   : > { %1376 = vmatpush2.msra.mxu0 %v835_v56  ;;  %1597 = vmatpush2.msra.mxu1 %v869_v63  ;;  %v3434_v56 = vld [vmem:[#allocation2 + $0x13a] sm:$0xff] }
  0x99   : > { %1047 = vmatmul.mubr.f32.gmra.mxu0 %v3267_v47  ;;  %1272 = vmatmul.mubr.f32.gmra.mxu1 %v3315_v3  ;;  %v3437_v63 = vld [vmem:[#allocation2 + $0x158] sm:$0xff] }
  0x9a   : > { %1051 = vmatprep.mubr.f32.mxu0 %v4034_v61  ;;  %1276 = vmatprep.mubr.f32.mxu1 %v3318_v22  ;;  %v3454_v61 = vld [vmem:[#allocation2 + $0x168] sm:$0xff] }
  0x9b   : > { %1377 = vmatprep.subr.mxu0 %v3165_v26  ;;  %1598 = vmatprep.subr.mxu1 %v3165_v26 }
  0x9c   : > { %1378 = vmatpush2.msra.mxu0 %v834_v12  ;;  %1599 = vmatpush2.msra.mxu1 %v868_v23  ;;  %v4041_v12 = vmax.f32 %v3013_v24, 0.0  ;;  %v3451_v23 = vld [vmem:[#allocation2 + $0x142] sm:$0xff]  ;;  %v826_v24 = vld [vmem:[%s4018_s3 + $0x298] sm:$0xff] }
  0x9d   : > { %1052 = vmatmul.mubr.f32.gmra.mxu0 %v3284_v60  ;;  %1277 = vmatmul.mubr.f32.gmra.mxu1 %v3332_v8 }
  0x9e   : > { %1056 = vmatprep.mubr.f32.mxu0 %v4035_v4  ;;  %1281 = vmatprep.mubr.f32.mxu1 %v3335_v35  ;;  %v3468_v4 = vld [vmem:[#allocation2 + $0x152] sm:$0xff] }
  0x9f   : > { %1379 = vmatprep.subr.mxu0 %v3165_v26  ;;  %1600 = vmatprep.subr.mxu1 %v3165_v26 }
  0xa0   : > { %1380 = vmatpush2.msra.mxu0 %v833_v30  ;;  %1601 = vmatpush2.msra.mxu1 %v867_v58  ;;  %v860_v30 = vld [vmem:[%s4018_s3 + $0x3a8] sm:$0xff]  ;;  %v4042_v58 = vmax.f32 %v3024_v57, 0.0  ;;  %v825_v57 = vld [vmem:[%s4018_s3 + $0x290] sm:$0xff] }
  0xa1   : > { %1057 = vmatmul.mubr.f32.gmra.mxu0 %v3301_v29  ;;  %1282 = vmatmul.mubr.f32.gmra.mxu1 %v3349_v14 }
  0xa2   : > { %1061 = vmatprep.mubr.f32.mxu0 %v4036_v5  ;;  %1286 = vmatprep.mubr.f32.mxu1 %v3352_v46  ;;  %v4043_v5 = vmax.f32 %v3033_v13, 0.0  ;;  %v824_v13 = vld [vmem:[%s4018_s3 + $0x288] sm:$0xff] }
  0xa3   : > { %1381 = vmatprep.subr.mxu0 %v3165_v26  ;;  %1602 = vmatprep.subr.mxu1 %v3165_v26 }
  0xa4   : > { %1382 = vmatpush2.msra.mxu0 %v832_v40  ;;  %1603 = vmatpush2.msra.mxu1 %v866_v34  ;;  %v3471_v40 = vld [vmem:[#allocation2 + $0x170] sm:$0xff]  ;;  %v859_v34 = vld [vmem:[%s4018_s3 + $0x3a0] sm:$0xff] }
  0xa5   : > { %1062 = vmatmul.mubr.f32.gmra.mxu0 %v3318_v22  ;;  %1287 = vmatmul.mubr.f32.gmra.mxu1 %v3366_v9 }
  0xa6   : > { %1066 = vmatprep.mubr.f32.mxu0 %v4037_v25  ;;  %1291 = vmatprep.mubr.f32.mxu1 %v3369_v19  ;;  %v858_v25 = vld [vmem:[%s4018_s3 + $0x398] sm:$0xff] }
  0xa7   : > { %1383 = vmatprep.subr.mxu0 %v3165_v26  ;;  %1604 = vmatprep.subr.mxu1 %v3165_v26 }
  0xa8   : > { %1384 = vmatpush2.msra.mxu0 %v831_v10  ;;  %1605 = vmatpush2.msra.mxu1 %v865_v16  ;;  %v3485_v10 = vld [vmem:[#allocation2 + $0x15a] sm:$0xff] }
  0xa9   : > { %1067 = vmatmul.mubr.f32.gmra.mxu0 %v3335_v35  ;;  %1292 = vmatmul.mubr.f32.gmra.mxu1 %v3383_v20  ;;  %v3489_v16 = vld [vmem:[#allocation2 + $0x180] sm:$0xff] }
  0xaa   : > { %1071 = vmatprep.mubr.f32.mxu0 %v4038_v38  ;;  %1296 = vmatprep.mubr.f32.mxu1 %v3386_v31  ;;  %v3506_v38 = vld [vmem:[#allocation2 + $0x188] sm:$0xff] }
  0xab   : > { %1385 = vmatprep.subr.mxu0 %v3165_v26  ;;  %1606 = vmatprep.subr.mxu1 %v3165_v26 }
  0xac   : > { %1386 = vmatpush2.msra.mxu0 %v830_v17  ;;  %1607 = vmatpush2.msra.mxu1 %v864_v28  ;;  %v4044_v17 = vmax.f32 %v3046_v18, 0.0  ;;  %v3502_v28 = vld [vmem:[#allocation2 + $0x16a] sm:$0xff]  ;;  %v3516_v18 = vld [vmem:[#allocation2 + $0x172] sm:$0xff] }
  0xad   : > { %1072 = vmatmul.mubr.f32.gmra.mxu0 %v3352_v46  ;;  %1297 = vmatmul.mubr.f32.gmra.mxu1 %v3400_v32 }
  0xae   : > { %1076 = vmatprep.mubr.f32.mxu0 %v4039_v51  ;;  %1301 = vmatprep.mubr.f32.mxu1 %v3403_v42  ;;  %v856_v51 = vld [vmem:[%s4018_s3 + $0x388] sm:$0xff] }
  0xaf   : > { %1387 = vmatprep.subr.mxu0 %v3165_v26  ;;  %1608 = vmatprep.subr.mxu1 %v3165_v26 }
  0xb0   : > { %1388 = vmatpush2.msra.mxu0 %v829_v33  ;;  %1609 = vmatpush2.msra.mxu1 %v863_v39  ;;  %v857_v33 = vld [vmem:[%s4018_s3 + $0x390] sm:$0xff]  ;;  %v823_v39 = vld [vmem:[%s4018_s3 + $0x280] sm:$0xff] }
  0xb1   : > { %1077 = vmatmul.mubr.f32.gmra.mxu0 %v3369_v19  ;;  %1302 = vmatmul.mubr.f32.gmra.mxu1 %v3417_v45 }
  0xb2   : > { %1081 = vmatprep.mubr.f32.mxu0 %v4040_v62  ;;  %1306 = vmatprep.mubr.f32.mxu1 %v3420_v53  ;;  %v647_v62 = vld [vmem:[#allocation2 + $0x30] sm:$0xff] }
  0xb3   : > { %1389 = vmatprep.subr.mxu0 %v3165_v26  ;;  %1610 = vmatprep.subr.mxu1 %v3165_v26 }
  0xb4   : > { %1390 = vmatpush2.msra.mxu0 %v828_v41  ;;  %1611 = vmatpush2.msra.mxu1 %v862_v52  ;;  %v614_v41 = vld [vmem:[#allocation2 + $0x1a] sm:$0xff] }
  0xb5   : > { %1082 = vmatmul.mubr.f32.gmra.mxu0 %v3386_v31  ;;  %1307 = vmatmul.mubr.f32.gmra.mxu1 %v3434_v56  ;;  %v582_v52 = vld [vmem:[#allocation2 + $0x19] sm:$0xff] }
  0xb6   : > { %1086 = vmatprep.mubr.f32.mxu0 %v4041_v12  ;;  %1311 = vmatprep.mubr.f32.mxu1 %v3437_v63  ;;  %v680_v12 = vld [vmem:[#allocation2 + $0x39] sm:$0xff] }
  0xb7   : > { %1391 = vmatprep.subr.mxu0 %v3165_v26  ;;  %1612 = vmatprep.subr.mxu1 %v3165_v26 }
  0xb8   : > { %1392 = vmatpush2.msra.mxu0 %v827_v0  ;;  %1613 = vmatpush2.msra.mxu1 %v861_v55  ;;  %v886_v0 = vld [vmem:[%s4018_s3 + $0x478] sm:$0xff]  ;;  %v615_v55 = vld [vmem:[#allocation2 + $0x22] sm:$0xff] }
  0xb9   : > { %1087 = vmatmul.mubr.f32.gmra.mxu0 %v3403_v42  ;;  %1312 = vmatmul.mubr.f32.gmra.mxu1 %v3451_v23 }
  0xba   : > { %1091 = vmatprep.mubr.f32.mxu0 %v4042_v58  ;;  %1316 = vmatprep.mubr.f32.mxu1 %v3454_v61  ;;  %v648_v58 = vld [vmem:[#allocation2 + $0x38] sm:$0xff] }
  0xbb   : > { %1393 = vmatprep.subr.mxu0 %v3165_v26  ;;  %1614 = vmatprep.subr.mxu1 %v3165_v26 }
  0xbc   : > { %1394 = vmatpush2.msra.mxu0 %v826_v24  ;;  %1615 = vmatpush2.msra.mxu1 %v860_v30  ;;  %v885_v24 = vld [vmem:[%s4018_s3 + $0x470] sm:$0xff]  ;;  %v583_v30 = vld [vmem:[#allocation2 + $0x21] sm:$0xff] }
  0xbd   : > { %1092 = vmatmul.mubr.f32.gmra.mxu0 %v3420_v53  ;;  %1317 = vmatmul.mubr.f32.gmra.mxu1 %v3468_v4 }
  0xbe   : > { %1096 = vmatprep.mubr.f32.mxu0 %v4043_v5  ;;  %1321 = vmatprep.mubr.f32.mxu1 %v3471_v40  ;;  %v649_v5 = vld [vmem:[#allocation2 + $0x48] sm:$0xff] }
  0xbf   : > { %1395 = vmatprep.subr.mxu0 %v3165_v26  ;;  %1616 = vmatprep.subr.mxu1 %v3165_v26 }
  0xc0   : > { %1396 = vmatpush2.msra.mxu0 %v825_v57  ;;  %1617 = vmatpush2.msra.mxu1 %v859_v34  ;;  %v681_v57 = vld [vmem:[#allocation2 + $0x49] sm:$0xff] }
  0xc1   : > { %1097 = vmatmul.mubr.f32.gmra.mxu0 %v3437_v63  ;;  %1322 = vmatmul.mubr.f32.gmra.mxu1 %v3485_v10  ;;  %v884_v34 = vld [vmem:[%s4018_s3 + $0x468] sm:$0xff] }
  0xc2   : > { %1101 = vmatprep.mubr.f32.mxu0 %v4044_v17  ;;  %1326 = vmatprep.mubr.f32.mxu1 %v3489_v16  ;;  %v883_v17 = vld [vmem:[%s4018_s3 + $0x460] sm:$0xff] }
  0xc3   : > { %1397 = vmatprep.subr.mxu0 %v3165_v26  ;;  %1618 = vmatprep.subr.mxu1 %v3165_v26 }
  0xc4   : > { %1398 = vmatpush2.msra.mxu0 %v824_v13  ;;  %1619 = vmatpush2.msra.mxu1 %v858_v25  ;;  %v3545_v13 = vld [vmem:[#allocation2 + $0x3a] sm:$0xff]  ;;  %v682_v25 = vld [vmem:[#allocation2 + $0x51] sm:$0xff] }
  0xc5   : > { %1102 = vmatmul.mubr.f32.gmra.mxu0 %v3454_v61  ;;  %1327 = vmatmul.mubr.f32.gmra.mxu1 %v3502_v28 }
  0xc6   : > { %1620 = vmatprep.subr.mxu1 %v3165_v26  ;;  %1106 = vmatprep.mubr.f32.mxu0 %v375_v11  ;;  %v679_v11 = vld [vmem:[#allocation2 + $0x31] sm:$0xff] }
  0xc7   : > { %1331 = vmatprep.mubr.f32.mxu1 %v3506_v38  ;;  %1621 = vmatpush2.msra.mxu1 %v857_v33  ;;  %v650_v33 = vld [vmem:[#allocation2 + $0x50] sm:$0xff] }
  0xc8   : > { %1399 = vmatprep.subr.mxu0 %v3165_v26  ;;  %1622 = vmatprep.subr.mxu1 %v3165_v26 }
  0xc9   : > { %1107 = vmatmul.mubr.f32.gmra.mxu0 %v3471_v40  ;;  %1332 = vmatmul.mubr.f32.gmra.mxu1 %v3516_v18 }
  0xca   : > { %1400 = vmatpush2.msra.mxu0 %v823_v39  ;;  %1623 = vmatpush2.msra.mxu1 %v856_v51  ;;  %v3551_v39 = vld [vmem:[#allocation2 + $0x4a] sm:$0xff]  ;;  %v683_v51 = vld [vmem:[#allocation2 + $0x61] sm:$0xff] }
  0xcb   : > { %1624 = vmatprep.subr.mxu1 %v3165_v26  ;;  %1401 = vmatprep.mubr.f32.mxu0 %v614_v41  ;;  %v3539_v26 = vld [vmem:[#allocation2 + $0x32] sm:$0xff] }
  0xcc   : > { %1625 = vmatpush2.msra.mxu1 %v855_v7  ;;  %1626 = vmatprep.mubr.f32.mxu1 %v679_v11  ;;  %v882_v41 = vld [vmem:[%s4018_s3 + $0x458] sm:$0xff]  ;;  %v651_v7 = vld [vmem:[#allocation2 + $0x60] sm:$0xff] }
  0xcd   : > { %1402 = vmatmul.mubr.f32.vlgmr.msra.gmra.mxu0 %v582_v52  ;;  %1627 = vmatmul.mubr.f32.vlgmr.msra.gmra.mxu1 %v647_v62  ;;  %v684_v52 = vld [vmem:[#allocation2 + $0x69] sm:$0xff] }
  0xce   : > { %2303 = vmatprep.subr.mxu0 %v886_v0  ;;  %1406 = vmatprep.mubr.f32.mxu0 %v615_v55  ;;  %v881_v62 = vld [vmem:[%s4018_s3 + $0x450] sm:$0xff]  ;;  %v3563_v55 = vld [vmem:[#allocation2 + $0x62] sm:$0xff] }
  0xcf   : > { %2304 = vmatpush3.msra.mxu0 %v886_v0  ;;  %1631 = vmatprep.mubr.f32.mxu1 %v680_v12 }
  0xd0   : > { %2305 = vmatprep.subr.mxu0 %v885_v24  ;;  %2383 = vmatprep.subr.mxu1 %v886_v0 }
  0xd1   : > { %1407 = vmatmul.mubr.f32.gmra.mxu0 %v583_v30  ;;  %1632 = vmatmul.mubr.f32.gmra.mxu1 %v648_v58  ;;  %v653_v30 = vld [vmem:[#allocation2 + $0x78] sm:$0xff]  ;;  %v3569_v58 = vld [vmem:[#allocation2 + $0x6a] sm:$0xff] }
  0xd2   : > { %1411 = vmatprep.mubr.f32.mxu0 %v3539_v26  ;;  %1636 = vmatprep.mubr.f32.mxu1 %v681_v57 }
  0xd3   : > { %2306 = vmatpush3.msra.mxu0 %v885_v24  ;;  %2399 = vmatpush3.msra.mxu1 %v886_v0  ;;  %v652_v0 = vld [vmem:[#allocation2 + $0x68] sm:$0xff] }
  0xd4   : > { %2307 = vmatprep.subr.mxu0 %v884_v34  ;;  %2384 = vmatprep.subr.mxu1 %v885_v24 }
  0xd5   : > { %1412 = vmatmul.mubr.f32.gmra.mxu0 %v679_v11  ;;  %1637 = vmatmul.mubr.f32.gmra.mxu1 %v649_v5  ;;  %v3557_v11 = vld [vmem:[#allocation2 + $0x52] sm:$0xff]  ;;  %v654_v5 = vld [vmem:[#allocation2 + $0x80] sm:$0xff] }
  0xd6   : > { %1416 = vmatprep.mubr.f32.mxu0 %v3545_v13  ;;  %1641 = vmatprep.mubr.f32.mxu1 %v682_v25 }
  0xd7   : > { %2308 = vmatpush3.msra.mxu0 %v884_v34  ;;  %2400 = vmatpush3.msra.mxu1 %v885_v24  ;;  %v880_v24 = vld [vmem:[%s4018_s3 + $0x448] sm:$0xff] }
  0xd8   : > { %2309 = vmatprep.subr.mxu0 %v883_v17  ;;  %2385 = vmatprep.subr.mxu1 %v884_v34 }
  0xd9   : > { %1417 = vmatmul.mubr.f32.gmra.mxu0 %v680_v12  ;;  %1642 = vmatmul.mubr.f32.gmra.mxu1 %v650_v33  ;;  %v685_v12 = vld [vmem:[#allocation2 + $0x79] sm:$0xff]  ;;  %v655_v33 = vld [vmem:[#allocation2 + $0x90] sm:$0xff] }
  0xda   : > { %1421 = vmatprep.mubr.f32.mxu0 %v3551_v39  ;;  %1646 = vmatprep.mubr.f32.mxu1 %v683_v51 }
  0xdb   : > { %2310 = vmatpush3.msra.mxu0 %v883_v17  ;;  %2401 = vmatpush3.msra.mxu1 %v884_v34  ;;  %v879_v34 = vld [vmem:[%s4018_s3 + $0x440] sm:$0xff] }
  0xdc   : > { %2311 = vmatprep.subr.mxu0 %v882_v41  ;;  %2386 = vmatprep.subr.mxu1 %v883_v17 }
  0xdd   : > { %1422 = vmatmul.mubr.f32.gmra.mxu0 %v681_v57  ;;  %1647 = vmatmul.mubr.f32.gmra.mxu1 %v651_v7  ;;  %v686_v57 = vld [vmem:[#allocation2 + $0x81] sm:$0xff]  ;;  %v2426_v7 = vld [vmem:[#allocation2 + $0xa9] sm:$0xff] }
  0xde   : > { %1426 = vmatprep.mubr.f32.mxu0 %v3557_v11  ;;  %1651 = vmatprep.mubr.f32.mxu1 %v684_v52 }
  0xdf   : > { %2312 = vmatpush3.msra.mxu0 %v882_v41  ;;  %2402 = vmatpush3.msra.mxu1 %v883_v17  ;;  %v878_v17 = vld [vmem:[%s4018_s3 + $0x438] sm:$0xff] }
  0xe0   : > { %2313 = vmatprep.subr.mxu0 %v881_v62  ;;  %2387 = vmatprep.subr.mxu1 %v882_v41 }
  0xe1   : > { %1427 = vmatmul.mubr.f32.gmra.mxu0 %v682_v25  ;;  %1652 = vmatmul.mubr.f32.gmra.mxu1 %v652_v0  ;;  %v687_v25 = vld [vmem:[#allocation2 + $0x91] sm:$0xff] }
  0xe2   : > { %1431 = vmatprep.mubr.f32.mxu0 %v3563_v55  ;;  %1656 = vmatprep.mubr.f32.mxu1 %v685_v12  ;;  %v595_v0 = vld [vmem:[#allocation2 + $0xb1] sm:$0xff] }
  0xe3   : > { %2314 = vmatpush3.msra.mxu0 %v881_v62  ;;  %2403 = vmatpush3.msra.mxu1 %v882_v41  ;;  %v2425_v41 = vld [vmem:[#allocation2 + $0x99] sm:$0xff] }
  0xe4   : > { %2315 = vmatprep.subr.mxu0 %v880_v24  ;;  %2388 = vmatprep.subr.mxu1 %v881_v62 }
  0xe5   : > { %1432 = vmatmul.mubr.f32.gmra.mxu0 %v683_v51  ;;  %1657 = vmatmul.mubr.f32.gmra.mxu1 %v653_v30  ;;  %v877_v51 = vld [vmem:[%s4018_s3 + $0x430] sm:$0xff] }
  0xe6   : > { %1436 = vmatprep.mubr.f32.mxu0 %v3569_v58  ;;  %1661 = vmatprep.mubr.f32.mxu1 %v686_v57 }
  0xe7   : > { %2316 = vmatpush3.msra.mxu0 %v880_v24  ;;  %2404 = vmatpush3.msra.mxu1 %v881_v62  ;;  %v594_v62 = vld [vmem:[#allocation2 + $0xa9] sm:$0xff] }
  0xe8   : > { %2317 = vmatprep.subr.mxu0 %v879_v34  ;;  %2389 = vmatprep.subr.mxu1 %v880_v24 }
  0xe9   : > { %1437 = vmatmul.mubr.f32.gmra.mxu0 %v684_v52  ;;  %1662 = vmatmul.mubr.f32.gmra.mxu1 %v654_v5  ;;  %v593_v52 = vld [vmem:[#allocation2 + $0x99] sm:$0xff]  ;;  %v2434_v5 = vld [vmem:[#allocation2 + $0x109] sm:$0xff] }
  0xea   : > { %1441 = vmatprep.mubr.f32.mxu0 %v3163_v15  ;;  %1666 = vmatprep.mubr.f32.mxu1 %v687_v25  ;;  %v876_v15 = vld [vmem:[%s4018_s3 + $0x428] sm:$0xff] }
  0xeb   : > { %2318 = vmatpush3.msra.mxu0 %v879_v34  ;;  %2405 = vmatpush3.msra.mxu1 %v880_v24  ;;  %v2433_v24 = vld [vmem:[#allocation2 + $0xf9] sm:$0xff] }
  0xec   : > { %2319 = vmatprep.subr.mxu0 %v878_v17  ;;  %2390 = vmatprep.subr.mxu1 %v879_v34 }
  0xed   : > { %1442 = vmatmul.mubr.f32.gmra.mxu0 %v685_v12  ;;  %1667 = vmatmul.mubr.f32.gmra.mxu1 %v655_v33 }
  0xee   : > { %1446 = vmatprep.mubr.f32.mxu0 %v3181_v43  ;;  %1671 = vmatprep.mubr.f32.mxu1 %v2425_v41  ;;  %v875_v43 = vld [vmem:[%s4018_s3 + $0x420] sm:$0xff] }
  0xef   : > { %2320 = vmatpush3.msra.mxu0 %v878_v17  ;;  %2406 = vmatpush3.msra.mxu1 %v879_v34 }
  0xf0   : > { %2321 = vmatprep.subr.mxu0 %v877_v51  ;;  %2391 = vmatprep.subr.mxu1 %v878_v17 }
  0xf1   : > { %1447 = vmatmul.mubr.f32.gmra.mxu0 %v686_v57  ;;  %1672 = vmatmul.mubr.f32.gmra.mxu1 %v3168_v2  ;;  %v2427_v2 = vld [vmem:[#allocation2 + $0xb1] sm:$0xff] }
  0xf2   : > { %1451 = vmatprep.mubr.f32.mxu0 %v3197_v27  ;;  %1676 = vmatprep.mubr.f32.mxu1 %v2426_v7  ;;  %v2428_v27 = vld [vmem:[#allocation2 + $0xc1] sm:$0xff] }
  0xf3   : > { %2322 = vmatpush3.msra.mxu0 %v877_v51  ;;  %2407 = vmatpush3.msra.mxu1 %v878_v17 }
  0xf4   : > { %2323 = vmatprep.subr.mxu0 %v876_v15  ;;  %2392 = vmatprep.subr.mxu1 %v877_v51 }
  0xf5   : > { %1452 = vmatmul.mubr.f32.gmra.mxu0 %v687_v25  ;;  %1677 = vmatmul.mubr.f32.gmra.mxu1 %v3184_v36  ;;  %v874_v36 = vld [vmem:[%s4018_s3 + $0x418] sm:$0xff] }
  0xf6   : > { %1456 = vmatprep.mubr.f32.mxu0 %v3213_v44  ;;  %1681 = vmatprep.mubr.f32.mxu1 %v2427_v2  ;;  %v2429_v44 = vld [vmem:[#allocation2 + $0xc9] sm:$0xff] }
  0xf7   : > { %2324 = vmatpush3.msra.mxu0 %v876_v15  ;;  %2408 = vmatpush3.msra.mxu1 %v877_v51  ;;  %v2435_v51 = vld [vmem:[#allocation2 + $0x111] sm:$0xff] }
  0xf8   : > { %2325 = vmatprep.subr.mxu0 %v875_v43  ;;  %2393 = vmatprep.subr.mxu1 %v876_v15 }
  0xf9   : > { %1457 = vmatmul.mubr.f32.gmra.mxu0 %v593_v52  ;;  %1682 = vmatmul.mubr.f32.gmra.mxu1 %v3200_v6  ;;  %v873_v6 = vld [vmem:[%s4018_s3 + $0x410] sm:$0xff] }
  0xfa   : > { %1461 = vmatprep.mubr.f32.mxu0 %v3230_v21  ;;  %1686 = vmatprep.mubr.f32.mxu1 %v2428_v27  ;;  %v2430_v21 = vld [vmem:[#allocation2 + $0xd9] sm:$0xff] }
  0xfb   : > { %2326 = vmatpush3.msra.mxu0 %v875_v43  ;;  %2409 = vmatpush3.msra.mxu1 %v876_v15 }
  0xfc   : > { %2327 = vmatprep.subr.mxu0 %v874_v36  ;;  %2394 = vmatprep.subr.mxu1 %v875_v43 }
  0xfd   : > { %1462 = vmatmul.mubr.f32.gmra.mxu0 %v594_v62  ;;  %1687 = vmatmul.mubr.f32.gmra.mxu1 %v3216_v54  ;;  %v872_v54 = vld [vmem:[%s4018_s3 + $0x408] sm:$0xff] }
  0xfe   : > { %1466 = vmatprep.mubr.f32.mxu0 %v3247_v48  ;;  %1691 = vmatprep.mubr.f32.mxu1 %v2429_v44  ;;  %v871_v48 = vld [vmem:[%s4018_s3 + $0x400] sm:$0xff] }
  0xff   : > { %2328 = vmatpush3.msra.mxu0 %v874_v36  ;;  %2410 = vmatpush3.msra.mxu1 %v875_v43  ;;  %v2436_v43 = vld [vmem:[#allocation2 + $0x121] sm:$0xff] }
 0x100   : > { %2329 = vmatprep.subr.mxu0 %v873_v6  ;;  %2395 = vmatprep.subr.mxu1 %v874_v36 }
 0x101   : > { %1467 = vmatmul.mubr.f32.gmra.mxu0 %v595_v0  ;;  %1692 = vmatmul.mubr.f32.gmra.mxu1 %v3233_v37  ;;  %v2431_v37 = vld [vmem:[#allocation2 + $0xe1] sm:$0xff]  ;;  %v2438_v0 = vld [vmem:[#allocation2 + $0x139] sm:$0xff] }
 0x102   : > { %1471 = vmatprep.mubr.f32.mxu0 %v3264_v1  ;;  %1696 = vmatprep.mubr.f32.mxu1 %v2430_v21  ;;  %v2432_v1 = vld [vmem:[#allocation2 + $0xf1] sm:$0xff] }
 0x103   : > { %2330 = vmatpush3.msra.mxu0 %v873_v6  ;;  %2411 = vmatpush3.msra.mxu1 %v874_v36 }
 0x104   : > { %2331 = vmatprep.subr.mxu0 %v872_v54  ;;  %2396 = vmatprep.subr.mxu1 %v873_v6 }
 0x105   : > { %1472 = vmatmul.mubr.f32.gmra.mxu0 %v2428_v27  ;;  %1697 = vmatmul.mubr.f32.gmra.mxu1 %v3250_v59  ;;  %v2437_v27 = vld [vmem:[#allocation2 + $0x129] sm:$0xff] }
 0x106   : > { %1476 = vmatprep.mubr.f32.mxu0 %v3281_v49  ;;  %1701 = vmatprep.mubr.f32.mxu1 %v2431_v37 }
 0x107   : > { %2332 = vmatpush3.msra.mxu0 %v872_v54  ;;  %2412 = vmatpush3.msra.mxu1 %v873_v6 }
 0x108   : > { %2333 = vmatprep.subr.mxu0 %v871_v48  ;;  %2397 = vmatprep.subr.mxu1 %v872_v54 }
 0x109   : > { %1477 = vmatmul.mubr.f32.gmra.mxu0 %v2429_v44  ;;  %1702 = vmatmul.mubr.f32.gmra.mxu1 %v3267_v47 }
 0x10a   : > { %1481 = vmatprep.mubr.f32.mxu0 %v3298_v50  ;;  %1706 = vmatprep.mubr.f32.mxu1 %v2432_v1 }
 0x10b   : > { %2334 = vmatpush3.msra.mxu0 %v871_v48  ;;  %2413 = vmatpush3.msra.mxu1 %v872_v54 }
 0x10c   : > { %2398 = vmatprep.subr.mxu1 %v871_v48 }
 0x10d   : > { %v953_v59 = vpop.f32.mrf.mxu0  ;;  %v1178_v12 = vpop.f32.mrf.mxu1  ;;  %1482 = vmatmul.mubr.f32.gmra.mxu0 %v2430_v21  ;;  %1707 = vmatmul.mubr.f32.gmra.mxu1 %v3284_v60 }
 0x10e   : > { %v3616_v49 = vadd.f32 %v1178_v12, %v953_v59  ;;  %1486 = vmatprep.mubr.f32.mxu0 %v3315_v3  ;;  %1711 = vmatprep.mubr.f32.mxu1 %v2433_v24 }
 0x10f   : > { %v955_v30 = vpop.f32.mrf.mxu0  ;;  %v1180_v47 = vpop.f32.mrf.mxu1  ;;  %2414 = vmatpush3.msra.mxu1 %v871_v48 }
 0x111   : > { %v958_v50 = vpop.f32.mrf.mxu0  ;;  %v1183_v57 = vpop.f32.mrf.mxu1  ;;  %1487 = vmatmul.mubr.f32.gmra.mxu0 %v2431_v37  ;;  %1712 = vmatmul.mubr.f32.gmra.mxu1 %v3301_v29  ;;  %v2439_v37 = vld [vmem:[#allocation2 + $0x141] sm:$0xff] }
 0x112   : > { %v3620_v34 = vadd.f32 %v1183_v57, %v958_v50  ;;  %1491 = vmatprep.mubr.f32.mxu0 %v3332_v8  ;;  %1716 = vmatprep.mubr.f32.mxu1 %v2434_v5  ;;  %v2441_v57 = vld [vmem:[#allocation2 + $0x159] sm:$0xff] }
 0x113   : > { %v960_v60 = vpop.f32.mrf.mxu0  ;;  %v1185_v25 = vpop.f32.mrf.mxu1 }
 0x115   : > { %v963_v17 = vpop.f32.mrf.mxu0  ;;  %v1188_v3 = vpop.f32.mrf.mxu1  ;;  %1492 = vmatmul.mubr.f32.gmra.mxu0 %v2432_v1  ;;  %1717 = vmatmul.mubr.f32.gmra.mxu1 %v3318_v22 }
 0x116   : > { %v3624_v33 = vadd.f32 %v1188_v3, %v963_v17  ;;  %1496 = vmatprep.mubr.f32.mxu0 %v3349_v14  ;;  %1721 = vmatprep.mubr.f32.mxu1 %v2435_v51  ;;  %v2442_v17 = vld [vmem:[#allocation2 + $0x169] sm:$0xff] }
 0x117   : > { %v965_v29 = vpop.f32.mrf.mxu0  ;;  %v1190_v41 = vpop.f32.mrf.mxu1 }
 0x118   : > { %v2443_v41 = vld [vmem:[#allocation2 + $0x171] sm:$0xff] }
 0x119   : > { %v968_v15 = vpop.f32.mrf.mxu0  ;;  %v1193_v7 = vpop.f32.mrf.mxu1  ;;  %1497 = vmatmul.mubr.f32.gmra.mxu0 %v2433_v24  ;;  %1722 = vmatmul.mubr.f32.gmra.mxu1 %v3335_v35  ;;  %v2440_v24 = vld [vmem:[#allocation2 + $0x151] sm:$0xff] }
 0x11a   : > { %v3628_v8 = vadd.f32 %v1193_v7, %v968_v15  ;;  %1501 = vmatprep.mubr.f32.mxu0 %v3366_v9  ;;  %1726 = vmatprep.mubr.f32.mxu1 %v2436_v43 }
 0x11b   : > { %v970_v22 = vpop.f32.mrf.mxu0  ;;  %v1195_v2 = vpop.f32.mrf.mxu1 }
 0x11c   : > { %v2444_v22 = vld [vmem:[#allocation2 + $0x181] sm:$0xff] }
 0x11d   : > { %v973_v52 = vpop.f32.mrf.mxu0  ;;  %v1198_v36 = vpop.f32.mrf.mxu1  ;;  %1502 = vmatmul.mubr.f32.gmra.mxu0 %v2434_v5  ;;  %1727 = vmatmul.mubr.f32.gmra.mxu1 %v3352_v46 }
 0x11e   : > { %v3632_v14 = vadd.f32 %v1198_v36, %v973_v52  ;;  %1506 = vmatprep.mubr.f32.mxu0 %v3383_v20  ;;  %1731 = vmatprep.mubr.f32.mxu1 %v2437_v27 }
 0x11f   : > { %v975_v35 = vpop.f32.mrf.mxu0  ;;  %v1200_v62 = vpop.f32.mrf.mxu1 }
 0x120   : > { %v3667_v62 = vld [vmem:[#allocation2 + $0x182] sm:$0xff] }
 0x121   : > { %v978_v6 = vpop.f32.mrf.mxu0  ;;  %v1203_v44 = vpop.f32.mrf.mxu1  ;;  %1507 = vmatmul.mubr.f32.gmra.mxu0 %v2435_v51  ;;  %1732 = vmatmul.mubr.f32.gmra.mxu1 %v3369_v19 }
 0x122   : > { %v3636_v9 = vadd.f32 %v1203_v44, %v978_v6  ;;  %1511 = vmatprep.mubr.f32.mxu0 %v3400_v32  ;;  %1736 = vmatprep.mubr.f32.mxu1 %v2438_v0 }
 0x123   : > { %v980_v46 = vpop.f32.mrf.mxu0  ;;  %v1205_v54 = vpop.f32.mrf.mxu1 }
 0x125   : > { %v983_v21 = vpop.f32.mrf.mxu0  ;;  %v1208_v48 = vpop.f32.mrf.mxu1  ;;  %1512 = vmatmul.mubr.f32.gmra.mxu0 %v2436_v43  ;;  %1737 = vmatmul.mubr.f32.gmra.mxu1 %v3386_v31 }
 0x126   : > { %v3640_v20 = vadd.f32 %v1208_v48, %v983_v21  ;;  %1516 = vmatprep.mubr.f32.mxu0 %v3417_v45  ;;  %1741 = vmatprep.mubr.f32.mxu1 %v2439_v37  ;;  %v3673_v21 = vld [vmem:[#allocation2 + $0x18a] sm:$0xff]  ;;  %v710_v48 = vld [vmem:[#allocation2 + $0x1a1] sm:$0xff] }
 0x127   : > { %v985_v19 = vpop.f32.mrf.mxu0  ;;  %v1210_v1 = vpop.f32.mrf.mxu1 }
 0x129   : > { %v988_v59 = vpop.f32.mrf.mxu0  ;;  %v1213_v12 = vpop.f32.mrf.mxu1  ;;  %1517 = vmatmul.mubr.f32.gmra.mxu0 %v2437_v27  ;;  %1742 = vmatmul.mubr.f32.gmra.mxu1 %v3403_v42  ;;  %v2445_v27 = vld [vmem:[#allocation2 + $0x189] sm:$0xff] }
 0x12a   : > { %v3644_v32 = vadd.f32 %v1213_v12, %v988_v59  ;;  %1521 = vmatprep.mubr.f32.mxu0 %v3434_v56  ;;  %1746 = vmatprep.mubr.f32.mxu1 %v2440_v24  ;;  %v727_v12 = vld [vmem:[#allocation2 + $0xf2] sm:$0xff] }
 0x12b   : > { %v990_v31 = vpop.f32.mrf.mxu0  ;;  %v1215_v30 = vpop.f32.mrf.mxu1 }
 0x12c   : > { %v2446_v30 = vld [vmem:[#allocation2 + $0x8] sm:$0xff] }
 0x12d   : > { %v993_v47 = vpop.f32.mrf.mxu0  ;;  %v1218_v50 = vpop.f32.mrf.mxu1  ;;  %1522 = vmatmul.mubr.f32.gmra.mxu0 %v2438_v0  ;;  %1747 = vmatmul.mubr.f32.gmra.mxu1 %v3420_v53 }
 0x12e   : > { %v3648_v45 = vadd.f32 %v1218_v50, %v993_v47  ;;  %1526 = vmatprep.mubr.f32.mxu0 %v3451_v23  ;;  %1751 = vmatprep.mubr.f32.mxu1 %v2441_v57  ;;  %v728_v50 = vld [vmem:[#allocation2 + $0xfa] sm:$0xff] }
 0x12f   : > { %v995_v42 = vpop.f32.mrf.mxu0  ;;  %v1220_v5 = vpop.f32.mrf.mxu1 }
 0x130   : > { %v729_v5 = vld [vmem:[#allocation2 + $0x10a] sm:$0xff] }
 0x131   : > { %v998_v60 = vpop.f32.mrf.mxu0  ;;  %v1223_v25 = vpop.f32.mrf.mxu1  ;;  %1527 = vmatmul.mubr.f32.gmra.mxu0 %v2439_v37  ;;  %1752 = vmatmul.mubr.f32.gmra.mxu1 %v3437_v63 }
 0x132   : > { %v3652_v56 = vadd.f32 %v1223_v25, %v998_v60  ;;  %1531 = vmatprep.mubr.f32.mxu0 %v3468_v4  ;;  %1756 = vmatprep.mubr.f32.mxu1 %v2442_v17 }
 0x133   : > { %v1000_v53 = vpop.f32.mrf.mxu0  ;;  %v1225_v3 = vpop.f32.mrf.mxu1 }
 0x134   : > { %v730_v53 = vld [vmem:[#allocation2 + $0x112] sm:$0xff] }
 0x135   : > { %v1003_v51 = vpop.f32.mrf.mxu0  ;;  %v1228_v29 = vpop.f32.mrf.mxu1  ;;  %1532 = vmatmul.mubr.f32.gmra.mxu0 %v2440_v24  ;;  %1757 = vmatmul.mubr.f32.gmra.mxu1 %v3454_v61 }
 0x136   : > { %v3656_v23 = vadd.f32 %v1228_v29, %v1003_v51  ;;  %1536 = vmatprep.mubr.f32.mxu0 %v3485_v10  ;;  %1761 = vmatprep.mubr.f32.mxu1 %v2443_v41  ;;  %v731_v29 = vld [vmem:[#allocation2 + $0x122] sm:$0xff] }
 0x137   : > { %v1005_v63 = vpop.f32.mrf.mxu0  ;;  %v1230_v15 = vpop.f32.mrf.mxu1 }
 0x139   : > { %v1008_v7 = vpop.f32.mrf.mxu0  ;;  %v1233_v43 = vpop.f32.mrf.mxu1  ;;  %1537 = vmatmul.mubr.f32.gmra.mxu0 %v2441_v57  ;;  %1762 = vmatmul.mubr.f32.gmra.mxu1 %v3471_v40 }
 0x13a   : > { %v3660_v4 = vadd.f32 %v1233_v43, %v1008_v7  ;;  %1541 = vmatprep.mubr.f32.mxu0 %v3502_v28  ;;  %1766 = vmatprep.mubr.f32.mxu1 %v2444_v22  ;;  %v709_v28 = vld [vmem:[#allocation2 + $0x199] sm:$0xff] }
 0x13b   : > { %v1010_v61 = vpop.f32.mrf.mxu0  ;;  %v1235_v2 = vpop.f32.mrf.mxu1  ;;  %v717_v43 = vld [vmem:[#allocation2 + $0x7a] sm:$0xff] }
 0x13d   : > { %v1013_v52 = vpop.f32.mrf.mxu0  ;;  %v1238_v36 = vpop.f32.mrf.mxu1  ;;  %1542 = vmatmul.mubr.f32.gmra.mxu0 %v2442_v17  ;;  %1767 = vmatmul.mubr.f32.gmra.mxu1 %v3489_v16  ;;  %v677_v16 = vld [vmem:[#allocation2 + $0x198] sm:$0xff] }
 0x13e   : > { %v3664_v10 = vadd.f32 %v1238_v36, %v1013_v52  ;;  %1546 = vmatprep.mubr.f32.mxu0 %v3516_v18  ;;  %1771 = vmatprep.mubr.f32.mxu1 %v2445_v27  ;;  %v734_v52 = vld [vmem:[#allocation2 + $0x142] sm:$0xff] }
 0x13f   : > { %v1015_v40 = vpop.f32.mrf.mxu0  ;;  %v1240_v35 = vpop.f32.mrf.mxu1 }
 0x140   : > { %v735_v40 = vld [vmem:[#allocation2 + $0x152] sm:$0xff] }
 0x141   : > { %v1018_v6 = vpop.f32.mrf.mxu0  ;;  %v1243_v44 = vpop.f32.mrf.mxu1  ;;  %1547 = vmatmul.mubr.f32.gmra.mxu0 %v2443_v41  ;;  %1772 = vmatmul.mubr.f32.gmra.mxu1 %v3506_v38 }
 0x142   : > { %v3670_v0 = vadd.f32 %v1243_v44, %v1018_v6  ;;  %1551 = vmatprep.mubr.f32.mxu0 %v3667_v62  ;;  %1776 = vmatprep.mubr.f32.mxu1 %v709_v28  ;;  %v736_v44 = vld [vmem:[#allocation2 + $0x15a] sm:$0xff] }
 0x143   : > { %v1020_v46 = vpop.f32.mrf.mxu0  ;;  %v1245_v54 = vpop.f32.mrf.mxu1 }
 0x144   : > { %v721_v54 = vld [vmem:[#allocation2 + $0xaa] sm:$0xff] }
 0x145   : > { %v1023_v37 = vpop.f32.mrf.mxu0  ;;  %v1248_v19 = vpop.f32.mrf.mxu1  ;;  %1552 = vmatmul.mubr.f32.gmra.mxu0 %v2444_v22  ;;  %1777 = vmatmul.mubr.f32.gmra.mxu1 %v677_v16 }
 0x146   : > { %v3675_v1 = vadd.f32 %v1248_v19, %v1023_v37  ;;  %1556 = vmatprep.mubr.f32.mxu0 %v3673_v21  ;;  %1781 = vmatprep.mubr.f32.mxu1 %v710_v48  ;;  %v737_v48 = vld [vmem:[#allocation2 + $0x16a] sm:$0xff] }
 0x147   : > { %v1025_v38 = vpop.f32.mrf.mxu0  ;;  %v1250_v59 = vpop.f32.mrf.mxu1 }
 0x148   : > { %v722_v59 = vld [vmem:[#allocation2 + $0xb2] sm:$0xff] }
 0x149   : > { %v1028_v24 = vpop.f32.mrf.mxu0  ;;  %v1253_v31 = vpop.f32.mrf.mxu1  ;;  %1557 = vmatmul.mubr.f32.gmra.mxu0 %v2445_v27  ;;  %1782 = vmatmul.mubr.f32.gmra.mxu1 %v2446_v30 }
 0x14a   : > { %v3678_v47 = vadd.f32 %v1253_v31, %v1028_v24  ;;  %2335 = vmatprep.mubr.f32.mxu0 %v3539_v26  ;;  %2359 = vmatprep.mubr.f32.mxu1 %v727_v12  ;;  %v723_v31 = vld [vmem:[#allocation2 + $0xc2] sm:$0xff] }
 0x14b   : > { %v1030_v57 = vpop.f32.mrf.mxu0  ;;  %v1255_v42 = vpop.f32.mrf.mxu1 }
 0x14c   : > { %v724_v42 = vld [vmem:[#allocation2 + $0xca] sm:$0xff] }
 0x14d   : > { %v1033_v60 = vpop.f32.mrf.mxu0  ;;  %v1258_v25 = vpop.f32.mrf.mxu1  ;;  %2336 = vmatmul.mubr.f32.vlgmr.msra.gmra.mxu0 %v3545_v13  ;;  %2360 = vmatmul.mubr.f32.vlgmr.msra.gmra.mxu1 %v728_v50  ;;  %v732_v13 = vld [vmem:[#allocation2 + $0x12a] sm:$0xff] }
 0x14e   : > { %v3682_v17 = vadd.f32 %v1258_v25, %v1033_v60  ;;  %2338 = vmatprep.mubr.f32.mxu0 %v3551_v39  ;;  %2362 = vmatprep.mubr.f32.mxu1 %v729_v5  ;;  %v733_v39 = vld [vmem:[#allocation2 + $0x13a] sm:$0xff] }
 0x14f   : > { %v1035_v3 = vpop.f32.mrf.mxu0  ;;  %v1260_v51 = vpop.f32.mrf.mxu1  ;;  %v725_v25 = vld [vmem:[#allocation2 + $0xda] sm:$0xff] }
 0x151   : > { %v1038_v26 = vpop.f32.mrf.mxu0  ;;  %v1263_v41 = vpop.f32.mrf.mxu1  ;;  %2339 = vmatmul.mubr.f32.gmra.mxu0 %v3557_v11  ;;  %2363 = vmatmul.mubr.f32.gmra.mxu1 %v730_v53  ;;  %v718_v11 = vld [vmem:[#allocation2 + $0x82] sm:$0xff]  ;;  %v741_v53 = vld [vmem:[#allocation2 + $0x19a] sm:$0xff] }
 0x152   : > { %v3686_v63 = vadd.f32 %v1263_v41, %v1038_v26  ;;  %2341 = vmatprep.mubr.f32.mxu0 %v3563_v55  ;;  %2365 = vmatprep.mubr.f32.mxu1 %v731_v29  ;;  %v719_v55 = vld [vmem:[#allocation2 + $0x92] sm:$0xff]  ;;  %v742_v26 = vld [vmem:[#allocation2 + $0x1a2] sm:$0xff] }
 0x153   : > { %v1040_v15 = vpop.f32.mrf.mxu0  ;;  %v1265_v7 = vpop.f32.mrf.mxu1 }
 0x155   : > { %v1043_v22 = vpop.f32.mrf.mxu0  ;;  %v1268_v61 = vpop.f32.mrf.mxu1  ;;  %2342 = vmatmul.mubr.f32.gmra.mxu0 %v3569_v58  ;;  %2366 = vmatmul.mubr.f32.gmra.mxu1 %v732_v13  ;;  %v720_v58 = vld [vmem:[#allocation2 + $0x9a] sm:$0xff] }
 0x156   : > { %v3690_v2 = vadd.f32 %v1268_v61, %v1043_v22  ;;  %2344 = vmatprep.mubr.f32.mxu0 %v717_v43  ;;  %2368 = vmatprep.mubr.f32.mxu1 %v733_v39 }
 0x157   : > { %v1045_v36 = vpop.f32.mrf.mxu0  ;;  %v1270_v27 = vpop.f32.mrf.mxu1 }
 0x159   : > { %v1048_v35 = vpop.f32.mrf.mxu0  ;;  %v1273_v28 = vpop.f32.mrf.mxu1  ;;  %2345 = vmatmul.mubr.f32.gmra.mxu0 %v718_v11  ;;  %2369 = vmatmul.mubr.f32.gmra.mxu1 %v734_v52 }
 0x15a   : > { %v3692_v6 = vadd.f32 %v1273_v28, %v1048_v35  ;;  %2347 = vmatprep.mubr.f32.mxu0 %v719_v55  ;;  %2371 = vmatprep.mubr.f32.mxu1 %v735_v40 }
 0x15b   : > { %v1050_v16 = vpop.f32.mrf.mxu0  ;;  %v1275_v46 = vpop.f32.mrf.mxu1 }
 0x15d   : > { %v1053_v37 = vpop.f32.mrf.mxu0  ;;  %v1278_v19 = vpop.f32.mrf.mxu1  ;;  %2348 = vmatmul.mubr.f32.gmra.mxu0 %v720_v58  ;;  %2372 = vmatmul.mubr.f32.gmra.mxu1 %v736_v44 }
 0x15e   : > { %v3694_v38 = vadd.f32 %v1278_v19, %v1053_v37  ;;  %2350 = vmatprep.mubr.f32.mxu0 %v721_v54  ;;  %2374 = vmatprep.mubr.f32.mxu1 %v737_v48 }
 0x15f   : > { %v1055_v12 = vpop.f32.mrf.mxu0  ;;  %v1280_v24 = vpop.f32.mrf.mxu1 }
 0x161   : > { %v1058_v30 = vpop.f32.mrf.mxu0  ;;  %v1283_v50 = vpop.f32.mrf.mxu1  ;;  %2351 = vmatmul.mubr.f32.gmra.mxu0 %v722_v59  ;;  %2375 = vmatmul.mubr.f32.gmra.mxu1 %v3516_v18  ;;  %v726_v18 = vld [vmem:[#allocation2 + $0xe2] sm:$0xff] }
 0x162   : > { %v3697_v57 = vadd.f32 %v1283_v50, %v1058_v30  ;;  %2353 = vmatprep.mubr.f32.mxu0 %v723_v31  ;;  %2377 = vmatprep.mubr.f32.mxu1 %v3667_v62 }
 0x163   : > { %v1060_v5 = vpop.f32.mrf.mxu0  ;;  %v1285_v60 = vpop.f32.mrf.mxu1 }
 0x165   : > { %v1063_v3 = vpop.f32.mrf.mxu0  ;;  %v1288_v51 = vpop.f32.mrf.mxu1  ;;  %2354 = vmatmul.mubr.f32.gmra.mxu0 %v724_v42  ;;  %2378 = vmatmul.mubr.f32.gmra.mxu1 %v3673_v21 }
 0x166   : > { %v3701_v29 = vadd.f32 %v1288_v51, %v1063_v3  ;;  %2356 = vmatprep.mubr.f32.mxu0 %v725_v25  ;;  %2380 = vmatprep.mubr.f32.mxu1 %v741_v53 }
 0x167   : > { %v1065_v41 = vpop.f32.mrf.mxu0  ;;  %v1290_v13 = vpop.f32.mrf.mxu1 }
 0x169   : > { %v1068_v15 = vpop.f32.mrf.mxu0  ;;  %v1293_v62 = vpop.f32.mrf.mxu1  ;;  %2357 = vmatmul.mubr.f32.gmra.mxu0 %v726_v18  ;;  %2381 = vmatmul.mubr.f32.gmra.mxu1 %v742_v26 }
 0x16a   : > { %v3703_v7 = vadd.f32 %v1293_v62, %v1068_v15 }
 0x16b   : > { %v1070_v43 = vpop.f32.mrf.mxu0  ;;  %v1295_v39 = vpop.f32.mrf.mxu1 }
 0x16d   : > { %v1073_v22 = vpop.f32.mrf.mxu0  ;;  %v1298_v61 = vpop.f32.mrf.mxu1 }
 0x16e   : > { %v3705_v11 = vadd.f32 %v1298_v61, %v1073_v22 }
 0x16f   : > { %v1075_v21 = vpop.f32.mrf.mxu0  ;;  %v1300_v52 = vpop.f32.mrf.mxu1 }
 0x171   : > { %v1078_v36 = vpop.f32.mrf.mxu0  ;;  %v1303_v27 = vpop.f32.mrf.mxu1 }
 0x172   : > { %v3707_v55 = vadd.f32 %v1303_v27, %v1078_v36 }
 0x173   : > { %v1080_v40 = vpop.f32.mrf.mxu0  ;;  %v1305_v35 = vpop.f32.mrf.mxu1 }
 0x175   : > { %v1083_v28 = vpop.f32.mrf.mxu0  ;;  %v1308_v58 = vpop.f32.mrf.mxu1 }
 0x176   : > { %v3709_v44 = vadd.f32 %v1308_v58, %v1083_v28 }
 0x177   : > { %v1085_v16 = vpop.f32.mrf.mxu0  ;;  %v1310_v46 = vpop.f32.mrf.mxu1 }
 0x179   : > { %v1088_v54 = vpop.f32.mrf.mxu0  ;;  %v1313_v48 = vpop.f32.mrf.mxu1 }
 0x17a   : > { %v3711_v37 = vadd.f32 %v1313_v48, %v1088_v54 }
 0x17b   : > { %v1090_v19 = vpop.f32.mrf.mxu0  ;;  %v1315_v59 = vpop.f32.mrf.mxu1 }
 0x17d   : > { %v1093_v12 = vpop.f32.mrf.mxu0  ;;  %v1318_v24 = vpop.f32.mrf.mxu1 }
 0x17e   : > { %v3713_v31 = vadd.f32 %v1318_v24, %v1093_v12 }
 0x17f   : > { %v1095_v30 = vpop.f32.mrf.mxu0  ;;  %v1320_v50 = vpop.f32.mrf.mxu1 }
 0x181   : > { %v1098_v42 = vpop.f32.mrf.mxu0  ;;  %v1323_v5 = vpop.f32.mrf.mxu1 }
 0x182   : > { %v3715_v60 = vadd.f32 %v1323_v5, %v1098_v42 }
 0x183   : > { %v1100_v25 = vpop.f32.mrf.mxu0  ;;  %v1325_v53 = vpop.f32.mrf.mxu1 }
 0x185   : > { %v1103_v3 = vpop.f32.mrf.mxu0  ;;  %v1328_v51 = vpop.f32.mrf.mxu1 }
 0x186   : > { %v3717_v18 = vadd.f32 %v1328_v51, %v1103_v3 }
 0x187   : > { %v1105_v26 = vpop.f32.mrf.mxu0  ;;  %v1330_v41 = vpop.f32.mrf.mxu1 }
 0x188   : > { %4045 = vst [vmem:[#allocation3_spill] sm:$0xff] %v3717_v18 }
 0x189   : > { %v1108_v13 = vpop.f32.mrf.mxu0  ;;  %v1333_v15 = vpop.f32.mrf.mxu1 }
 0x18a   : > { %v3719_v62 = vadd.f32 %v1333_v15, %v1108_v13 }
 0x18b   : > { %v1110_v43 = vpop.f32.mrf.mxu0  ;;  %v1335_v39 = vpop.f32.mrf.mxu1 }
 0x18c   : > { %4046 = vst [vmem:[#allocation4_spill] sm:$0xff] %v3719_v62 }
 0x18d   : > { %v1403_v22 = vpop.f32.mrf.mxu0  ;;  %v1628_v61 = vpop.f32.mrf.mxu1 }
 0x18e   : > { %v1404_v21 = vadd.f32 %v1403_v22, %v3616_v49 }
 0x18f   : > { %v1405_v52 = vpop.f32.mrf.mxu0  ;;  %v1630_v36 = vpop.f32.mrf.mxu1 }
 0x190   : > { %v3722_v27 = vadd.f32 %v1628_v61, %v1404_v21 }
 0x191   : > { %v1408_v40 = vpop.f32.mrf.mxu0  ;;  %v1633_v35 = vpop.f32.mrf.mxu1 }
 0x192   : > { %v1409_v28 = vadd.f32 %v1408_v40, %v3620_v34 }
 0x193   : > { %v1410_v58 = vpop.f32.mrf.mxu0  ;;  %v1635_v16 = vpop.f32.mrf.mxu1 }
 0x194   : > { %v3725_v46 = vadd.f32 %v1633_v35, %v1409_v28 }
 0x195   : > { %v1413_v54 = vpop.f32.mrf.mxu0  ;;  %v1638_v48 = vpop.f32.mrf.mxu1 }
 0x196   : > { %v1414_v19 = vadd.f32 %v1413_v54, %v3624_v33 }
 0x197   : > { %v1415_v59 = vpop.f32.mrf.mxu0  ;;  %v1640_v12 = vpop.f32.mrf.mxu1 }
 0x198   : > { %v3728_v24 = vadd.f32 %v1638_v48, %v1414_v19 }
 0x199   : > { %v1418_v49 = vpop.f32.mrf.mxu0  ;;  %v1643_v30 = vpop.f32.mrf.mxu1 }
 0x19a   : > { %v1419_v50 = vadd.f32 %v1418_v49, %v3628_v8 }
 0x19b   : > { %v1420_v42 = vpop.f32.mrf.mxu0  ;;  %v1645_v5 = vpop.f32.mrf.mxu1 }
 0x19c   : > { %v3731_v25 = vadd.f32 %v1643_v30, %v1419_v50 }
 0x19d   : > { %v1423_v34 = vpop.f32.mrf.mxu0  ;;  %v1648_v53 = vpop.f32.mrf.mxu1 }
 0x19e   : > { %v1424_v3 = vadd.f32 %v1423_v34, %v3632_v14 }
 0x19f   : > { %v1425_v51 = vpop.f32.mrf.mxu0  ;;  %v1650_v26 = vpop.f32.mrf.mxu1 }
 0x1a0   : > { %v3734_v41 = vadd.f32 %v1648_v53, %v1424_v3 }
 0x1a1   : > { %v1428_v33 = vpop.f32.mrf.mxu0  ;;  %v1653_v13 = vpop.f32.mrf.mxu1 }
 0x1a2   : > { %v1429_v15 = vadd.f32 %v1428_v33, %v3636_v9 }
 0x1a3   : > { %v1430_v43 = vpop.f32.mrf.mxu0  ;;  %v1655_v39 = vpop.f32.mrf.mxu1 }
 0x1a4   : > { %v3737_v22 = vadd.f32 %v1653_v13, %v1429_v15 }
 0x1a5   : > { %v1433_v8 = vpop.f32.mrf.mxu0  ;;  %v1658_v61 = vpop.f32.mrf.mxu1 }
 0x1a6   : > { %v1434_v21 = vadd.f32 %v1433_v8, %v3640_v20 }
 0x1a7   : > { %v1435_v52 = vpop.f32.mrf.mxu0  ;;  %v1660_v36 = vpop.f32.mrf.mxu1 }
 0x1a8   : > { %v3740_v40 = vadd.f32 %v1658_v61, %v1434_v21 }
 0x1a9   : > { %v1438_v14 = vpop.f32.mrf.mxu0  ;;  %v1663_v35 = vpop.f32.mrf.mxu1 }
 0x1aa   : > { %v1439_v28 = vadd.f32 %v1438_v14, %v3644_v32 }
 0x1ab   : > { %v1440_v58 = vpop.f32.mrf.mxu0  ;;  %v1665_v16 = vpop.f32.mrf.mxu1 }
 0x1ac   : > { %v3743_v54 = vadd.f32 %v1663_v35, %v1439_v28 }
 0x1ad   : > { %v1443_v9 = vpop.f32.mrf.mxu0  ;;  %v1668_v48 = vpop.f32.mrf.mxu1 }
 0x1ae   : > { %v1444_v19 = vadd.f32 %v1443_v9, %v3648_v45 }
 0x1af   : > { %v1445_v59 = vpop.f32.mrf.mxu0  ;;  %v1670_v12 = vpop.f32.mrf.mxu1 }
 0x1b0   : > { %v3746_v49 = vadd.f32 %v1668_v48, %v1444_v19 }
 0x1b1   : > { %v1448_v20 = vpop.f32.mrf.mxu0  ;;  %v1673_v30 = vpop.f32.mrf.mxu1 }
 0x1b2   : > { %v1449_v50 = vadd.f32 %v1448_v20, %v3652_v56 }
 0x1b3   : > { %v1450_v42 = vpop.f32.mrf.mxu0  ;;  %v1675_v5 = vpop.f32.mrf.mxu1 }
 0x1b4   : > { %v3749_v34 = vadd.f32 %v1673_v30, %v1449_v50 }
 0x1b5   : > { %v1453_v32 = vpop.f32.mrf.mxu0  ;;  %v1678_v53 = vpop.f32.mrf.mxu1 }
 0x1b6   : > { %v1454_v3 = vadd.f32 %v1453_v32, %v3656_v23 }
 0x1b7   : > { %v1455_v51 = vpop.f32.mrf.mxu0  ;;  %v1680_v26 = vpop.f32.mrf.mxu1 }
 0x1b8   : > { %v3752_v33 = vadd.f32 %v1678_v53, %v1454_v3 }
 0x1b9   : > { %v1458_v45 = vpop.f32.mrf.mxu0  ;;  %v1683_v13 = vpop.f32.mrf.mxu1 }
 0x1ba   : > { %v1459_v15 = vadd.f32 %v1458_v45, %v3660_v4 }
 0x1bb   : > { %v1460_v43 = vpop.f32.mrf.mxu0  ;;  %v1685_v39 = vpop.f32.mrf.mxu1 }
 0x1bc   : > { %v3755_v8 = vadd.f32 %v1683_v13, %v1459_v15 }
 0x1bd   : > { %v1463_v56 = vpop.f32.mrf.mxu0  ;;  %v1688_v61 = vpop.f32.mrf.mxu1 }
 0x1be   : > { %v1464_v21 = vadd.f32 %v1463_v56, %v3664_v10 }
 0x1bf   : > { %v1465_v52 = vpop.f32.mrf.mxu0  ;;  %v1690_v36 = vpop.f32.mrf.mxu1 }
 0x1c0   : > { %v3758_v14 = vadd.f32 %v1688_v61, %v1464_v21 }
 0x1c1   : > { %v1468_v23 = vpop.f32.mrf.mxu0  ;;  %v1693_v35 = vpop.f32.mrf.mxu1 }
 0x1c2   : > { %4047 = vst [vmem:[#allocation5_spill] sm:$0xff] %v3758_v14  ;;  %v1469_v28 = vadd.f32 %v1468_v23, %v3670_v0 }
 0x1c3   : > { %v1470_v58 = vpop.f32.mrf.mxu0  ;;  %v1695_v16 = vpop.f32.mrf.mxu1 }
 0x1c4   : > { %v3761_v9 = vadd.f32 %v1693_v35, %v1469_v28 }
 0x1c5   : > { %v1473_v4 = vpop.f32.mrf.mxu0  ;;  %v1698_v48 = vpop.f32.mrf.mxu1 }
 0x1c6   : > { %4048 = vst [vmem:[#allocation6_spill] sm:$0xff] %v3761_v9  ;;  %v1474_v19 = vadd.f32 %v1473_v4, %v3675_v1 }
 0x1c7   : > { %v1475_v59 = vpop.f32.mrf.mxu0  ;;  %v1700_v12 = vpop.f32.mrf.mxu1 }
 0x1c8   : > { %v3764_v20 = vadd.f32 %v1698_v48, %v1474_v19 }
 0x1c9   : > { %v1478_v10 = vpop.f32.mrf.mxu0  ;;  %v1703_v30 = vpop.f32.mrf.mxu1 }
 0x1ca   : > { %4049 = vst [vmem:[#allocation7_spill] sm:$0xff] %v3764_v20  ;;  %v1479_v50 = vadd.f32 %v1478_v10, %v3678_v47 }
 0x1cb   : > { %v1480_v42 = vpop.f32.mrf.mxu0  ;;  %v1705_v5 = vpop.f32.mrf.mxu1 }
 0x1cc   : > { %v3767_v32 = vadd.f32 %v1703_v30, %v1479_v50 }
 0x1cd   : > { %v1483_v0 = vpop.f32.mrf.mxu0  ;;  %v1708_v53 = vpop.f32.mrf.mxu1 }
 0x1ce   : > { %4050 = vst [vmem:[#allocation8_spill] sm:$0xff] %v3767_v32  ;;  %v1484_v3 = vadd.f32 %v1483_v0, %v3682_v17 }
 0x1cf   : > { %v1485_v51 = vpop.f32.mrf.mxu0  ;;  %v1710_v26 = vpop.f32.mrf.mxu1 }
 0x1d0   : > { %v3770_v45 = vadd.f32 %v1708_v53, %v1484_v3 }
 0x1d1   : > { %v1488_v1 = vpop.f32.mrf.mxu0  ;;  %v1713_v13 = vpop.f32.mrf.mxu1 }
 0x1d3   : > { %v1490_v15 = vpop.f32.mrf.mxu0  ;;  %v1715_v43 = vpop.f32.mrf.mxu1 }
 0x1d5   : > { %v1493_v39 = vpop.f32.mrf.mxu0  ;;  %v3772_v56 = vpop.f32.mrf.mxu1 }
 0x1d6   : > { %v1494_v62 = vadd.f32 %v1493_v39, %v3690_v2 }
 0x1d7   : > { %v1495_v47 = vpop.f32.mrf.mxu0  ;;  %v1720_v61 = vpop.f32.mrf.mxu1 }
 0x1d9   : > { %v1498_v21 = vpop.f32.mrf.mxu0  ;;  %v3774_v52 = vpop.f32.mrf.mxu1 }
 0x1db   : > { %v1500_v36 = vpop.f32.mrf.mxu0  ;;  %v1725_v23 = vpop.f32.mrf.mxu1 }
 0x1dd   : > { %v3776_v35 = vpop.f32.mrf.mxu0  ;;  %v3778_v17 = vpop.f32.mrf.mxu1 }
 0x1df   : > { %v1505_v28 = vpop.f32.mrf.mxu0  ;;  %v1730_v58 = vpop.f32.mrf.mxu1 }
 0x1e1   : > { %v1508_v16 = vpop.f32.mrf.mxu0  ;;  %v3780_v4 = vpop.f32.mrf.mxu1 }
 0x1e3   : > { %v1510_v48 = vpop.f32.mrf.mxu0  ;;  %v1735_v19 = vpop.f32.mrf.mxu1 }
 0x1e5   : > { %v3782_v59 = vpop.f32.mrf.mxu0  ;;  %v3784_v12 = vpop.f32.mrf.mxu1 }
 0x1e7   : > { %v1515_v10 = vpop.f32.mrf.mxu0  ;;  %v1740_v30 = vpop.f32.mrf.mxu1 }
 0x1e9   : > { %v3786_v50 = vpop.f32.mrf.mxu0  ;;  %v3788_v42 = vpop.f32.mrf.mxu1 }
 0x1eb   : > { %v1520_v5 = vpop.f32.mrf.mxu0  ;;  %v1745_v0 = vpop.f32.mrf.mxu1 }
 0x1ed   : > { %v3790_v53 = vpop.f32.mrf.mxu0  ;;  %v3792_v3 = vpop.f32.mrf.mxu1 }
 0x1ef   : > { %v1525_v51 = vpop.f32.mrf.mxu0  ;;  %v1750_v26 = vpop.f32.mrf.mxu1 }
 0x1f1   : > { %v3794_v15 = vpop.f32.mrf.mxu0  ;;  %v3796_v43 = vpop.f32.mrf.mxu1 }
 0x1f3   : > { %v1530_v47 = vpop.f32.mrf.mxu0  ;;  %v1755_v61 = vpop.f32.mrf.mxu1 }
 0x1f5   : > { %v3798_v36 = vpop.f32.mrf.mxu0  ;;  %v3800_v23 = vpop.f32.mrf.mxu1 }
 0x1f7   : > { %v1535_v28 = vpop.f32.mrf.mxu0  ;;  %v1760_v58 = vpop.f32.mrf.mxu1 }
 0x1f9   : > { %v3802_v48 = vpop.f32.mrf.mxu0  ;;  %v3804_v19 = vpop.f32.mrf.mxu1 }
 0x1fb   : > { %v1540_v10 = vpop.f32.mrf.mxu0  ;;  %v1765_v30 = vpop.f32.mrf.mxu1 }
 0x1fc   : > { %v1489_v30 = vadd.f32 %v1488_v1, %v3686_v63 }
 0x1fd   : > { %v3806_v5 = vpop.f32.mrf.mxu0  ;;  %v3808_v0 = vpop.f32.mrf.mxu1 }
 0x1fe   : > { %4051 = vst [vmem:[#allocation9_spill] sm:$0xff] %v3808_v0  ;;  %v1714_v9 = vadd.f32 %v1713_v13, %v1489_v30 }
 0x1ff   : > { %v1545_v51 = vpop.f32.mrf.mxu0  ;;  %v1770_v26 = vpop.f32.mrf.mxu1 }
 0x201   : > { %v3810_v47 = vpop.f32.mrf.mxu0  ;;  %v3812_v61 = vpop.f32.mrf.mxu1 }
 0x203   : > { %v1550_v20 = vpop.f32.mrf.mxu0  ;;  %v1775_v28 = vpop.f32.mrf.mxu1 }
 0x204   : > { %v1499_v20 = vadd.f32 %v1498_v21, %v3692_v6  ;;  %v1719_v21 = vadd.f32 %v3772_v56, %v1494_v62  ;;  %v1504_v62 = vadd.f32 %v3776_v35, %v3694_v38 }
 0x205   : > { %v3814_v58 = vpop.f32.mrf.mxu0  ;;  %v3816_v32 = vpop.f32.mrf.mxu1 }
 0x207   : > { %v1555_v14 = vpop.f32.mrf.mxu0  ;;  %v1780_v10 = vpop.f32.mrf.mxu1 }
 0x208   : > { %v1724_v10 = vadd.f32 %v3774_v52, %v1499_v20 }
 0x209   : > { %v3819_v18 = vpop.f32.mrf.mxu0  ;;  %v3821_v0 = vpop.f32.mrf.mxu1 }
 0x20b   : > { %v1560_v51 = vpop.f32.mrf.mxu0  ;;  %v1785_v26 = vpop.f32.mrf.mxu1 }
 0x20d   : > { %v2337_v63 = vpop.f32.mrf.mxu0  ;;  %v2361_v14 = vpop.f32.mrf.mxu1 }
 0x20e   : > { %v1859_v1 = vadd.f32 %v2337_v63, %v3725_v46  ;;  %v3833_v28 = vadd.f32 %v2361_v14, %v1714_v9  ;;  %v1509_v46 = vadd.f32 %v1508_v16, %v3697_v57 }
 0x20f   : > { %v1853_v13 = vpop.f32.mrf.mxu0  ;;  %v1933_v2 = vpop.f32.mrf.mxu1 }
 0x210   : > { %2013 = vst [vmem:[%s3830_s15 + $0x8] sm:$0xff] %v1859_v1  ;;  %2029 = vst [vmem:[%s3830_s15 + $0x88] sm:$0xff] %v3833_v28  ;;  %v1854_v6 = vadd.f32 %v1853_v13, %v3722_v27  ;;  %v3840_v39 = vadd.f32 %v1933_v2, %v3770_v45  ;;  %v2082_v51 = vmul.f32 %v1859_v1, %v1859_v1 }
 0x211   : > { %v2340_v9 = vpop.f32.mrf.mxu0  ;;  %v2364_v30 = vpop.f32.mrf.mxu1  ;;  %v1734_v14 = vadd.f32 %v3780_v4, %v1509_v46  ;;  %v1729_v2 = vadd.f32 %v3778_v17, %v1504_v62  ;;  %v1514_v4 = vadd.f32 %v3782_v59, %v3701_v29 }
 0x212   : > { %2012 = vst [vmem:[%s3830_s15] sm:$0xff] %v1854_v6  ;;  %v2044_v26 = vadd.f32 %v1859_v1, %v1854_v6  ;;  %v2081_v63 = vmul.f32 %v1854_v6, %v1854_v6  ;;  %2028 = vst [vmem:[%s3830_s15 + $0x80] sm:$0xff] %v3840_v39  ;;  %v1869_v27 = vadd.f32 %v2340_v9, %v3731_v25 }
 0x213   : > { %v3851_v45 = vadd.f32 %v2364_v30, %v1724_v10  ;;  %v1863_v56 = vpop.f32.mrf.mxu0  ;;  %v1943_v57 = vpop.f32.mrf.mxu1  ;;  %v1519_v1 = vadd.f32 %v3786_v50, %v3703_v7 }
 0x214   : > { %v2113_v52 = vadd.f32 %v2082_v51, %v2081_v63  ;;  %2015 = vst [vmem:[%s3830_s15 + $0x18] sm:$0xff] %v1869_v27  ;;  %v1864_v16 = vadd.f32 %v1863_v56, %v3728_v24  ;;  %v3855_v20 = vadd.f32 %v1943_v57, %v1719_v21  ;;  %v2084_v21 = vmul.f32 %v1869_v27, %v1869_v27 }
 0x215   : > { %2031 = vst [vmem:[%s3830_s15 + $0x98] sm:$0xff] %v3851_v45  ;;  %v2343_v38 = vpop.f32.mrf.mxu0  ;;  %v2367_v25 = vpop.f32.mrf.mxu1  ;;  %v1744_v30 = vadd.f32 %v3788_v42, %v1519_v1  ;;  %v1524_v42 = vadd.f32 %v3790_v53, %v3705_v11 }
 0x216   : > { %2014 = vst [vmem:[%s3830_s15 + $0x10] sm:$0xff] %v1864_v16  ;;  %v2045_v35 = vadd.f32 %v2044_v26, %v1864_v16  ;;  %v2083_v13 = vmul.f32 %v1864_v16, %v1864_v16  ;;  %2030 = vst [vmem:[%s3830_s15 + $0x90] sm:$0xff] %v3855_v20  ;;  %v1879_v24 = vadd.f32 %v2343_v38, %v3737_v22 }
 0x217   : > { %v3869_v7 = vadd.f32 %v2367_v25, %v1734_v14  ;;  %v1873_v50 = vpop.f32.mrf.mxu0  ;;  %v1953_v6 = vpop.f32.mrf.mxu1  ;;  %v1529_v22 = vadd.f32 %v3794_v15, %v3707_v55 }
 0x218   : > { %v2114_v10 = vadd.f32 %v2113_v52, %v2083_v13  ;;  %2017 = vst [vmem:[%s3830_s15 + $0x28] sm:$0xff] %v1879_v24  ;;  %v1874_v46 = vadd.f32 %v1873_v50, %v3734_v41  ;;  %v2046_v9 = vadd.f32 %v2045_v35, %v1869_v27  ;;  %v3878_v17 = vadd.f32 %v1953_v6, %v1729_v2 }
 0x219   : > { %2033 = vst [vmem:[%s3830_s15 + $0xa8] sm:$0xff] %v3869_v7  ;;  %v2346_v29 = vpop.f32.mrf.mxu0  ;;  %v2370_v59 = vpop.f32.mrf.mxu1  ;;  %v1739_v27 = vadd.f32 %v3784_v12, %v1514_v4  ;;  %v2086_v56 = vmul.f32 %v1879_v24, %v1879_v24  ;;  %v1539_v12 = vadd.f32 %v3802_v48, %v3711_v37  ;;  %v1749_v35 = vadd.f32 %v3792_v3, %v1524_v42 }
 0x21a   : > { %2016 = vst [vmem:[%s3830_s15 + $0x20] sm:$0xff] %v1874_v46  ;;  %v2047_v51 = vadd.f32 %v2046_v9, %v1874_v46  ;;  %v2085_v26 = vmul.f32 %v1874_v46, %v1874_v46  ;;  %v2115_v63 = vadd.f32 %v2114_v10, %v2084_v21  ;;  %v1889_v41 = vadd.f32 %v2346_v29, %v3743_v54 }
 0x21b   : > { %2032 = vst [vmem:[%s3830_s15 + $0xa0] sm:$0xff] %v3878_v17  ;;  %v3887_v55 = vadd.f32 %v2370_v59, %v1744_v30  ;;  %v1883_v15 = vpop.f32.mrf.mxu0  ;;  %v1963_v62 = vpop.f32.mrf.mxu1  ;;  %v1754_v54 = vadd.f32 %v3796_v43, %v1529_v22  ;;  %v1534_v43 = vadd.f32 %v3798_v36, %v3709_v44  ;;  %v1549_v3 = vadd.f32 %v3810_v47, %v3715_v60 }
 0x21c   : > { %v2116_v57 = vadd.f32 %v2115_v63, %v2085_v26  ;;  %2019 = vst [vmem:[%s3830_s15 + $0x38] sm:$0xff] %v1889_v41  ;;  %v1884_v52 = vadd.f32 %v1883_v15, %v3740_v40  ;;  %v2048_v16 = vadd.f32 %v2047_v51, %v1879_v24  ;;  %v3896_v11 = vadd.f32 %v1963_v62, %v1739_v27  ;;  %v4053_v15 = vld [vmem:[#allocation6_spill] sm:$0xff]  ;;  %v4054_v62 = vld [vmem:[#allocation9_spill] sm:$0xff] }
 0x21d   : > { %2035 = vst [vmem:[%s3830_s15 + $0xb8] sm:$0xff] %v3887_v55  ;;  %v2349_v53 = vpop.f32.mrf.mxu0  ;;  %v2373_v14 = vpop.f32.mrf.mxu1  ;;  %v2088_v24 = vmul.f32 %v1889_v41, %v1889_v41  ;;  %v1759_v9 = vadd.f32 %v3800_v23, %v1534_v43  ;;  %v4052_v23 = vld [vmem:[#allocation4_spill] sm:$0xff] }
 0x21e   : > { %2018 = vst [vmem:[%s3830_s15 + $0x30] sm:$0xff] %v1884_v52  ;;  %v2049_v1 = vadd.f32 %v2048_v16, %v1884_v52  ;;  %v2087_v38 = vmul.f32 %v1884_v52, %v1884_v52  ;;  %v2117_v25 = vadd.f32 %v2116_v57, %v2086_v56  ;;  %v1899_v40 = vadd.f32 %v2349_v53, %v3749_v34  ;;  %v4056_v53 = vld [vmem:[#allocation5_spill] sm:$0xff] }
 0x21f   : > { %2034 = vst [vmem:[%s3830_s15 + $0xb0] sm:$0xff] %v3896_v11  ;;  %v3905_v37 = vadd.f32 %v2373_v14, %v1754_v54  ;;  %v1893_v48 = vpop.f32.mrf.mxu0  ;;  %v1973_v13 = vpop.f32.mrf.mxu1  ;;  %v1764_v34 = vadd.f32 %v3804_v19, %v1539_v12  ;;  %v1544_v19 = vadd.f32 %v3806_v5, %v3713_v31  ;;  %v1559_v26 = vadd.f32 %v3819_v18, %v4052_v23 }
 0x220   : > { %v2118_v2 = vadd.f32 %v2117_v25, %v2087_v38  ;;  %2021 = vst [vmem:[%s3830_s15 + $0x48] sm:$0xff] %v1899_v40  ;;  %v1894_v4 = vadd.f32 %v1893_v48, %v3746_v49  ;;  %v2050_v50 = vadd.f32 %v2049_v1, %v1889_v41  ;;  %v3914_v44 = vadd.f32 %v1973_v13, %v1749_v35  ;;  %v4057_v13 = vld [vmem:[#allocation8_spill] sm:$0xff] }
 0x221   : > { %2037 = vst [vmem:[%s3830_s15 + $0xc8] sm:$0xff] %v3905_v37  ;;  %v2352_v36 = vpop.f32.mrf.mxu0  ;;  %v2376_v6 = vpop.f32.mrf.mxu1  ;;  %v2090_v22 = vmul.f32 %v1899_v40, %v1899_v40  ;;  %v1769_v56 = vadd.f32 %v4054_v62, %v1544_v19  ;;  %v1784_v38 = vadd.f32 %v3821_v0, %v1559_v26  ;;  %v2099_v23 = vmul.f32 %v3855_v20, %v3855_v20 }
 0x222   : > { %2020 = vst [vmem:[%s3830_s15 + $0x40] sm:$0xff] %v1894_v4  ;;  %v2051_v21 = vadd.f32 %v2050_v50, %v1894_v4  ;;  %v2089_v10 = vmul.f32 %v1894_v4, %v1894_v4  ;;  %v2119_v46 = vadd.f32 %v2118_v2, %v2088_v24  ;;  %v1909_v49 = vadd.f32 %v2352_v36, %v3755_v8  ;;  %v4058_v36 = vld [vmem:[#allocation7_spill] sm:$0xff] }
 0x223   : > { %2036 = vst [vmem:[%s3830_s15 + $0xc0] sm:$0xff] %v3914_v44  ;;  %v3923_v60 = vadd.f32 %v2376_v6, %v1764_v34  ;;  %v1903_v47 = vpop.f32.mrf.mxu0  ;;  %v1983_v30 = vpop.f32.mrf.mxu1  ;;  %v1774_v8 = vadd.f32 %v3812_v61, %v1549_v3  ;;  %v4055_v61 = vld [vmem:[#allocation3_spill] sm:$0xff] }
 0x224   : > { %v2120_v29 = vadd.f32 %v2119_v46, %v2089_v10  ;;  %2023 = vst [vmem:[%s3830_s15 + $0x58] sm:$0xff] %v1909_v49  ;;  %v1904_v59 = vadd.f32 %v1903_v47, %v3752_v33  ;;  %v2052_v51 = vadd.f32 %v2051_v21, %v1899_v40  ;;  %v3932_v31 = vadd.f32 %v1983_v30, %v1759_v9 }
 0x225   : > { %2039 = vst [vmem:[%s3830_s15 + $0xd8] sm:$0xff] %v3923_v60  ;;  %v2355_v5 = vpop.f32.mrf.mxu0  ;;  %v2379_v63 = vpop.f32.mrf.mxu1  ;;  %v1554_v18 = vadd.f32 %v3814_v58, %v4055_v61  ;;  %v2092_v54 = vmul.f32 %v1909_v49, %v1909_v49  ;;  %v2097_v30 = vmul.f32 %v3840_v39, %v3840_v39 }
 0x226   : > { %2022 = vst [vmem:[%s3830_s15 + $0x50] sm:$0xff] %v1904_v59  ;;  %v2053_v41 = vadd.f32 %v2052_v51, %v1904_v59  ;;  %v2091_v27 = vmul.f32 %v1904_v59, %v1904_v59  ;;  %v2121_v42 = vadd.f32 %v2120_v29, %v2090_v22  ;;  %v1919_v33 = vadd.f32 %v2355_v5, %v4053_v15 }
 0x227   : > { %2038 = vst [vmem:[%s3830_s15 + $0xd0] sm:$0xff] %v3932_v31  ;;  %v3941_v57 = vadd.f32 %v2379_v63, %v1774_v8  ;;  %v1913_v52 = vpop.f32.mrf.mxu0  ;;  %v1993_v16 = vpop.f32.mrf.mxu1  ;;  %v1779_v2 = vadd.f32 %v3816_v32, %v1554_v18  ;;  %v2098_v59 = vmul.f32 %v3833_v28, %v3833_v28  ;;  %v2100_v63 = vmul.f32 %v3851_v45, %v3851_v45 }
 0x228   : > { %v2122_v12 = vadd.f32 %v2121_v42, %v2091_v27  ;;  %2025 = vst [vmem:[%s3830_s15 + $0x68] sm:$0xff] %v1919_v33  ;;  %v1914_v14 = vadd.f32 %v1913_v52, %v4056_v53  ;;  %v2054_v1 = vadd.f32 %v2053_v41, %v1909_v49  ;;  %v3948_v25 = vadd.f32 %v1993_v16, %v1769_v56 }
 0x229   : > { %2041 = vst [vmem:[%s3830_s15 + $0xe8] sm:$0xff] %v3941_v57  ;;  %v2358_v58 = vpop.f32.mrf.mxu0  ;;  %v2382_v40 = vpop.f32.mrf.mxu1  ;;  %v2094_v34 = vmul.f32 %v1919_v33, %v1919_v33 }
 0x22a   : > { %2024 = vst [vmem:[%s3830_s15 + $0x60] sm:$0xff] %v1914_v14  ;;  %v2055_v35 = vadd.f32 %v2054_v1, %v1914_v14  ;;  %v2093_v43 = vmul.f32 %v1914_v14, %v1914_v14  ;;  %v2123_v48 = vadd.f32 %v2122_v12, %v2092_v54  ;;  %v1929_v24 = vadd.f32 %v2358_v58, %v4057_v13 }
 0x22b   : > { %2040 = vst [vmem:[%s3830_s15 + $0xe0] sm:$0xff] %v3948_v25  ;;  %v3955_v0 = vadd.f32 %v2382_v40, %v1784_v38  ;;  %v1923_v4 = vpop.f32.mrf.mxu0  ;;  %v2003_v50 = vpop.f32.mrf.mxu1 }
 0x22c   : > { %v2124_v3 = vadd.f32 %v2123_v48, %v2093_v43  ;;  %2027 = vst [vmem:[%s3830_s15 + $0x78] sm:$0xff] %v1929_v24  ;;  %v1924_v6 = vadd.f32 %v1923_v4, %v4058_v36  ;;  %v2056_v21 = vadd.f32 %v2055_v35, %v1919_v33  ;;  %v2004_v10 = vadd.f32 %v2003_v50, %v1779_v2 }
 0x22d   : > { %2043 = vst [vmem:[%s3830_s15 + $0xf8] sm:$0xff] %v3955_v0  ;;  %v2096_v9 = vmul.f32 %v1929_v24, %v1929_v24 }
 0x22e   : > { %2026 = vst [vmem:[%s3830_s15 + $0x70] sm:$0xff] %v1924_v6  ;;  %v2057_v46 = vadd.f32 %v2056_v21, %v1924_v6  ;;  %v2095_v49 = vmul.f32 %v1924_v6, %v1924_v6  ;;  %v2125_v32 = vadd.f32 %v2124_v3, %v2094_v34  ;;  %2042 = vst [vmem:[%s3830_s15 + $0xf0] sm:$0xff] %v2004_v10 }
 0x22f   : > { %v2111_v13 = vmul.f32 %v2004_v10, %v2004_v10 }
 0x230   : > { %v2058_v19 = vadd.f32 %v2057_v46, %v1929_v24  ;;  %v2126_v47 = vadd.f32 %v2125_v32, %v2095_v49 }
 0x232   : > { %v2059_v22 = vadd.f32 %v2058_v19, %v3840_v39  ;;  %v2127_v29 = vadd.f32 %v2126_v47, %v2096_v9  ;;  %v2101_v39 = vmul.f32 %v3878_v17, %v3878_v17 }
 0x234   : > { %v2060_v51 = vadd.f32 %v2059_v22, %v3833_v28  ;;  %v2128_v8 = vadd.f32 %v2127_v29, %v2097_v30  ;;  %v2102_v28 = vmul.f32 %v3869_v7, %v3869_v7 }
 0x236   : > { %v2061_v26 = vadd.f32 %v2060_v51, %v3855_v20  ;;  %v2129_v5 = vadd.f32 %v2128_v8, %v2098_v59  ;;  %v2103_v20 = vmul.f32 %v3896_v11, %v3896_v11 }
 0x238   : > { %v2062_v41 = vadd.f32 %v2061_v26, %v3851_v45  ;;  %v2130_v27 = vadd.f32 %v2129_v5, %v2099_v23  ;;  %v2104_v45 = vmul.f32 %v3887_v55, %v3887_v55 }
 0x23a   : > { %v2063_v42 = vadd.f32 %v2062_v41, %v3878_v17  ;;  %v2131_v15 = vadd.f32 %v2130_v27, %v2100_v63  ;;  %v2105_v17 = vmul.f32 %v3914_v44, %v3914_v44 }
 0x23c   : > { %v2064_v33 = vadd.f32 %v2063_v42, %v3869_v7  ;;  %v2132_v62 = vadd.f32 %v2131_v15, %v2101_v39  ;;  %v2106_v7 = vmul.f32 %v3905_v37, %v3905_v37 }
 0x23e   : > { %v2133_v56 = vadd.f32 %v2132_v62, %v2102_v28  ;;  %v2065_v61 = vadd.f32 %v2064_v33, %v3896_v11  ;;  %v2107_v11 = vmul.f32 %v3932_v31, %v3932_v31 }
 0x240   : > { %v2066_v18 = vadd.f32 %v2065_v61, %v3887_v55  ;;  %v2134_v52 = vadd.f32 %v2133_v56, %v2103_v20  ;;  %v2108_v55 = vmul.f32 %v3923_v60, %v3923_v60 }
 0x242   : > { %v2067_v16 = vadd.f32 %v2066_v18, %v3914_v44  ;;  %v2135_v54 = vadd.f32 %v2134_v52, %v2104_v45  ;;  %v2109_v44 = vmul.f32 %v3948_v25, %v3948_v25 }
 0x244   : > { %v2068_v12 = vadd.f32 %v2067_v16, %v3905_v37  ;;  %v2136_v53 = vadd.f32 %v2135_v54, %v2105_v17  ;;  %v2110_v37 = vmul.f32 %v3941_v57, %v3941_v57 }
 0x246   : > { %v2069_v14 = vadd.f32 %v2068_v12, %v3932_v31  ;;  %v2137_v1 = vadd.f32 %v2136_v53, %v2106_v7 }
 0x248   : > { %v2070_v38 = vadd.f32 %v2069_v14, %v3923_v60  ;;  %v2138_v58 = vadd.f32 %v2137_v1, %v2107_v11  ;;  %v2112_v60 = vmul.f32 %v3955_v0, %v3955_v0 }
 0x24a   : > { %v2071_v40 = vadd.f32 %v2070_v38, %v3948_v25  ;;  %v2139_v35 = vadd.f32 %v2138_v58, %v2108_v55 }
 0x24c   : > { %v2072_v43 = vadd.f32 %v2071_v40, %v3941_v57  ;;  %v2140_v48 = vadd.f32 %v2139_v35, %v2109_v44 }
 0x24e   : > { %v2073_v31 = vadd.f32 %v2072_v43, %v2004_v10  ;;  %v2141_v24 = vadd.f32 %v2140_v48, %v2110_v37 }
 0x250   : > { %v2074_v2 = vadd.f32 %v2073_v31, %v3955_v0  ;;  %v2142_v4 = vadd.f32 %v2141_v24, %v2111_v13 }
 0x252   : > { %v2075_v50 = vrot.slane %v2074_v2, 4  ;;  %v2143_v34 = vadd.f32 %v2142_v4, %v2112_v60 }
 0x254   : > { %v2076_v25 = vadd.f32 %v2075_v50, %v2074_v2  ;;  %v2144_v3 = vrot.slane %v2143_v34, 4 }
 0x256   : > { %v2077_v36 = vrot.slane %v2076_v25, 2  ;;  %v2145_v6 = vadd.f32 %v2144_v3, %v2143_v34 }
 0x258   : > { %v2078_v21 = vadd.f32 %v2077_v36, %v2076_v25  ;;  %v2146_v46 = vrot.slane %v2145_v6, 2 }
 0x25a   : > { %v2079_v57 = vrot.slane %v2078_v21, 1  ;;  %v2147_v49 = vadd.f32 %v2146_v46, %v2145_v6 }
 0x25c   : > { %v2148_v32 = vrot.slane %v2147_v49, 1  ;;  %v2080_v10 = vadd.f32 %v2079_v57, %v2078_v21 }
 0x25e   : > { %v2149_v0 = vadd.f32 %v2148_v32, %v2147_v49 }
 0x260   : > { %v2151_v9 = vsel %vm2150_vm0, %v2080_v10, %v2149_v0 }
 0x261   : > { %2152 = vst [vmem:[%s235_s12] sm:$0x3] %v2151_v9 }
 0x262 PF: > { %s16_s18 = sadd.s32 1, %s2453_s18  }
 0x263   : > { %p13_p4 = scmp.ge.s32.totalorder %s16_s18, 4  }
 0x265   :  { %15 = sbr.rel (!%p13_p4) target bundleno = 1 (0x1), region = 81 }

// kernel: residual_block_nhwc.3
= control target key start
LH: loop header
LB: loop body
LE: loop exit
PB: predicated region body
PF: predicated region fallthrough
CT: control target
= control target key end

     0   :  { %s2799_s15 = smov 0   ;;  %s4298_s0 = inlined_call_operand.vmem [shape: f32[2,16,16,128], index: 0, kind: input, shape index: {}]   ;;  %s4299_s1 = inlined_call_operand.vmem [shape: f32[1152,128], index: 1, kind: input, shape index: {}]   ;;  %s4300_s2 = inlined_call_operand.vmem [shape: f32[128,128], index: 2, kind: input, shape index: {}]   ;;  %s4301_s3 = inlined_call_operand.vmem [shape: f32[2,16,16,128], index: 3, kind: output, shape index: {0}]   ;;  %s4302_s4 = inlined_call_operand.vmem [shape: f32[2,4,128], index: 4, kind: output, shape index: {1}]  }
   0x1 LB: > { %s2453_s16 = sadd.s32 4294967295, %s2771_s15   ;;  %p2457_p0 = scmp.ge.s32.totalorder %s2771_s15, 1  ;;  %s2771_s15 = sphi %s2799_s15, %s15_s15  }
   0x2   : > { %p165_p1 = scmp.lt.s32.totalorder %s2771_s15, 3 }
   0x4   : > { %p166_p2 = pnand %p2457_p0, %p165_p1 }
   0x6   : > { %169 = sbr.rel (%p166_p2) target bundleno = 612 (0x264), region = 32 }
   0xb   : > { %v621_v0 = vld [vmem:[%s4299_s1 + $0x78] sm:$0xff]  ;;  %v2773_v2 = vmov 0.0   ;;  %v620_v3 = vld [vmem:[%s4299_s1 + $0x70] sm:$0xff]  ;;  %v619_v5 = vld [vmem:[%s4299_s1 + $0x68] sm:$0xff]  ;;  %p195_p3 = scmp.lt.s32.totalorder %s2453_s16, 1  ;;  %vm2360_vm0 = vcmask 1040384  }
   0xc   : > { %v653_v1 = vld [vmem:[%s4299_s1 + $0x178] sm:$0xff]  ;;  %750 = vmatprep.subr.mxu0 %v2773_v2  ;;  %241 = vst [vmem:[#allocation2] sm:$0xff] %v2773_v2  ;;  %242 = vst [vmem:[#allocation2 + $0x8] sm:$0xff] %v2773_v2  ;;  %975 = vmatprep.subr.mxu1 %v2773_v2  ;;  %v652_v4 = vld [vmem:[%s4299_s1 + $0x170] sm:$0xff]  ;;  %vm2362_vm1 = vcmask 1041408   ;;  %vm2364_vm2 = vcmask 1042432  }
   0xd   : > { %243 = vst [vmem:[#allocation2 + $0x10] sm:$0x3] %v2773_v2  ;;  %245 = vst [vmem:[#allocation2 + $0x198] sm:$0xff] %v2773_v2  ;;  %751 = vmatpush1.msra.mxu0 %v621_v0  ;;  %976 = vmatpush1.msra.mxu1 %v653_v1  ;;  %v651_v6 = vld [vmem:[%s4299_s1 + $0x168] sm:$0xff]  ;;  %v618_v7 = vld [vmem:[%s4299_s1 + $0x60] sm:$0xff]  ;;  %s4313_s16 = smov (!%p195_p3, %s2453_s16), 1 }
   0xe   : > { %246 = vst [vmem:[#allocation2 + $0x1a0] sm:$0xff] %v2773_v2  ;;  %247 = vst [vmem:[#allocation2 + $0x1a8] sm:$0x3] %v2773_v2  ;;  %752 = vmatprep.subr.mxu0 %v2773_v2  ;;  %977 = vmatprep.subr.mxu1 %v2773_v2  ;;  %v650_v8 = vld [vmem:[%s4299_s1 + $0x160] sm:$0xff]  ;;  %v617_v9 = vld [vmem:[%s4299_s1 + $0x58] sm:$0xff]  ;;  %s2465_s29 = sshll.u32 %s4313_s16, 8 }
   0xf   : > { %249 = vst [vmem:[#allocation2 + $0x18] sm:$0x1] %v2773_v2  ;;  %250 = vst [vmem:[#allocation2 + $0x30] sm:$0x1] %v2773_v2  ;;  %753 = vmatpush1.msra.mxu0 %v620_v3  ;;  %978 = vmatpush1.msra.mxu1 %v652_v4  ;;  %v649_v10 = vld [vmem:[%s4299_s1 + $0x158] sm:$0xff]  ;;  %v616_v11 = vld [vmem:[%s4299_s1 + $0x50] sm:$0xff]  ;;  %s2939_s10 = scalar_lea.vmem %s4298_s0, %s2465_s29 }
  0x10   : > { %251 = vst [vmem:[#allocation2 + $0x48] sm:$0x1] %v2773_v2  ;;  %252 = vst [vmem:[#allocation2 + $0x60] sm:$0x1] %v2773_v2  ;;  %754 = vmatprep.subr.mxu0 %v2773_v2  ;;  %979 = vmatprep.subr.mxu1 %v2773_v2  ;;  %v648_v12 = vld [vmem:[%s4299_s1 + $0x150] sm:$0xff]  ;;  %v615_v13 = vld [vmem:[%s4299_s1 + $0x48] sm:$0xff] }
  0x11   : > { %253 = vst [vmem:[#allocation2 + $0x78] sm:$0x1] %v2773_v2  ;;  %254 = vst [vmem:[#allocation2 + $0x90] sm:$0x1] %v2773_v2  ;;  %755 = vmatpush1.msra.mxu0 %v619_v5  ;;  %980 = vmatpush1.msra.mxu1 %v651_v6  ;;  %v647_v14 = vld [vmem:[%s4299_s1 + $0x148] sm:$0xff]  ;;  %v614_v15 = vld [vmem:[%s4299_s1 + $0x40] sm:$0xff] }
  0x12   : > { %255 = vst [vmem:[#allocation2 + $0xa8] sm:$0x1] %v2773_v2  ;;  %256 = vst [vmem:[#allocation2 + $0xc0] sm:$0x1] %v2773_v2  ;;  %756 = vmatprep.subr.mxu0 %v2773_v2  ;;  %981 = vmatprep.subr.mxu1 %v2773_v2  ;;  %v646_v16 = vld [vmem:[%s4299_s1 + $0x140] sm:$0xff]  ;;  %v613_v17 = vld [vmem:[%s4299_s1 + $0x38] sm:$0xff] }
  0x13   : > { %257 = vst [vmem:[#allocation2 + $0xd8] sm:$0x1] %v2773_v2  ;;  %258 = vst [vmem:[#allocation2 + $0xf0] sm:$0x1] %v2773_v2  ;;  %757 = vmatpush1.msra.mxu0 %v618_v7  ;;  %982 = vmatpush1.msra.mxu1 %v650_v8  ;;  %v645_v18 = vld [vmem:[%s4299_s1 + $0x138] sm:$0xff]  ;;  %v612_v19 = vld [vmem:[%s4299_s1 + $0x30] sm:$0xff] }
  0x14   : > { %259 = vst [vmem:[#allocation2 + $0x108] sm:$0x1] %v2773_v2  ;;  %260 = vst [vmem:[#allocation2 + $0x120] sm:$0x1] %v2773_v2  ;;  %758 = vmatprep.subr.mxu0 %v2773_v2  ;;  %983 = vmatprep.subr.mxu1 %v2773_v2  ;;  %v644_v20 = vld [vmem:[%s4299_s1 + $0x130] sm:$0xff]  ;;  %v611_v21 = vld [vmem:[%s4299_s1 + $0x28] sm:$0xff] }
  0x15   : > { %261 = vst [vmem:[#allocation2 + $0x138] sm:$0x1] %v2773_v2  ;;  %262 = vst [vmem:[#allocation2 + $0x150] sm:$0x1] %v2773_v2  ;;  %759 = vmatpush1.msra.mxu0 %v617_v9  ;;  %984 = vmatpush1.msra.mxu1 %v649_v10  ;;  %v643_v22 = vld [vmem:[%s4299_s1 + $0x128] sm:$0xff]  ;;  %v610_v23 = vld [vmem:[%s4299_s1 + $0x20] sm:$0xff] }
  0x16   : > { %263 = vst [vmem:[#allocation2 + $0x168] sm:$0x1] %v2773_v2  ;;  %264 = vst [vmem:[#allocation2 + $0x180] sm:$0x1] %v2773_v2  ;;  %760 = vmatprep.subr.mxu0 %v2773_v2  ;;  %985 = vmatprep.subr.mxu1 %v2773_v2  ;;  %v642_v24 = vld [vmem:[%s4299_s1 + $0x120] sm:$0xff]  ;;  %v609_v26 = vld [vmem:[%s4299_s1 + $0x18] sm:$0xff] }
  0x17   : > { %267 = vst [vmem:[#allocation2 + $0x29] sm:$0x1] %v2773_v2  ;;  %268 = vst [vmem:[#allocation2 + $0x41] sm:$0x1] %v2773_v2  ;;  %761 = vmatpush1.msra.mxu0 %v616_v11  ;;  %986 = vmatpush1.msra.mxu1 %v648_v12  ;;  %v2958_v25 = vld [vmem:[%s2939_s10] sm:$0xff]  ;;  %v641_v27 = vld [vmem:[%s4299_s1 + $0x118] sm:$0xff] }
  0x18   : > { %269 = vst [vmem:[#allocation2 + $0x59] sm:$0x1] %v2773_v2  ;;  %270 = vst [vmem:[#allocation2 + $0x71] sm:$0x1] %v2773_v2  ;;  %762 = vmatprep.subr.mxu0 %v2773_v2  ;;  %987 = vmatprep.subr.mxu1 %v2773_v2  ;;  %v2970_v28 = vld [vmem:[%s2939_s10 + $0x8] sm:$0xff]  ;;  %v2974_v29 = vld [vmem:[%s2939_s10 + $0x10] sm:$0xff] }
  0x19   : > { %271 = vst [vmem:[#allocation2 + $0x89] sm:$0x1] %v2773_v2  ;;  %272 = vst [vmem:[#allocation2 + $0xa1] sm:$0x1] %v2773_v2  ;;  %763 = vmatpush1.msra.mxu0 %v615_v13  ;;  %988 = vmatpush1.msra.mxu1 %v647_v14  ;;  %v608_v30 = vld [vmem:[%s4299_s1 + $0x10] sm:$0xff]  ;;  %v2986_v32 = vld [vmem:[%s2939_s10 + $0x18] sm:$0xff] }
  0x1a   : > { %273 = vst [vmem:[#allocation2 + $0xb9] sm:$0x1] %v2773_v2  ;;  %274 = vst [vmem:[#allocation2 + $0xd1] sm:$0x1] %v2773_v2  ;;  %764 = vmatprep.subr.mxu0 %v2773_v2  ;;  %989 = vmatprep.subr.mxu1 %v2773_v2  ;;  %v640_v31 = vld [vmem:[%s4299_s1 + $0x110] sm:$0xff]  ;;  %v2990_v33 = vld [vmem:[%s2939_s10 + $0x20] sm:$0xff] }
  0x1b   : > { %275 = vst [vmem:[#allocation2 + $0xe9] sm:$0x1] %v2773_v2  ;;  %276 = vst [vmem:[#allocation2 + $0x101] sm:$0x1] %v2773_v2  ;;  %765 = vmatpush1.msra.mxu0 %v614_v15  ;;  %990 = vmatpush1.msra.mxu1 %v646_v16  ;;  %v607_v34 = vld [vmem:[%s4299_s1 + $0x8] sm:$0xff]  ;;  %v3006_v37 = vld [vmem:[%s2939_s10 + $0x30] sm:$0xff] }
  0x1c   : > { %277 = vst [vmem:[#allocation2 + $0x119] sm:$0x1] %v2773_v2  ;;  %278 = vst [vmem:[#allocation2 + $0x131] sm:$0x1] %v2773_v2  ;;  %766 = vmatprep.subr.mxu0 %v2773_v2  ;;  %991 = vmatprep.subr.mxu1 %v2773_v2  ;;  %v639_v35 = vld [vmem:[%s4299_s1 + $0x108] sm:$0xff]  ;;  %v606_v38 = vld [vmem:[%s4299_s1] sm:$0xff] }
  0x1d   : > { %279 = vst [vmem:[#allocation2 + $0x149] sm:$0x1] %v2773_v2  ;;  %280 = vst [vmem:[#allocation2 + $0x161] sm:$0x1] %v2773_v2  ;;  %767 = vmatpush1.msra.mxu0 %v613_v17  ;;  %992 = vmatpush1.msra.mxu1 %v645_v18  ;;  %v3002_v36 = vld [vmem:[%s2939_s10 + $0x28] sm:$0xff]  ;;  %v638_v39 = vld [vmem:[%s4299_s1 + $0x100] sm:$0xff] }
  0x1e   : > { %281 = vst [vmem:[#allocation2 + $0x179] sm:$0x1] %v2773_v2  ;;  %282 = vst [vmem:[#allocation2 + $0x191] sm:$0x1] %v2773_v2  ;;  %768 = vmatprep.subr.mxu0 %v2773_v2  ;;  %993 = vmatprep.subr.mxu1 %v2773_v2  ;;  %v3018_v40 = vld [vmem:[%s2939_s10 + $0x38] sm:$0xff]  ;;  %v3030_v43 = vld [vmem:[%s2939_s10 + $0x40] sm:$0xff] }
  0x1f   : > { %248 = vst [vmem:[#allocation2] sm:$0x1] %v2773_v2  ;;  %265 = vst [vmem:[#allocation2 + $0x198] sm:$0x1] %v2773_v2  ;;  %769 = vmatpush1.msra.mxu0 %v612_v19  ;;  %994 = vmatpush1.msra.mxu1 %v644_v20  ;;  %v637_v41 = vld [vmem:[%s4299_s1 + $0xf8] sm:$0xff]  ;;  %v636_v44 = vld [vmem:[%s4299_s1 + $0xf0] sm:$0xff] }
  0x20   : > { %266 = vst [vmem:[#allocation2 + $0x11] sm:$0x1] %v2773_v2  ;;  %283 = vst [vmem:[#allocation2 + $0x1a9] sm:$0x1] %v2773_v2  ;;  %770 = vmatprep.subr.mxu0 %v2773_v2  ;;  %995 = vmatprep.subr.mxu1 %v2773_v2  ;;  %v669_v42 = vld [vmem:[%s4299_s1 + $0x1f8] sm:$0xff]  ;;  %v668_v45 = vld [vmem:[%s4299_s1 + $0x1f0] sm:$0xff] }
  0x21   : > { %771 = vmatpush1.msra.mxu0 %v611_v21  ;;  %996 = vmatpush1.msra.mxu1 %v643_v22  ;;  %285 = vst [vmem:[#allocation2 + $0x19] sm:$0xff] %v2958_v25  ;;  %286 = vst [vmem:[#allocation2 + $0x21] sm:$0xff] %v2970_v28  ;;  %v3042_v46 = vld [vmem:[%s2939_s10 + $0x48] sm:$0xff]  ;;  %v634_v49 = vld [vmem:[%s4299_s1 + $0xe0] sm:$0xff] }
  0x22   : > { %772 = vmatprep.subr.mxu0 %v2773_v2  ;;  %997 = vmatprep.subr.mxu1 %v2773_v2  ;;  %287 = vst [vmem:[#allocation2 + $0x31] sm:$0xff] %v2974_v29  ;;  %288 = vst [vmem:[#allocation2 + $0x39] sm:$0xff] %v2986_v32  ;;  %v635_v47 = vld [vmem:[%s4299_s1 + $0xe8] sm:$0xff]  ;;  %v666_v50 = vld [vmem:[%s4299_s1 + $0x1e0] sm:$0xff] }
  0x23   : > { %773 = vmatpush1.msra.mxu0 %v610_v23  ;;  %998 = vmatpush1.msra.mxu1 %v642_v24  ;;  %289 = vst [vmem:[#allocation2 + $0x49] sm:$0xff] %v2990_v33  ;;  %290 = vst [vmem:[#allocation2 + $0x51] sm:$0xff] %v3002_v36  ;;  %v667_v48 = vld [vmem:[%s4299_s1 + $0x1e8] sm:$0xff]  ;;  %v3062_v51 = vld [vmem:[%s2939_s10 + $0x50] sm:$0xff] }
  0x24   : > { %774 = vmatprep.subr.mxu0 %v2773_v2  ;;  %999 = vmatprep.subr.mxu1 %v2773_v2  ;;  %291 = vst [vmem:[#allocation2 + $0x61] sm:$0xff] %v3006_v37  ;;  %292 = vst [vmem:[#allocation2 + $0x69] sm:$0xff] %v3018_v40  ;;  %v633_v52 = vld [vmem:[%s4299_s1 + $0xd8] sm:$0xff]  ;;  %v3078_v55 = vld [vmem:[%s2939_s10 + $0x60] sm:$0xff] }
  0x25   : > { %775 = vmatpush1.msra.mxu0 %v609_v26  ;;  %1000 = vmatpush1.msra.mxu1 %v641_v27  ;;  %293 = vst [vmem:[#allocation2 + $0x79] sm:$0xff] %v3030_v43  ;;  %294 = vst [vmem:[#allocation2 + $0x81] sm:$0xff] %v3042_v46  ;;  %v665_v53 = vld [vmem:[%s4299_s1 + $0x1d8] sm:$0xff]  ;;  %v632_v56 = vld [vmem:[%s4299_s1 + $0xd0] sm:$0xff] }
  0x26   : > { %776 = vmatprep.subr.mxu0 %v2773_v2  ;;  %1001 = vmatprep.subr.mxu1 %v2773_v2  ;;  %295 = vst [vmem:[#allocation2 + $0x91] sm:$0xff] %v3062_v51  ;;  %v3074_v54 = vld [vmem:[%s2939_s10 + $0x58] sm:$0xff]  ;;  %v664_v57 = vld [vmem:[%s4299_s1 + $0x1d0] sm:$0xff]  ;;  %297 = vst [vmem:[#allocation2 + $0xa9] sm:$0xff] %v3078_v55 }
  0x27   : > { %777 = vmatpush1.msra.mxu0 %v608_v30  ;;  %1002 = vmatpush1.msra.mxu1 %v640_v31  ;;  %296 = vst [vmem:[#allocation2 + $0x99] sm:$0xff] %v3074_v54  ;;  %v3090_v58 = vld [vmem:[%s2939_s10 + $0x68] sm:$0xff]  ;;  %v3102_v61 = vld [vmem:[%s2939_s10 + $0x70] sm:$0xff]  ;;  %v3106_v62 = vld [vmem:[%s2939_s10 + $0x78] sm:$0xff] }
  0x28   : > { %778 = vmatprep.subr.mxu0 %v2773_v2  ;;  %1003 = vmatprep.subr.mxu1 %v2773_v2  ;;  %298 = vst [vmem:[#allocation2 + $0xb1] sm:$0xff] %v3090_v58  ;;  %v631_v59 = vld [vmem:[%s4299_s1 + $0xc8] sm:$0xff]  ;;  %299 = vst [vmem:[#allocation2 + $0xc1] sm:$0xff] %v3102_v61  ;;  %v630_v63 = vld [vmem:[%s4299_s1 + $0xc0] sm:$0xff] }
  0x29   : > { %779 = vmatpush1.msra.mxu0 %v607_v34  ;;  %1004 = vmatpush1.msra.mxu1 %v639_v35  ;;  %v663_v60 = vld [vmem:[%s4299_s1 + $0x1c8] sm:$0xff]  ;;  %v662_v0 = vld [vmem:[%s4299_s1 + $0x1c0] sm:$0xff]  ;;  %300 = vst [vmem:[#allocation2 + $0xc9] sm:$0xff] %v3106_v62  ;;  %v629_v4 = vld [vmem:[%s4299_s1 + $0xb8] sm:$0xff] }
  0x2a   : > { %780 = vmatprep.subr.mxu0 %v2773_v2  ;;  %1005 = vmatprep.subr.mxu1 %v2773_v2  ;;  %v3118_v1 = vld [vmem:[%s2939_s10 + $0x80] sm:$0xff]  ;;  %v3122_v3 = vld [vmem:[%s2939_s10 + $0x88] sm:$0xff]  ;;  %v661_v5 = vld [vmem:[%s4299_s1 + $0x1b8] sm:$0xff] }
  0x2b   : > { %781 = vmatpush1.msra.mxu0 %v606_v38  ;;  %1006 = vmatpush1.msra.mxu1 %v638_v39  ;;  %301 = vst [vmem:[#allocation2 + $0xd9] sm:$0xff] %v3118_v1  ;;  %302 = vst [vmem:[#allocation2 + $0xe1] sm:$0xff] %v3122_v3  ;;  %v628_v6 = vld [vmem:[%s4299_s1 + $0xb0] sm:$0xff]  ;;  %v627_v9 = vld [vmem:[%s4299_s1 + $0xa8] sm:$0xff] }
  0x2c   : > { %782 = vmatprep.subr.mxu0 %v2773_v2  ;;  %1007 = vmatprep.subr.mxu1 %v2773_v2  ;;  %v660_v7 = vld [vmem:[%s4299_s1 + $0x1b0] sm:$0xff]  ;;  %v659_v10 = vld [vmem:[%s4299_s1 + $0x1a8] sm:$0xff]  ;;  %v3154_v11 = vld [vmem:[%s2939_s10 + $0x98] sm:$0xff] }
  0x2d   : > { %783 = vmatpush2.msra.mxu0 %v637_v41  ;;  %1008 = vmatpush2.msra.mxu1 %v669_v42  ;;  %v3142_v8 = vld [vmem:[%s2939_s10 + $0x90] sm:$0xff]  ;;  %304 = vst [vmem:[#allocation2 + $0xf9] sm:$0xff] %v3154_v11  ;;  %v626_v12 = vld [vmem:[%s4299_s1 + $0xa0] sm:$0xff]  ;;  %v625_v15 = vld [vmem:[%s4299_s1 + $0x98] sm:$0xff] }
  0x2e   : > { %784 = vmatprep.subr.mxu0 %v2773_v2  ;;  %1009 = vmatprep.subr.mxu1 %v2773_v2  ;;  %303 = vst [vmem:[#allocation2 + $0xf1] sm:$0xff] %v3142_v8  ;;  %v658_v13 = vld [vmem:[%s4299_s1 + $0x1a0] sm:$0xff]  ;;  %v657_v16 = vld [vmem:[%s4299_s1 + $0x198] sm:$0xff]  ;;  %v3178_v17 = vld [vmem:[%s2939_s10 + $0xa8] sm:$0xff] }
  0x2f   : > { %785 = vmatpush2.msra.mxu0 %v636_v44  ;;  %1010 = vmatpush2.msra.mxu1 %v668_v45  ;;  %v3166_v14 = vld [vmem:[%s2939_s10 + $0xa0] sm:$0xff]  ;;  %306 = vst [vmem:[#allocation2 + $0x111] sm:$0xff] %v3178_v17  ;;  %v3182_v18 = vld [vmem:[%s2939_s10 + $0xb0] sm:$0xff]  ;;  %v3194_v21 = vld [vmem:[%s2939_s10 + $0xb8] sm:$0xff] }
  0x30   : > { %786 = vmatprep.subr.mxu0 %v2773_v2  ;;  %1011 = vmatprep.subr.mxu1 %v2773_v2  ;;  %305 = vst [vmem:[#allocation2 + $0x109] sm:$0xff] %v3166_v14  ;;  %v624_v19 = vld [vmem:[%s4299_s1 + $0x90] sm:$0xff]  ;;  %307 = vst [vmem:[#allocation2 + $0x121] sm:$0xff] %v3182_v18  ;;  %v623_v22 = vld [vmem:[%s4299_s1 + $0x88] sm:$0xff] }
  0x31   : > { %787 = vmatpush2.msra.mxu0 %v635_v47  ;;  %1012 = vmatpush2.msra.mxu1 %v667_v48  ;;  %v656_v20 = vld [vmem:[%s4299_s1 + $0x190] sm:$0xff]  ;;  %308 = vst [vmem:[#allocation2 + $0x129] sm:$0xff] %v3194_v21  ;;  %v655_v23 = vld [vmem:[%s4299_s1 + $0x188] sm:$0xff]  ;;  %v3206_v24 = vld [vmem:[%s2939_s10 + $0xc0] sm:$0xff] }
  0x32   : > { %788 = vmatprep.subr.mxu0 %v2773_v2  ;;  %1013 = vmatprep.subr.mxu1 %v2773_v2  ;;  %v622_v26 = vld [vmem:[%s4299_s1 + $0x80] sm:$0xff]  ;;  %309 = vst [vmem:[#allocation2 + $0x139] sm:$0xff] %v3206_v24  ;;  %v3215_v30 = vld [vmem:[%s2939_s10 + $0xc8] sm:$0xff]  ;;  %v413_v34 = vld [vmem:[#allocation2 + $0x18] sm:$0xff] }
  0x33   : > { %789 = vmatpush2.msra.mxu0 %v634_v49  ;;  %1014 = vmatpush2.msra.mxu1 %v666_v50  ;;  %v349_v27 = vld [vmem:[#allocation2 + $0x1] sm:$0xff]  ;;  %310 = vst [vmem:[#allocation2 + $0x141] sm:$0xff] %v3215_v30  ;;  %v3222_v35 = vld [vmem:[%s2939_s10 + $0xd0] sm:$0xff]  ;;  %v3228_v42 = vld [vmem:[%s2939_s10 + $0xd8] sm:$0xff] }
  0x34   : > { %790 = vmatprep.subr.mxu0 %v2773_v2  ;;  %1015 = vmatprep.subr.mxu1 %v2773_v2  ;;  %v654_v31 = vld [vmem:[%s4299_s1 + $0x180] sm:$0xff]  ;;  %311 = vst [vmem:[#allocation2 + $0x151] sm:$0xff] %v3222_v35  ;;  %v350_v41 = vld [vmem:[#allocation2 + $0x9] sm:$0xff]  ;;  %v685_v44 = vld [vmem:[%s4299_s1 + $0x278] sm:$0xff] }
  0x35   : > { %791 = vmatpush2.msra.mxu0 %v633_v52  ;;  %1016 = vmatpush2.msra.mxu1 %v665_v53  ;;  %v317_v38 = vld [vmem:[#allocation2] sm:$0xff]  ;;  %312 = vst [vmem:[#allocation2 + $0x159] sm:$0xff] %v3228_v42  ;;  %v382_v48 = vld [vmem:[#allocation2 + $0xa] sm:$0xff]  ;;  %v717_v52 = vld [vmem:[%s4299_s1 + $0x378] sm:$0xff] }
  0x36   : > { %792 = vmatprep.subr.mxu0 %v2773_v2  ;;  %1017 = vmatprep.subr.mxu1 %v2773_v2  ;;  %v381_v39 = vld [vmem:[#allocation2 + $0x2] sm:$0xff]  ;;  %v684_v50 = vld [vmem:[%s4299_s1 + $0x270] sm:$0xff] }
  0x37   : > { %793 = vmatpush2.msra.mxu0 %v632_v56  ;;  %1018 = vmatpush2.msra.mxu1 %v664_v57  ;;  %v414_v45 = vld [vmem:[#allocation2 + $0x20] sm:$0xff]  ;;  %v3240_v49 = vld [vmem:[%s2939_s10 + $0xe8] sm:$0xff]  ;;  %v3251_v53 = vld [vmem:[#allocation2 + $0x30] sm:$0xff] }
  0x38   : > { %794 = vmatprep.subr.mxu0 %v2773_v2  ;;  %1019 = vmatprep.subr.mxu1 %v2773_v2  ;;  %v3235_v47 = vld [vmem:[%s2939_s10 + $0xe0] sm:$0xff]  ;;  %314 = vst [vmem:[#allocation2 + $0x171] sm:$0xff] %v3240_v49  ;;  %v239_v56 = vld [vmem:[%s2939_s10 + $0xf0] sm:$0xff] }
  0x39   : > { %795 = vmatpush2.msra.mxu0 %v631_v59  ;;  %1020 = vmatpush2.msra.mxu1 %v663_v60  ;;  %313 = vst [vmem:[#allocation2 + $0x169] sm:$0xff] %v3235_v47  ;;  %v3255_v57 = vld [vmem:[#allocation2 + $0x1a] sm:$0xff]  ;;  %315 = vst [vmem:[#allocation2 + $0x181] sm:$0xff] %v239_v56  ;;  %v683_v60 = vld [vmem:[%s4299_s1 + $0x268] sm:$0xff] }
  0x3a   : > { %796 = vmatprep.subr.mxu0 %v2773_v2  ;;  %1021 = vmatprep.subr.mxu1 %v2773_v2  ;;  %v240_v59 = vld [vmem:[%s2939_s10 + $0xf8] sm:$0xff]  ;;  %v3410_v56 = vld [vmem:[#allocation2 + $0xa8] sm:$0xff]  ;;  %s4223_s10 = scalar_lea.vmem %s4301_s3, %s2465_s29  ;;  %s2462_s29 = sshll.u32 %s4313_s16, 2 }
  0x3b   : > { %797 = vmatpush2.msra.mxu0 %v630_v63  ;;  %1022 = vmatpush2.msra.mxu1 %v662_v0  ;;  %v716_v63 = vld [vmem:[%s4299_s1 + $0x370] sm:$0xff]  ;;  %316 = vst [vmem:[#allocation2 + $0x189] sm:$0xff] %v240_v59  ;;  %v3268_v0 = vld [vmem:[#allocation2 + $0x38] sm:$0xff]  ;;  %s208_s25 = scalar_lea.vmem %s4302_s4, %s2462_s29 }
  0x3c   : > { %798 = vmatprep.subr.mxu0 %v2773_v2  ;;  %1023 = vmatprep.subr.mxu1 %v2773_v2  ;;  %v673_v59 = vld [vmem:[%s4299_s1 + $0x218] sm:$0xff] }
  0x3d   : > { %799 = vmatpush2.msra.mxu0 %v629_v4  ;;  %1024 = vmatpush2.msra.mxu1 %v661_v5  ;;  %v682_v4 = vld [vmem:[%s4299_s1 + $0x260] sm:$0xff]  ;;  %v715_v5 = vld [vmem:[%s4299_s1 + $0x368] sm:$0xff] }
  0x3e   : > { %800 = vmatprep.subr.mxu0 %v2773_v2  ;;  %1025 = vmatprep.subr.mxu1 %v2773_v2 }
  0x3f   : > { %801 = vmatpush2.msra.mxu0 %v628_v6  ;;  %1026 = vmatpush2.msra.mxu1 %v660_v7  ;;  %v3283_v6 = vld [vmem:[#allocation2 + $0x48] sm:$0xff]  ;;  %v681_v7 = vld [vmem:[%s4299_s1 + $0x258] sm:$0xff] }
  0x40   : > { %802 = vmatprep.subr.mxu0 %v2773_v2  ;;  %1027 = vmatprep.subr.mxu1 %v2773_v2 }
  0x41   : > { %803 = vmatpush2.msra.mxu0 %v627_v9  ;;  %1028 = vmatpush2.msra.mxu1 %v659_v10  ;;  %v714_v9 = vld [vmem:[%s4299_s1 + $0x360] sm:$0xff]  ;;  %v3298_v10 = vld [vmem:[#allocation2 + $0x50] sm:$0xff] }
  0x42   : > { %804 = vmatprep.subr.mxu0 %v2773_v2  ;;  %1029 = vmatprep.subr.mxu1 %v2773_v2 }
  0x43   : > { %805 = vmatpush2.msra.mxu0 %v626_v12  ;;  %1030 = vmatpush2.msra.mxu1 %v658_v13  ;;  %v680_v12 = vld [vmem:[%s4299_s1 + $0x250] sm:$0xff]  ;;  %v713_v13 = vld [vmem:[%s4299_s1 + $0x358] sm:$0xff] }
  0x44   : > { %806 = vmatprep.subr.mxu0 %v2773_v2  ;;  %1031 = vmatprep.subr.mxu1 %v2773_v2 }
  0x45   : > { %807 = vmatpush2.msra.mxu0 %v625_v15  ;;  %1032 = vmatpush2.msra.mxu1 %v657_v16  ;;  %v3314_v15 = vld [vmem:[#allocation2 + $0x60] sm:$0xff]  ;;  %v679_v16 = vld [vmem:[%s4299_s1 + $0x248] sm:$0xff] }
  0x46   : > { %808 = vmatprep.subr.mxu0 %v2773_v2  ;;  %1033 = vmatprep.subr.mxu1 %v2773_v2 }
  0x47   : > { %809 = vmatpush2.msra.mxu0 %v624_v19  ;;  %1034 = vmatpush2.msra.mxu1 %v656_v20  ;;  %v712_v19 = vld [vmem:[%s4299_s1 + $0x350] sm:$0xff]  ;;  %v3330_v20 = vld [vmem:[#allocation2 + $0x68] sm:$0xff] }
  0x48   : > { %810 = vmatprep.subr.mxu0 %v2773_v2  ;;  %1035 = vmatprep.subr.mxu1 %v2773_v2 }
  0x49   : > { %811 = vmatpush2.msra.mxu0 %v623_v22  ;;  %1036 = vmatpush2.msra.mxu1 %v655_v23  ;;  %v678_v22 = vld [vmem:[%s4299_s1 + $0x240] sm:$0xff]  ;;  %v711_v23 = vld [vmem:[%s4299_s1 + $0x348] sm:$0xff] }
  0x4a   : > { %812 = vmatprep.subr.mxu0 %v2773_v2  ;;  %1037 = vmatprep.subr.mxu1 %v2773_v2 }
  0x4b   : > { %813 = vmatpush2.msra.mxu0 %v622_v26  ;;  %814 = vmatprep.mubr.f32.mxu0 %v349_v27  ;;  %v3346_v26 = vld [vmem:[#allocation2 + $0x78] sm:$0xff] }
  0x4c   : > { %1038 = vmatpush2.msra.mxu1 %v654_v31  ;;  %1039 = vmatprep.mubr.f32.mxu1 %v413_v34  ;;  %v677_v27 = vld [vmem:[%s4299_s1 + $0x238] sm:$0xff]  ;;  %v710_v31 = vld [vmem:[%s4299_s1 + $0x340] sm:$0xff] }
  0x4d   : > { %815 = vmatmul.mubr.f32.vlgmr.msra.gmra.mxu0 %v317_v38  ;;  %1040 = vmatmul.mubr.f32.vlgmr.msra.gmra.mxu1 %v381_v39  ;;  %v676_v38 = vld [vmem:[%s4299_s1 + $0x230] sm:$0xff]  ;;  %v709_v39 = vld [vmem:[%s4299_s1 + $0x338] sm:$0xff] }
  0x4e   : > { %1200 = vmatprep.subr.mxu0 %v2773_v2  ;;  %819 = vmatprep.mubr.f32.mxu0 %v350_v41  ;;  %v3378_v41 = vld [vmem:[#allocation2 + $0x90] sm:$0xff] }
  0x4f   : > { %1201 = vmatpush1.msra.mxu0 %v685_v44  ;;  %1044 = vmatprep.mubr.f32.mxu1 %v414_v45  ;;  %v675_v44 = vld [vmem:[%s4299_s1 + $0x228] sm:$0xff] }
  0x50   : > { %1202 = vmatprep.subr.mxu0 %v2773_v2  ;;  %1425 = vmatprep.subr.mxu1 %v2773_v2 }
  0x51   : > { %820 = vmatmul.mubr.f32.gmra.mxu0 %v2773_v2  ;;  %1045 = vmatmul.mubr.f32.gmra.mxu1 %v382_v48  ;;  %v3394_v48 = vld [vmem:[#allocation2 + $0x98] sm:$0xff] }
  0x52   : > { %1203 = vmatpush1.msra.mxu0 %v684_v50  ;;  %1426 = vmatpush1.msra.mxu1 %v717_v52  ;;  %v674_v50 = vld [vmem:[%s4299_s1 + $0x220] sm:$0xff]  ;;  %v707_v52 = vld [vmem:[%s4299_s1 + $0x328] sm:$0xff] }
  0x53   : > { %824 = vmatprep.mubr.f32.mxu0 %v2958_v25  ;;  %1049 = vmatprep.mubr.f32.mxu1 %v3251_v53  ;;  %v3271_v25 = vld [vmem:[#allocation2 + $0x22] sm:$0xff] }
  0x54   : > { %1204 = vmatprep.subr.mxu0 %v2773_v2  ;;  %1427 = vmatprep.subr.mxu1 %v2773_v2 }
  0x55   : > { %825 = vmatmul.mubr.f32.gmra.mxu0 %v413_v34  ;;  %1050 = vmatmul.mubr.f32.gmra.mxu1 %v3255_v57  ;;  %v3362_v34 = vld [vmem:[#allocation2 + $0x80] sm:$0xff] }
  0x56   : > { %1205 = vmatpush1.msra.mxu0 %v683_v60  ;;  %1428 = vmatpush1.msra.mxu1 %v716_v63  ;;  %v706_v60 = vld [vmem:[%s4299_s1 + $0x320] sm:$0xff]  ;;  %v3426_v63 = vld [vmem:[#allocation2 + $0xb0] sm:$0xff] }
  0x57   : > { %829 = vmatprep.mubr.f32.mxu0 %v2970_v28  ;;  %1054 = vmatprep.mubr.f32.mxu1 %v3268_v0  ;;  %v3286_v28 = vld [vmem:[#allocation2 + $0x32] sm:$0xff] }
  0x58   : > { %1206 = vmatprep.subr.mxu0 %v2773_v2  ;;  %1429 = vmatprep.subr.mxu1 %v2773_v2 }
  0x59   : > { %830 = vmatmul.mubr.f32.gmra.mxu0 %v414_v45  ;;  %1055 = vmatmul.mubr.f32.gmra.mxu1 %v3271_v25  ;;  %v708_v45 = vld [vmem:[%s4299_s1 + $0x330] sm:$0xff] }
  0x5a   : > { %1207 = vmatpush1.msra.mxu0 %v682_v4  ;;  %1430 = vmatpush1.msra.mxu1 %v715_v5  ;;  %v672_v4 = vld [vmem:[%s4299_s1 + $0x210] sm:$0xff]  ;;  %v705_v5 = vld [vmem:[%s4299_s1 + $0x318] sm:$0xff] }
  0x5b   : > { %834 = vmatprep.mubr.f32.mxu0 %v2974_v29  ;;  %1059 = vmatprep.mubr.f32.mxu1 %v3283_v6  ;;  %v3302_v29 = vld [vmem:[#allocation2 + $0x3a] sm:$0xff] }
  0x5c   : > { %1208 = vmatprep.subr.mxu0 %v2773_v2  ;;  %1431 = vmatprep.subr.mxu1 %v2773_v2 }
  0x5d   : > { %835 = vmatmul.mubr.f32.gmra.mxu0 %v3251_v53  ;;  %1060 = vmatmul.mubr.f32.gmra.mxu1 %v3286_v28 }
  0x5e   : > { %1209 = vmatpush1.msra.mxu0 %v681_v7  ;;  %1432 = vmatpush1.msra.mxu1 %v714_v9  ;;  %v3442_v7 = vld [vmem:[#allocation2 + $0xc0] sm:$0xff]  ;;  %v671_v9 = vld [vmem:[%s4299_s1 + $0x208] sm:$0xff] }
  0x5f   : > { %839 = vmatprep.mubr.f32.mxu0 %v2986_v32  ;;  %1064 = vmatprep.mubr.f32.mxu1 %v3298_v10  ;;  %v3318_v32 = vld [vmem:[#allocation2 + $0x4a] sm:$0xff] }
  0x60   : > { %1210 = vmatprep.subr.mxu0 %v2773_v2  ;;  %1433 = vmatprep.subr.mxu1 %v2773_v2 }
  0x61   : > { %840 = vmatmul.mubr.f32.gmra.mxu0 %v3268_v0  ;;  %1065 = vmatmul.mubr.f32.gmra.mxu1 %v3302_v29 }
  0x62   : > { %1211 = vmatpush1.msra.mxu0 %v680_v12  ;;  %1434 = vmatpush1.msra.mxu1 %v713_v13  ;;  %v704_v12 = vld [vmem:[%s4299_s1 + $0x310] sm:$0xff]  ;;  %v3458_v13 = vld [vmem:[#allocation2 + $0xc8] sm:$0xff] }
  0x63   : > { %844 = vmatprep.mubr.f32.mxu0 %v2990_v33  ;;  %1069 = vmatprep.mubr.f32.mxu1 %v3314_v15  ;;  %v3334_v33 = vld [vmem:[#allocation2 + $0x52] sm:$0xff] }
  0x64   : > { %1212 = vmatprep.subr.mxu0 %v2773_v2  ;;  %1435 = vmatprep.subr.mxu1 %v2773_v2 }
  0x65   : > { %845 = vmatmul.mubr.f32.gmra.mxu0 %v3283_v6  ;;  %1070 = vmatmul.mubr.f32.gmra.mxu1 %v3318_v32 }
  0x66   : > { %1213 = vmatpush1.msra.mxu0 %v679_v16  ;;  %1436 = vmatpush1.msra.mxu1 %v712_v19  ;;  %v670_v16 = vld [vmem:[%s4299_s1 + $0x200] sm:$0xff]  ;;  %v703_v19 = vld [vmem:[%s4299_s1 + $0x308] sm:$0xff] }
  0x67   : > { %849 = vmatprep.mubr.f32.mxu0 %v3002_v36  ;;  %1074 = vmatprep.mubr.f32.mxu1 %v3330_v20  ;;  %v3350_v36 = vld [vmem:[#allocation2 + $0x62] sm:$0xff] }
  0x68   : > { %1214 = vmatprep.subr.mxu0 %v2773_v2  ;;  %1437 = vmatprep.subr.mxu1 %v2773_v2 }
  0x69   : > { %850 = vmatmul.mubr.f32.gmra.mxu0 %v3298_v10  ;;  %1075 = vmatmul.mubr.f32.gmra.mxu1 %v3334_v33 }
  0x6a   : > { %1215 = vmatpush1.msra.mxu0 %v678_v22  ;;  %1438 = vmatpush1.msra.mxu1 %v711_v23  ;;  %v3474_v22 = vld [vmem:[#allocation2 + $0xd8] sm:$0xff] }
  0x6b   : > { %854 = vmatprep.mubr.f32.mxu0 %v3006_v37  ;;  %1079 = vmatprep.mubr.f32.mxu1 %v3346_v26  ;;  %v3366_v37 = vld [vmem:[#allocation2 + $0x6a] sm:$0xff]  ;;  %v701_v23 = vld [vmem:[%s4299_s1 + $0x2f8] sm:$0xff] }
  0x6c   : > { %1216 = vmatprep.subr.mxu0 %v2773_v2  ;;  %1439 = vmatprep.subr.mxu1 %v2773_v2 }
  0x6d   : > { %855 = vmatmul.mubr.f32.gmra.mxu0 %v3314_v15  ;;  %1080 = vmatmul.mubr.f32.gmra.mxu1 %v3350_v36 }
  0x6e   : > { %1217 = vmatpush1.msra.mxu0 %v677_v27  ;;  %1440 = vmatpush1.msra.mxu1 %v710_v31  ;;  %v702_v27 = vld [vmem:[%s4299_s1 + $0x300] sm:$0xff] }
  0x6f   : > { %859 = vmatprep.mubr.f32.mxu0 %v3018_v40  ;;  %1084 = vmatprep.mubr.f32.mxu1 %v3362_v34  ;;  %v3382_v40 = vld [vmem:[#allocation2 + $0x7a] sm:$0xff] }
  0x70   : > { %1218 = vmatprep.subr.mxu0 %v2773_v2  ;;  %1441 = vmatprep.subr.mxu1 %v2773_v2  ;;  %v3490_v31 = vld [vmem:[#allocation2 + $0xe0] sm:$0xff] }
  0x71   : > { %860 = vmatmul.mubr.f32.gmra.mxu0 %v3330_v20  ;;  %1085 = vmatmul.mubr.f32.gmra.mxu1 %v3366_v37 }
  0x72   : > { %1219 = vmatpush1.msra.mxu0 %v676_v38  ;;  %1442 = vmatpush1.msra.mxu1 %v709_v39  ;;  %v700_v38 = vld [vmem:[%s4299_s1 + $0x2f0] sm:$0xff]  ;;  %v733_v39 = vld [vmem:[%s4299_s1 + $0x3f8] sm:$0xff] }
  0x73   : > { %864 = vmatprep.mubr.f32.mxu0 %v3030_v43  ;;  %1089 = vmatprep.mubr.f32.mxu1 %v3378_v41  ;;  %v3398_v43 = vld [vmem:[#allocation2 + $0x82] sm:$0xff] }
  0x74   : > { %1220 = vmatprep.subr.mxu0 %v2773_v2  ;;  %1443 = vmatprep.subr.mxu1 %v2773_v2 }
  0x75   : > { %865 = vmatmul.mubr.f32.gmra.mxu0 %v3346_v26  ;;  %1090 = vmatmul.mubr.f32.gmra.mxu1 %v3382_v40 }
  0x76   : > { %1221 = vmatpush1.msra.mxu0 %v675_v44  ;;  %1444 = vmatpush1.msra.mxu1 %v708_v45  ;;  %v3506_v44 = vld [vmem:[#allocation2 + $0xf0] sm:$0xff]  ;;  %v699_v45 = vld [vmem:[%s4299_s1 + $0x2e8] sm:$0xff] }
  0x77   : > { %869 = vmatprep.mubr.f32.mxu0 %v3042_v46  ;;  %1094 = vmatprep.mubr.f32.mxu1 %v3394_v48  ;;  %v3414_v46 = vld [vmem:[#allocation2 + $0x92] sm:$0xff] }
  0x78   : > { %1222 = vmatprep.subr.mxu0 %v2773_v2  ;;  %1445 = vmatprep.subr.mxu1 %v2773_v2 }
  0x79   : > { %870 = vmatmul.mubr.f32.gmra.mxu0 %v3362_v34  ;;  %1095 = vmatmul.mubr.f32.gmra.mxu1 %v3398_v43 }
  0x7a   : > { %1223 = vmatpush1.msra.mxu0 %v674_v50  ;;  %1446 = vmatpush1.msra.mxu1 %v707_v52  ;;  %v3520_v50 = vld [vmem:[#allocation2 + $0x8] sm:$0xff]  ;;  %v3524_v52 = vld [vmem:[#allocation2 + $0xf8] sm:$0xff] }
  0x7b   : > { %874 = vmatprep.mubr.f32.mxu0 %v3062_v51  ;;  %1099 = vmatprep.mubr.f32.mxu1 %v3410_v56  ;;  %v3430_v51 = vld [vmem:[#allocation2 + $0x9a] sm:$0xff] }
  0x7c   : > { %1224 = vmatprep.subr.mxu0 %v2773_v2  ;;  %1447 = vmatprep.subr.mxu1 %v2773_v2 }
  0x7d   : > { %875 = vmatmul.mubr.f32.gmra.mxu0 %v3378_v41  ;;  %1100 = vmatmul.mubr.f32.gmra.mxu1 %v3414_v46 }
  0x7e   : > { %1225 = vmatpush1.msra.mxu0 %v673_v59  ;;  %1448 = vmatpush1.msra.mxu1 %v706_v60  ;;  %v698_v59 = vld [vmem:[%s4299_s1 + $0x2e0] sm:$0xff]  ;;  %v731_v60 = vld [vmem:[%s4299_s1 + $0x3e8] sm:$0xff] }
  0x7f   : > { %879 = vmatprep.mubr.f32.mxu0 %v3074_v54  ;;  %1104 = vmatprep.mubr.f32.mxu1 %v3426_v63  ;;  %v3446_v54 = vld [vmem:[#allocation2 + $0xaa] sm:$0xff] }
  0x80   : > { %1226 = vmatprep.subr.mxu0 %v2773_v2  ;;  %1449 = vmatprep.subr.mxu1 %v2773_v2 }
  0x81   : > { %880 = vmatmul.mubr.f32.gmra.mxu0 %v3394_v48  ;;  %1105 = vmatmul.mubr.f32.gmra.mxu1 %v3430_v51 }
  0x82   : > { %1227 = vmatpush1.msra.mxu0 %v672_v4  ;;  %1450 = vmatpush1.msra.mxu1 %v705_v5  ;;  %v3540_v4 = vld [vmem:[#allocation2 + $0x108] sm:$0xff]  ;;  %v697_v5 = vld [vmem:[%s4299_s1 + $0x2d8] sm:$0xff] }
  0x83   : > { %884 = vmatprep.mubr.f32.mxu0 %v3078_v55  ;;  %1109 = vmatprep.mubr.f32.mxu1 %v3442_v7  ;;  %v3462_v55 = vld [vmem:[#allocation2 + $0xb2] sm:$0xff] }
  0x84   : > { %1228 = vmatprep.subr.mxu0 %v2773_v2  ;;  %1451 = vmatprep.subr.mxu1 %v2773_v2 }
  0x85   : > { %885 = vmatmul.mubr.f32.gmra.mxu0 %v3410_v56  ;;  %1110 = vmatmul.mubr.f32.gmra.mxu1 %v3446_v54 }
  0x86   : > { %1229 = vmatpush1.msra.mxu0 %v671_v9  ;;  %1452 = vmatpush1.msra.mxu1 %v704_v12  ;;  %v730_v9 = vld [vmem:[%s4299_s1 + $0x3e0] sm:$0xff]  ;;  %v3556_v12 = vld [vmem:[#allocation2 + $0x110] sm:$0xff] }
  0x87   : > { %889 = vmatprep.mubr.f32.mxu0 %v3090_v58  ;;  %1114 = vmatprep.mubr.f32.mxu1 %v3458_v13  ;;  %v3478_v58 = vld [vmem:[#allocation2 + $0xc2] sm:$0xff] }
  0x88   : > { %1230 = vmatprep.subr.mxu0 %v2773_v2  ;;  %1453 = vmatprep.subr.mxu1 %v2773_v2 }
  0x89   : > { %890 = vmatmul.mubr.f32.gmra.mxu0 %v3426_v63  ;;  %1115 = vmatmul.mubr.f32.gmra.mxu1 %v3462_v55 }
  0x8a   : > { %1231 = vmatpush1.msra.mxu0 %v670_v16  ;;  %1454 = vmatpush1.msra.mxu1 %v703_v19  ;;  %v696_v16 = vld [vmem:[%s4299_s1 + $0x2d0] sm:$0xff]  ;;  %v729_v19 = vld [vmem:[%s4299_s1 + $0x3d8] sm:$0xff] }
  0x8b   : > { %894 = vmatprep.mubr.f32.mxu0 %v3102_v61  ;;  %1119 = vmatprep.mubr.f32.mxu1 %v3474_v22  ;;  %v3494_v61 = vld [vmem:[#allocation2 + $0xca] sm:$0xff] }
  0x8c   : > { %1232 = vmatprep.subr.mxu0 %v2773_v2  ;;  %1455 = vmatprep.subr.mxu1 %v2773_v2 }
  0x8d   : > { %895 = vmatmul.mubr.f32.gmra.mxu0 %v3442_v7  ;;  %1120 = vmatmul.mubr.f32.gmra.mxu1 %v3478_v58 }
  0x8e   : > { %1233 = vmatpush2.msra.mxu0 %v701_v23  ;;  %1456 = vmatpush1.msra.mxu1 %v702_v27  ;;  %v3572_v23 = vld [vmem:[#allocation2 + $0x120] sm:$0xff]  ;;  %v695_v27 = vld [vmem:[%s4299_s1 + $0x2c8] sm:$0xff] }
  0x8f   : > { %899 = vmatprep.mubr.f32.mxu0 %v3106_v62  ;;  %1124 = vmatprep.mubr.f32.mxu1 %v3490_v31  ;;  %v3510_v62 = vld [vmem:[#allocation2 + $0xda] sm:$0xff] }
  0x90   : > { %1234 = vmatprep.subr.mxu0 %v2773_v2  ;;  %1457 = vmatprep.subr.mxu1 %v2773_v2  ;;  %v732_v2 = vld [vmem:[%s4299_s1 + $0x3f0] sm:$0xff] }
  0x91   : > { %900 = vmatmul.mubr.f32.gmra.mxu0 %v3458_v13  ;;  %1125 = vmatmul.mubr.f32.gmra.mxu1 %v3494_v61 }
  0x92   : > { %1235 = vmatpush2.msra.mxu0 %v700_v38  ;;  %1458 = vmatpush2.msra.mxu1 %v733_v39  ;;  %v728_v38 = vld [vmem:[%s4299_s1 + $0x3d0] sm:$0xff]  ;;  %v3588_v39 = vld [vmem:[#allocation2 + $0x128] sm:$0xff] }
  0x93   : > { %904 = vmatprep.mubr.f32.mxu0 %v3118_v1  ;;  %1129 = vmatprep.mubr.f32.mxu1 %v3506_v44  ;;  %v3528_v1 = vld [vmem:[#allocation2 + $0xe2] sm:$0xff] }
  0x94   : > { %1236 = vmatprep.subr.mxu0 %v3520_v50  ;;  %1459 = vmatprep.subr.mxu1 %v3520_v50 }
  0x95   : > { %905 = vmatmul.mubr.f32.gmra.mxu0 %v3474_v22  ;;  %1130 = vmatmul.mubr.f32.gmra.mxu1 %v3510_v62 }
  0x96   : > { %1237 = vmatpush2.msra.mxu0 %v699_v45  ;;  %1460 = vmatpush2.msra.mxu1 %v732_v2  ;;  %v694_v45 = vld [vmem:[%s4299_s1 + $0x2c0] sm:$0xff]  ;;  %v727_v2 = vld [vmem:[%s4299_s1 + $0x3c8] sm:$0xff] }
  0x97   : > { %909 = vmatprep.mubr.f32.mxu0 %v3122_v3  ;;  %1134 = vmatprep.mubr.f32.mxu1 %v3524_v52  ;;  %v3544_v3 = vld [vmem:[#allocation2 + $0xf2] sm:$0xff] }
  0x98   : > { %1238 = vmatprep.subr.mxu0 %v3520_v50  ;;  %1461 = vmatprep.subr.mxu1 %v3520_v50 }
  0x99   : > { %910 = vmatmul.mubr.f32.gmra.mxu0 %v3490_v31  ;;  %1135 = vmatmul.mubr.f32.gmra.mxu1 %v3528_v1 }
  0x9a   : > { %1239 = vmatpush2.msra.mxu0 %v698_v59  ;;  %1462 = vmatpush2.msra.mxu1 %v731_v60  ;;  %v3604_v59 = vld [vmem:[#allocation2 + $0x138] sm:$0xff] }
  0x9b   : > { %914 = vmatprep.mubr.f32.mxu0 %v3142_v8  ;;  %1139 = vmatprep.mubr.f32.mxu1 %v3540_v4  ;;  %v3560_v8 = vld [vmem:[#allocation2 + $0xfa] sm:$0xff] }
  0x9c   : > { %1240 = vmatprep.subr.mxu0 %v3520_v50  ;;  %1463 = vmatprep.subr.mxu1 %v3520_v50  ;;  %v693_v60 = vld [vmem:[%s4299_s1 + $0x2b8] sm:$0xff] }
  0x9d   : > { %915 = vmatmul.mubr.f32.gmra.mxu0 %v3506_v44  ;;  %1140 = vmatmul.mubr.f32.gmra.mxu1 %v3544_v3 }
  0x9e   : > { %1241 = vmatpush2.msra.mxu0 %v697_v5  ;;  %1464 = vmatpush2.msra.mxu1 %v730_v9  ;;  %v726_v5 = vld [vmem:[%s4299_s1 + $0x3c0] sm:$0xff] }
  0x9f   : > { %919 = vmatprep.mubr.f32.mxu0 %v3154_v11  ;;  %1144 = vmatprep.mubr.f32.mxu1 %v3556_v12  ;;  %v3576_v11 = vld [vmem:[#allocation2 + $0x10a] sm:$0xff]  ;;  %v3620_v9 = vld [vmem:[#allocation2 + $0x140] sm:$0xff] }
  0xa0   : > { %1242 = vmatprep.subr.mxu0 %v3520_v50  ;;  %1465 = vmatprep.subr.mxu1 %v3520_v50 }
  0xa1   : > { %920 = vmatmul.mubr.f32.gmra.mxu0 %v3524_v52  ;;  %1145 = vmatmul.mubr.f32.gmra.mxu1 %v3560_v8 }
  0xa2   : > { %1243 = vmatpush2.msra.mxu0 %v696_v16  ;;  %1466 = vmatpush2.msra.mxu1 %v729_v19  ;;  %v692_v16 = vld [vmem:[%s4299_s1 + $0x2b0] sm:$0xff]  ;;  %v725_v19 = vld [vmem:[%s4299_s1 + $0x3b8] sm:$0xff] }
  0xa3   : > { %924 = vmatprep.mubr.f32.mxu0 %v3166_v14  ;;  %1149 = vmatprep.mubr.f32.mxu1 %v3572_v23  ;;  %v3592_v14 = vld [vmem:[#allocation2 + $0x112] sm:$0xff] }
  0xa4   : > { %1244 = vmatprep.subr.mxu0 %v3520_v50  ;;  %1467 = vmatprep.subr.mxu1 %v3520_v50 }
  0xa5   : > { %925 = vmatmul.mubr.f32.gmra.mxu0 %v3540_v4  ;;  %1150 = vmatmul.mubr.f32.gmra.mxu1 %v3576_v11 }
  0xa6   : > { %1245 = vmatpush2.msra.mxu0 %v695_v27  ;;  %1468 = vmatpush2.msra.mxu1 %v728_v38  ;;  %v3636_v27 = vld [vmem:[#allocation2 + $0x150] sm:$0xff]  ;;  %v691_v38 = vld [vmem:[%s4299_s1 + $0x2a8] sm:$0xff] }
  0xa7   : > { %929 = vmatprep.mubr.f32.mxu0 %v3178_v17  ;;  %1154 = vmatprep.mubr.f32.mxu1 %v3588_v39  ;;  %v3608_v17 = vld [vmem:[#allocation2 + $0x122] sm:$0xff] }
  0xa8   : > { %1246 = vmatprep.subr.mxu0 %v3520_v50  ;;  %1469 = vmatprep.subr.mxu1 %v3520_v50 }
  0xa9   : > { %930 = vmatmul.mubr.f32.gmra.mxu0 %v3556_v12  ;;  %1155 = vmatmul.mubr.f32.gmra.mxu1 %v3592_v14 }
  0xaa   : > { %1247 = vmatpush2.msra.mxu0 %v694_v45  ;;  %1470 = vmatpush2.msra.mxu1 %v727_v2  ;;  %v724_v45 = vld [vmem:[%s4299_s1 + $0x3b0] sm:$0xff]  ;;  %v3652_v2 = vld [vmem:[#allocation2 + $0x158] sm:$0xff] }
  0xab   : > { %934 = vmatprep.mubr.f32.mxu0 %v3182_v18  ;;  %1159 = vmatprep.mubr.f32.mxu1 %v3604_v59  ;;  %v3624_v18 = vld [vmem:[#allocation2 + $0x12a] sm:$0xff] }
  0xac   : > { %1248 = vmatprep.subr.mxu0 %v3520_v50  ;;  %1471 = vmatprep.subr.mxu1 %v3520_v50 }
  0xad   : > { %935 = vmatmul.mubr.f32.gmra.mxu0 %v3572_v23  ;;  %1160 = vmatmul.mubr.f32.gmra.mxu1 %v3608_v17 }
  0xae   : > { %1249 = vmatpush2.msra.mxu0 %v693_v60  ;;  %1472 = vmatpush2.msra.mxu1 %v726_v5  ;;  %v690_v60 = vld [vmem:[%s4299_s1 + $0x2a0] sm:$0xff]  ;;  %v723_v5 = vld [vmem:[%s4299_s1 + $0x3a8] sm:$0xff] }
  0xaf   : > { %939 = vmatprep.mubr.f32.mxu0 %v3194_v21  ;;  %1164 = vmatprep.mubr.f32.mxu1 %v3620_v9  ;;  %v3640_v21 = vld [vmem:[#allocation2 + $0x13a] sm:$0xff] }
  0xb0   : > { %1250 = vmatprep.subr.mxu0 %v3520_v50  ;;  %1473 = vmatprep.subr.mxu1 %v3520_v50 }
  0xb1   : > { %940 = vmatmul.mubr.f32.gmra.mxu0 %v3588_v39  ;;  %1165 = vmatmul.mubr.f32.gmra.mxu1 %v3624_v18 }
  0xb2   : > { %1251 = vmatpush2.msra.mxu0 %v692_v16  ;;  %1474 = vmatpush2.msra.mxu1 %v725_v19  ;;  %v3668_v16 = vld [vmem:[#allocation2 + $0x168] sm:$0xff]  ;;  %v689_v19 = vld [vmem:[%s4299_s1 + $0x298] sm:$0xff] }
  0xb3   : > { %944 = vmatprep.mubr.f32.mxu0 %v3206_v24  ;;  %1169 = vmatprep.mubr.f32.mxu1 %v3636_v27  ;;  %v3656_v24 = vld [vmem:[#allocation2 + $0x142] sm:$0xff] }
  0xb4   : > { %1252 = vmatprep.subr.mxu0 %v3520_v50  ;;  %1475 = vmatprep.subr.mxu1 %v3520_v50 }
  0xb5   : > { %945 = vmatmul.mubr.f32.gmra.mxu0 %v3604_v59  ;;  %1170 = vmatmul.mubr.f32.gmra.mxu1 %v3640_v21 }
  0xb6   : > { %1253 = vmatpush2.msra.mxu0 %v691_v38  ;;  %1476 = vmatpush2.msra.mxu1 %v724_v45  ;;  %v722_v38 = vld [vmem:[%s4299_s1 + $0x3a0] sm:$0xff]  ;;  %v3684_v45 = vld [vmem:[#allocation2 + $0x170] sm:$0xff] }
  0xb7   : > { %949 = vmatprep.mubr.f32.mxu0 %v3215_v30  ;;  %1174 = vmatprep.mubr.f32.mxu1 %v3652_v2  ;;  %v3672_v30 = vld [vmem:[#allocation2 + $0x152] sm:$0xff] }
  0xb8   : > { %1254 = vmatprep.subr.mxu0 %v3520_v50  ;;  %1477 = vmatprep.subr.mxu1 %v3520_v50  ;;  %4306 = vst [vmem:[#allocation3_spill] sm:$0xff] %v3672_v30 }
  0xb9   : > { %950 = vmatmul.mubr.f32.gmra.mxu0 %v3620_v9  ;;  %1175 = vmatmul.mubr.f32.gmra.mxu1 %v3656_v24 }
  0xba   : > { %1255 = vmatpush2.msra.mxu0 %v690_v60  ;;  %1478 = vmatpush2.msra.mxu1 %v723_v5  ;;  %v688_v60 = vld [vmem:[%s4299_s1 + $0x290] sm:$0xff]  ;;  %v721_v5 = vld [vmem:[%s4299_s1 + $0x398] sm:$0xff] }
  0xbb   : > { %954 = vmatprep.mubr.f32.mxu0 %v3222_v35  ;;  %1179 = vmatprep.mubr.f32.mxu1 %v3668_v16  ;;  %v3688_v35 = vld [vmem:[#allocation2 + $0x15a] sm:$0xff] }
  0xbc   : > { %1256 = vmatprep.subr.mxu0 %v3520_v50  ;;  %1479 = vmatprep.subr.mxu1 %v3520_v50 }
  0xbd   : > { %955 = vmatmul.mubr.f32.gmra.mxu0 %v3636_v27  ;;  %1180 = vmatmul.mubr.f32.gmra.mxu1 %v3672_v30  ;;  %v720_v30 = vld [vmem:[%s4299_s1 + $0x390] sm:$0xff] }
  0xbe   : > { %1257 = vmatpush2.msra.mxu0 %v689_v19  ;;  %1480 = vmatpush2.msra.mxu1 %v722_v38  ;;  %v3700_v19 = vld [vmem:[#allocation2 + $0x180] sm:$0xff]  ;;  %v687_v38 = vld [vmem:[%s4299_s1 + $0x288] sm:$0xff] }
  0xbf   : > { %959 = vmatprep.mubr.f32.mxu0 %v3228_v42  ;;  %1184 = vmatprep.mubr.f32.mxu1 %v3684_v45  ;;  %4307 = vst [vmem:[#allocation4_spill] sm:$0xff] %v3700_v19  ;;  %v3704_v42 = vld [vmem:[#allocation2 + $0x16a] sm:$0xff] }
  0xc0   : > { %1258 = vmatprep.subr.mxu0 %v3520_v50  ;;  %1481 = vmatprep.subr.mxu1 %v3520_v50 }
  0xc1   : > { %960 = vmatmul.mubr.f32.gmra.mxu0 %v3652_v2  ;;  %1185 = vmatmul.mubr.f32.gmra.mxu1 %v3688_v35 }
  0xc2   : > { %1259 = vmatpush2.msra.mxu0 %v688_v60  ;;  %1482 = vmatpush2.msra.mxu1 %v721_v5  ;;  %v3716_v60 = vld [vmem:[#allocation2 + $0x188] sm:$0xff]  ;;  %v686_v5 = vld [vmem:[%s4299_s1 + $0x280] sm:$0xff] }
  0xc3   : > { %964 = vmatprep.mubr.f32.mxu0 %v3235_v47  ;;  %1189 = vmatprep.mubr.f32.mxu1 %v3700_v19  ;;  %4308 = vst [vmem:[#allocation5_spill] sm:$0xff] %v3716_v60  ;;  %v3720_v47 = vld [vmem:[#allocation2 + $0x172] sm:$0xff]  ;;  %v719_v19 = vld [vmem:[%s4299_s1 + $0x388] sm:$0xff] }
  0xc4   : > { %1260 = vmatprep.subr.mxu0 %v3520_v50  ;;  %1483 = vmatprep.subr.mxu1 %v3520_v50 }
  0xc5   : > { %965 = vmatmul.mubr.f32.gmra.mxu0 %v3668_v16  ;;  %1190 = vmatmul.mubr.f32.gmra.mxu1 %v3704_v42 }
  0xc6   : > { %1261 = vmatpush2.msra.mxu0 %v687_v38  ;;  %1484 = vmatpush2.msra.mxu1 %v720_v30  ;;  %v445_v30 = vld [vmem:[#allocation2 + $0x19] sm:$0xff] }
  0xc7   : > { %969 = vmatprep.mubr.f32.mxu0 %v3240_v49  ;;  %1194 = vmatprep.mubr.f32.mxu1 %v3716_v60  ;;  %v718_v49 = vld [vmem:[%s4299_s1 + $0x380] sm:$0xff]  ;;  %v749_v38 = vld [vmem:[%s4299_s1 + $0x478] sm:$0xff] }
  0xc8   : > { %1262 = vmatprep.subr.mxu0 %v3520_v50  ;;  %1485 = vmatprep.subr.mxu1 %v3520_v50  ;;  %v3742_v60 = vld [vmem:[#allocation2 + $0x31] sm:$0xff] }
  0xc9   : > { %970 = vmatmul.mubr.f32.gmra.mxu0 %v3684_v45  ;;  %1195 = vmatmul.mubr.f32.gmra.mxu1 %v3720_v47 }
  0xca   : > { %1263 = vmatpush2.msra.mxu0 %v686_v5  ;;  %1486 = vmatpush2.msra.mxu1 %v719_v19  ;;  %v2028_v19 = vld [vmem:[%s4300_s2 + $0x78] sm:$0xff] }
  0xcb   : > { %1487 = vmatprep.subr.mxu1 %v3520_v50  ;;  %1264 = vmatprep.mubr.f32.mxu0 %v3255_v57  ;;  %v748_v57 = vld [vmem:[%s4299_s1 + $0x470] sm:$0xff]  ;;  %v3753_v5 = vld [vmem:[#allocation2 + $0x39] sm:$0xff] }
  0xcc   : > { %1488 = vmatpush2.msra.mxu1 %v718_v49  ;;  %1489 = vmatprep.mubr.f32.mxu1 %v3742_v60  ;;  %v3756_v49 = vld [vmem:[#allocation2 + $0x21] sm:$0xff] }
  0xcd   : > { %1265 = vmatmul.mubr.f32.vlgmr.msra.gmra.mxu0 %v445_v30  ;;  %1490 = vmatmul.mubr.f32.vlgmr.msra.gmra.mxu1 %v3251_v53  ;;  %v2027_v53 = vld [vmem:[%s4300_s2 + $0x70] sm:$0xff] }
  0xce   : > { %2563 = vmatprep.subr.mxu0 %v749_v38  ;;  %1269 = vmatprep.mubr.f32.mxu0 %v3271_v25  ;;  %v747_v25 = vld [vmem:[%s4299_s1 + $0x468] sm:$0xff] }
  0xcf   : > { %2564 = vmatpush3.msra.mxu0 %v749_v38  ;;  %1494 = vmatprep.mubr.f32.mxu1 %v3753_v5  ;;  %v3767_v30 = vld [vmem:[#allocation2 + $0x49] sm:$0xff]  ;;  %v746_v38 = vld [vmem:[%s4299_s1 + $0x460] sm:$0xff] }
  0xd0   : > { %2643 = vmatprep.subr.mxu1 %v2028_v19  ;;  %2565 = vmatprep.subr.mxu0 %v748_v57 }
  0xd1   : > { %1270 = vmatmul.mubr.f32.gmra.mxu0 %v3756_v49  ;;  %1495 = vmatmul.mubr.f32.gmra.mxu1 %v3268_v0  ;;  %v2026_v0 = vld [vmem:[%s4300_s2 + $0x68] sm:$0xff] }
  0xd2   : > { %2644 = vmatpush3.msra.mxu1 %v2028_v19  ;;  %1274 = vmatprep.mubr.f32.mxu0 %v3286_v28  ;;  %v3779_v28 = vld [vmem:[#allocation2 + $0x51] sm:$0xff]  ;;  %v3791_v19 = vld [vmem:[#allocation2 + $0x61] sm:$0xff] }
  0xd3   : > { %1499 = vmatprep.mubr.f32.mxu1 %v3767_v30  ;;  %2566 = vmatpush3.msra.mxu0 %v748_v57  ;;  %v3803_v57 = vld [vmem:[#allocation2 + $0x69] sm:$0xff] }
  0xd4   : > { %2645 = vmatprep.subr.mxu1 %v2027_v53  ;;  %2567 = vmatprep.subr.mxu0 %v747_v25 }
  0xd5   : > { %1275 = vmatmul.mubr.f32.gmra.mxu0 %v3742_v60  ;;  %1500 = vmatmul.mubr.f32.gmra.mxu1 %v3283_v6  ;;  %v2025_v6 = vld [vmem:[%s4300_s2 + $0x60] sm:$0xff] }
  0xd6   : > { %1279 = vmatprep.mubr.f32.mxu0 %v3302_v29  ;;  %1504 = vmatprep.mubr.f32.mxu1 %v3779_v28  ;;  %v745_v29 = vld [vmem:[%s4299_s1 + $0x458] sm:$0xff] }
  0xd7   : > { %2646 = vmatpush3.msra.mxu1 %v2027_v53  ;;  %2568 = vmatpush3.msra.mxu0 %v747_v25  ;;  %v3815_v53 = vld [vmem:[#allocation2 + $0x79] sm:$0xff]  ;;  %v3827_v25 = vld [vmem:[#allocation2 + $0x81] sm:$0xff] }
  0xd8   : > { %2647 = vmatprep.subr.mxu1 %v2026_v0  ;;  %2569 = vmatprep.subr.mxu0 %v746_v38 }
  0xd9   : > { %1280 = vmatmul.mubr.f32.gmra.mxu0 %v3753_v5  ;;  %1505 = vmatmul.mubr.f32.gmra.mxu1 %v3298_v10  ;;  %v2024_v10 = vld [vmem:[%s4300_s2 + $0x58] sm:$0xff] }
  0xda   : > { %1284 = vmatprep.mubr.f32.mxu0 %v3318_v32  ;;  %1509 = vmatprep.mubr.f32.mxu1 %v3791_v19  ;;  %v744_v32 = vld [vmem:[%s4299_s1 + $0x450] sm:$0xff] }
  0xdb   : > { %2648 = vmatpush3.msra.mxu1 %v2026_v0  ;;  %2570 = vmatpush3.msra.mxu0 %v746_v38  ;;  %v3839_v0 = vld [vmem:[#allocation2 + $0x91] sm:$0xff]  ;;  %v3851_v38 = vld [vmem:[#allocation2 + $0x99] sm:$0xff] }
  0xdc   : > { %2649 = vmatprep.subr.mxu1 %v2025_v6  ;;  %2571 = vmatprep.subr.mxu0 %v745_v29 }
  0xdd   : > { %1285 = vmatmul.mubr.f32.gmra.mxu0 %v3767_v30  ;;  %1510 = vmatmul.mubr.f32.gmra.mxu1 %v3314_v15  ;;  %v2023_v15 = vld [vmem:[%s4300_s2 + $0x50] sm:$0xff] }
  0xde   : > { %1289 = vmatprep.mubr.f32.mxu0 %v3334_v33  ;;  %1514 = vmatprep.mubr.f32.mxu1 %v3803_v57  ;;  %v743_v33 = vld [vmem:[%s4299_s1 + $0x448] sm:$0xff] }
  0xdf   : > { %2650 = vmatpush3.msra.mxu1 %v2025_v6  ;;  %2572 = vmatpush3.msra.mxu0 %v745_v29  ;;  %v3863_v6 = vld [vmem:[#allocation2 + $0xa9] sm:$0xff]  ;;  %v3875_v29 = vld [vmem:[#allocation2 + $0xb1] sm:$0xff] }
  0xe0   : > { %2651 = vmatprep.subr.mxu1 %v2024_v10  ;;  %2573 = vmatprep.subr.mxu0 %v744_v32 }
  0xe1   : > { %1290 = vmatmul.mubr.f32.gmra.mxu0 %v3779_v28  ;;  %1515 = vmatmul.mubr.f32.gmra.mxu1 %v3330_v20  ;;  %v2022_v20 = vld [vmem:[%s4300_s2 + $0x48] sm:$0xff] }
  0xe2   : > { %1294 = vmatprep.mubr.f32.mxu0 %v3350_v36  ;;  %1519 = vmatprep.mubr.f32.mxu1 %v3815_v53  ;;  %v742_v36 = vld [vmem:[%s4299_s1 + $0x440] sm:$0xff] }
  0xe3   : > { %2652 = vmatpush3.msra.mxu1 %v2024_v10  ;;  %2574 = vmatpush3.msra.mxu0 %v744_v32  ;;  %v3887_v10 = vld [vmem:[#allocation2 + $0xc1] sm:$0xff]  ;;  %v3899_v32 = vld [vmem:[#allocation2 + $0xc9] sm:$0xff] }
  0xe4   : > { %2653 = vmatprep.subr.mxu1 %v2023_v15  ;;  %2575 = vmatprep.subr.mxu0 %v743_v33 }
  0xe5   : > { %1295 = vmatmul.mubr.f32.gmra.mxu0 %v3791_v19  ;;  %1520 = vmatmul.mubr.f32.gmra.mxu1 %v3346_v26  ;;  %v2021_v26 = vld [vmem:[%s4300_s2 + $0x40] sm:$0xff] }
  0xe6   : > { %1299 = vmatprep.mubr.f32.mxu0 %v3366_v37  ;;  %1524 = vmatprep.mubr.f32.mxu1 %v3827_v25  ;;  %v741_v37 = vld [vmem:[%s4299_s1 + $0x438] sm:$0xff] }
  0xe7   : > { %2654 = vmatpush3.msra.mxu1 %v2023_v15  ;;  %2576 = vmatpush3.msra.mxu0 %v743_v33  ;;  %v3911_v15 = vld [vmem:[#allocation2 + $0xd9] sm:$0xff]  ;;  %v3923_v33 = vld [vmem:[#allocation2 + $0xe1] sm:$0xff] }
  0xe8   : > { %2655 = vmatprep.subr.mxu1 %v2022_v20  ;;  %2577 = vmatprep.subr.mxu0 %v742_v36 }
  0xe9   : > { %1300 = vmatmul.mubr.f32.gmra.mxu0 %v3803_v57  ;;  %1525 = vmatmul.mubr.f32.gmra.mxu1 %v3362_v34  ;;  %v2020_v34 = vld [vmem:[%s4300_s2 + $0x38] sm:$0xff] }
  0xea   : > { %1304 = vmatprep.mubr.f32.mxu0 %v3382_v40  ;;  %1529 = vmatprep.mubr.f32.mxu1 %v3839_v0  ;;  %v740_v40 = vld [vmem:[%s4299_s1 + $0x430] sm:$0xff] }
  0xeb   : > { %2656 = vmatpush3.msra.mxu1 %v2022_v20  ;;  %2578 = vmatpush3.msra.mxu0 %v742_v36  ;;  %v3932_v20 = vld [vmem:[#allocation2 + $0xf1] sm:$0xff] }
  0xec   : > { %2657 = vmatprep.subr.mxu1 %v2021_v26  ;;  %2579 = vmatprep.subr.mxu0 %v741_v37 }
  0xed   : > { %1305 = vmatmul.mubr.f32.gmra.mxu0 %v3815_v53  ;;  %1530 = vmatmul.mubr.f32.gmra.mxu1 %v3378_v41  ;;  %v2019_v41 = vld [vmem:[%s4300_s2 + $0x30] sm:$0xff] }
  0xee   : > { %1309 = vmatprep.mubr.f32.mxu0 %v3398_v43  ;;  %1534 = vmatprep.mubr.f32.mxu1 %v3851_v38  ;;  %v739_v43 = vld [vmem:[%s4299_s1 + $0x428] sm:$0xff] }
  0xef   : > { %2658 = vmatpush3.msra.mxu1 %v2021_v26  ;;  %2580 = vmatpush3.msra.mxu0 %v741_v37  ;;  %v3940_v26 = vld [vmem:[#allocation2 + $0xf9] sm:$0xff] }
  0xf0   : > { %2659 = vmatprep.subr.mxu1 %v2020_v34  ;;  %2581 = vmatprep.subr.mxu0 %v740_v40 }
  0xf1   : > { %1310 = vmatmul.mubr.f32.gmra.mxu0 %v3827_v25  ;;  %1535 = vmatmul.mubr.f32.gmra.mxu1 %v3394_v48  ;;  %v2018_v48 = vld [vmem:[%s4300_s2 + $0x28] sm:$0xff] }
  0xf2   : > { %1314 = vmatprep.mubr.f32.mxu0 %v3414_v46  ;;  %1539 = vmatprep.mubr.f32.mxu1 %v3863_v6  ;;  %v738_v46 = vld [vmem:[%s4299_s1 + $0x420] sm:$0xff] }
  0xf3   : > { %2660 = vmatpush3.msra.mxu1 %v2020_v34  ;;  %2582 = vmatpush3.msra.mxu0 %v740_v40 }
  0xf4   : > { %2661 = vmatprep.subr.mxu1 %v2019_v41  ;;  %2583 = vmatprep.subr.mxu0 %v739_v43 }
  0xf5   : > { %1315 = vmatmul.mubr.f32.gmra.mxu0 %v3839_v0  ;;  %1540 = vmatmul.mubr.f32.gmra.mxu1 %v3410_v56  ;;  %v2017_v56 = vld [vmem:[%s4300_s2 + $0x20] sm:$0xff] }
  0xf6   : > { %1319 = vmatprep.mubr.f32.mxu0 %v3430_v51  ;;  %1544 = vmatprep.mubr.f32.mxu1 %v3875_v29  ;;  %v737_v51 = vld [vmem:[%s4299_s1 + $0x418] sm:$0xff] }
  0xf7   : > { %2662 = vmatpush3.msra.mxu1 %v2019_v41  ;;  %2584 = vmatpush3.msra.mxu0 %v739_v43 }
  0xf8   : > { %2663 = vmatprep.subr.mxu1 %v2018_v48  ;;  %2585 = vmatprep.subr.mxu0 %v738_v46 }
  0xf9   : > { %1320 = vmatmul.mubr.f32.gmra.mxu0 %v3851_v38  ;;  %1545 = vmatmul.mubr.f32.gmra.mxu1 %v3426_v63  ;;  %v2016_v63 = vld [vmem:[%s4300_s2 + $0x18] sm:$0xff] }
  0xfa   : > { %1324 = vmatprep.mubr.f32.mxu0 %v3446_v54  ;;  %1549 = vmatprep.mubr.f32.mxu1 %v3887_v10  ;;  %v736_v54 = vld [vmem:[%s4299_s1 + $0x410] sm:$0xff] }
  0xfb   : > { %2664 = vmatpush3.msra.mxu1 %v2018_v48  ;;  %2586 = vmatpush3.msra.mxu0 %v738_v46 }
  0xfc   : > { %2665 = vmatprep.subr.mxu1 %v2017_v56  ;;  %2587 = vmatprep.subr.mxu0 %v737_v51 }
  0xfd   : > { %1325 = vmatmul.mubr.f32.gmra.mxu0 %v3863_v6  ;;  %1550 = vmatmul.mubr.f32.gmra.mxu1 %v3442_v7  ;;  %v2015_v7 = vld [vmem:[%s4300_s2 + $0x10] sm:$0xff] }
  0xfe   : > { %1329 = vmatprep.mubr.f32.mxu0 %v3462_v55  ;;  %1554 = vmatprep.mubr.f32.mxu1 %v3899_v32  ;;  %v735_v55 = vld [vmem:[%s4299_s1 + $0x408] sm:$0xff] }
  0xff   : > { %2666 = vmatpush3.msra.mxu1 %v2017_v56  ;;  %2588 = vmatpush3.msra.mxu0 %v737_v51 }
 0x100   : > { %2667 = vmatprep.subr.mxu1 %v2016_v63  ;;  %2589 = vmatprep.subr.mxu0 %v736_v54 }
 0x101   : > { %1330 = vmatmul.mubr.f32.gmra.mxu0 %v3875_v29  ;;  %1555 = vmatmul.mubr.f32.gmra.mxu1 %v3458_v13  ;;  %v2014_v13 = vld [vmem:[%s4300_s2 + $0x8] sm:$0xff] }
 0x102   : > { %1334 = vmatprep.mubr.f32.mxu0 %v3478_v58  ;;  %1559 = vmatprep.mubr.f32.mxu1 %v3911_v15  ;;  %v734_v58 = vld [vmem:[%s4299_s1 + $0x400] sm:$0xff] }
 0x103   : > { %2668 = vmatpush3.msra.mxu1 %v2016_v63  ;;  %2590 = vmatpush3.msra.mxu0 %v736_v54 }
 0x104   : > { %2669 = vmatprep.subr.mxu1 %v2015_v7  ;;  %2591 = vmatprep.subr.mxu0 %v735_v55 }
 0x105   : > { %1335 = vmatmul.mubr.f32.gmra.mxu0 %v3887_v10  ;;  %1560 = vmatmul.mubr.f32.gmra.mxu1 %v3474_v22  ;;  %v2013_v22 = vld [vmem:[%s4300_s2] sm:$0xff] }
 0x106   : > { %1339 = vmatprep.mubr.f32.mxu0 %v3494_v61  ;;  %1564 = vmatprep.mubr.f32.mxu1 %v3923_v33 }
 0x107   : > { %2670 = vmatpush3.msra.mxu1 %v2015_v7  ;;  %2592 = vmatpush3.msra.mxu0 %v735_v55 }
 0x108   : > { %2671 = vmatprep.subr.mxu1 %v2014_v13  ;;  %2593 = vmatprep.subr.mxu0 %v734_v58 }
 0x109   : > { %1340 = vmatmul.mubr.f32.gmra.mxu0 %v3899_v32  ;;  %1565 = vmatmul.mubr.f32.gmra.mxu1 %v3490_v31 }
 0x10a   : > { %1344 = vmatprep.mubr.f32.mxu0 %v3510_v62  ;;  %1569 = vmatprep.mubr.f32.mxu1 %v3932_v20 }
 0x10b   : > { %2672 = vmatpush3.msra.mxu1 %v2014_v13  ;;  %2594 = vmatpush3.msra.mxu0 %v734_v58 }
 0x10c   : > { %2673 = vmatprep.subr.mxu1 %v2013_v22 }
 0x10d   : > { %v816_v61 = vpop.f32.mrf.mxu0  ;;  %v1041_v36 = vpop.f32.mrf.mxu1  ;;  %1345 = vmatmul.mubr.f32.gmra.mxu0 %v3911_v15  ;;  %1570 = vmatmul.mubr.f32.gmra.mxu1 %v3506_v44  ;;  %v3948_v44 = vld [vmem:[#allocation2 + $0x109] sm:$0xff] }
 0x10e   : > { %v3937_v31 = vadd.f32 %v1041_v36, %v816_v61  ;;  %1349 = vmatprep.mubr.f32.mxu0 %v3528_v1  ;;  %1574 = vmatprep.mubr.f32.mxu1 %v3940_v26 }
 0x10f   : > { %v818_v62 = vpop.f32.mrf.mxu0  ;;  %v1043_v37 = vpop.f32.mrf.mxu1  ;;  %2674 = vmatpush3.msra.mxu1 %v2013_v22 }
 0x111   : > { %v821_v34 = vpop.f32.mrf.mxu0  ;;  %v1046_v40 = vpop.f32.mrf.mxu1  ;;  %1350 = vmatmul.mubr.f32.gmra.mxu0 %v3923_v33  ;;  %1575 = vmatmul.mubr.f32.gmra.mxu1 %v3524_v52  ;;  %v3956_v52 = vld [vmem:[#allocation2 + $0x111] sm:$0xff] }
 0x112   : > { %v3945_v41 = vadd.f32 %v1046_v40, %v821_v34  ;;  %1354 = vmatprep.mubr.f32.mxu0 %v3544_v3  ;;  %1579 = vmatprep.mubr.f32.mxu1 %v3948_v44 }
 0x113   : > { %v823_v1 = vpop.f32.mrf.mxu0  ;;  %v1048_v43 = vpop.f32.mrf.mxu1 }
 0x115   : > { %v826_v48 = vpop.f32.mrf.mxu0  ;;  %v1051_v46 = vpop.f32.mrf.mxu1  ;;  %1355 = vmatmul.mubr.f32.gmra.mxu0 %v3932_v20  ;;  %1580 = vmatmul.mubr.f32.gmra.mxu1 %v3540_v4  ;;  %v3964_v4 = vld [vmem:[#allocation2 + $0x121] sm:$0xff] }
 0x116   : > { %v3953_v56 = vadd.f32 %v1051_v46, %v826_v48  ;;  %1359 = vmatprep.mubr.f32.mxu0 %v3560_v8  ;;  %1584 = vmatprep.mubr.f32.mxu1 %v3956_v52 }
 0x117   : > { %v828_v3 = vpop.f32.mrf.mxu0  ;;  %v1053_v51 = vpop.f32.mrf.mxu1 }
 0x119   : > { %v831_v63 = vpop.f32.mrf.mxu0  ;;  %v1056_v54 = vpop.f32.mrf.mxu1  ;;  %1360 = vmatmul.mubr.f32.gmra.mxu0 %v3940_v26  ;;  %1585 = vmatmul.mubr.f32.gmra.mxu1 %v3556_v12  ;;  %v3972_v12 = vld [vmem:[#allocation2 + $0x129] sm:$0xff] }
 0x11a   : > { %v3961_v7 = vadd.f32 %v1056_v54, %v831_v63  ;;  %1364 = vmatprep.mubr.f32.mxu0 %v3576_v11  ;;  %1589 = vmatprep.mubr.f32.mxu1 %v3964_v4 }
 0x11b   : > { %v833_v8 = vpop.f32.mrf.mxu0  ;;  %v1058_v55 = vpop.f32.mrf.mxu1 }
 0x11d   : > { %v836_v13 = vpop.f32.mrf.mxu0  ;;  %v1061_v58 = vpop.f32.mrf.mxu1  ;;  %1365 = vmatmul.mubr.f32.gmra.mxu0 %v3948_v44  ;;  %1590 = vmatmul.mubr.f32.gmra.mxu1 %v3572_v23  ;;  %v3980_v23 = vld [vmem:[#allocation2 + $0x139] sm:$0xff] }
 0x11e   : > { %v3969_v22 = vadd.f32 %v1061_v58, %v836_v13  ;;  %1369 = vmatprep.mubr.f32.mxu0 %v3592_v14  ;;  %1594 = vmatprep.mubr.f32.mxu1 %v3972_v12 }
 0x11f   : > { %v838_v11 = vpop.f32.mrf.mxu0  ;;  %v1063_v61 = vpop.f32.mrf.mxu1 }
 0x121   : > { %v841_v36 = vpop.f32.mrf.mxu0  ;;  %v1066_v62 = vpop.f32.mrf.mxu1  ;;  %1370 = vmatmul.mubr.f32.gmra.mxu0 %v3956_v52  ;;  %1595 = vmatmul.mubr.f32.gmra.mxu1 %v3588_v39  ;;  %v3988_v39 = vld [vmem:[#allocation2 + $0x141] sm:$0xff] }
 0x122   : > { %v3977_v37 = vadd.f32 %v1066_v62, %v841_v36  ;;  %1374 = vmatprep.mubr.f32.mxu0 %v3608_v17  ;;  %1599 = vmatprep.mubr.f32.mxu1 %v3980_v23  ;;  %v4309_v36 = vld [vmem:[#allocation3_spill] sm:$0xff] }
 0x123   : > { %v843_v14 = vpop.f32.mrf.mxu0  ;;  %v1068_v34 = vpop.f32.mrf.mxu1 }
 0x125   : > { %v846_v40 = vpop.f32.mrf.mxu0  ;;  %v1071_v1 = vpop.f32.mrf.mxu1  ;;  %1375 = vmatmul.mubr.f32.gmra.mxu0 %v3964_v4  ;;  %1600 = vmatmul.mubr.f32.gmra.mxu1 %v3604_v59  ;;  %v3996_v59 = vld [vmem:[#allocation2 + $0x151] sm:$0xff] }
 0x126   : > { %v3985_v43 = vadd.f32 %v1071_v1, %v846_v40  ;;  %1379 = vmatprep.mubr.f32.mxu0 %v3624_v18  ;;  %1604 = vmatprep.mubr.f32.mxu1 %v3988_v39 }
 0x127   : > { %v848_v17 = vpop.f32.mrf.mxu0  ;;  %v1073_v48 = vpop.f32.mrf.mxu1 }
 0x129   : > { %v851_v46 = vpop.f32.mrf.mxu0  ;;  %v1076_v3 = vpop.f32.mrf.mxu1  ;;  %1380 = vmatmul.mubr.f32.gmra.mxu0 %v3972_v12  ;;  %1605 = vmatmul.mubr.f32.gmra.mxu1 %v3620_v9  ;;  %v4004_v9 = vld [vmem:[#allocation2 + $0x159] sm:$0xff] }
 0x12a   : > { %v3993_v51 = vadd.f32 %v1076_v3, %v851_v46  ;;  %1384 = vmatprep.mubr.f32.mxu0 %v3640_v21  ;;  %1609 = vmatprep.mubr.f32.mxu1 %v3996_v59 }
 0x12b   : > { %v853_v18 = vpop.f32.mrf.mxu0  ;;  %v1078_v63 = vpop.f32.mrf.mxu1 }
 0x12d   : > { %v856_v54 = vpop.f32.mrf.mxu0  ;;  %v1081_v8 = vpop.f32.mrf.mxu1  ;;  %1385 = vmatmul.mubr.f32.gmra.mxu0 %v3980_v23  ;;  %1610 = vmatmul.mubr.f32.gmra.mxu1 %v3636_v27  ;;  %v4012_v27 = vld [vmem:[#allocation2 + $0x169] sm:$0xff] }
 0x12e   : > { %v4001_v55 = vadd.f32 %v1081_v8, %v856_v54  ;;  %1389 = vmatprep.mubr.f32.mxu0 %v3656_v24  ;;  %1614 = vmatprep.mubr.f32.mxu1 %v4004_v9  ;;  %v4310_v8 = vld [vmem:[#allocation4_spill] sm:$0xff] }
 0x12f   : > { %v858_v21 = vpop.f32.mrf.mxu0  ;;  %v1083_v13 = vpop.f32.mrf.mxu1 }
 0x131   : > { %v861_v58 = vpop.f32.mrf.mxu0  ;;  %v1086_v11 = vpop.f32.mrf.mxu1  ;;  %1390 = vmatmul.mubr.f32.gmra.mxu0 %v3988_v39  ;;  %1615 = vmatmul.mubr.f32.gmra.mxu1 %v3652_v2  ;;  %v4020_v2 = vld [vmem:[#allocation2 + $0x171] sm:$0xff] }
 0x132   : > { %v4009_v61 = vadd.f32 %v1086_v11, %v861_v58  ;;  %1394 = vmatprep.mubr.f32.mxu0 %v4309_v36  ;;  %1619 = vmatprep.mubr.f32.mxu1 %v4012_v27  ;;  %v4039_v58 = vld [vmem:[#allocation2 + $0x182] sm:$0xff]  ;;  %v572_v11 = vld [vmem:[#allocation2 + $0x199] sm:$0xff] }
 0x133   : > { %v863_v24 = vpop.f32.mrf.mxu0  ;;  %v1088_v62 = vpop.f32.mrf.mxu1 }
 0x134   : > { %v4311_v62 = vld [vmem:[#allocation5_spill] sm:$0xff] }
 0x135   : > { %v866_v14 = vpop.f32.mrf.mxu0  ;;  %v1091_v34 = vpop.f32.mrf.mxu1  ;;  %1395 = vmatmul.mubr.f32.gmra.mxu0 %v3996_v59  ;;  %1620 = vmatmul.mubr.f32.gmra.mxu1 %v3668_v16  ;;  %v4028_v16 = vld [vmem:[#allocation2 + $0x181] sm:$0xff] }
 0x136   : > { %v4017_v40 = vadd.f32 %v1091_v34, %v866_v14  ;;  %1399 = vmatprep.mubr.f32.mxu0 %v3688_v35  ;;  %1624 = vmatprep.mubr.f32.mxu1 %v4020_v2 }
 0x137   : > { %v868_v1 = vpop.f32.mrf.mxu0  ;;  %v1093_v17 = vpop.f32.mrf.mxu1 }
 0x138   : > { %v4046_v17 = vld [vmem:[#allocation2 + $0x18a] sm:$0xff] }
 0x139   : > { %v871_v48 = vpop.f32.mrf.mxu0  ;;  %v1096_v46 = vpop.f32.mrf.mxu1  ;;  %1400 = vmatmul.mubr.f32.gmra.mxu0 %v4004_v9  ;;  %1625 = vmatmul.mubr.f32.gmra.mxu1 %v3684_v45  ;;  %v4036_v45 = vld [vmem:[#allocation2 + $0x189] sm:$0xff] }
 0x13a   : > { %v4025_v3 = vadd.f32 %v1096_v46, %v871_v48  ;;  %1404 = vmatprep.mubr.f32.mxu0 %v3704_v42  ;;  %1629 = vmatprep.mubr.f32.mxu1 %v4028_v16  ;;  %v573_v48 = vld [vmem:[#allocation2 + $0x1a1] sm:$0xff] }
 0x13b   : > { %v873_v35 = vpop.f32.mrf.mxu0  ;;  %v1098_v18 = vpop.f32.mrf.mxu1 }
 0x13d   : > { %v876_v63 = vpop.f32.mrf.mxu0  ;;  %v1101_v54 = vpop.f32.mrf.mxu1  ;;  %1405 = vmatmul.mubr.f32.gmra.mxu0 %v4012_v27  ;;  %1630 = vmatmul.mubr.f32.gmra.mxu1 %v4310_v8  ;;  %v574_v8 = vld [vmem:[#allocation2 + $0x32] sm:$0xff] }
 0x13e   : > { %v4033_v21 = vadd.f32 %v1101_v54, %v876_v63  ;;  %1409 = vmatprep.mubr.f32.mxu0 %v3720_v47  ;;  %1634 = vmatprep.mubr.f32.mxu1 %v4036_v45  ;;  %v540_v47 = vld [vmem:[#allocation2 + $0x198] sm:$0xff] }
 0x13f   : > { %v878_v42 = vpop.f32.mrf.mxu0  ;;  %v1103_v13 = vpop.f32.mrf.mxu1 }
 0x141   : > { %v881_v36 = vpop.f32.mrf.mxu0  ;;  %v1106_v24 = vpop.f32.mrf.mxu1  ;;  %1410 = vmatmul.mubr.f32.gmra.mxu0 %v4020_v2  ;;  %1635 = vmatmul.mubr.f32.gmra.mxu1 %v4311_v62 }
 0x142   : > { %v4043_v14 = vadd.f32 %v1106_v24, %v881_v36  ;;  %1414 = vmatprep.mubr.f32.mxu0 %v4039_v58  ;;  %1639 = vmatprep.mubr.f32.mxu1 %v572_v11  ;;  %v2764_v36 = vld [vmem:[#allocation2 + $0x19] sm:$0xff] }
 0x143   : > { %v883_v34 = vpop.f32.mrf.mxu0  ;;  %v1108_v1 = vpop.f32.mrf.mxu1  ;;  %v575_v24 = vld [vmem:[#allocation2 + $0x3a] sm:$0xff] }
 0x144   : > { %v576_v34 = vld [vmem:[#allocation2 + $0x4a] sm:$0xff] }
 0x145   : > { %v886_v46 = vpop.f32.mrf.mxu0  ;;  %v1111_v35 = vpop.f32.mrf.mxu1  ;;  %1415 = vmatmul.mubr.f32.gmra.mxu0 %v4028_v16  ;;  %1640 = vmatmul.mubr.f32.gmra.mxu1 %v540_v47 }
 0x146   : > { %v4049_v18 = vadd.f32 %v1111_v35, %v886_v46  ;;  %1419 = vmatprep.mubr.f32.mxu0 %v4046_v17  ;;  %1644 = vmatprep.mubr.f32.mxu1 %v573_v48 }
 0x147   : > { %v888_v63 = vpop.f32.mrf.mxu0  ;;  %v1113_v54 = vpop.f32.mrf.mxu1 }
 0x148   : > { %v578_v54 = vld [vmem:[#allocation2 + $0x62] sm:$0xff] }
 0x149   : > { %v891_v42 = vpop.f32.mrf.mxu0  ;;  %v1116_v13 = vpop.f32.mrf.mxu1  ;;  %1420 = vmatmul.mubr.f32.gmra.mxu0 %v4036_v45  ;;  %1645 = vmatmul.mubr.f32.gmra.mxu1 %v3520_v50  ;;  %v577_v50 = vld [vmem:[#allocation2 + $0x52] sm:$0xff] }
 0x14a   : > { %v4054_v11 = vadd.f32 %v1116_v13, %v891_v42  ;;  %2595 = vmatprep.mubr.f32.mxu0 %v574_v8  ;;  %2675 = vmatprep.mubr.f32.mxu1 %v2764_v36 }
 0x14b   : > { %v893_v62 = vpop.f32.mrf.mxu0  ;;  %v1118_v47 = vpop.f32.mrf.mxu1 }
 0x14c   : > { %v580_v62 = vld [vmem:[#allocation2 + $0x7a] sm:$0xff] }
 0x14d   : > { %v896_v1 = vpop.f32.mrf.mxu0  ;;  %v1121_v48 = vpop.f32.mrf.mxu1  ;;  %2596 = vmatmul.mubr.f32.vlgmr.msra.gmra.mxu0 %v575_v24  ;;  %2676 = vmatmul.mubr.f32.vlgmr.msra.gmra.mxu1 %v3756_v49  ;;  %v579_v49 = vld [vmem:[#allocation2 + $0x6a] sm:$0xff] }
 0x14e   : > { %v4057_v46 = vadd.f32 %v1121_v48, %v896_v1  ;;  %2598 = vmatprep.mubr.f32.mxu0 %v576_v34  ;;  %2678 = vmatprep.mubr.f32.mxu1 %v3742_v60 }
 0x14f   : > { %v898_v35 = vpop.f32.mrf.mxu0  ;;  %v1123_v63 = vpop.f32.mrf.mxu1 }
 0x151   : > { %v901_v8 = vpop.f32.mrf.mxu0  ;;  %v1126_v42 = vpop.f32.mrf.mxu1  ;;  %2599 = vmatmul.mubr.f32.gmra.mxu0 %v577_v50  ;;  %2679 = vmatmul.mubr.f32.gmra.mxu1 %v3753_v5  ;;  %v581_v5 = vld [vmem:[#allocation2 + $0x82] sm:$0xff]  ;;  %v582_v50 = vld [vmem:[#allocation2 + $0x92] sm:$0xff] }
 0x152   : > { %v4061_v13 = vadd.f32 %v1126_v42, %v901_v8  ;;  %2601 = vmatprep.mubr.f32.mxu0 %v578_v54  ;;  %2681 = vmatprep.mubr.f32.mxu1 %v3767_v30  ;;  %v584_v42 = vld [vmem:[#allocation2 + $0xaa] sm:$0xff] }
 0x153   : > { %v903_v36 = vpop.f32.mrf.mxu0  ;;  %v1128_v24 = vpop.f32.mrf.mxu1 }
 0x155   : > { %v906_v47 = vpop.f32.mrf.mxu0  ;;  %v1131_v60 = vpop.f32.mrf.mxu1  ;;  %2602 = vmatmul.mubr.f32.gmra.mxu0 %v579_v49  ;;  %2682 = vmatmul.mubr.f32.gmra.mxu1 %v3779_v28  ;;  %v583_v28 = vld [vmem:[#allocation2 + $0x9a] sm:$0xff] }
 0x156   : > { %v4065_v34 = vadd.f32 %v1131_v60, %v906_v47  ;;  %2604 = vmatprep.mubr.f32.mxu0 %v580_v62  ;;  %2684 = vmatprep.mubr.f32.mxu1 %v3791_v19  ;;  %v586_v47 = vld [vmem:[#allocation2 + $0xc2] sm:$0xff] }
 0x157   : > { %v908_v1 = vpop.f32.mrf.mxu0  ;;  %v1133_v48 = vpop.f32.mrf.mxu1 }
 0x159   : > { %v911_v35 = vpop.f32.mrf.mxu0  ;;  %v1136_v30 = vpop.f32.mrf.mxu1  ;;  %2605 = vmatmul.mubr.f32.gmra.mxu0 %v581_v5  ;;  %2685 = vmatmul.mubr.f32.gmra.mxu1 %v3803_v57  ;;  %v585_v57 = vld [vmem:[#allocation2 + $0xb2] sm:$0xff] }
 0x15a   : > { %v4069_v63 = vadd.f32 %v1136_v30, %v911_v35  ;;  %2607 = vmatprep.mubr.f32.mxu0 %v582_v50  ;;  %2687 = vmatprep.mubr.f32.mxu1 %v3815_v53  ;;  %v588_v50 = vld [vmem:[#allocation2 + $0xda] sm:$0xff] }
 0x15b   : > { %v913_v54 = vpop.f32.mrf.mxu0  ;;  %v1138_v8 = vpop.f32.mrf.mxu1 }
 0x15c   : > { %v590_v8 = vld [vmem:[#allocation2 + $0xf2] sm:$0xff] }
 0x15d   : > { %v916_v49 = vpop.f32.mrf.mxu0  ;;  %v1141_v19 = vpop.f32.mrf.mxu1  ;;  %2608 = vmatmul.mubr.f32.gmra.mxu0 %v583_v28  ;;  %2688 = vmatmul.mubr.f32.gmra.mxu1 %v3827_v25  ;;  %v587_v25 = vld [vmem:[#allocation2 + $0xca] sm:$0xff] }
 0x15e   : > { %v4073_v36 = vadd.f32 %v1141_v19, %v916_v49  ;;  %2610 = vmatprep.mubr.f32.mxu0 %v584_v42  ;;  %2690 = vmatprep.mubr.f32.mxu1 %v3839_v0 }
 0x15f   : > { %v918_v24 = vpop.f32.mrf.mxu0  ;;  %v1143_v62 = vpop.f32.mrf.mxu1 }
 0x160   : > { %v592_v24 = vld [vmem:[#allocation2 + $0x10a] sm:$0xff] }
 0x161   : > { %v921_v60 = vpop.f32.mrf.mxu0  ;;  %v1146_v53 = vpop.f32.mrf.mxu1  ;;  %2611 = vmatmul.mubr.f32.gmra.mxu0 %v585_v57  ;;  %2691 = vmatmul.mubr.f32.gmra.mxu1 %v3851_v38  ;;  %v589_v38 = vld [vmem:[#allocation2 + $0xe2] sm:$0xff] }
 0x162   : > { %v4077_v5 = vadd.f32 %v1146_v53, %v921_v60  ;;  %2613 = vmatprep.mubr.f32.mxu0 %v586_v47  ;;  %2693 = vmatprep.mubr.f32.mxu1 %v3863_v6 }
 0x163   : > { %v923_v1 = vpop.f32.mrf.mxu0  ;;  %v1148_v48 = vpop.f32.mrf.mxu1 }
 0x165   : > { %v926_v35 = vpop.f32.mrf.mxu0  ;;  %v1151_v0 = vpop.f32.mrf.mxu1  ;;  %2614 = vmatmul.mubr.f32.gmra.mxu0 %v587_v25  ;;  %2694 = vmatmul.mubr.f32.gmra.mxu1 %v3875_v29  ;;  %v591_v29 = vld [vmem:[#allocation2 + $0xfa] sm:$0xff]  ;;  %v594_v25 = vld [vmem:[#allocation2 + $0x122] sm:$0xff] }
 0x166   : > { %v4081_v30 = vadd.f32 %v1151_v0, %v926_v35  ;;  %2616 = vmatprep.mubr.f32.mxu0 %v588_v50  ;;  %2696 = vmatprep.mubr.f32.mxu1 %v3887_v10  ;;  %v596_v0 = vld [vmem:[#allocation2 + $0x13a] sm:$0xff] }
 0x167   : > { %v928_v28 = vpop.f32.mrf.mxu0  ;;  %v1153_v54 = vpop.f32.mrf.mxu1 }
 0x169   : > { %v931_v42 = vpop.f32.mrf.mxu0  ;;  %v1156_v6 = vpop.f32.mrf.mxu1  ;;  %2617 = vmatmul.mubr.f32.gmra.mxu0 %v589_v38  ;;  %2697 = vmatmul.mubr.f32.gmra.mxu1 %v3899_v32  ;;  %v593_v32 = vld [vmem:[#allocation2 + $0x112] sm:$0xff] }
 0x16a   : > { %v4085_v49 = vadd.f32 %v1156_v6, %v931_v42  ;;  %2619 = vmatprep.mubr.f32.mxu0 %v590_v8  ;;  %2699 = vmatprep.mubr.f32.mxu1 %v3911_v15  ;;  %v598_v42 = vld [vmem:[#allocation2 + $0x152] sm:$0xff] }
 0x16b   : > { %v933_v19 = vpop.f32.mrf.mxu0  ;;  %v1158_v57 = vpop.f32.mrf.mxu1 }
 0x16d   : > { %v936_v62 = vpop.f32.mrf.mxu0  ;;  %v1161_v10 = vpop.f32.mrf.mxu1  ;;  %2620 = vmatmul.mubr.f32.gmra.mxu0 %v591_v29  ;;  %2700 = vmatmul.mubr.f32.gmra.mxu1 %v3923_v33  ;;  %v595_v33 = vld [vmem:[#allocation2 + $0x12a] sm:$0xff] }
 0x16e   : > { %v4089_v47 = vadd.f32 %v1161_v10, %v936_v62  ;;  %2622 = vmatprep.mubr.f32.mxu0 %v592_v24  ;;  %2702 = vmatprep.mubr.f32.mxu1 %v3932_v20  ;;  %v600_v24 = vld [vmem:[#allocation2 + $0x16a] sm:$0xff] }
 0x16f   : > { %v938_v60 = vpop.f32.mrf.mxu0  ;;  %v1163_v53 = vpop.f32.mrf.mxu1 }
 0x171   : > { %v941_v1 = vpop.f32.mrf.mxu0  ;;  %v1166_v15 = vpop.f32.mrf.mxu1  ;;  %2623 = vmatmul.mubr.f32.gmra.mxu0 %v593_v32  ;;  %2703 = vmatmul.mubr.f32.gmra.mxu1 %v3940_v26  ;;  %v597_v26 = vld [vmem:[#allocation2 + $0x142] sm:$0xff] }
 0x172   : > { %v4093_v48 = vadd.f32 %v1166_v15, %v941_v1  ;;  %2625 = vmatprep.mubr.f32.mxu0 %v594_v25  ;;  %2705 = vmatprep.mubr.f32.mxu1 %v3948_v44  ;;  %v604_v15 = vld [vmem:[#allocation2 + $0x19a] sm:$0xff] }
 0x173   : > { %v943_v50 = vpop.f32.mrf.mxu0  ;;  %v1168_v35 = vpop.f32.mrf.mxu1 }
 0x175   : > { %v946_v38 = vpop.f32.mrf.mxu0  ;;  %v1171_v20 = vpop.f32.mrf.mxu1  ;;  %2626 = vmatmul.mubr.f32.gmra.mxu0 %v595_v33  ;;  %2706 = vmatmul.mubr.f32.gmra.mxu1 %v3956_v52  ;;  %v599_v52 = vld [vmem:[#allocation2 + $0x15a] sm:$0xff] }
 0x176   : > { %v4097_v28 = vadd.f32 %v1171_v20, %v946_v38  ;;  %2628 = vmatprep.mubr.f32.mxu0 %v596_v0  ;;  %2708 = vmatprep.mubr.f32.mxu1 %v3964_v4 }
 0x177   : > { %v948_v54 = vpop.f32.mrf.mxu0  ;;  %v1173_v8 = vpop.f32.mrf.mxu1 }
 0x179   : > { %v951_v6 = vpop.f32.mrf.mxu0  ;;  %v1176_v44 = vpop.f32.mrf.mxu1  ;;  %2629 = vmatmul.mubr.f32.gmra.mxu0 %v597_v26  ;;  %2709 = vmatmul.mubr.f32.gmra.mxu1 %v3972_v12  ;;  %v601_v12 = vld [vmem:[#allocation2 + $0x172] sm:$0xff] }
 0x17a   : > { %v4101_v29 = vadd.f32 %v1176_v44, %v951_v6  ;;  %2631 = vmatprep.mubr.f32.mxu0 %v598_v42  ;;  %2711 = vmatprep.mubr.f32.mxu1 %v3980_v23 }
 0x17b   : > { %v953_v19 = vpop.f32.mrf.mxu0  ;;  %v1178_v57 = vpop.f32.mrf.mxu1 }
 0x17d   : > { %v956_v62 = vpop.f32.mrf.mxu0  ;;  %v1181_v4 = vpop.f32.mrf.mxu1  ;;  %2632 = vmatmul.mubr.f32.gmra.mxu0 %v599_v52  ;;  %2712 = vmatmul.mubr.f32.gmra.mxu1 %v3988_v39 }
 0x17e   : > { %v4105_v10 = vadd.f32 %v1181_v4, %v956_v62  ;;  %2634 = vmatprep.mubr.f32.mxu0 %v600_v24  ;;  %2714 = vmatprep.mubr.f32.mxu1 %v3996_v59 }
 0x17f   : > { %v958_v32 = vpop.f32.mrf.mxu0  ;;  %v1183_v60 = vpop.f32.mrf.mxu1 }
 0x181   : > { %v961_v53 = vpop.f32.mrf.mxu0  ;;  %v1186_v25 = vpop.f32.mrf.mxu1  ;;  %2635 = vmatmul.mubr.f32.gmra.mxu0 %v601_v12  ;;  %2715 = vmatmul.mubr.f32.gmra.mxu1 %v4004_v9  ;;  %v605_v9 = vld [vmem:[#allocation2 + $0x1a2] sm:$0xff] }
 0x182   : > { %v4109_v23 = vadd.f32 %v1186_v25, %v961_v53  ;;  %2637 = vmatprep.mubr.f32.mxu0 %v4039_v58  ;;  %2717 = vmatprep.mubr.f32.mxu1 %v4012_v27 }
 0x183   : > { %v963_v39 = vpop.f32.mrf.mxu0  ;;  %v1188_v1 = vpop.f32.mrf.mxu1 }
 0x185   : > { %v966_v33 = vpop.f32.mrf.mxu0  ;;  %v1191_v50 = vpop.f32.mrf.mxu1  ;;  %2638 = vmatmul.mubr.f32.gmra.mxu0 %v4046_v17  ;;  %2718 = vmatmul.mubr.f32.gmra.mxu1 %v4020_v2 }
 0x186   : > { %v4115_v59 = vadd.f32 %v1191_v50, %v966_v33  ;;  %2640 = vmatprep.mubr.f32.mxu0 %v604_v15  ;;  %2720 = vmatprep.mubr.f32.mxu1 %v4028_v16 }
 0x187   : > { %v968_v35 = vpop.f32.mrf.mxu0  ;;  %v1193_v0 = vpop.f32.mrf.mxu1 }
 0x189   : > { %v971_v58 = vpop.f32.mrf.mxu0  ;;  %v1196_v38 = vpop.f32.mrf.mxu1  ;;  %2641 = vmatmul.mubr.f32.gmra.mxu0 %v605_v9  ;;  %2721 = vmatmul.mubr.f32.gmra.mxu1 %v4036_v45 }
 0x18a   : > { %v4119_v27 = vadd.f32 %v1196_v38, %v971_v58 }
 0x18b   : > { %v973_v20 = vpop.f32.mrf.mxu0  ;;  %v1198_v26 = vpop.f32.mrf.mxu1 }
 0x18d   : > { %v1266_v17 = vpop.f32.mrf.mxu0  ;;  %v1491_v54 = vpop.f32.mrf.mxu1 }
 0x18e   : > { %v1267_v2 = vadd.f32 %v1266_v17, %v3937_v31 }
 0x18f   : > { %v1268_v8 = vpop.f32.mrf.mxu0  ;;  %v1493_v42 = vpop.f32.mrf.mxu1 }
 0x190   : > { %v4122_v6 = vadd.f32 %v1491_v54, %v1267_v2 }
 0x191   : > { %v1271_v16 = vpop.f32.mrf.mxu0  ;;  %v1496_v44 = vpop.f32.mrf.mxu1 }
 0x192   : > { %v1272_v52 = vadd.f32 %v1271_v16, %v3945_v41 }
 0x193   : > { %v1273_v19 = vpop.f32.mrf.mxu0  ;;  %v1498_v57 = vpop.f32.mrf.mxu1 }
 0x194   : > { %v4125_v24 = vadd.f32 %v1496_v44, %v1272_v52 }
 0x195   : > { %v1276_v45 = vpop.f32.mrf.mxu0  ;;  %v1501_v62 = vpop.f32.mrf.mxu1 }
 0x196   : > { %v1277_v4 = vadd.f32 %v1276_v45, %v3953_v56 }
 0x197   : > { %v1278_v12 = vpop.f32.mrf.mxu0  ;;  %v1503_v32 = vpop.f32.mrf.mxu1 }
 0x198   : > { %v4128_v60 = vadd.f32 %v1501_v62, %v1277_v4 }
 0x199   : > { %v1281_v31 = vpop.f32.mrf.mxu0  ;;  %v1506_v53 = vpop.f32.mrf.mxu1 }
 0x19a   : > { %v1282_v25 = vadd.f32 %v1281_v31, %v3961_v7 }
 0x19b   : > { %v1283_v39 = vpop.f32.mrf.mxu0  ;;  %v1508_v1 = vpop.f32.mrf.mxu1 }
 0x19c   : > { %v4131_v15 = vadd.f32 %v1506_v53, %v1282_v25 }
 0x19d   : > { %v1286_v41 = vpop.f32.mrf.mxu0  ;;  %v1511_v33 = vpop.f32.mrf.mxu1 }
 0x19e   : > { %v1287_v50 = vadd.f32 %v1286_v41, %v3969_v22 }
 0x19f   : > { %v1288_v9 = vpop.f32.mrf.mxu0  ;;  %v1513_v35 = vpop.f32.mrf.mxu1 }
 0x1a0   : > { %v4134_v0 = vadd.f32 %v1511_v33, %v1287_v50 }
 0x1a1   : > { %v1291_v56 = vpop.f32.mrf.mxu0  ;;  %v1516_v58 = vpop.f32.mrf.mxu1 }
 0x1a2   : > { %v1292_v38 = vadd.f32 %v1291_v56, %v3977_v37 }
 0x1a3   : > { %v1293_v20 = vpop.f32.mrf.mxu0  ;;  %v1518_v26 = vpop.f32.mrf.mxu1 }
 0x1a4   : > { %v4137_v17 = vadd.f32 %v1516_v58, %v1292_v38 }
 0x1a5   : > { %v1296_v7 = vpop.f32.mrf.mxu0  ;;  %v1521_v54 = vpop.f32.mrf.mxu1 }
 0x1a6   : > { %v1297_v2 = vadd.f32 %v1296_v7, %v3985_v43 }
 0x1a7   : > { %v1298_v8 = vpop.f32.mrf.mxu0  ;;  %v1523_v42 = vpop.f32.mrf.mxu1 }
 0x1a8   : > { %v4140_v16 = vadd.f32 %v1521_v54, %v1297_v2 }
 0x1a9   : > { %v1301_v22 = vpop.f32.mrf.mxu0  ;;  %v1526_v44 = vpop.f32.mrf.mxu1 }
 0x1aa   : > { %v1302_v52 = vadd.f32 %v1301_v22, %v3993_v51 }
 0x1ab   : > { %v1303_v19 = vpop.f32.mrf.mxu0  ;;  %v1528_v57 = vpop.f32.mrf.mxu1 }
 0x1ac   : > { %v4143_v45 = vadd.f32 %v1526_v44, %v1302_v52 }
 0x1ad   : > { %v1306_v37 = vpop.f32.mrf.mxu0  ;;  %v1531_v62 = vpop.f32.mrf.mxu1 }
 0x1ae   : > { %v1307_v4 = vadd.f32 %v1306_v37, %v4001_v55 }
 0x1af   : > { %v1308_v12 = vpop.f32.mrf.mxu0  ;;  %v1533_v32 = vpop.f32.mrf.mxu1 }
 0x1b0   : > { %v4146_v31 = vadd.f32 %v1531_v62, %v1307_v4 }
 0x1b1   : > { %v1311_v43 = vpop.f32.mrf.mxu0  ;;  %v1536_v53 = vpop.f32.mrf.mxu1 }
 0x1b2   : > { %v1312_v25 = vadd.f32 %v1311_v43, %v4009_v61 }
 0x1b3   : > { %v1313_v39 = vpop.f32.mrf.mxu0  ;;  %v1538_v1 = vpop.f32.mrf.mxu1 }
 0x1b4   : > { %v4149_v41 = vadd.f32 %v1536_v53, %v1312_v25 }
 0x1b5   : > { %v1316_v51 = vpop.f32.mrf.mxu0  ;;  %v1541_v33 = vpop.f32.mrf.mxu1 }
 0x1b6   : > { %v1317_v50 = vadd.f32 %v1316_v51, %v4017_v40 }
 0x1b7   : > { %v1318_v9 = vpop.f32.mrf.mxu0  ;;  %v1543_v35 = vpop.f32.mrf.mxu1 }
 0x1b8   : > { %v4152_v56 = vadd.f32 %v1541_v33, %v1317_v50 }
 0x1b9   : > { %v1321_v55 = vpop.f32.mrf.mxu0  ;;  %v1546_v58 = vpop.f32.mrf.mxu1 }
 0x1ba   : > { %v1322_v38 = vadd.f32 %v1321_v55, %v4025_v3 }
 0x1bb   : > { %v1323_v20 = vpop.f32.mrf.mxu0  ;;  %v1548_v26 = vpop.f32.mrf.mxu1 }
 0x1bc   : > { %v4155_v7 = vadd.f32 %v1546_v58, %v1322_v38 }
 0x1bd   : > { %v1326_v61 = vpop.f32.mrf.mxu0  ;;  %v1551_v54 = vpop.f32.mrf.mxu1 }
 0x1be   : > { %v1327_v2 = vadd.f32 %v1326_v61, %v4033_v21 }
 0x1bf   : > { %v1328_v8 = vpop.f32.mrf.mxu0  ;;  %v1553_v42 = vpop.f32.mrf.mxu1 }
 0x1c0   : > { %v4158_v22 = vadd.f32 %v1551_v54, %v1327_v2 }
 0x1c1   : > { %v1331_v40 = vpop.f32.mrf.mxu0  ;;  %v1556_v44 = vpop.f32.mrf.mxu1 }
 0x1c2   : > { %v1332_v52 = vadd.f32 %v1331_v40, %v4043_v14 }
 0x1c3   : > { %v1333_v19 = vpop.f32.mrf.mxu0  ;;  %v1558_v57 = vpop.f32.mrf.mxu1 }
 0x1c4   : > { %v4161_v37 = vadd.f32 %v1556_v44, %v1332_v52 }
 0x1c5   : > { %v1336_v3 = vpop.f32.mrf.mxu0  ;;  %v1561_v62 = vpop.f32.mrf.mxu1 }
 0x1c6   : > { %v1337_v4 = vadd.f32 %v1336_v3, %v4049_v18 }
 0x1c7   : > { %v1338_v12 = vpop.f32.mrf.mxu0  ;;  %v1563_v32 = vpop.f32.mrf.mxu1 }
 0x1c8   : > { %v4164_v43 = vadd.f32 %v1561_v62, %v1337_v4 }
 0x1c9   : > { %v1341_v21 = vpop.f32.mrf.mxu0  ;;  %v1566_v53 = vpop.f32.mrf.mxu1 }
 0x1ca   : > { %v1342_v25 = vadd.f32 %v1341_v21, %v4054_v11 }
 0x1cb   : > { %v1343_v39 = vpop.f32.mrf.mxu0  ;;  %v1568_v1 = vpop.f32.mrf.mxu1 }
 0x1cc   : > { %v4167_v51 = vadd.f32 %v1566_v53, %v1342_v25 }
 0x1cd   : > { %v1346_v14 = vpop.f32.mrf.mxu0  ;;  %v1571_v33 = vpop.f32.mrf.mxu1 }
 0x1ce   : > { %v1347_v50 = vadd.f32 %v1346_v14, %v4057_v46 }
 0x1cf   : > { %v1348_v9 = vpop.f32.mrf.mxu0  ;;  %v1573_v35 = vpop.f32.mrf.mxu1 }
 0x1d0   : > { %v4170_v55 = vadd.f32 %v1571_v33, %v1347_v50 }
 0x1d1   : > { %v1351_v18 = vpop.f32.mrf.mxu0  ;;  %v1576_v58 = vpop.f32.mrf.mxu1 }
 0x1d2   : > { %v1352_v38 = vadd.f32 %v1351_v18, %v4061_v13 }
 0x1d3   : > { %v1353_v20 = vpop.f32.mrf.mxu0  ;;  %v1578_v26 = vpop.f32.mrf.mxu1 }
 0x1d4   : > { %v4173_v61 = vadd.f32 %v1576_v58, %v1352_v38 }
 0x1d5   : > { %v1356_v11 = vpop.f32.mrf.mxu0  ;;  %v1581_v54 = vpop.f32.mrf.mxu1 }
 0x1d6   : > { %v1357_v2 = vadd.f32 %v1356_v11, %v4065_v34 }
 0x1d7   : > { %v1358_v8 = vpop.f32.mrf.mxu0  ;;  %v1583_v42 = vpop.f32.mrf.mxu1 }
 0x1d8   : > { %v4176_v40 = vadd.f32 %v1581_v54, %v1357_v2 }
 0x1d9   : > { %v1361_v46 = vpop.f32.mrf.mxu0  ;;  %v1586_v44 = vpop.f32.mrf.mxu1 }
 0x1da   : > { %v1362_v52 = vadd.f32 %v1361_v46, %v4069_v63 }
 0x1db   : > { %v1363_v19 = vpop.f32.mrf.mxu0  ;;  %v1588_v57 = vpop.f32.mrf.mxu1 }
 0x1dc   : > { %v4179_v3 = vadd.f32 %v1586_v44, %v1362_v52 }
 0x1dd   : > { %v1366_v13 = vpop.f32.mrf.mxu0  ;;  %v1591_v62 = vpop.f32.mrf.mxu1 }
 0x1de   : > { %v1367_v4 = vadd.f32 %v1366_v13, %v4073_v36 }
 0x1df   : > { %v1368_v12 = vpop.f32.mrf.mxu0  ;;  %v1593_v32 = vpop.f32.mrf.mxu1 }
 0x1e0   : > { %v4182_v21 = vadd.f32 %v1591_v62, %v1367_v4 }
 0x1e1   : > { %v1371_v34 = vpop.f32.mrf.mxu0  ;;  %v1596_v53 = vpop.f32.mrf.mxu1 }
 0x1e2   : > { %v1372_v25 = vadd.f32 %v1371_v34, %v4077_v5 }
 0x1e3   : > { %v1373_v39 = vpop.f32.mrf.mxu0  ;;  %v1598_v1 = vpop.f32.mrf.mxu1 }
 0x1e4   : > { %v4185_v14 = vadd.f32 %v1596_v53, %v1372_v25 }
 0x1e5   : > { %v1376_v63 = vpop.f32.mrf.mxu0  ;;  %v1601_v33 = vpop.f32.mrf.mxu1 }
 0x1e6   : > { %v1377_v50 = vadd.f32 %v1376_v63, %v4081_v30 }
 0x1e7   : > { %v1378_v9 = vpop.f32.mrf.mxu0  ;;  %v1603_v35 = vpop.f32.mrf.mxu1 }
 0x1e8   : > { %v4188_v18 = vadd.f32 %v1601_v33, %v1377_v50 }
 0x1e9   : > { %v1381_v36 = vpop.f32.mrf.mxu0  ;;  %v1606_v58 = vpop.f32.mrf.mxu1 }
 0x1ea   : > { %v1382_v38 = vadd.f32 %v1381_v36, %v4085_v49 }
 0x1eb   : > { %v1383_v20 = vpop.f32.mrf.mxu0  ;;  %v1608_v26 = vpop.f32.mrf.mxu1 }
 0x1ec   : > { %v4191_v11 = vadd.f32 %v1606_v58, %v1382_v38 }
 0x1ed   : > { %v1386_v5 = vpop.f32.mrf.mxu0  ;;  %v1611_v54 = vpop.f32.mrf.mxu1 }
 0x1ee   : > { %v1387_v2 = vadd.f32 %v1386_v5, %v4089_v47 }
 0x1ef   : > { %v1388_v8 = vpop.f32.mrf.mxu0  ;;  %v1613_v42 = vpop.f32.mrf.mxu1 }
 0x1f0   : > { %v4194_v46 = vadd.f32 %v1611_v54, %v1387_v2 }
 0x1f1   : > { %v1391_v30 = vpop.f32.mrf.mxu0  ;;  %v1616_v44 = vpop.f32.mrf.mxu1 }
 0x1f2   : > { %v1392_v52 = vadd.f32 %v1391_v30, %v4093_v48 }
 0x1f3   : > { %v1393_v19 = vpop.f32.mrf.mxu0  ;;  %v1618_v57 = vpop.f32.mrf.mxu1 }
 0x1f4   : > { %v4197_v13 = vadd.f32 %v1616_v44, %v1392_v52 }
 0x1f5   : > { %v1396_v49 = vpop.f32.mrf.mxu0  ;;  %v1621_v62 = vpop.f32.mrf.mxu1 }
 0x1f6   : > { %v1397_v4 = vadd.f32 %v1396_v49, %v4097_v28 }
 0x1f7   : > { %v1398_v12 = vpop.f32.mrf.mxu0  ;;  %v1623_v32 = vpop.f32.mrf.mxu1 }
 0x1f8   : > { %v4200_v34 = vadd.f32 %v1621_v62, %v1397_v4 }
 0x1f9   : > { %v1401_v47 = vpop.f32.mrf.mxu0  ;;  %v1626_v53 = vpop.f32.mrf.mxu1 }
 0x1fa   : > { %v1402_v25 = vadd.f32 %v1401_v47, %v4101_v29 }
 0x1fb   : > { %v1403_v39 = vpop.f32.mrf.mxu0  ;;  %v1628_v1 = vpop.f32.mrf.mxu1 }
 0x1fc   : > { %v4203_v63 = vadd.f32 %v1626_v53, %v1402_v25 }
 0x1fd   : > { %v1406_v48 = vpop.f32.mrf.mxu0  ;;  %v1631_v33 = vpop.f32.mrf.mxu1 }
 0x1fe   : > { %v1407_v50 = vadd.f32 %v1406_v48, %v4105_v10 }
 0x1ff   : > { %v1408_v9 = vpop.f32.mrf.mxu0  ;;  %v1633_v35 = vpop.f32.mrf.mxu1 }
 0x200   : > { %v4206_v36 = vadd.f32 %v1631_v33, %v1407_v50 }
 0x201   : > { %v1411_v28 = vpop.f32.mrf.mxu0  ;;  %v1636_v58 = vpop.f32.mrf.mxu1 }
 0x202   : > { %v1412_v38 = vadd.f32 %v1411_v28, %v4109_v23 }
 0x203   : > { %v1413_v20 = vpop.f32.mrf.mxu0  ;;  %v1638_v26 = vpop.f32.mrf.mxu1 }
 0x204   : > { %v4209_v29 = vadd.f32 %v1636_v58, %v1412_v38 }
 0x205   : > { %v1416_v5 = vpop.f32.mrf.mxu0  ;;  %v1641_v54 = vpop.f32.mrf.mxu1 }
 0x206   : > { %v1417_v2 = vadd.f32 %v1416_v5, %v4115_v59 }
 0x207   : > { %v1418_v8 = vpop.f32.mrf.mxu0  ;;  %v1643_v42 = vpop.f32.mrf.mxu1 }
 0x208   : > { %v4212_v10 = vadd.f32 %v1641_v54, %v1417_v2 }
 0x209   : > { %v4214_v30 = vpop.f32.mrf.mxu0  ;;  %v4216_v44 = vpop.f32.mrf.mxu1 }
 0x20b   : > { %v1423_v52 = vpop.f32.mrf.mxu0  ;;  %v1648_v19 = vpop.f32.mrf.mxu1 }
 0x20d   : > { %v2597_v23 = vpop.f32.mrf.mxu0  ;;  %v2677_v59 = vpop.f32.mrf.mxu1 }
 0x20e   : > { %v1722_v57 = vadd.f32 %v2597_v23, %v4125_v24  ;;  %v2292_v49 = vmul.f32 %v2677_v59, %v2677_v59 }
 0x20f   : > { %v1716_v62 = vpop.f32.mrf.mxu0  ;;  %v2095_v4 = vpop.f32.mrf.mxu1 }
 0x210   : > { %1876 = vst [vmem:[%s4223_s10 + $0x8] sm:$0xff] %v1722_v57  ;;  %v1717_v12 = vadd.f32 %v1716_v62, %v4122_v6  ;;  %v2254_v32 = vadd.f32 %v2677_v59, %v2095_v4  ;;  %v2291_v47 = vmul.f32 %v2095_v4, %v2095_v4  ;;  %v1945_v39 = vmul.f32 %v1722_v57, %v1722_v57 }
 0x211   : > { %v2600_v53 = vpop.f32.mrf.mxu0  ;;  %v2680_v25 = vpop.f32.mrf.mxu1 }
 0x212   : > { %1875 = vst [vmem:[%s4223_s10] sm:$0xff] %v1717_v12  ;;  %v1907_v1 = vadd.f32 %v1722_v57, %v1717_v12  ;;  %v1944_v48 = vmul.f32 %v1717_v12, %v1717_v12  ;;  %v1732_v33 = vadd.f32 %v2600_v53, %v4131_v15  ;;  %v2323_v50 = vadd.f32 %v2292_v49, %v2291_v47 }
 0x213   : > { %v1726_v24 = vpop.f32.mrf.mxu0  ;;  %v2105_v9 = vpop.f32.mrf.mxu1  ;;  %v2294_v58 = vmul.f32 %v2680_v25, %v2680_v25 }
 0x214   : > { %v1976_v35 = vadd.f32 %v1945_v39, %v1944_v48  ;;  %1878 = vst [vmem:[%s4223_s10 + $0x18] sm:$0xff] %v1732_v33  ;;  %v1727_v28 = vadd.f32 %v1726_v24, %v4128_v60  ;;  %v2255_v6 = vadd.f32 %v2254_v32, %v2105_v9  ;;  %v2293_v38 = vmul.f32 %v2105_v9, %v2105_v9 }
 0x215   : > { %v2603_v20 = vpop.f32.mrf.mxu0  ;;  %v2683_v26 = vpop.f32.mrf.mxu1  ;;  %v1947_v19 = vmul.f32 %v1732_v33, %v1732_v33 }
 0x216   : > { %1877 = vst [vmem:[%s4223_s10 + $0x10] sm:$0xff] %v1727_v28  ;;  %v1908_v5 = vadd.f32 %v1907_v1, %v1727_v28  ;;  %v1946_v54 = vmul.f32 %v1727_v28, %v1727_v28  ;;  %v1742_v2 = vadd.f32 %v2603_v20, %v4137_v17  ;;  %v2324_v15 = vadd.f32 %v2323_v50, %v2293_v38 }
 0x217   : > { %v1736_v8 = vpop.f32.mrf.mxu0  ;;  %v2115_v42 = vpop.f32.mrf.mxu1  ;;  %v2256_v52 = vadd.f32 %v2680_v25, %v2255_v6  ;;  %v2296_v57 = vmul.f32 %v2683_v26, %v2683_v26 }
 0x218   : > { %v1977_v23 = vadd.f32 %v1976_v35, %v1946_v54  ;;  %1880 = vst [vmem:[%s4223_s10 + $0x28] sm:$0xff] %v1742_v2  ;;  %v1737_v60 = vadd.f32 %v1736_v8, %v4134_v0  ;;  %v1909_v59 = vadd.f32 %v1908_v5, %v1732_v33  ;;  %v2295_v62 = vmul.f32 %v2115_v42, %v2115_v42 }
 0x219   : > { %v2257_v49 = vadd.f32 %v2256_v52, %v2115_v42  ;;  %v2325_v4 = vadd.f32 %v2324_v15, %v2294_v58  ;;  %v2606_v12 = vpop.f32.mrf.mxu0  ;;  %v2686_v32 = vpop.f32.mrf.mxu1  ;;  %v1949_v0 = vmul.f32 %v1742_v2, %v1742_v2 }
 0x21a   : > { %1879 = vst [vmem:[%s4223_s10 + $0x20] sm:$0xff] %v1737_v60  ;;  %v1910_v17 = vadd.f32 %v1909_v59, %v1737_v60  ;;  %v1948_v47 = vmul.f32 %v1737_v60, %v1737_v60  ;;  %v1978_v53 = vadd.f32 %v1977_v23, %v1947_v19  ;;  %v1752_v39 = vadd.f32 %v2606_v12, %v4143_v45 }
 0x21b   : > { %v2326_v25 = vadd.f32 %v2325_v4, %v2295_v62  ;;  %v1746_v1 = vpop.f32.mrf.mxu0  ;;  %v2125_v48 = vpop.f32.mrf.mxu1  ;;  %v2258_v50 = vadd.f32 %v2683_v26, %v2257_v49  ;;  %v2298_v35 = vmul.f32 %v2686_v32, %v2686_v32 }
 0x21c   : > { %v1979_v33 = vadd.f32 %v1978_v53, %v1948_v47  ;;  %1882 = vst [vmem:[%s4223_s10 + $0x38] sm:$0xff] %v1752_v39  ;;  %v1747_v24 = vadd.f32 %v1746_v1, %v4140_v16  ;;  %v1911_v9 = vadd.f32 %v1910_v17, %v1742_v2  ;;  %v2297_v6 = vmul.f32 %v2125_v48, %v2125_v48 }
 0x21d   : > { %v2259_v28 = vadd.f32 %v2258_v50, %v2125_v48  ;;  %v2327_v58 = vadd.f32 %v2326_v25, %v2296_v57  ;;  %v2609_v38 = vpop.f32.mrf.mxu0  ;;  %v2689_v20 = vpop.f32.mrf.mxu1  ;;  %v1951_v16 = vmul.f32 %v1752_v39, %v1752_v39 }
 0x21e   : > { %1881 = vst [vmem:[%s4223_s10 + $0x30] sm:$0xff] %v1747_v24  ;;  %v1912_v45 = vadd.f32 %v1911_v9, %v1747_v24  ;;  %v1950_v5 = vmul.f32 %v1747_v24, %v1747_v24  ;;  %v1980_v54 = vadd.f32 %v1979_v33, %v1949_v0  ;;  %v1762_v15 = vadd.f32 %v2609_v38, %v4149_v41 }
 0x21f   : > { %v2328_v26 = vadd.f32 %v2327_v58, %v2297_v6  ;;  %v1756_v8 = vpop.f32.mrf.mxu0  ;;  %v2135_v42 = vpop.f32.mrf.mxu1  ;;  %v2260_v52 = vadd.f32 %v2686_v32, %v2259_v28  ;;  %v2300_v60 = vmul.f32 %v2689_v20, %v2689_v20 }
 0x220   : > { %v1981_v2 = vadd.f32 %v1980_v54, %v1950_v5  ;;  %1884 = vst [vmem:[%s4223_s10 + $0x48] sm:$0xff] %v1762_v15  ;;  %v1757_v19 = vadd.f32 %v1756_v8, %v4146_v31  ;;  %v1913_v23 = vadd.f32 %v1912_v45, %v1752_v39  ;;  %v2299_v57 = vmul.f32 %v2135_v42, %v2135_v42 }
 0x221   : > { %v2261_v59 = vadd.f32 %v2260_v52, %v2135_v42  ;;  %v2329_v49 = vadd.f32 %v2328_v26, %v2298_v35  ;;  %v2612_v62 = vpop.f32.mrf.mxu0  ;;  %v2692_v4 = vpop.f32.mrf.mxu1  ;;  %v1953_v31 = vmul.f32 %v1762_v15, %v1762_v15 }
 0x222   : > { %1883 = vst [vmem:[%s4223_s10 + $0x40] sm:$0xff] %v1757_v19  ;;  %v1914_v41 = vadd.f32 %v1913_v23, %v1757_v19  ;;  %v1952_v12 = vmul.f32 %v1757_v19, %v1757_v19  ;;  %v1982_v17 = vadd.f32 %v1981_v2, %v1951_v16  ;;  %v1772_v47 = vadd.f32 %v2612_v62, %v4155_v7 }
 0x223   : > { %v2330_v32 = vadd.f32 %v2329_v49, %v2299_v57  ;;  %v1766_v53 = vpop.f32.mrf.mxu0  ;;  %v2145_v25 = vpop.f32.mrf.mxu1  ;;  %v2262_v1 = vadd.f32 %v2689_v20, %v2261_v59  ;;  %v2302_v0 = vmul.f32 %v2692_v4, %v2692_v4 }
 0x224   : > { %v1983_v39 = vadd.f32 %v1982_v17, %v1952_v12  ;;  %1886 = vst [vmem:[%s4223_s10 + $0x58] sm:$0xff] %v1772_v47  ;;  %v1767_v48 = vadd.f32 %v1766_v53, %v4152_v56  ;;  %v1915_v50 = vadd.f32 %v1914_v41, %v1762_v15  ;;  %v2301_v24 = vmul.f32 %v2145_v25, %v2145_v25 }
 0x225   : > { %v2263_v33 = vadd.f32 %v2262_v1, %v2145_v25  ;;  %v2331_v9 = vadd.f32 %v2330_v32, %v2300_v60  ;;  %v2615_v35 = vpop.f32.mrf.mxu0  ;;  %v2695_v28 = vpop.f32.mrf.mxu1  ;;  %v1955_v56 = vmul.f32 %v1772_v47, %v1772_v47 }
 0x226   : > { %1885 = vst [vmem:[%s4223_s10 + $0x50] sm:$0xff] %v1767_v48  ;;  %v1916_v7 = vadd.f32 %v1915_v50, %v1767_v48  ;;  %v1954_v6 = vmul.f32 %v1767_v48, %v1767_v48  ;;  %v1984_v58 = vadd.f32 %v1983_v39, %v1953_v31  ;;  %v1782_v38 = vadd.f32 %v2615_v35, %v4161_v37 }
 0x227   : > { %v2332_v20 = vadd.f32 %v2331_v9, %v2301_v24  ;;  %v1776_v45 = vpop.f32.mrf.mxu0  ;;  %v2155_v5 = vpop.f32.mrf.mxu1  ;;  %v2264_v54 = vadd.f32 %v2692_v4, %v2263_v33  ;;  %v2304_v42 = vmul.f32 %v2695_v28, %v2695_v28 }
 0x228   : > { %v1985_v15 = vadd.f32 %v1984_v58, %v1954_v6  ;;  %1888 = vst [vmem:[%s4223_s10 + $0x68] sm:$0xff] %v1782_v38  ;;  %v1777_v26 = vadd.f32 %v1776_v45, %v4158_v22  ;;  %v1917_v8 = vadd.f32 %v1916_v7, %v1772_v47  ;;  %v2303_v16 = vmul.f32 %v2155_v5, %v2155_v5 }
 0x229   : > { %v2265_v52 = vadd.f32 %v2264_v54, %v2155_v5  ;;  %v2333_v2 = vadd.f32 %v2332_v20, %v2302_v0  ;;  %v2618_v19 = vpop.f32.mrf.mxu0  ;;  %v2698_v23 = vpop.f32.mrf.mxu1  ;;  %v1957_v22 = vmul.f32 %v1782_v38, %v1782_v38 }
 0x22a   : > { %1887 = vst [vmem:[%s4223_s10 + $0x60] sm:$0xff] %v1777_v26  ;;  %v1918_v37 = vadd.f32 %v1917_v8, %v1777_v26  ;;  %v1956_v60 = vmul.f32 %v1777_v26, %v1777_v26  ;;  %v1986_v59 = vadd.f32 %v1985_v15, %v1955_v56  ;;  %v1792_v57 = vadd.f32 %v2618_v19, %v4167_v51 }
 0x22b   : > { %v2334_v49 = vadd.f32 %v2333_v2, %v2303_v16  ;;  %v1786_v62 = vpop.f32.mrf.mxu0  ;;  %v2165_v4 = vpop.f32.mrf.mxu1  ;;  %v2266_v41 = vadd.f32 %v2695_v28, %v2265_v52  ;;  %v2306_v32 = vmul.f32 %v2698_v23, %v2698_v23 }
 0x22c   : > { %v1987_v12 = vadd.f32 %v1986_v59, %v1956_v60  ;;  %1890 = vst [vmem:[%s4223_s10 + $0x78] sm:$0xff] %v1792_v57  ;;  %v1787_v17 = vadd.f32 %v1786_v62, %v4164_v43  ;;  %v1919_v47 = vadd.f32 %v1918_v37, %v1782_v38  ;;  %v2305_v25 = vmul.f32 %v2165_v4, %v2165_v4 }
 0x22d   : > { %v2267_v53 = vadd.f32 %v2266_v41, %v2165_v4  ;;  %v2335_v1 = vadd.f32 %v2334_v49, %v2304_v42  ;;  %v2621_v31 = vpop.f32.mrf.mxu0  ;;  %v2701_v39 = vpop.f32.mrf.mxu1  ;;  %v1959_v43 = vmul.f32 %v1792_v57, %v1792_v57 }
 0x22e   : > { %1889 = vst [vmem:[%s4223_s10 + $0x70] sm:$0xff] %v1787_v17  ;;  %v1920_v51 = vadd.f32 %v1919_v47, %v1787_v17  ;;  %v1958_v48 = vmul.f32 %v1787_v17, %v1787_v17  ;;  %v1988_v50 = vadd.f32 %v1987_v12, %v1957_v22  ;;  %v1802_v0 = vadd.f32 %v2621_v31, %v4173_v61 }
 0x22f   : > { %v2336_v33 = vadd.f32 %v2335_v1, %v2305_v25  ;;  %v1796_v24 = vpop.f32.mrf.mxu0  ;;  %v2175_v9 = vpop.f32.mrf.mxu1  ;;  %v2268_v35 = vadd.f32 %v2698_v23, %v2267_v53  ;;  %v2308_v58 = vmul.f32 %v2701_v39, %v2701_v39 }
 0x230   : > { %v1989_v28 = vadd.f32 %v1988_v50, %v1958_v48  ;;  %1892 = vst [vmem:[%s4223_s10 + $0x88] sm:$0xff] %v1802_v0  ;;  %v1797_v7 = vadd.f32 %v1796_v24, %v4170_v55  ;;  %v1921_v6 = vadd.f32 %v1920_v51, %v1792_v57  ;;  %v2307_v20 = vmul.f32 %v2175_v9, %v2175_v9 }
 0x231   : > { %v2269_v38 = vadd.f32 %v2268_v35, %v2175_v9  ;;  %v2337_v45 = vadd.f32 %v2336_v33, %v2306_v32  ;;  %v2624_v5 = vpop.f32.mrf.mxu0  ;;  %v2704_v54 = vpop.f32.mrf.mxu1  ;;  %v1961_v55 = vmul.f32 %v1802_v0, %v1802_v0 }
 0x232   : > { %1891 = vst [vmem:[%s4223_s10 + $0x80] sm:$0xff] %v1797_v7  ;;  %v1922_v61 = vadd.f32 %v1921_v6, %v1797_v7  ;;  %v1960_v56 = vmul.f32 %v1797_v7, %v1797_v7  ;;  %v1990_v15 = vadd.f32 %v1989_v28, %v1959_v43  ;;  %v1812_v26 = vadd.f32 %v2624_v5, %v4179_v3 }
 0x233   : > { %v2338_v8 = vadd.f32 %v2337_v45, %v2307_v20  ;;  %v1806_v42 = vpop.f32.mrf.mxu0  ;;  %v2185_v52 = vpop.f32.mrf.mxu1  ;;  %v2270_v16 = vadd.f32 %v2701_v39, %v2269_v38  ;;  %v2310_v37 = vmul.f32 %v2704_v54, %v2704_v54 }
 0x234   : > { %v1991_v2 = vadd.f32 %v1990_v15, %v1960_v56  ;;  %1894 = vst [vmem:[%s4223_s10 + $0x98] sm:$0xff] %v1812_v26  ;;  %v1807_v19 = vadd.f32 %v1806_v42, %v4176_v40  ;;  %v1923_v23 = vadd.f32 %v1922_v61, %v1802_v0  ;;  %v2309_v59 = vmul.f32 %v2185_v52, %v2185_v52 }
 0x235   : > { %v2271_v60 = vadd.f32 %v2270_v16, %v2185_v52  ;;  %v2339_v57 = vadd.f32 %v2338_v8, %v2308_v58  ;;  %v2627_v49 = vpop.f32.mrf.mxu0  ;;  %v2707_v62 = vpop.f32.mrf.mxu1  ;;  %v1963_v40 = vmul.f32 %v1812_v26, %v1812_v26 }
 0x236   : > { %1893 = vst [vmem:[%s4223_s10 + $0x90] sm:$0xff] %v1807_v19  ;;  %v1924_v3 = vadd.f32 %v1923_v23, %v1807_v19  ;;  %v1962_v4 = vmul.f32 %v1807_v19, %v1807_v19  ;;  %v1992_v41 = vadd.f32 %v1991_v2, %v1961_v55  ;;  %v1822_v22 = vadd.f32 %v2627_v49, %v4185_v14 }
 0x237   : > { %v2340_v12 = vadd.f32 %v2339_v57, %v2309_v59  ;;  %v1816_v17 = vpop.f32.mrf.mxu0  ;;  %v2195_v47 = vpop.f32.mrf.mxu1  ;;  %v2272_v32 = vadd.f32 %v2704_v54, %v2271_v60  ;;  %v2312_v31 = vmul.f32 %v2707_v62, %v2707_v62 }
 0x238   : > { %v1993_v53 = vadd.f32 %v1992_v41, %v1962_v4  ;;  %1896 = vst [vmem:[%s4223_s10 + $0xa8] sm:$0xff] %v1822_v22  ;;  %v1817_v25 = vadd.f32 %v1816_v17, %v4182_v21  ;;  %v1925_v1 = vadd.f32 %v1924_v3, %v1812_v26  ;;  %v2311_v51 = vmul.f32 %v2195_v47, %v2195_v47 }
 0x239   : > { %v2273_v39 = vadd.f32 %v2272_v32, %v2195_v47  ;;  %v2341_v48 = vadd.f32 %v2340_v12, %v2310_v37  ;;  %v2630_v50 = vpop.f32.mrf.mxu0  ;;  %v2710_v0 = vpop.f32.mrf.mxu1  ;;  %v1965_v21 = vmul.f32 %v1822_v22, %v1822_v22 }
 0x23a   : > { %1895 = vst [vmem:[%s4223_s10 + $0xa0] sm:$0xff] %v1817_v25  ;;  %v1926_v14 = vadd.f32 %v1925_v1, %v1817_v25  ;;  %v1964_v33 = vmul.f32 %v1817_v25, %v1817_v25  ;;  %v1994_v24 = vadd.f32 %v1993_v53, %v1963_v40  ;;  %v1832_v9 = vadd.f32 %v2630_v50, %v4191_v11 }
 0x23b   : > { %v2342_v35 = vadd.f32 %v2341_v48, %v2311_v51  ;;  %v1826_v43 = vpop.f32.mrf.mxu0  ;;  %v2205_v28 = vpop.f32.mrf.mxu1  ;;  %v2274_v7 = vadd.f32 %v2707_v62, %v2273_v39  ;;  %v2314_v20 = vmul.f32 %v2710_v0, %v2710_v0 }
 0x23c   : > { %v1995_v6 = vadd.f32 %v1994_v24, %v1964_v33  ;;  %1898 = vst [vmem:[%s4223_s10 + $0xb8] sm:$0xff] %v1832_v9  ;;  %v1827_v58 = vadd.f32 %v1826_v43, %v4188_v18  ;;  %v1927_v38 = vadd.f32 %v1926_v14, %v1822_v22  ;;  %v2313_v5 = vmul.f32 %v2205_v28, %v2205_v28 }
 0x23d   : > { %v2275_v45 = vadd.f32 %v2274_v7, %v2205_v28  ;;  %v2343_v54 = vadd.f32 %v2342_v35, %v2312_v31  ;;  %v2633_v61 = vpop.f32.mrf.mxu0  ;;  %v2713_v56 = vpop.f32.mrf.mxu1  ;;  %v1967_v18 = vmul.f32 %v1832_v9, %v1832_v9  ;;  %v1422_v22 = vadd.f32 %v4214_v30, %v4119_v27 }
 0x23e   : > { %1897 = vst [vmem:[%s4223_s10 + $0xb0] sm:$0xff] %v1827_v58  ;;  %v1928_v11 = vadd.f32 %v1927_v38, %v1827_v58  ;;  %v1966_v15 = vmul.f32 %v1827_v58, %v1827_v58  ;;  %v1996_v26 = vadd.f32 %v1995_v6, %v1965_v21  ;;  %v1842_v8 = vadd.f32 %v2633_v61, %v4197_v13 }
 0x23f   : > { %v2344_v42 = vadd.f32 %v2343_v54, %v2313_v5  ;;  %v1836_v52 = vpop.f32.mrf.mxu0  ;;  %v2215_v16 = vpop.f32.mrf.mxu1  ;;  %v2276_v55 = vadd.f32 %v2710_v0, %v2275_v45  ;;  %v2316_v37 = vmul.f32 %v2713_v56, %v2713_v56  ;;  %v1647_v14 = vadd.f32 %v4216_v44, %v1422_v22 }
 0x240   : > { %v1997_v2 = vadd.f32 %v1996_v26, %v1966_v15  ;;  %1900 = vst [vmem:[%s4223_s10 + $0xc8] sm:$0xff] %v1842_v8  ;;  %v1837_v19 = vadd.f32 %v1836_v52, %v4194_v46  ;;  %v1929_v23 = vadd.f32 %v1928_v11, %v1832_v9  ;;  %v2315_v59 = vmul.f32 %v2215_v16, %v2215_v16 }
 0x241   : > { %v2277_v60 = vadd.f32 %v2276_v55, %v2215_v16  ;;  %v2345_v57 = vadd.f32 %v2344_v42, %v2314_v20  ;;  %v2636_v49 = vpop.f32.mrf.mxu0  ;;  %v2716_v62 = vpop.f32.mrf.mxu1  ;;  %v1969_v32 = vmul.f32 %v1842_v8, %v1842_v8 }
 0x242   : > { %1899 = vst [vmem:[%s4223_s10 + $0xc0] sm:$0xff] %v1837_v19  ;;  %v1930_v13 = vadd.f32 %v1929_v23, %v1837_v19  ;;  %v1968_v3 = vmul.f32 %v1837_v19, %v1837_v19  ;;  %v1998_v4 = vadd.f32 %v1997_v2, %v1967_v18  ;;  %v1852_v41 = vadd.f32 %v2636_v49, %v4203_v63 }
 0x243   : > { %v2346_v12 = vadd.f32 %v2345_v57, %v2315_v59  ;;  %v1846_v46 = vpop.f32.mrf.mxu0  ;;  %v2225_v17 = vpop.f32.mrf.mxu1  ;;  %v2278_v47 = vadd.f32 %v2713_v56, %v2277_v60  ;;  %v2318_v1 = vmul.f32 %v2716_v62, %v2716_v62 }
 0x244   : > { %v1999_v40 = vadd.f32 %v1998_v4, %v1968_v3  ;;  %1902 = vst [vmem:[%s4223_s10 + $0xd8] sm:$0xff] %v1852_v41  ;;  %v1847_v53 = vadd.f32 %v1846_v46, %v4200_v34  ;;  %v1931_v25 = vadd.f32 %v1930_v13, %v1842_v8  ;;  %v2317_v39 = vmul.f32 %v2225_v17, %v2225_v17 }
 0x245   : > { %v2279_v31 = vadd.f32 %v2278_v47, %v2225_v17  ;;  %v2347_v51 = vadd.f32 %v2346_v12, %v2316_v37  ;;  %v2639_v63 = vpop.f32.mrf.mxu0  ;;  %v2719_v48 = vpop.f32.mrf.mxu1  ;;  %v1971_v35 = vmul.f32 %v1852_v41, %v1852_v41 }
 0x246   : > { %1901 = vst [vmem:[%s4223_s10 + $0xd0] sm:$0xff] %v1847_v53  ;;  %v1932_v27 = vadd.f32 %v1931_v25, %v1847_v53  ;;  %v1970_v30 = vmul.f32 %v1847_v53, %v1847_v53  ;;  %v2000_v50 = vadd.f32 %v1999_v40, %v1969_v32  ;;  %v1862_v0 = vadd.f32 %v2639_v63, %v4209_v29 }
 0x247   : > { %v2348_v33 = vadd.f32 %v2347_v51, %v2317_v39  ;;  %v1856_v24 = vpop.f32.mrf.mxu0  ;;  %v2235_v34 = vpop.f32.mrf.mxu1  ;;  %v2280_v9 = vadd.f32 %v2716_v62, %v2279_v31  ;;  %v2320_v21 = vmul.f32 %v2719_v48, %v2719_v48 }
 0x248   : > { %v2001_v43 = vadd.f32 %v2000_v50, %v1970_v30  ;;  %1904 = vst [vmem:[%s4223_s10 + $0xe8] sm:$0xff] %v1862_v0  ;;  %v1857_v28 = vadd.f32 %v1856_v24, %v4206_v36  ;;  %v1933_v7 = vadd.f32 %v1932_v27, %v1852_v41  ;;  %v2319_v58 = vmul.f32 %v2235_v34, %v2235_v34 }
 0x249   : > { %v2281_v6 = vadd.f32 %v2280_v9, %v2235_v34  ;;  %v2349_v38 = vadd.f32 %v2348_v33, %v2318_v1  ;;  %v2642_v20 = vpop.f32.mrf.mxu0  ;;  %v2722_v29 = vpop.f32.mrf.mxu1  ;;  %v1973_v26 = vmul.f32 %v1862_v0, %v1862_v0 }
 0x24a   : > { %1903 = vst [vmem:[%s4223_s10 + $0xe0] sm:$0xff] %v1857_v28  ;;  %v1934_v44 = vadd.f32 %v1933_v7, %v1857_v28  ;;  %v1972_v45 = vmul.f32 %v1857_v28, %v1857_v28  ;;  %v2002_v5 = vadd.f32 %v2001_v43, %v1971_v35  ;;  %v1872_v54 = vadd.f32 %v2642_v20, %v1647_v14 }
 0x24b   : > { %v2350_v61 = vadd.f32 %v2349_v38, %v2319_v58  ;;  %v1866_v56 = vpop.f32.mrf.mxu0  ;;  %v2245_v11 = vpop.f32.mrf.mxu1  ;;  %v2282_v15 = vadd.f32 %v2719_v48, %v2281_v6  ;;  %v2322_v52 = vmul.f32 %v2722_v29, %v2722_v29 }
 0x24c   : > { %v2003_v36 = vadd.f32 %v2002_v5, %v1972_v45  ;;  %1906 = vst [vmem:[%s4223_s10 + $0xf8] sm:$0xff] %v1872_v54  ;;  %v1867_v8 = vadd.f32 %v1866_v56, %v4212_v10  ;;  %v1935_v42 = vadd.f32 %v1934_v44, %v1862_v0  ;;  %v2321_v55 = vmul.f32 %v2245_v11, %v2245_v11 }
 0x24d   : > { %v2283_v16 = vadd.f32 %v2282_v15, %v2245_v11  ;;  %v2351_v18 = vadd.f32 %v2350_v61, %v2320_v21  ;;  %v1975_v59 = vmul.f32 %v1872_v54, %v1872_v54 }
 0x24e   : > { %1905 = vst [vmem:[%s4223_s10 + $0xf0] sm:$0xff] %v1867_v8  ;;  %v1936_v2 = vadd.f32 %v1935_v42, %v1867_v8  ;;  %v1974_v19 = vmul.f32 %v1867_v8, %v1867_v8  ;;  %v2004_v23 = vadd.f32 %v2003_v36, %v1973_v26 }
 0x24f   : > { %v2284_v37 = vadd.f32 %v2722_v29, %v2283_v16  ;;  %v2352_v60 = vadd.f32 %v2351_v18, %v2321_v55 }
 0x250   : > { %v1937_v57 = vadd.f32 %v1936_v2, %v1872_v54  ;;  %v2005_v49 = vadd.f32 %v2004_v23, %v1974_v19 }
 0x251   : > { %v2285_v62 = vrot.slane %v2284_v37, 4  ;;  %v2353_v13 = vadd.f32 %v2352_v60, %v2322_v52 }
 0x252   : > { %v1938_v3 = vrot.slane %v1937_v57, 4  ;;  %v2006_v4 = vadd.f32 %v2005_v49, %v1975_v59 }
 0x253   : > { %v2286_v41 = vadd.f32 %v2285_v62, %v2284_v37  ;;  %v2354_v10 = vrot.slane %v2353_v13, 4 }
 0x254   : > { %v1939_v22 = vadd.f32 %v1938_v3, %v1937_v57  ;;  %v2007_v12 = vrot.slane %v2006_v4, 4 }
 0x255   : > { %v2287_v46 = vrot.slane %v2286_v41, 2  ;;  %v2355_v17 = vadd.f32 %v2354_v10, %v2353_v13 }
 0x256   : > { %v1940_v47 = vrot.slane %v1939_v22, 2  ;;  %v2008_v32 = vadd.f32 %v2007_v12, %v2006_v4 }
 0x257   : > { %v2288_v40 = vadd.f32 %v2287_v46, %v2286_v41  ;;  %v2356_v53 = vrot.slane %v2355_v17, 2 }
 0x258   : > { %v1941_v25 = vadd.f32 %v1940_v47, %v1939_v22  ;;  %v2009_v1 = vrot.slane %v2008_v32, 2 }
 0x259   : > { %v2357_v31 = vadd.f32 %v2356_v53, %v2355_v17  ;;  %v2289_v63 = vrot.slane %v2288_v40, 1 }
 0x25a   : > { %v1942_v39 = vrot.slane %v1941_v25, 1  ;;  %v2010_v51 = vadd.f32 %v2009_v1, %v2008_v32 }
 0x25b   : > { %v2358_v27 = vrot.slane %v2357_v31, 1  ;;  %v2290_v0 = vadd.f32 %v2289_v63, %v2288_v40 }
 0x25c   : > { %v2011_v48 = vrot.slane %v2010_v51, 1  ;;  %v1943_v30 = vadd.f32 %v1942_v39, %v1941_v25 }
 0x25d   : > { %v2359_v14 = vadd.f32 %v2358_v27, %v2357_v31 }
 0x25e   : > { %v2012_v50 = vadd.f32 %v2011_v48, %v2010_v51 }
 0x260   : > { %v2361_v33 = vsel %vm2360_vm0, %v1943_v30, %v2012_v50 }
 0x261   : > { %v2363_v24 = vsel %vm2362_vm1, %v2361_v33, %v2290_v0 }
 0x262   : > { %v2365_v34 = vsel %vm2364_vm2, %v2363_v24, %v2359_v14 }
 0x263   : > { %2366 = vst [vmem:[%s208_s25] sm:$0xf] %v2365_v34 }
 0x264 PF: > { %s15_s15 = sadd.s32 1, %s2771_s15  }
 0x265   : > { %p12_p4 = scmp.ge.s32.totalorder %s15_s15, 4  }
 0x267   :  { %14 = sbr.rel (!%p12_p4) target bundleno = 1 (0x1), region = 77 }

</bundles_post_ra>
